<compile_context>
chip_gen: v7x
topology: tpu7x:2x2x1
jax: 0.10.0
libtpu: 0.0.40
codegen_flags: <defaults>
</compile_context>

<pallas_src>
import functools
import math

import jax
import jax.numpy as jnp
from jax.experimental import pallas as pl
from jax.experimental.pallas import tpu as pltpu

LN_EPS = 1e-5
BINS = 10
TAIL_BOUND = 5.0
MIN_BIN_WIDTH = 1e-3
MIN_BIN_HEIGHT = 1e-3
MIN_DERIVATIVE = 1e-3

_MXU_BF16 = True     # cast MXU matmul operands to bf16 (f32 accumulation)


def _cores_per_chip():
    try:
        kind = jax.devices()[0].device_kind.lower()
    except Exception:
        return 1
    return 2 if ("v7" in kind or "7x" in kind) else 1


# Collapse the batch into one block on single-TC chips (v5e/v6e) so the matmul
# M-dim is B*T; keep a "parallel" batch grid axis on v7x for both TensorCores.
_BATCH_COLLAPSE = (_cores_per_chip() == 1)


def _vmem_limit_bytes():
    # Explicit scoped-VMEM limit (defaults: 16 MiB v5e / 32 MiB v6e, v7x).
    try:
        cap = int(pltpu.get_tpu_info().vmem_capacity_bytes)
    except Exception:
        cap = 64 * 1024 * 1024
    return int(min(3 * cap // 4, 96 * 1024 * 1024))


_VMEM_LIMIT = _vmem_limit_bytes()


# --------------------------------------------------------------------------
# In-kernel math helpers
# --------------------------------------------------------------------------
def _gelu(x):
    # tanh-approximation GELU (EUP tanh; ~1e-3 deviation from exact erf GELU).
    c = 0.7978845608028654  # sqrt(2/pi)
    return 0.5 * x * (1.0 + jnp.tanh(c * (x + 0.044715 * x * x * x)))


def _layernorm_lastdim(x, gamma, beta):
    mu = jnp.mean(x, axis=-1, keepdims=True)
    var = jnp.mean((x - mu) ** 2, axis=-1, keepdims=True)
    return (x - mu) * jax.lax.rsqrt(var + LN_EPS) * gamma + beta


def _mm(a, b):
    # MXU matmul with bf16 operands / f32 accumulation.
    if _MXU_BF16:
        a = a.astype(jnp.bfloat16)
        b = b.astype(jnp.bfloat16)
    return jnp.dot(a, b, preferred_element_type=jnp.float32)


def _dds_stack(h, msk, t_local, dw, dwb, g1, b1, pw, pwb, g2, b2, *, K, T):
    """DilatedDepthSeparableConv stack on batched rows.

    h: (N, C) with N = Bb*T; msk, t_local: (N, 1); dw: (L, K, C); pw: (L, C, C);
    biases / LN params: (L, 1, C).  Depthwise taps use pltpu.roll (XLU) plus
    static edge masks (zero padding, no cross-batch bleed at segment borders).
    """
    N = h.shape[0]
    L = dw.shape[0]
    for i in range(L):
        dilation = K ** i
        pad = dilation * (K - 1) // 2
        hm = h * msk
        y = None
        for j in range(K):
            off = j * dilation - pad                      # static int in [-pad, pad]
            if off == 0:
                tap = hm
            else:
                # rolled[t] = hm[(t + off) mod N]; zero rows whose source local
                # time t+off falls outside [0, T) (padding + batch boundaries).
                tap = pltpu.roll(hm, shift=(-off) % N, axis=0)
                valid = ((t_local >= -off) & (t_local < T - off)).astype(jnp.float32)
                tap = tap * valid
            contrib = tap * dw[i, j:j + 1, :]
            y = contrib if y is None else y + contrib
        y = y + dwb[i]
        y = _gelu(_layernorm_lastdim(y, g1[i], b1[i]))
        y = _mm(y, pw[i]) + pwb[i]
        y = _gelu(_layernorm_lastdim(y, g2[i], b2[i]))
        # dropout: identity (eval mode)
        h = h + y                                         # residual
    return h


def _rq_spline_fwd(xb, uw, uh, udc, step, knot2, knotN, bidx, *, bins, tail_bound):
    """Piecewise rational-quadratic spline, forward, linear tails.

    xb: (N, 1); uw/uh: (N, bins); udc: (N, bins-1).  Returns (y, log|det|) (N, 1).
    """
    N = xb.shape[0]
    left, right = -tail_bound, tail_bound

    inside = (xb >= left) & (xb <= right)
    xs = jnp.clip(xb, left, right)

    # widths & heights share the normalization -> stack along sublanes and do
    # ONE softmax + ONE cumulative-sum matmul for both.
    wh = jnp.concatenate([uw, uh], axis=0)                           # (2N, bins)
    e = jnp.exp(wh - jnp.max(wh, axis=-1, keepdims=True))
    wh = e * pl.reciprocal(jnp.sum(e, axis=-1, keepdims=True), approx=True)
    wh = MIN_BIN_WIDTH + (1.0 - MIN_BIN_WIDTH * bins) * wh

    cum = jnp.dot(wh, step, preferred_element_type=jnp.float32)      # (2N, bins+1)
    cum = (right - left) * cum + left
    cum = jnp.where(knot2 == 0, left, jnp.where(knot2 == bins, right, cum))
    seg = cum[:, 1:] - cum[:, :-1]                                   # (2N, bins)

    cumw, cumh = cum[0:N], cum[N:2 * N]
    w_, h_ = seg[0:N], seg[N:2 * N]

    # derivatives (N, bins+1): min_derivative + softplus, constant-padded ends
    # (softplus(const) + min_derivative == 1.0  =>  linear tails).
    const = math.log(math.exp(1.0 - MIN_DERIVATIVE) - 1.0)
    padc = jnp.full((N, 1), const, jnp.float32)
    ud = jnp.concatenate([padc, udc, padc], axis=-1)                 # (N, bins+1)
    sp = jnp.where(ud > 20.0, ud, jnp.log(1.0 + jnp.exp(jnp.minimum(ud, 20.0))))
    derivs = MIN_DERIVATIVE + sp

    # searchsorted: count left knots <= x (last knot gets +1e-6 as in reference)
    bl = cumw + jnp.where(knotN == bins, 1e-6, 0.0)
    bin_idx = jnp.sum((xs >= bl).astype(jnp.int32), axis=-1, keepdims=True) - 1
    onehot = (bidx == bin_idx).astype(jnp.float32)                   # (N, bins)

    def gsel(src):                                                   # (N,bins)->(N,1)
        return jnp.sum(src * onehot, axis=-1, keepdims=True)

    in_cumw = gsel(cumw[:, :bins])
    in_w = gsel(w_)
    in_cumh = gsel(cumh[:, :bins])
    in_h = gsel(h_)
    in_d = gsel(derivs[:, :bins])
    in_d1 = gsel(derivs[:, 1:])

    inv_w = pl.reciprocal(in_w, approx=True)
    in_delta = in_h * inv_w
    theta = (xs - in_cumw) * inv_w
    ttm = theta * (1.0 - theta)
    numerator = in_h * (in_delta * theta * theta + in_d * ttm)
    denom = in_delta + (in_d + in_d1 - 2.0 * in_delta) * ttm
    y_in = in_cumh + numerator * pl.reciprocal(denom, approx=True)
    dnum = (in_delta * in_delta) * (in_d1 * theta * theta + 2.0 * in_delta * ttm
                                    + in_d * (1.0 - theta) * (1.0 - theta))
    ld_in = jnp.log(dnum) - 2.0 * jnp.log(denom)

    y = jnp.where(inside, y_in, xb)
    ld = jnp.where(inside, ld_in, 0.0)
    return y, ld


# --------------------------------------------------------------------------
# Kernel 1: fused encoder  (pre 1x1 conv -> DDS stack -> proj 1x1 conv -> mask)
# --------------------------------------------------------------------------
def _encoder_kernel(x_ref, m_ref, prew_ref, preb_ref,
                    dw_ref, dwb_ref, g1_ref, b1_ref,
                    pw_ref, pwb_ref, g2_ref, b2_ref,
                    projw_ref, projb_ref, o_ref, *, K, T):
    N, Cin = x_ref.shape
    x = x_ref[...].astype(jnp.float32)                   # (N, Cin)
    msk = m_ref[...].astype(jnp.float32)                 # (N, 1)
    t_local = jax.lax.broadcasted_iota(jnp.int32, (N, 1), 0) % T

    pre_w = prew_ref[...]
    pre_b = preb_ref[...]
    if Cin == 1:
        h = x * pre_w + pre_b                            # (N,1)*(1,C)
    else:
        h = _mm(x, pre_w) + pre_b

    h = _dds_stack(h, msk, t_local,
                   dw_ref[...], dwb_ref[...], g1_ref[...], b1_ref[...],
                   pw_ref[...], pwb_ref[...], g2_ref[...], b2_ref[...],
                   K=K, T=T)
    h = h * msk
    h = _mm(h, projw_ref[...]) + projb_ref[...]
    o_ref[...] = (h * msk).astype(o_ref.dtype)


def encoder_forward(x2, m2, pre, dds, proj, *, kernel_size, seq_len, batch):
    """x2: (B*T, Cin); m2: (B*T, 1) -> (B*T, C).  One pallas_call."""
    N, Cin = x2.shape
    C = pre["w"].shape[1]
    L = dds["dw"].shape[0]
    K = kernel_size
    Bb = batch if _BATCH_COLLAPSE else 1
    rows = Bb * seq_len

    def wspec(shape):
        return pl.BlockSpec(shape, lambda b: (0,) * len(shape))

    in_specs = [
        pl.BlockSpec((rows, Cin), lambda b: (b, 0)),
        pl.BlockSpec((rows, 1), lambda b: (b, 0)),
        wspec((Cin, C)), wspec((1, C)),
        wspec((L, K, C)), wspec((L, 1, C)), wspec((L, 1, C)), wspec((L, 1, C)),
        wspec((L, C, C)), wspec((L, 1, C)), wspec((L, 1, C)), wspec((L, 1, C)),
        wspec((C, C)), wspec((1, C)),
    ]
    return pl.pallas_call(
        functools.partial(_encoder_kernel, K=K, T=seq_len),
        out_shape=jax.ShapeDtypeStruct((N, C), x2.dtype),
        grid=(batch // Bb,),
        in_specs=in_specs,
        out_specs=pl.BlockSpec((rows, C), lambda b: (b, 0)),
        compiler_params=pltpu.CompilerParams(
            dimension_semantics=("parallel",),
            vmem_limit_bytes=_VMEM_LIMIT),
    )(x2, m2, pre["w"], pre["b"],
      dds["dw"], dds["dwb"], dds["g1"], dds["b1"],
      dds["pw"], dds["pwb"], dds["g2"], dds["b2"],
      proj["w"], proj["b"])


# --------------------------------------------------------------------------
# Kernel 2: fused flow chain  ElementwiseAffine + n_flows x (ConvFlow + Flip)
# --------------------------------------------------------------------------
def _flow_chain_kernel(z_ref, m_ref, cond_ref, eafm_ref, eafl_ref,
                       inw_ref, inb_ref, dw_ref, dwb_ref, g1_ref, b1_ref,
                       pw_ref, pwb_ref, g2_ref, b2_ref, projw_ref, projb_ref,
                       o_ref, ld_ref, *, K, T, bins, tail_bound):
    N = z_ref.shape[0]
    C = cond_ref.shape[1]
    F_ = dw_ref.shape[0]
    inv_sqrt_c = 1.0 / math.sqrt(C)

    z = z_ref[...].astype(jnp.float32)                    # (N, 2)
    msk = m_ref[...].astype(jnp.float32)                  # (N, 1)
    cond = cond_ref[...].astype(jnp.float32)              # (N, C)
    t_local = jax.lax.broadcasted_iota(jnp.int32, (N, 1), 0) % T

    eaf_m = eafm_ref[...]           # (1, 2)
    eaf_l = eafl_ref[...]           # (1, 2)
    in_w = inw_ref[...]             # (F, 1, C)
    in_b = inb_ref[...]
    dw = dw_ref[...]                # (F, L, K, C)
    dwb = dwb_ref[...]
    g1 = g1_ref[...]
    b1 = b1_ref[...]
    pw = pw_ref[...]                # (F, L, C, C)
    pwb = pwb_ref[...]
    g2 = g2_ref[...]
    b2 = b2_ref[...]
    proj_w = projw_ref[...]         # (F, C, 3*bins-1)
    proj_b = projb_ref[...]         # (F, 1, 3*bins-1)

    # Hoisted spline constants (shared by every flow).
    row = jax.lax.broadcasted_iota(jnp.int32, (bins, bins + 1), 0)
    col = jax.lax.broadcasted_iota(jnp.int32, (bins, bins + 1), 1)
    step = (row < col).astype(jnp.float32)
    knot2 = jax.lax.broadcasted_iota(jnp.int32, (2 * N, bins + 1), 1)
    knotN = jax.lax.broadcasted_iota(jnp.int32, (N, bins + 1), 1)
    bidx = jax.lax.broadcasted_iota(jnp.int32, (N, bins), 1)

    a = z[:, 0:1]
    b = z[:, 1:2]

    # --- ElementwiseAffineFlow ---
    a = (eaf_m[:, 0:1] + jnp.exp(eaf_l[:, 0:1]) * a) * msk
    b = (eaf_m[:, 1:2] + jnp.exp(eaf_l[:, 1:2]) * b) * msk
    ld_rows = (eaf_l[:, 0:1] + eaf_l[:, 1:2]) * msk       # per-row logdet contribution

    # --- [ConvFlow -> FlipFlow] x F ---
    for f in range(F_):
        h = a * in_w[f] + in_b[f]                         # 1x1 in-conv (Cin == 1)
        h = h + cond                                      # DDS conditioning
        h = _dds_stack(h, msk, t_local, dw[f], dwb[f], g1[f], b1[f],
                       pw[f], pwb[f], g2[f], b2[f], K=K, T=T)
        h = h * msk
        proj_out = (_mm(h, proj_w[f]) + proj_b[f]) * msk  # (N, 3*bins-1)

        uw = proj_out[:, :bins] * inv_sqrt_c
        uh = proj_out[:, bins:2 * bins] * inv_sqrt_c
        udc = proj_out[:, 2 * bins:]                      # (N, bins-1)

        y, ld = _rq_spline_fwd(b, uw, uh, udc, step, knot2, knotN, bidx,
                               bins=bins, tail_bound=tail_bound)
        ld_rows = ld_rows + ld * msk

        # cat([a, y]) * mask, then flip  ==  swap roles (both masked)
        a, b = y * msk, a * msk

    o_ref[...] = jnp.concatenate([a, b], axis=-1).astype(o_ref.dtype)
    ld_ref[...] = ld_rows.astype(ld_ref.dtype)


def flow_chain_forward(z2, m2, cond2, p, *, kernel_size, seq_len, batch,
                       bins=BINS, tail_bound=TAIL_BOUND):
    """Whole flow chain (EAF + n_flows x (ConvFlow, Flip)) in one pallas_call.

    z2: (B*T, 2); m2: (B*T, 1); cond2: (B*T, C)
    Returns (z_out (B*T, 2), logdet_total (B,)).
    """
    N = z2.shape[0]
    C = cond2.shape[1]
    F_ = p["dds"]["dw"].shape[0]
    L = p["dds"]["dw"].shape[1]
    P = 3 * bins - 1
    K = kernel_size
    Bb = batch if _BATCH_COLLAPSE else 1
    rows = Bb * seq_len

    def wspec(shape):
        return pl.BlockSpec(shape, lambda b: (0,) * len(shape))

    in_specs = [
        pl.BlockSpec((rows, 2), lambda b: (b, 0)),
        pl.BlockSpec((rows, 1), lambda b: (b, 0)),
        pl.BlockSpec((rows, C), lambda b: (b, 0)),
        wspec((1, 2)), wspec((1, 2)),
        wspec((F_, 1, C)), wspec((F_, 1, C)),
        wspec((F_, L, K, C)), wspec((F_, L, 1, C)),
        wspec((F_, L, 1, C)), wspec((F_, L, 1, C)),
        wspec((F_, L, C, C)), wspec((F_, L, 1, C)),
        wspec((F_, L, 1, C)), wspec((F_, L, 1, C)),
        wspec((F_, C, P)), wspec((F_, 1, P)),
    ]
    z_out, ld_rows = pl.pallas_call(
        functools.partial(_flow_chain_kernel, K=K, T=seq_len,
                          bins=bins, tail_bound=tail_bound),
        out_shape=(jax.ShapeDtypeStruct((N, 2), z2.dtype),
                   jax.ShapeDtypeStruct((N, 1), jnp.float32)),
        grid=(batch // Bb,),
        in_specs=in_specs,
        out_specs=(pl.BlockSpec((rows, 2), lambda b: (b, 0)),
                   pl.BlockSpec((rows, 1), lambda b: (b, 0))),
        compiler_params=pltpu.CompilerParams(
            dimension_semantics=("parallel",),
            vmem_limit_bytes=_VMEM_LIMIT),
    )(z2, m2, cond2, p["eaf_m"], p["eaf_logs"], p["in_w"], p["in_b"],
      p["dds"]["dw"], p["dds"]["dwb"], p["dds"]["g1"], p["dds"]["b1"],
      p["dds"]["pw"], p["dds"]["pwb"], p["dds"]["g2"], p["dds"]["b2"],
      p["proj_w"], p["proj_b"])
    logdet = jnp.sum(ld_rows.reshape(batch, seq_len), axis=1)
    return z_out, logdet


# --------------------------------------------------------------------------
# StochasticDurationPredictor forward (inverse=False -> NLL of shape (B,))
# --------------------------------------------------------------------------
def stochastic_duration_predictor_forward(params, x, x_mask, w, noise_key,
                                          *, channels, kernel_size):
    # PyTorch layouts at the boundary: x (B,C,T), x_mask (B,1,T), w (B,1,T)
    del channels
    B, C, T = x.shape
    Tp = ((T + 7) // 8) * 8                       # sublane (8) aligned time dim
    x_t = jnp.transpose(x, (0, 2, 1))             # (B, T, C)
    mask = jnp.transpose(x_mask, (0, 2, 1))       # (B, T, 1)
    w_t = jnp.transpose(w, (0, 2, 1))             # (B, T, 1)
    if Tp != T:                                   # zero-pad; mask makes it inert
        padT = ((0, 0), (0, Tp - T), (0, 0))
        x_t, mask, w_t = (jnp.pad(a, padT) for a in (x_t, mask, w_t))
    N = B * Tp
    x2 = x_t.reshape(N, C)
    m2 = mask.reshape(N, 1)
    w2 = w_t.reshape(N, 1)

    x_enc = encoder_forward(x2, m2, params["pre"], params["dds"], params["proj"],
                            kernel_size=kernel_size, seq_len=Tp, batch=B)
    h_w = encoder_forward(w2, m2, params["post_pre"], params["post_dds"],
                          params["post_proj"], kernel_size=kernel_size,
                          seq_len=Tp, batch=B)

    def bsum(v):                                  # (N, k) -> (B,)
        return jnp.sum(v.reshape(B, Tp, -1), axis=(1, 2))

    e_q = jax.random.normal(noise_key, (N, 2), dtype=x2.dtype) * m2
    z_q, logdet_tot_q = flow_chain_forward(e_q, m2, x_enc + h_w,
                                           params["post_flows"],
                                           kernel_size=kernel_size,
                                           seq_len=Tp, batch=B)

    z_u, z1 = z_q[:, 0:1], z_q[:, 1:2]
    u = jax.nn.sigmoid(z_u) * m2
    z0 = (w2 - u) * m2
    logdet_tot_q = logdet_tot_q + bsum(
        (jax.nn.log_sigmoid(z_u) + jax.nn.log_sigmoid(-z_u)) * m2)
    logq = bsum(-0.5 * (math.log(2 * math.pi) + e_q ** 2) * m2) - logdet_tot_q

    # LogFlow (plain jnp; XLA fuses it)
    z0 = jnp.log(jnp.maximum(z0, 1e-5)) * m2
    logdet_tot = bsum(-z0)
    z = jnp.concatenate([z0, z1], axis=-1)
    z, ld_chain = flow_chain_forward(z, m2, x_enc, params["flows"],
                                     kernel_size=kernel_size, seq_len=Tp, batch=B)
    logdet_tot = logdet_tot + ld_chain

    nll = bsum(0.5 * (math.log(2 * math.pi) + z ** 2) * m2) - logdet_tot
    return nll + logq


# --------------------------------------------------------------------------
# Deterministic parameter init (shapes follow the torch __init__)
# --------------------------------------------------------------------------
def _conv_init(key, fan_in, shape):
    bound = 1.0 / math.sqrt(fan_in)
    return jax.random.uniform(key, shape, jnp.float32, -bound, bound)


def init_dds_params(key, C, K, layers):
    dws, dwbs, pws, pwbs = [], [], [], []
    for i in range(layers):
        ks = jax.random.split(jax.random.fold_in(key, i), 4)
        dws.append(_conv_init(ks[0], K, (K, C)))          # depthwise Conv1d (K, C)
        dwbs.append(_conv_init(ks[1], K, (1, C)))
        pws.append(_conv_init(ks[2], C, (C, C)))          # 1x1 Conv1d (Cin, Cout)
        pwbs.append(_conv_init(ks[3], C, (1, C)))
    return dict(
        dw=jnp.stack(dws), dwb=jnp.stack(dwbs),
        g1=jnp.ones((layers, 1, C), jnp.float32), b1=jnp.zeros((layers, 1, C), jnp.float32),
        pw=jnp.stack(pws), pwb=jnp.stack(pwbs),
        g2=jnp.ones((layers, 1, C), jnp.float32), b2=jnp.zeros((layers, 1, C), jnp.float32),
    )


def init_flow_chain_params(key, C, K, n_flows, layers, bins):
    P = 3 * bins - 1
    in_ws, in_bs, proj_ws, proj_bs, dds_stacks = [], [], [], [], []
    for f in range(n_flows):
        ks = jax.random.split(jax.random.fold_in(key, f), 5)
        in_ws.append(_conv_init(ks[0], 1, (1, C)))
        in_bs.append(_conv_init(ks[1], 1, (1, C)))
        dds_stacks.append(init_dds_params(ks[2], C, K, layers))
        # torch zero-inits proj; small random values keep the spline non-trivial.
        proj_ws.append(0.01 * jax.random.normal(ks[3], (C, P), jnp.float32))
        proj_bs.append(0.01 * jax.random.normal(ks[4], (1, P), jnp.float32))
    dds = jax.tree_util.tree_map(lambda *a: jnp.stack(a), *dds_stacks)
    return dict(
        eaf_m=jnp.zeros((1, 2), jnp.float32),
        eaf_logs=jnp.zeros((1, 2), jnp.float32),
        in_w=jnp.stack(in_ws), in_b=jnp.stack(in_bs),
        dds=dds,
        proj_w=jnp.stack(proj_ws), proj_b=jnp.stack(proj_bs),
    )


def init_sdp_params(key, C, K, n_flows, dds_layers, bins=BINS):
    ks = jax.random.split(key, 12)
    return dict(
        pre=dict(w=_conv_init(ks[0], C, (C, C)), b=_conv_init(ks[1], C, (1, C))),
        proj=dict(w=_conv_init(ks[2], C, (C, C)), b=_conv_init(ks[3], C, (1, C))),
        dds=init_dds_params(ks[4], C, K, dds_layers),
        post_pre=dict(w=_conv_init(ks[5], 1, (1, C)), b=_conv_init(ks[6], 1, (1, C))),
        post_proj=dict(w=_conv_init(ks[7], C, (C, C)), b=_conv_init(ks[8], C, (1, C))),
        post_dds=init_dds_params(ks[9], C, K, dds_layers),
        flows=init_flow_chain_params(ks[10], C, K, n_flows, dds_layers, bins),
        post_flows=init_flow_chain_params(ks[11], C, K, n_flows, dds_layers, bins),
    )


# --------------------------------------------------------------------------
if __name__ == "__main__":
    B, C, T = 2, 32, 16          # small shapes: batch, channels, T_text
    K = 3                        # kernel_size
    N_FLOWS = 2                  # flows
    DDS_LAYERS = 2               # dds_conv_layers

    root = jax.random.PRNGKey(0)
    k_param, k_x, k_w, k_noise = jax.random.split(root, 4)
    params = init_sdp_params(k_param, C, K, N_FLOWS, DDS_LAYERS)

    x = jax.random.normal(k_x, (B, C, T), jnp.float32)                       # (B, C, T)
    lengths = jnp.array([T, T - 5], jnp.int32)
    x_mask = (jnp.arange(T)[None, :] < lengths[:, None]).astype(jnp.float32)[:, None, :]  # (B,1,T)
    w = (1.0 + 5.0 * jax.random.uniform(k_w, (B, 1, T), jnp.float32)) * x_mask            # (B,1,T)

    @jax.jit
    def fwd(x_, x_mask_, w_, key_):
        return stochastic_duration_predictor_forward(
            params, x_, x_mask_, w_, key_, channels=C, kernel_size=K)

    nll = jax.block_until_ready(fwd(x, x_mask, w, k_noise))
    assert nll.shape == (B,), nll.shape
    assert bool(jnp.all(jnp.isfinite(nll)))
    print("KERNEL_OK")
</pallas_src>

<mosaic_0001>
module attributes {stable_mosaic.version = 11 : i64} {
  func.func @_encoder_kernel(%arg0: i32, %arg1: memref<32x32xf32, #tpu.memory_space<vmem>>, %arg2: memref<32x1xf32, #tpu.memory_space<vmem>>, %arg3: memref<32x32xf32, #tpu.memory_space<vmem>>, %arg4: memref<1x32xf32, #tpu.memory_space<vmem>>, %arg5: memref<2x3x32xf32, #tpu.memory_space<vmem>>, %arg6: memref<2x1x32xf32, #tpu.memory_space<vmem>>, %arg7: memref<2x1x32xf32, #tpu.memory_space<vmem>>, %arg8: memref<2x1x32xf32, #tpu.memory_space<vmem>>, %arg9: memref<2x32x32xf32, #tpu.memory_space<vmem>>, %arg10: memref<2x1x32xf32, #tpu.memory_space<vmem>>, %arg11: memref<2x1x32xf32, #tpu.memory_space<vmem>>, %arg12: memref<2x1x32xf32, #tpu.memory_space<vmem>>, %arg13: memref<32x32xf32, #tpu.memory_space<vmem>>, %arg14: memref<1x32xf32, #tpu.memory_space<vmem>>, %arg15: memref<32x32xf32, #tpu.memory_space<vmem>>) attributes {dimension_semantics = [#tpu.dimension_semantics<parallel>], iteration_bounds = array<i64: 1>, scalar_prefetch = 0 : i64, scratch_operands = 0 : i64, tpu.core_type = #tpu.core_type<tc>, window_params = [{transform_indices = @transform_0, window_bounds = array<i64: 32, 32>}, {transform_indices = @transform_1, window_bounds = array<i64: 32, 1>}, {pipeline_mode = #tpu.pipeline_mode<synchronous>, transform_indices = @transform_2, window_bounds = array<i64: 32, 32>}, {pipeline_mode = #tpu.pipeline_mode<synchronous>, transform_indices = @transform_3, window_bounds = array<i64: 1, 32>}, {pipeline_mode = #tpu.pipeline_mode<synchronous>, transform_indices = @transform_4, window_bounds = array<i64: 2, 3, 32>}, {pipeline_mode = #tpu.pipeline_mode<synchronous>, transform_indices = @transform_5, window_bounds = array<i64: 2, 1, 32>}, {pipeline_mode = #tpu.pipeline_mode<synchronous>, transform_indices = @transform_6, window_bounds = array<i64: 2, 1, 32>}, {pipeline_mode = #tpu.pipeline_mode<synchronous>, transform_indices = @transform_7, window_bounds = array<i64: 2, 1, 32>}, {pipeline_mode = #tpu.pipeline_mode<synchronous>, transform_indices = @transform_8, window_bounds = array<i64: 2, 32, 32>}, {pipeline_mode = #tpu.pipeline_mode<synchronous>, transform_indices = @transform_9, window_bounds = array<i64: 2, 1, 32>}, {pipeline_mode = #tpu.pipeline_mode<synchronous>, transform_indices = @transform_10, window_bounds = array<i64: 2, 1, 32>}, {pipeline_mode = #tpu.pipeline_mode<synchronous>, transform_indices = @transform_11, window_bounds = array<i64: 2, 1, 32>}, {pipeline_mode = #tpu.pipeline_mode<synchronous>, transform_indices = @transform_12, window_bounds = array<i64: 32, 32>}, {pipeline_mode = #tpu.pipeline_mode<synchronous>, transform_indices = @transform_13, window_bounds = array<i64: 1, 32>}, {transform_indices = @transform_14, window_bounds = array<i64: 32, 32>}]} {
    %c0 = arith.constant 0 : index
    %c0_0 = arith.constant 0 : index
    %0 = vector.load %arg1[%c0, %c0_0] : memref<32x32xf32, #tpu.memory_space<vmem>>, vector<32x32xf32>
    %c0_1 = arith.constant 0 : index
    %c0_2 = arith.constant 0 : index
    %1 = vector.load %arg2[%c0_1, %c0_2] : memref<32x1xf32, #tpu.memory_space<vmem>>, vector<32x1xf32>
    %2 = tpu.iota {dimensions = array<i32: 0>} : vector<32x1xi32>
    %c16_i32 = arith.constant 16 : i32
    %c0_i32 = arith.constant 0 : i32
    %3 = arith.cmpi eq, %c16_i32, %c0_i32 : i32
    %c1_i32 = arith.constant 1 : i32
    %4 = arith.select %3, %c1_i32, %c16_i32 : i32
    %5 = vector.broadcast %4 : i32 to vector<32x1xi32>
    %6 = arith.remsi %2, %5 : vector<32x1xi32>
    %c0_i32_3 = arith.constant 0 : i32
    %7 = vector.broadcast %c0_i32_3 : i32 to vector<32x1xi32>
    %8 = arith.cmpi ne, %6, %7 : vector<32x1xi32>
    %c0_i32_4 = arith.constant 0 : i32
    %9 = vector.broadcast %c0_i32_4 : i32 to vector<32x1xi32>
    %10 = arith.cmpi slt, %6, %9 : vector<32x1xi32>
    %c0_i32_5 = arith.constant 0 : i32
    %11 = arith.cmpi slt, %4, %c0_i32_5 : i32
    %12 = vector.broadcast %11 : i1 to vector<32x1xi1>
    %13 = vector.broadcast %12 : vector<32x1xi1> to vector<32x1xi1>
    %14 = arith.xori %10, %13 : vector<32x1xi1>
    %15 = arith.andi %14, %8 : vector<32x1xi1>
    %16 = vector.broadcast %4 : i32 to vector<32x1xi32>
    %17 = arith.addi %6, %16 : vector<32x1xi32>
    %18 = arith.select %15, %17, %6 : vector<32x1xi1>, vector<32x1xi32>
    %c0_6 = arith.constant 0 : index
    %c0_7 = arith.constant 0 : index
    %19 = vector.load %arg3[%c0_6, %c0_7] : memref<32x32xf32, #tpu.memory_space<vmem>>, vector<32x32xf32>
    %c0_8 = arith.constant 0 : index
    %c0_9 = arith.constant 0 : index
    %20 = vector.load %arg4[%c0_8, %c0_9] : memref<1x32xf32, #tpu.memory_space<vmem>>, vector<1x32xf32>
    %21 = arith.truncf %0 : vector<32x32xf32> to vector<32x32xbf16>
    %22 = arith.truncf %19 : vector<32x32xf32> to vector<32x32xbf16>
    %cst = arith.constant dense<0.000000e+00> : vector<32x32xf32>
    %23 = tpu.matmul %21, %22, %cst {dimension_numbers = #tpu.dot_dimension_numbers<[1], [0], [0], [1], [0, 0, 1, 1], [], []>} : vector<32x32xbf16>, vector<32x32xbf16>, vector<32x32xf32> -> vector<32x32xf32>
    %24 = vector.broadcast %20 : vector<1x32xf32> to vector<32x32xf32>
    %25 = arith.addf %23, %24 : vector<32x32xf32>
    %c0_10 = arith.constant 0 : index
    %c0_11 = arith.constant 0 : index
    %c0_12 = arith.constant 0 : index
    %26 = vector.load %arg5[%c0_10, %c0_11, %c0_12] : memref<2x3x32xf32, #tpu.memory_space<vmem>>, vector<2x3x32xf32>
    %c0_13 = arith.constant 0 : index
    %c0_14 = arith.constant 0 : index
    %c0_15 = arith.constant 0 : index
    %27 = vector.load %arg6[%c0_13, %c0_14, %c0_15] : memref<2x1x32xf32, #tpu.memory_space<vmem>>, vector<2x1x32xf32>
    %c0_16 = arith.constant 0 : index
    %c0_17 = arith.constant 0 : index
    %c0_18 = arith.constant 0 : index
    %28 = vector.load %arg7[%c0_16, %c0_17, %c0_18] : memref<2x1x32xf32, #tpu.memory_space<vmem>>, vector<2x1x32xf32>
    %c0_19 = arith.constant 0 : index
    %c0_20 = arith.constant 0 : index
    %c0_21 = arith.constant 0 : index
    %29 = vector.load %arg8[%c0_19, %c0_20, %c0_21] : memref<2x1x32xf32, #tpu.memory_space<vmem>>, vector<2x1x32xf32>
    %c0_22 = arith.constant 0 : index
    %c0_23 = arith.constant 0 : index
    %c0_24 = arith.constant 0 : index
    %30 = vector.load %arg9[%c0_22, %c0_23, %c0_24] : memref<2x32x32xf32, #tpu.memory_space<vmem>>, vector<2x32x32xf32>
    %c0_25 = arith.constant 0 : index
    %c0_26 = arith.constant 0 : index
    %c0_27 = arith.constant 0 : index
    %31 = vector.load %arg10[%c0_25, %c0_26, %c0_27] : memref<2x1x32xf32, #tpu.memory_space<vmem>>, vector<2x1x32xf32>
    %c0_28 = arith.constant 0 : index
    %c0_29 = arith.constant 0 : index
    %c0_30 = arith.constant 0 : index
    %32 = vector.load %arg11[%c0_28, %c0_29, %c0_30] : memref<2x1x32xf32, #tpu.memory_space<vmem>>, vector<2x1x32xf32>
    %c0_31 = arith.constant 0 : index
    %c0_32 = arith.constant 0 : index
    %c0_33 = arith.constant 0 : index
    %33 = vector.load %arg12[%c0_31, %c0_32, %c0_33] : memref<2x1x32xf32, #tpu.memory_space<vmem>>, vector<2x1x32xf32>
    %34 = vector.broadcast %1 : vector<32x1xf32> to vector<32x32xf32>
    %35 = arith.mulf %25, %34 : vector<32x32xf32>
    %c1_i32_34 = arith.constant 1 : i32
    %36 = tpu.dynamic_rotate %35 by %c1_i32_34 dim 0 : vector<32x32xf32>, i32 -> vector<32x32xf32>
    %c1_i32_35 = arith.constant 1 : i32
    %37 = vector.broadcast %c1_i32_35 : i32 to vector<32x1xi32>
    %38 = arith.cmpi sge, %18, %37 : vector<32x1xi32>
    %c17_i32 = arith.constant 17 : i32
    %39 = vector.broadcast %c17_i32 : i32 to vector<32x1xi32>
    %40 = arith.cmpi slt, %18, %39 : vector<32x1xi32>
    %41 = arith.andi %38, %40 : vector<32x1xi1>
    %42 = arith.extui %41 : vector<32x1xi1> to vector<32x1xi32>
    %43 = arith.sitofp %42 : vector<32x1xi32> to vector<32x1xf32>
    %44 = vector.broadcast %43 : vector<32x1xf32> to vector<32x32xf32>
    %45 = arith.mulf %36, %44 : vector<32x32xf32>
    %46 = vector.extract_strided_slice %26 {offsets = [0, 0, 0], sizes = [1, 1, 32], strides = [1, 1, 1]} : vector<2x3x32xf32> to vector<1x1x32xf32>
    %47 = vector.shape_cast %46 : vector<1x1x32xf32> to vector<1x32xf32>
    %48 = vector.broadcast %47 : vector<1x32xf32> to vector<32x32xf32>
    %49 = arith.mulf %45, %48 : vector<32x32xf32>
    %50 = vector.extract_strided_slice %26 {offsets = [0, 1, 0], sizes = [1, 1, 32], strides = [1, 1, 1]} : vector<2x3x32xf32> to vector<1x1x32xf32>
    %51 = vector.shape_cast %50 : vector<1x1x32xf32> to vector<1x32xf32>
    %52 = vector.broadcast %51 : vector<1x32xf32> to vector<32x32xf32>
    %53 = arith.mulf %35, %52 : vector<32x32xf32>
    %54 = arith.addf %49, %53 : vector<32x32xf32>
    %c31_i32 = arith.constant 31 : i32
    %55 = tpu.dynamic_rotate %35 by %c31_i32 dim 0 : vector<32x32xf32>, i32 -> vector<32x32xf32>
    %c-1_i32 = arith.constant -1 : i32
    %56 = vector.broadcast %c-1_i32 : i32 to vector<32x1xi32>
    %57 = arith.cmpi sge, %18, %56 : vector<32x1xi32>
    %c15_i32 = arith.constant 15 : i32
    %58 = vector.broadcast %c15_i32 : i32 to vector<32x1xi32>
    %59 = arith.cmpi slt, %18, %58 : vector<32x1xi32>
    %60 = arith.andi %57, %59 : vector<32x1xi1>
    %61 = arith.extui %60 : vector<32x1xi1> to vector<32x1xi32>
    %62 = arith.sitofp %61 : vector<32x1xi32> to vector<32x1xf32>
    %63 = vector.broadcast %62 : vector<32x1xf32> to vector<32x32xf32>
    %64 = arith.mulf %55, %63 : vector<32x32xf32>
    %65 = vector.extract_strided_slice %26 {offsets = [0, 2, 0], sizes = [1, 1, 32], strides = [1, 1, 1]} : vector<2x3x32xf32> to vector<1x1x32xf32>
    %66 = vector.shape_cast %65 : vector<1x1x32xf32> to vector<1x32xf32>
    %67 = vector.broadcast %66 : vector<1x32xf32> to vector<32x32xf32>
    %68 = arith.mulf %64, %67 : vector<32x32xf32>
    %69 = arith.addf %54, %68 : vector<32x32xf32>
    %70 = vector.extract_strided_slice %27 {offsets = [0, 0, 0], sizes = [1, 1, 32], strides = [1, 1, 1]} : vector<2x1x32xf32> to vector<1x1x32xf32>
    %71 = vector.shape_cast %70 : vector<1x1x32xf32> to vector<1x32xf32>
    %72 = vector.broadcast %71 : vector<1x32xf32> to vector<32x32xf32>
    %73 = arith.addf %69, %72 : vector<32x32xf32>
    %74 = vector.extract_strided_slice %28 {offsets = [0, 0, 0], sizes = [1, 1, 32], strides = [1, 1, 1]} : vector<2x1x32xf32> to vector<1x1x32xf32>
    %75 = vector.shape_cast %74 : vector<1x1x32xf32> to vector<1x32xf32>
    %76 = vector.extract_strided_slice %29 {offsets = [0, 0, 0], sizes = [1, 1, 32], strides = [1, 1, 1]} : vector<2x1x32xf32> to vector<1x1x32xf32>
    %77 = vector.shape_cast %76 : vector<1x1x32xf32> to vector<1x32xf32>
    %cst_36 = arith.constant dense<0.000000e+00> : vector<32xf32>
    %78 = vector.multi_reduction <add>, %73, %cst_36 [1] : vector<32x32xf32> to vector<32xf32>
    %79 = vector.shape_cast %78 : vector<32xf32> to vector<32x1xf32>
    %cst_37 = arith.constant 3.200000e+01 : f32
    %80 = vector.broadcast %cst_37 : f32 to vector<32x1xf32>
    %81 = arith.divf %79, %80 : vector<32x1xf32>
    %82 = vector.broadcast %81 : vector<32x1xf32> to vector<32x32xf32>
    %83 = arith.subf %73, %82 : vector<32x32xf32>
    %84 = arith.mulf %83, %83 : vector<32x32xf32>
    %cst_38 = arith.constant dense<0.000000e+00> : vector<32xf32>
    %85 = vector.multi_reduction <add>, %84, %cst_38 [1] : vector<32x32xf32> to vector<32xf32>
    %86 = vector.shape_cast %85 : vector<32xf32> to vector<32x1xf32>
    %cst_39 = arith.constant 3.200000e+01 : f32
    %87 = vector.broadcast %cst_39 : f32 to vector<32x1xf32>
    %88 = arith.divf %86, %87 : vector<32x1xf32>
    %89 = vector.broadcast %81 : vector<32x1xf32> to vector<32x32xf32>
    %90 = arith.subf %73, %89 : vector<32x32xf32>
    %cst_40 = arith.constant 9.99999974E-6 : f32
    %91 = vector.broadcast %cst_40 : f32 to vector<32x1xf32>
    %92 = arith.addf %88, %91 : vector<32x1xf32>
    %93 = math.rsqrt %92 : vector<32x1xf32>
    %94 = vector.broadcast %93 : vector<32x1xf32> to vector<32x32xf32>
    %95 = arith.mulf %90, %94 : vector<32x32xf32>
    %96 = vector.broadcast %75 : vector<1x32xf32> to vector<32x32xf32>
    %97 = arith.mulf %95, %96 : vector<32x32xf32>
    %98 = vector.broadcast %77 : vector<1x32xf32> to vector<32x32xf32>
    %99 = arith.addf %97, %98 : vector<32x32xf32>
    %cst_41 = arith.constant 5.000000e-01 : f32
    %100 = vector.broadcast %cst_41 : f32 to vector<32x32xf32>
    %101 = arith.mulf %100, %99 : vector<32x32xf32>
    %cst_42 = arith.constant 4.471500e-02 : f32
    %102 = vector.broadcast %cst_42 : f32 to vector<32x32xf32>
    %103 = arith.mulf %102, %99 : vector<32x32xf32>
    %104 = arith.mulf %103, %99 : vector<32x32xf32>
    %105 = arith.mulf %104, %99 : vector<32x32xf32>
    %106 = arith.addf %99, %105 : vector<32x32xf32>
    %cst_43 = arith.constant 0.797884583 : f32
    %107 = vector.broadcast %cst_43 : f32 to vector<32x32xf32>
    %108 = arith.mulf %107, %106 : vector<32x32xf32>
    %109 = math.tanh %108 : vector<32x32xf32>
    %cst_44 = arith.constant 1.000000e+00 : f32
    %110 = vector.broadcast %cst_44 : f32 to vector<32x32xf32>
    %111 = arith.addf %110, %109 : vector<32x32xf32>
    %112 = arith.mulf %101, %111 : vector<32x32xf32>
    %113 = vector.extract_strided_slice %30 {offsets = [0, 0, 0], sizes = [1, 32, 32], strides = [1, 1, 1]} : vector<2x32x32xf32> to vector<1x32x32xf32>
    %114 = vector.shape_cast %113 : vector<1x32x32xf32> to vector<32x32xf32>
    %115 = arith.truncf %112 : vector<32x32xf32> to vector<32x32xbf16>
    %116 = arith.truncf %114 : vector<32x32xf32> to vector<32x32xbf16>
    %cst_45 = arith.constant dense<0.000000e+00> : vector<32x32xf32>
    %117 = tpu.matmul %115, %116, %cst_45 {dimension_numbers = #tpu.dot_dimension_numbers<[1], [0], [0], [1], [0, 0, 1, 1], [], []>} : vector<32x32xbf16>, vector<32x32xbf16>, vector<32x32xf32> -> vector<32x32xf32>
    %118 = vector.extract_strided_slice %31 {offsets = [0, 0, 0], sizes = [1, 1, 32], strides = [1, 1, 1]} : vector<2x1x32xf32> to vector<1x1x32xf32>
    %119 = vector.shape_cast %118 : vector<1x1x32xf32> to vector<1x32xf32>
    %120 = vector.broadcast %119 : vector<1x32xf32> to vector<32x32xf32>
    %121 = arith.addf %117, %120 : vector<32x32xf32>
    %122 = vector.extract_strided_slice %32 {offsets = [0, 0, 0], sizes = [1, 1, 32], strides = [1, 1, 1]} : vector<2x1x32xf32> to vector<1x1x32xf32>
    %123 = vector.shape_cast %122 : vector<1x1x32xf32> to vector<1x32xf32>
    %124 = vector.extract_strided_slice %33 {offsets = [0, 0, 0], sizes = [1, 1, 32], strides = [1, 1, 1]} : vector<2x1x32xf32> to vector<1x1x32xf32>
    %125 = vector.shape_cast %124 : vector<1x1x32xf32> to vector<1x32xf32>
    %cst_46 = arith.constant dense<0.000000e+00> : vector<32xf32>
    %126 = vector.multi_reduction <add>, %121, %cst_46 [1] : vector<32x32xf32> to vector<32xf32>
    %127 = vector.shape_cast %126 : vector<32xf32> to vector<32x1xf32>
    %cst_47 = arith.constant 3.200000e+01 : f32
    %128 = vector.broadcast %cst_47 : f32 to vector<32x1xf32>
    %129 = arith.divf %127, %128 : vector<32x1xf32>
    %130 = vector.broadcast %129 : vector<32x1xf32> to vector<32x32xf32>
    %131 = arith.subf %121, %130 : vector<32x32xf32>
    %132 = arith.mulf %131, %131 : vector<32x32xf32>
    %cst_48 = arith.constant dense<0.000000e+00> : vector<32xf32>
    %133 = vector.multi_reduction <add>, %132, %cst_48 [1] : vector<32x32xf32> to vector<32xf32>
    %134 = vector.shape_cast %133 : vector<32xf32> to vector<32x1xf32>
    %cst_49 = arith.constant 3.200000e+01 : f32
    %135 = vector.broadcast %cst_49 : f32 to vector<32x1xf32>
    %136 = arith.divf %134, %135 : vector<32x1xf32>
    %137 = vector.broadcast %129 : vector<32x1xf32> to vector<32x32xf32>
    %138 = arith.subf %121, %137 : vector<32x32xf32>
    %cst_50 = arith.constant 9.99999974E-6 : f32
    %139 = vector.broadcast %cst_50 : f32 to vector<32x1xf32>
    %140 = arith.addf %136, %139 : vector<32x1xf32>
    %141 = math.rsqrt %140 : vector<32x1xf32>
    %142 = vector.broadcast %141 : vector<32x1xf32> to vector<32x32xf32>
    %143 = arith.mulf %138, %142 : vector<32x32xf32>
    %144 = vector.broadcast %123 : vector<1x32xf32> to vector<32x32xf32>
    %145 = arith.mulf %143, %144 : vector<32x32xf32>
    %146 = vector.broadcast %125 : vector<1x32xf32> to vector<32x32xf32>
    %147 = arith.addf %145, %146 : vector<32x32xf32>
    %cst_51 = arith.constant 5.000000e-01 : f32
    %148 = vector.broadcast %cst_51 : f32 to vector<32x32xf32>
    %149 = arith.mulf %148, %147 : vector<32x32xf32>
    %cst_52 = arith.constant 4.471500e-02 : f32
    %150 = vector.broadcast %cst_52 : f32 to vector<32x32xf32>
    %151 = arith.mulf %150, %147 : vector<32x32xf32>
    %152 = arith.mulf %151, %147 : vector<32x32xf32>
    %153 = arith.mulf %152, %147 : vector<32x32xf32>
    %154 = arith.addf %147, %153 : vector<32x32xf32>
    %cst_53 = arith.constant 0.797884583 : f32
    %155 = vector.broadcast %cst_53 : f32 to vector<32x32xf32>
    %156 = arith.mulf %155, %154 : vector<32x32xf32>
    %157 = math.tanh %156 : vector<32x32xf32>
    %cst_54 = arith.constant 1.000000e+00 : f32
    %158 = vector.broadcast %cst_54 : f32 to vector<32x32xf32>
    %159 = arith.addf %158, %157 : vector<32x32xf32>
    %160 = arith.mulf %149, %159 : vector<32x32xf32>
    %161 = arith.addf %25, %160 : vector<32x32xf32>
    %162 = vector.broadcast %1 : vector<32x1xf32> to vector<32x32xf32>
    %163 = arith.mulf %161, %162 : vector<32x32xf32>
    %c3_i32 = arith.constant 3 : i32
    %164 = tpu.dynamic_rotate %163 by %c3_i32 dim 0 : vector<32x32xf32>, i32 -> vector<32x32xf32>
    %c3_i32_55 = arith.constant 3 : i32
    %165 = vector.broadcast %c3_i32_55 : i32 to vector<32x1xi32>
    %166 = arith.cmpi sge, %18, %165 : vector<32x1xi32>
    %c19_i32 = arith.constant 19 : i32
    %167 = vector.broadcast %c19_i32 : i32 to vector<32x1xi32>
    %168 = arith.cmpi slt, %18, %167 : vector<32x1xi32>
    %169 = arith.andi %166, %168 : vector<32x1xi1>
    %170 = arith.extui %169 : vector<32x1xi1> to vector<32x1xi32>
    %171 = arith.sitofp %170 : vector<32x1xi32> to vector<32x1xf32>
    %172 = vector.broadcast %171 : vector<32x1xf32> to vector<32x32xf32>
    %173 = arith.mulf %164, %172 : vector<32x32xf32>
    %174 = vector.extract_strided_slice %26 {offsets = [1, 0, 0], sizes = [1, 1, 32], strides = [1, 1, 1]} : vector<2x3x32xf32> to vector<1x1x32xf32>
    %175 = vector.shape_cast %174 : vector<1x1x32xf32> to vector<1x32xf32>
    %176 = vector.broadcast %175 : vector<1x32xf32> to vector<32x32xf32>
    %177 = arith.mulf %173, %176 : vector<32x32xf32>
    %178 = vector.extract_strided_slice %26 {offsets = [1, 1, 0], sizes = [1, 1, 32], strides = [1, 1, 1]} : vector<2x3x32xf32> to vector<1x1x32xf32>
    %179 = vector.shape_cast %178 : vector<1x1x32xf32> to vector<1x32xf32>
    %180 = vector.broadcast %179 : vector<1x32xf32> to vector<32x32xf32>
    %181 = arith.mulf %163, %180 : vector<32x32xf32>
    %182 = arith.addf %177, %181 : vector<32x32xf32>
    %c29_i32 = arith.constant 29 : i32
    %183 = tpu.dynamic_rotate %163 by %c29_i32 dim 0 : vector<32x32xf32>, i32 -> vector<32x32xf32>
    %c-3_i32 = arith.constant -3 : i32
    %184 = vector.broadcast %c-3_i32 : i32 to vector<32x1xi32>
    %185 = arith.cmpi sge, %18, %184 : vector<32x1xi32>
    %c13_i32 = arith.constant 13 : i32
    %186 = vector.broadcast %c13_i32 : i32 to vector<32x1xi32>
    %187 = arith.cmpi slt, %18, %186 : vector<32x1xi32>
    %188 = arith.andi %185, %187 : vector<32x1xi1>
    %189 = arith.extui %188 : vector<32x1xi1> to vector<32x1xi32>
    %190 = arith.sitofp %189 : vector<32x1xi32> to vector<32x1xf32>
    %191 = vector.broadcast %190 : vector<32x1xf32> to vector<32x32xf32>
    %192 = arith.mulf %183, %191 : vector<32x32xf32>
    %193 = vector.extract_strided_slice %26 {offsets = [1, 2, 0], sizes = [1, 1, 32], strides = [1, 1, 1]} : vector<2x3x32xf32> to vector<1x1x32xf32>
    %194 = vector.shape_cast %193 : vector<1x1x32xf32> to vector<1x32xf32>
    %195 = vector.broadcast %194 : vector<1x32xf32> to vector<32x32xf32>
    %196 = arith.mulf %192, %195 : vector<32x32xf32>
    %197 = arith.addf %182, %196 : vector<32x32xf32>
    %198 = vector.extract_strided_slice %27 {offsets = [1, 0, 0], sizes = [1, 1, 32], strides = [1, 1, 1]} : vector<2x1x32xf32> to vector<1x1x32xf32>
    %199 = vector.shape_cast %198 : vector<1x1x32xf32> to vector<1x32xf32>
    %200 = vector.broadcast %199 : vector<1x32xf32> to vector<32x32xf32>
    %201 = arith.addf %197, %200 : vector<32x32xf32>
    %202 = vector.extract_strided_slice %28 {offsets = [1, 0, 0], sizes = [1, 1, 32], strides = [1, 1, 1]} : vector<2x1x32xf32> to vector<1x1x32xf32>
    %203 = vector.shape_cast %202 : vector<1x1x32xf32> to vector<1x32xf32>
    %204 = vector.extract_strided_slice %29 {offsets = [1, 0, 0], sizes = [1, 1, 32], strides = [1, 1, 1]} : vector<2x1x32xf32> to vector<1x1x32xf32>
    %205 = vector.shape_cast %204 : vector<1x1x32xf32> to vector<1x32xf32>
    %cst_56 = arith.constant dense<0.000000e+00> : vector<32xf32>
    %206 = vector.multi_reduction <add>, %201, %cst_56 [1] : vector<32x32xf32> to vector<32xf32>
    %207 = vector.shape_cast %206 : vector<32xf32> to vector<32x1xf32>
    %cst_57 = arith.constant 3.200000e+01 : f32
    %208 = vector.broadcast %cst_57 : f32 to vector<32x1xf32>
    %209 = arith.divf %207, %208 : vector<32x1xf32>
    %210 = vector.broadcast %209 : vector<32x1xf32> to vector<32x32xf32>
    %211 = arith.subf %201, %210 : vector<32x32xf32>
    %212 = arith.mulf %211, %211 : vector<32x32xf32>
    %cst_58 = arith.constant dense<0.000000e+00> : vector<32xf32>
    %213 = vector.multi_reduction <add>, %212, %cst_58 [1] : vector<32x32xf32> to vector<32xf32>
    %214 = vector.shape_cast %213 : vector<32xf32> to vector<32x1xf32>
    %cst_59 = arith.constant 3.200000e+01 : f32
    %215 = vector.broadcast %cst_59 : f32 to vector<32x1xf32>
    %216 = arith.divf %214, %215 : vector<32x1xf32>
    %217 = vector.broadcast %209 : vector<32x1xf32> to vector<32x32xf32>
    %218 = arith.subf %201, %217 : vector<32x32xf32>
    %cst_60 = arith.constant 9.99999974E-6 : f32
    %219 = vector.broadcast %cst_60 : f32 to vector<32x1xf32>
    %220 = arith.addf %216, %219 : vector<32x1xf32>
    %221 = math.rsqrt %220 : vector<32x1xf32>
    %222 = vector.broadcast %221 : vector<32x1xf32> to vector<32x32xf32>
    %223 = arith.mulf %218, %222 : vector<32x32xf32>
    %224 = vector.broadcast %203 : vector<1x32xf32> to vector<32x32xf32>
    %225 = arith.mulf %223, %224 : vector<32x32xf32>
    %226 = vector.broadcast %205 : vector<1x32xf32> to vector<32x32xf32>
    %227 = arith.addf %225, %226 : vector<32x32xf32>
    %cst_61 = arith.constant 5.000000e-01 : f32
    %228 = vector.broadcast %cst_61 : f32 to vector<32x32xf32>
    %229 = arith.mulf %228, %227 : vector<32x32xf32>
    %cst_62 = arith.constant 4.471500e-02 : f32
    %230 = vector.broadcast %cst_62 : f32 to vector<32x32xf32>
    %231 = arith.mulf %230, %227 : vector<32x32xf32>
    %232 = arith.mulf %231, %227 : vector<32x32xf32>
    %233 = arith.mulf %232, %227 : vector<32x32xf32>
    %234 = arith.addf %227, %233 : vector<32x32xf32>
    %cst_63 = arith.constant 0.797884583 : f32
    %235 = vector.broadcast %cst_63 : f32 to vector<32x32xf32>
    %236 = arith.mulf %235, %234 : vector<32x32xf32>
    %237 = math.tanh %236 : vector<32x32xf32>
    %cst_64 = arith.constant 1.000000e+00 : f32
    %238 = vector.broadcast %cst_64 : f32 to vector<32x32xf32>
    %239 = arith.addf %238, %237 : vector<32x32xf32>
    %240 = arith.mulf %229, %239 : vector<32x32xf32>
    %241 = vector.extract_strided_slice %30 {offsets = [1, 0, 0], sizes = [1, 32, 32], strides = [1, 1, 1]} : vector<2x32x32xf32> to vector<1x32x32xf32>
    %242 = vector.shape_cast %241 : vector<1x32x32xf32> to vector<32x32xf32>
    %243 = arith.truncf %240 : vector<32x32xf32> to vector<32x32xbf16>
    %244 = arith.truncf %242 : vector<32x32xf32> to vector<32x32xbf16>
    %cst_65 = arith.constant dense<0.000000e+00> : vector<32x32xf32>
    %245 = tpu.matmul %243, %244, %cst_65 {dimension_numbers = #tpu.dot_dimension_numbers<[1], [0], [0], [1], [0, 0, 1, 1], [], []>} : vector<32x32xbf16>, vector<32x32xbf16>, vector<32x32xf32> -> vector<32x32xf32>
    %246 = vector.extract_strided_slice %31 {offsets = [1, 0, 0], sizes = [1, 1, 32], strides = [1, 1, 1]} : vector<2x1x32xf32> to vector<1x1x32xf32>
    %247 = vector.shape_cast %246 : vector<1x1x32xf32> to vector<1x32xf32>
    %248 = vector.broadcast %247 : vector<1x32xf32> to vector<32x32xf32>
    %249 = arith.addf %245, %248 : vector<32x32xf32>
    %250 = vector.extract_strided_slice %32 {offsets = [1, 0, 0], sizes = [1, 1, 32], strides = [1, 1, 1]} : vector<2x1x32xf32> to vector<1x1x32xf32>
    %251 = vector.shape_cast %250 : vector<1x1x32xf32> to vector<1x32xf32>
    %252 = vector.extract_strided_slice %33 {offsets = [1, 0, 0], sizes = [1, 1, 32], strides = [1, 1, 1]} : vector<2x1x32xf32> to vector<1x1x32xf32>
    %253 = vector.shape_cast %252 : vector<1x1x32xf32> to vector<1x32xf32>
    %cst_66 = arith.constant dense<0.000000e+00> : vector<32xf32>
    %254 = vector.multi_reduction <add>, %249, %cst_66 [1] : vector<32x32xf32> to vector<32xf32>
    %255 = vector.shape_cast %254 : vector<32xf32> to vector<32x1xf32>
    %cst_67 = arith.constant 3.200000e+01 : f32
    %256 = vector.broadcast %cst_67 : f32 to vector<32x1xf32>
    %257 = arith.divf %255, %256 : vector<32x1xf32>
    %258 = vector.broadcast %257 : vector<32x1xf32> to vector<32x32xf32>
    %259 = arith.subf %249, %258 : vector<32x32xf32>
    %260 = arith.mulf %259, %259 : vector<32x32xf32>
    %cst_68 = arith.constant dense<0.000000e+00> : vector<32xf32>
    %261 = vector.multi_reduction <add>, %260, %cst_68 [1] : vector<32x32xf32> to vector<32xf32>
    %262 = vector.shape_cast %261 : vector<32xf32> to vector<32x1xf32>
    %cst_69 = arith.constant 3.200000e+01 : f32
    %263 = vector.broadcast %cst_69 : f32 to vector<32x1xf32>
    %264 = arith.divf %262, %263 : vector<32x1xf32>
    %265 = vector.broadcast %257 : vector<32x1xf32> to vector<32x32xf32>
    %266 = arith.subf %249, %265 : vector<32x32xf32>
    %cst_70 = arith.constant 9.99999974E-6 : f32
    %267 = vector.broadcast %cst_70 : f32 to vector<32x1xf32>
    %268 = arith.addf %264, %267 : vector<32x1xf32>
    %269 = math.rsqrt %268 : vector<32x1xf32>
    %270 = vector.broadcast %269 : vector<32x1xf32> to vector<32x32xf32>
    %271 = arith.mulf %266, %270 : vector<32x32xf32>
    %272 = vector.broadcast %251 : vector<1x32xf32> to vector<32x32xf32>
    %273 = arith.mulf %271, %272 : vector<32x32xf32>
    %274 = vector.broadcast %253 : vector<1x32xf32> to vector<32x32xf32>
    %275 = arith.addf %273, %274 : vector<32x32xf32>
    %cst_71 = arith.constant 5.000000e-01 : f32
    %276 = vector.broadcast %cst_71 : f32 to vector<32x32xf32>
    %277 = arith.mulf %276, %275 : vector<32x32xf32>
    %cst_72 = arith.constant 4.471500e-02 : f32
    %278 = vector.broadcast %cst_72 : f32 to vector<32x32xf32>
    %279 = arith.mulf %278, %275 : vector<32x32xf32>
    %280 = arith.mulf %279, %275 : vector<32x32xf32>
    %281 = arith.mulf %280, %275 : vector<32x32xf32>
    %282 = arith.addf %275, %281 : vector<32x32xf32>
    %cst_73 = arith.constant 0.797884583 : f32
    %283 = vector.broadcast %cst_73 : f32 to vector<32x32xf32>
    %284 = arith.mulf %283, %282 : vector<32x32xf32>
    %285 = math.tanh %284 : vector<32x32xf32>
    %cst_74 = arith.constant 1.000000e+00 : f32
    %286 = vector.broadcast %cst_74 : f32 to vector<32x32xf32>
    %287 = arith.addf %286, %285 : vector<32x32xf32>
    %288 = arith.mulf %277, %287 : vector<32x32xf32>
    %289 = arith.addf %161, %288 : vector<32x32xf32>
    %290 = vector.broadcast %1 : vector<32x1xf32> to vector<32x32xf32>
    %291 = arith.mulf %289, %290 : vector<32x32xf32>
    %c0_75 = arith.constant 0 : index
    %c0_76 = arith.constant 0 : index
    %292 = vector.load %arg13[%c0_75, %c0_76] : memref<32x32xf32, #tpu.memory_space<vmem>>, vector<32x32xf32>
    %293 = arith.truncf %291 : vector<32x32xf32> to vector<32x32xbf16>
    %294 = arith.truncf %292 : vector<32x32xf32> to vector<32x32xbf16>
    %cst_77 = arith.constant dense<0.000000e+00> : vector<32x32xf32>
    %295 = tpu.matmul %293, %294, %cst_77 {dimension_numbers = #tpu.dot_dimension_numbers<[1], [0], [0], [1], [0, 0, 1, 1], [], []>} : vector<32x32xbf16>, vector<32x32xbf16>, vector<32x32xf32> -> vector<32x32xf32>
    %c0_78 = arith.constant 0 : index
    %c0_79 = arith.constant 0 : index
    %296 = vector.load %arg14[%c0_78, %c0_79] : memref<1x32xf32, #tpu.memory_space<vmem>>, vector<1x32xf32>
    %297 = vector.broadcast %296 : vector<1x32xf32> to vector<32x32xf32>
    %298 = arith.addf %295, %297 : vector<32x32xf32>
    %299 = vector.broadcast %1 : vector<32x1xf32> to vector<32x32xf32>
    %300 = arith.mulf %298, %299 : vector<32x32xf32>
    %c0_80 = arith.constant 0 : index
    %c0_81 = arith.constant 0 : index
    %301 = vector.load %arg15[%c0_80, %c0_81] : memref<32x32xf32, #tpu.memory_space<vmem>>, vector<32x32xf32>
    tpu.vector_store %arg15[%c0_80, %c0_81], %300 {strides = array<i32>} : memref<32x32xf32, #tpu.memory_space<vmem>>, vector<32x32xf32>,
    return
  }
  func.func @transform_0(%arg0: i32) -> (i32, i32) {
    %c0_i32 = arith.constant 0 : i32
    %c0_i32_0 = arith.constant 0 : i32
    return %arg0, %c0_i32 : i32, i32
  }
  func.func @transform_1(%arg0: i32) -> (i32, i32) {
    %c0_i32 = arith.constant 0 : i32
    %c0_i32_0 = arith.constant 0 : i32
    return %arg0, %c0_i32 : i32, i32
  }
  func.func @transform_2(%arg0: i32) -> (i32, i32) {
    %c0_i32 = arith.constant 0 : i32
    %c0_i32_0 = arith.constant 0 : i32
    %c0_i32_1 = arith.constant 0 : i32
    return %c0_i32, %c0_i32_0 : i32, i32
  }
  func.func @transform_3(%arg0: i32) -> (i32, i32) {
    %c0_i32 = arith.constant 0 : i32
    %c0_i32_0 = arith.constant 0 : i32
    %c0_i32_1 = arith.constant 0 : i32
    return %c0_i32, %c0_i32_0 : i32, i32
  }
  func.func @transform_4(%arg0: i32) -> (i32, i32, i32) {
    %c0_i32 = arith.constant 0 : i32
    %c0_i32_0 = arith.constant 0 : i32
    %c0_i32_1 = arith.constant 0 : i32
    %c0_i32_2 = arith.constant 0 : i32
    return %c0_i32, %c0_i32_0, %c0_i32_1 : i32, i32, i32
  }
  func.func @transform_5(%arg0: i32) -> (i32, i32, i32) {
    %c0_i32 = arith.constant 0 : i32
    %c0_i32_0 = arith.constant 0 : i32
    %c0_i32_1 = arith.constant 0 : i32
    %c0_i32_2 = arith.constant 0 : i32
    return %c0_i32, %c0_i32_0, %c0_i32_1 : i32, i32, i32
  }
  func.func @transform_6(%arg0: i32) -> (i32, i32, i32) {
    %c0_i32 = arith.constant 0 : i32
    %c0_i32_0 = arith.constant 0 : i32
    %c0_i32_1 = arith.constant 0 : i32
    %c0_i32_2 = arith.constant 0 : i32
    return %c0_i32, %c0_i32_0, %c0_i32_1 : i32, i32, i32
  }
  func.func @transform_7(%arg0: i32) -> (i32, i32, i32) {
    %c0_i32 = arith.constant 0 : i32
    %c0_i32_0 = arith.constant 0 : i32
    %c0_i32_1 = arith.constant 0 : i32
    %c0_i32_2 = arith.constant 0 : i32
    return %c0_i32, %c0_i32_0, %c0_i32_1 : i32, i32, i32
  }
  func.func @transform_8(%arg0: i32) -> (i32, i32, i32) {
    %c0_i32 = arith.constant 0 : i32
    %c0_i32_0 = arith.constant 0 : i32
    %c0_i32_1 = arith.constant 0 : i32
    %c0_i32_2 = arith.constant 0 : i32
    return %c0_i32, %c0_i32_0, %c0_i32_1 : i32, i32, i32
  }
  func.func @transform_9(%arg0: i32) -> (i32, i32, i32) {
    %c0_i32 = arith.constant 0 : i32
    %c0_i32_0 = arith.constant 0 : i32
    %c0_i32_1 = arith.constant 0 : i32
    %c0_i32_2 = arith.constant 0 : i32
    return %c0_i32, %c0_i32_0, %c0_i32_1 : i32, i32, i32
  }
  func.func @transform_10(%arg0: i32) -> (i32, i32, i32) {
    %c0_i32 = arith.constant 0 : i32
    %c0_i32_0 = arith.constant 0 : i32
    %c0_i32_1 = arith.constant 0 : i32
    %c0_i32_2 = arith.constant 0 : i32
    return %c0_i32, %c0_i32_0, %c0_i32_1 : i32, i32, i32
  }
  func.func @transform_11(%arg0: i32) -> (i32, i32, i32) {
    %c0_i32 = arith.constant 0 : i32
    %c0_i32_0 = arith.constant 0 : i32
    %c0_i32_1 = arith.constant 0 : i32
    %c0_i32_2 = arith.constant 0 : i32
    return %c0_i32, %c0_i32_0, %c0_i32_1 : i32, i32, i32
  }
  func.func @transform_12(%arg0: i32) -> (i32, i32) {
    %c0_i32 = arith.constant 0 : i32
    %c0_i32_0 = arith.constant 0 : i32
    %c0_i32_1 = arith.constant 0 : i32
    return %c0_i32, %c0_i32_0 : i32, i32
  }
  func.func @transform_13(%arg0: i32) -> (i32, i32) {
    %c0_i32 = arith.constant 0 : i32
    %c0_i32_0 = arith.constant 0 : i32
    %c0_i32_1 = arith.constant 0 : i32
    return %c0_i32, %c0_i32_0 : i32, i32
  }
  func.func @transform_14(%arg0: i32) -> (i32, i32) {
    %c0_i32 = arith.constant 0 : i32
    %c0_i32_0 = arith.constant 0 : i32
    return %arg0, %c0_i32 : i32, i32
  }
}

module attributes {stable_mosaic.version = 11 : i64} {
  func.func @_encoder_kernel(%arg0: i32, %arg1: memref<32x1xf32, #tpu.memory_space<vmem>>, %arg2: memref<32x1xf32, #tpu.memory_space<vmem>>, %arg3: memref<1x32xf32, #tpu.memory_space<vmem>>, %arg4: memref<1x32xf32, #tpu.memory_space<vmem>>, %arg5: memref<2x3x32xf32, #tpu.memory_space<vmem>>, %arg6: memref<2x1x32xf32, #tpu.memory_space<vmem>>, %arg7: memref<2x1x32xf32, #tpu.memory_space<vmem>>, %arg8: memref<2x1x32xf32, #tpu.memory_space<vmem>>, %arg9: memref<2x32x32xf32, #tpu.memory_space<vmem>>, %arg10: memref<2x1x32xf32, #tpu.memory_space<vmem>>, %arg11: memref<2x1x32xf32, #tpu.memory_space<vmem>>, %arg12: memref<2x1x32xf32, #tpu.memory_space<vmem>>, %arg13: memref<32x32xf32, #tpu.memory_space<vmem>>, %arg14: memref<1x32xf32, #tpu.memory_space<vmem>>, %arg15: memref<32x32xf32, #tpu.memory_space<vmem>>) attributes {dimension_semantics = [#tpu.dimension_semantics<parallel>], iteration_bounds = array<i64: 1>, scalar_prefetch = 0 : i64, scratch_operands = 0 : i64, tpu.core_type = #tpu.core_type<tc>, window_params = [{transform_indices = @transform_0, window_bounds = array<i64: 32, 1>}, {transform_indices = @transform_1, window_bounds = array<i64: 32, 1>}, {pipeline_mode = #tpu.pipeline_mode<synchronous>, transform_indices = @transform_2, window_bounds = array<i64: 1, 32>}, {pipeline_mode = #tpu.pipeline_mode<synchronous>, transform_indices = @transform_3, window_bounds = array<i64: 1, 32>}, {pipeline_mode = #tpu.pipeline_mode<synchronous>, transform_indices = @transform_4, window_bounds = array<i64: 2, 3, 32>}, {pipeline_mode = #tpu.pipeline_mode<synchronous>, transform_indices = @transform_5, window_bounds = array<i64: 2, 1, 32>}, {pipeline_mode = #tpu.pipeline_mode<synchronous>, transform_indices = @transform_6, window_bounds = array<i64: 2, 1, 32>}, {pipeline_mode = #tpu.pipeline_mode<synchronous>, transform_indices = @transform_7, window_bounds = array<i64: 2, 1, 32>}, {pipeline_mode = #tpu.pipeline_mode<synchronous>, transform_indices = @transform_8, window_bounds = array<i64: 2, 32, 32>}, {pipeline_mode = #tpu.pipeline_mode<synchronous>, transform_indices = @transform_9, window_bounds = array<i64: 2, 1, 32>}, {pipeline_mode = #tpu.pipeline_mode<synchronous>, transform_indices = @transform_10, window_bounds = array<i64: 2, 1, 32>}, {pipeline_mode = #tpu.pipeline_mode<synchronous>, transform_indices = @transform_11, window_bounds = array<i64: 2, 1, 32>}, {pipeline_mode = #tpu.pipeline_mode<synchronous>, transform_indices = @transform_12, window_bounds = array<i64: 32, 32>}, {pipeline_mode = #tpu.pipeline_mode<synchronous>, transform_indices = @transform_13, window_bounds = array<i64: 1, 32>}, {transform_indices = @transform_14, window_bounds = array<i64: 32, 32>}]} {
    %c0 = arith.constant 0 : index
    %c0_0 = arith.constant 0 : index
    %0 = vector.load %arg1[%c0, %c0_0] : memref<32x1xf32, #tpu.memory_space<vmem>>, vector<32x1xf32>
    %c0_1 = arith.constant 0 : index
    %c0_2 = arith.constant 0 : index
    %1 = vector.load %arg2[%c0_1, %c0_2] : memref<32x1xf32, #tpu.memory_space<vmem>>, vector<32x1xf32>
    %2 = tpu.iota {dimensions = array<i32: 0>} : vector<32x1xi32>
    %c16_i32 = arith.constant 16 : i32
    %c0_i32 = arith.constant 0 : i32
    %3 = arith.cmpi eq, %c16_i32, %c0_i32 : i32
    %c1_i32 = arith.constant 1 : i32
    %4 = arith.select %3, %c1_i32, %c16_i32 : i32
    %5 = vector.broadcast %4 : i32 to vector<32x1xi32>
    %6 = arith.remsi %2, %5 : vector<32x1xi32>
    %c0_i32_3 = arith.constant 0 : i32
    %7 = vector.broadcast %c0_i32_3 : i32 to vector<32x1xi32>
    %8 = arith.cmpi ne, %6, %7 : vector<32x1xi32>
    %c0_i32_4 = arith.constant 0 : i32
    %9 = vector.broadcast %c0_i32_4 : i32 to vector<32x1xi32>
    %10 = arith.cmpi slt, %6, %9 : vector<32x1xi32>
    %c0_i32_5 = arith.constant 0 : i32
    %11 = arith.cmpi slt, %4, %c0_i32_5 : i32
    %12 = vector.broadcast %11 : i1 to vector<32x1xi1>
    %13 = vector.broadcast %12 : vector<32x1xi1> to vector<32x1xi1>
    %14 = arith.xori %10, %13 : vector<32x1xi1>
    %15 = arith.andi %14, %8 : vector<32x1xi1>
    %16 = vector.broadcast %4 : i32 to vector<32x1xi32>
    %17 = arith.addi %6, %16 : vector<32x1xi32>
    %18 = arith.select %15, %17, %6 : vector<32x1xi1>, vector<32x1xi32>
    %c0_6 = arith.constant 0 : index
    %c0_7 = arith.constant 0 : index
    %19 = vector.load %arg3[%c0_6, %c0_7] : memref<1x32xf32, #tpu.memory_space<vmem>>, vector<1x32xf32>
    %c0_8 = arith.constant 0 : index
    %c0_9 = arith.constant 0 : index
    %20 = vector.load %arg4[%c0_8, %c0_9] : memref<1x32xf32, #tpu.memory_space<vmem>>, vector<1x32xf32>
    %21 = vector.broadcast %0 : vector<32x1xf32> to vector<32x32xf32>
    %22 = vector.broadcast %19 : vector<1x32xf32> to vector<32x32xf32>
    %23 = arith.mulf %21, %22 : vector<32x32xf32>
    %24 = vector.broadcast %20 : vector<1x32xf32> to vector<32x32xf32>
    %25 = arith.addf %23, %24 : vector<32x32xf32>
    %c0_10 = arith.constant 0 : index
    %c0_11 = arith.constant 0 : index
    %c0_12 = arith.constant 0 : index
    %26 = vector.load %arg5[%c0_10, %c0_11, %c0_12] : memref<2x3x32xf32, #tpu.memory_space<vmem>>, vector<2x3x32xf32>
    %c0_13 = arith.constant 0 : index
    %c0_14 = arith.constant 0 : index
    %c0_15 = arith.constant 0 : index
    %27 = vector.load %arg6[%c0_13, %c0_14, %c0_15] : memref<2x1x32xf32, #tpu.memory_space<vmem>>, vector<2x1x32xf32>
    %c0_16 = arith.constant 0 : index
    %c0_17 = arith.constant 0 : index
    %c0_18 = arith.constant 0 : index
    %28 = vector.load %arg7[%c0_16, %c0_17, %c0_18] : memref<2x1x32xf32, #tpu.memory_space<vmem>>, vector<2x1x32xf32>
    %c0_19 = arith.constant 0 : index
    %c0_20 = arith.constant 0 : index
    %c0_21 = arith.constant 0 : index
    %29 = vector.load %arg8[%c0_19, %c0_20, %c0_21] : memref<2x1x32xf32, #tpu.memory_space<vmem>>, vector<2x1x32xf32>
    %c0_22 = arith.constant 0 : index
    %c0_23 = arith.constant 0 : index
    %c0_24 = arith.constant 0 : index
    %30 = vector.load %arg9[%c0_22, %c0_23, %c0_24] : memref<2x32x32xf32, #tpu.memory_space<vmem>>, vector<2x32x32xf32>
    %c0_25 = arith.constant 0 : index
    %c0_26 = arith.constant 0 : index
    %c0_27 = arith.constant 0 : index
    %31 = vector.load %arg10[%c0_25, %c0_26, %c0_27] : memref<2x1x32xf32, #tpu.memory_space<vmem>>, vector<2x1x32xf32>
    %c0_28 = arith.constant 0 : index
    %c0_29 = arith.constant 0 : index
    %c0_30 = arith.constant 0 : index
    %32 = vector.load %arg11[%c0_28, %c0_29, %c0_30] : memref<2x1x32xf32, #tpu.memory_space<vmem>>, vector<2x1x32xf32>
    %c0_31 = arith.constant 0 : index
    %c0_32 = arith.constant 0 : index
    %c0_33 = arith.constant 0 : index
    %33 = vector.load %arg12[%c0_31, %c0_32, %c0_33] : memref<2x1x32xf32, #tpu.memory_space<vmem>>, vector<2x1x32xf32>
    %34 = vector.broadcast %1 : vector<32x1xf32> to vector<32x32xf32>
    %35 = arith.mulf %25, %34 : vector<32x32xf32>
    %c1_i32_34 = arith.constant 1 : i32
    %36 = tpu.dynamic_rotate %35 by %c1_i32_34 dim 0 : vector<32x32xf32>, i32 -> vector<32x32xf32>
    %c1_i32_35 = arith.constant 1 : i32
    %37 = vector.broadcast %c1_i32_35 : i32 to vector<32x1xi32>
    %38 = arith.cmpi sge, %18, %37 : vector<32x1xi32>
    %c17_i32 = arith.constant 17 : i32
    %39 = vector.broadcast %c17_i32 : i32 to vector<32x1xi32>
    %40 = arith.cmpi slt, %18, %39 : vector<32x1xi32>
    %41 = arith.andi %38, %40 : vector<32x1xi1>
    %42 = arith.extui %41 : vector<32x1xi1> to vector<32x1xi32>
    %43 = arith.sitofp %42 : vector<32x1xi32> to vector<32x1xf32>
    %44 = vector.broadcast %43 : vector<32x1xf32> to vector<32x32xf32>
    %45 = arith.mulf %36, %44 : vector<32x32xf32>
    %46 = vector.extract_strided_slice %26 {offsets = [0, 0, 0], sizes = [1, 1, 32], strides = [1, 1, 1]} : vector<2x3x32xf32> to vector<1x1x32xf32>
    %47 = vector.shape_cast %46 : vector<1x1x32xf32> to vector<1x32xf32>
    %48 = vector.broadcast %47 : vector<1x32xf32> to vector<32x32xf32>
    %49 = arith.mulf %45, %48 : vector<32x32xf32>
    %50 = vector.extract_strided_slice %26 {offsets = [0, 1, 0], sizes = [1, 1, 32], strides = [1, 1, 1]} : vector<2x3x32xf32> to vector<1x1x32xf32>
    %51 = vector.shape_cast %50 : vector<1x1x32xf32> to vector<1x32xf32>
    %52 = vector.broadcast %51 : vector<1x32xf32> to vector<32x32xf32>
    %53 = arith.mulf %35, %52 : vector<32x32xf32>
    %54 = arith.addf %49, %53 : vector<32x32xf32>
    %c31_i32 = arith.constant 31 : i32
    %55 = tpu.dynamic_rotate %35 by %c31_i32 dim 0 : vector<32x32xf32>, i32 -> vector<32x32xf32>
    %c-1_i32 = arith.constant -1 : i32
    %56 = vector.broadcast %c-1_i32 : i32 to vector<32x1xi32>
    %57 = arith.cmpi sge, %18, %56 : vector<32x1xi32>
    %c15_i32 = arith.constant 15 : i32
    %58 = vector.broadcast %c15_i32 : i32 to vector<32x1xi32>
    %59 = arith.cmpi slt, %18, %58 : vector<32x1xi32>
    %60 = arith.andi %57, %59 : vector<32x1xi1>
    %61 = arith.extui %60 : vector<32x1xi1> to vector<32x1xi32>
    %62 = arith.sitofp %61 : vector<32x1xi32> to vector<32x1xf32>
    %63 = vector.broadcast %62 : vector<32x1xf32> to vector<32x32xf32>
    %64 = arith.mulf %55, %63 : vector<32x32xf32>
    %65 = vector.extract_strided_slice %26 {offsets = [0, 2, 0], sizes = [1, 1, 32], strides = [1, 1, 1]} : vector<2x3x32xf32> to vector<1x1x32xf32>
    %66 = vector.shape_cast %65 : vector<1x1x32xf32> to vector<1x32xf32>
    %67 = vector.broadcast %66 : vector<1x32xf32> to vector<32x32xf32>
    %68 = arith.mulf %64, %67 : vector<32x32xf32>
    %69 = arith.addf %54, %68 : vector<32x32xf32>
    %70 = vector.extract_strided_slice %27 {offsets = [0, 0, 0], sizes = [1, 1, 32], strides = [1, 1, 1]} : vector<2x1x32xf32> to vector<1x1x32xf32>
    %71 = vector.shape_cast %70 : vector<1x1x32xf32> to vector<1x32xf32>
    %72 = vector.broadcast %71 : vector<1x32xf32> to vector<32x32xf32>
    %73 = arith.addf %69, %72 : vector<32x32xf32>
    %74 = vector.extract_strided_slice %28 {offsets = [0, 0, 0], sizes = [1, 1, 32], strides = [1, 1, 1]} : vector<2x1x32xf32> to vector<1x1x32xf32>
    %75 = vector.shape_cast %74 : vector<1x1x32xf32> to vector<1x32xf32>
    %76 = vector.extract_strided_slice %29 {offsets = [0, 0, 0], sizes = [1, 1, 32], strides = [1, 1, 1]} : vector<2x1x32xf32> to vector<1x1x32xf32>
    %77 = vector.shape_cast %76 : vector<1x1x32xf32> to vector<1x32xf32>
    %cst = arith.constant dense<0.000000e+00> : vector<32xf32>
    %78 = vector.multi_reduction <add>, %73, %cst [1] : vector<32x32xf32> to vector<32xf32>
    %79 = vector.shape_cast %78 : vector<32xf32> to vector<32x1xf32>
    %cst_36 = arith.constant 3.200000e+01 : f32
    %80 = vector.broadcast %cst_36 : f32 to vector<32x1xf32>
    %81 = arith.divf %79, %80 : vector<32x1xf32>
    %82 = vector.broadcast %81 : vector<32x1xf32> to vector<32x32xf32>
    %83 = arith.subf %73, %82 : vector<32x32xf32>
    %84 = arith.mulf %83, %83 : vector<32x32xf32>
    %cst_37 = arith.constant dense<0.000000e+00> : vector<32xf32>
    %85 = vector.multi_reduction <add>, %84, %cst_37 [1] : vector<32x32xf32> to vector<32xf32>
    %86 = vector.shape_cast %85 : vector<32xf32> to vector<32x1xf32>
    %cst_38 = arith.constant 3.200000e+01 : f32
    %87 = vector.broadcast %cst_38 : f32 to vector<32x1xf32>
    %88 = arith.divf %86, %87 : vector<32x1xf32>
    %89 = vector.broadcast %81 : vector<32x1xf32> to vector<32x32xf32>
    %90 = arith.subf %73, %89 : vector<32x32xf32>
    %cst_39 = arith.constant 9.99999974E-6 : f32
    %91 = vector.broadcast %cst_39 : f32 to vector<32x1xf32>
    %92 = arith.addf %88, %91 : vector<32x1xf32>
    %93 = math.rsqrt %92 : vector<32x1xf32>
    %94 = vector.broadcast %93 : vector<32x1xf32> to vector<32x32xf32>
    %95 = arith.mulf %90, %94 : vector<32x32xf32>
    %96 = vector.broadcast %75 : vector<1x32xf32> to vector<32x32xf32>
    %97 = arith.mulf %95, %96 : vector<32x32xf32>
    %98 = vector.broadcast %77 : vector<1x32xf32> to vector<32x32xf32>
    %99 = arith.addf %97, %98 : vector<32x32xf32>
    %cst_40 = arith.constant 5.000000e-01 : f32
    %100 = vector.broadcast %cst_40 : f32 to vector<32x32xf32>
    %101 = arith.mulf %100, %99 : vector<32x32xf32>
    %cst_41 = arith.constant 4.471500e-02 : f32
    %102 = vector.broadcast %cst_41 : f32 to vector<32x32xf32>
    %103 = arith.mulf %102, %99 : vector<32x32xf32>
    %104 = arith.mulf %103, %99 : vector<32x32xf32>
    %105 = arith.mulf %104, %99 : vector<32x32xf32>
    %106 = arith.addf %99, %105 : vector<32x32xf32>
    %cst_42 = arith.constant 0.797884583 : f32
    %107 = vector.broadcast %cst_42 : f32 to vector<32x32xf32>
    %108 = arith.mulf %107, %106 : vector<32x32xf32>
    %109 = math.tanh %108 : vector<32x32xf32>
    %cst_43 = arith.constant 1.000000e+00 : f32
    %110 = vector.broadcast %cst_43 : f32 to vector<32x32xf32>
    %111 = arith.addf %110, %109 : vector<32x32xf32>
    %112 = arith.mulf %101, %111 : vector<32x32xf32>
    %113 = vector.extract_strided_slice %30 {offsets = [0, 0, 0], sizes = [1, 32, 32], strides = [1, 1, 1]} : vector<2x32x32xf32> to vector<1x32x32xf32>
    %114 = vector.shape_cast %113 : vector<1x32x32xf32> to vector<32x32xf32>
    %115 = arith.truncf %112 : vector<32x32xf32> to vector<32x32xbf16>
    %116 = arith.truncf %114 : vector<32x32xf32> to vector<32x32xbf16>
    %cst_44 = arith.constant dense<0.000000e+00> : vector<32x32xf32>
    %117 = tpu.matmul %115, %116, %cst_44 {dimension_numbers = #tpu.dot_dimension_numbers<[1], [0], [0], [1], [0, 0, 1, 1], [], []>} : vector<32x32xbf16>, vector<32x32xbf16>, vector<32x32xf32> -> vector<32x32xf32>
    %118 = vector.extract_strided_slice %31 {offsets = [0, 0, 0], sizes = [1, 1, 32], strides = [1, 1, 1]} : vector<2x1x32xf32> to vector<1x1x32xf32>
    %119 = vector.shape_cast %118 : vector<1x1x32xf32> to vector<1x32xf32>
    %120 = vector.broadcast %119 : vector<1x32xf32> to vector<32x32xf32>
    %121 = arith.addf %117, %120 : vector<32x32xf32>
    %122 = vector.extract_strided_slice %32 {offsets = [0, 0, 0], sizes = [1, 1, 32], strides = [1, 1, 1]} : vector<2x1x32xf32> to vector<1x1x32xf32>
    %123 = vector.shape_cast %122 : vector<1x1x32xf32> to vector<1x32xf32>
    %124 = vector.extract_strided_slice %33 {offsets = [0, 0, 0], sizes = [1, 1, 32], strides = [1, 1, 1]} : vector<2x1x32xf32> to vector<1x1x32xf32>
    %125 = vector.shape_cast %124 : vector<1x1x32xf32> to vector<1x32xf32>
    %cst_45 = arith.constant dense<0.000000e+00> : vector<32xf32>
    %126 = vector.multi_reduction <add>, %121, %cst_45 [1] : vector<32x32xf32> to vector<32xf32>
    %127 = vector.shape_cast %126 : vector<32xf32> to vector<32x1xf32>
    %cst_46 = arith.constant 3.200000e+01 : f32
    %128 = vector.broadcast %cst_46 : f32 to vector<32x1xf32>
    %129 = arith.divf %127, %128 : vector<32x1xf32>
    %130 = vector.broadcast %129 : vector<32x1xf32> to vector<32x32xf32>
    %131 = arith.subf %121, %130 : vector<32x32xf32>
    %132 = arith.mulf %131, %131 : vector<32x32xf32>
    %cst_47 = arith.constant dense<0.000000e+00> : vector<32xf32>
    %133 = vector.multi_reduction <add>, %132, %cst_47 [1] : vector<32x32xf32> to vector<32xf32>
    %134 = vector.shape_cast %133 : vector<32xf32> to vector<32x1xf32>
    %cst_48 = arith.constant 3.200000e+01 : f32
    %135 = vector.broadcast %cst_48 : f32 to vector<32x1xf32>
    %136 = arith.divf %134, %135 : vector<32x1xf32>
    %137 = vector.broadcast %129 : vector<32x1xf32> to vector<32x32xf32>
    %138 = arith.subf %121, %137 : vector<32x32xf32>
    %cst_49 = arith.constant 9.99999974E-6 : f32
    %139 = vector.broadcast %cst_49 : f32 to vector<32x1xf32>
    %140 = arith.addf %136, %139 : vector<32x1xf32>
    %141 = math.rsqrt %140 : vector<32x1xf32>
    %142 = vector.broadcast %141 : vector<32x1xf32> to vector<32x32xf32>
    %143 = arith.mulf %138, %142 : vector<32x32xf32>
    %144 = vector.broadcast %123 : vector<1x32xf32> to vector<32x32xf32>
    %145 = arith.mulf %143, %144 : vector<32x32xf32>
    %146 = vector.broadcast %125 : vector<1x32xf32> to vector<32x32xf32>
    %147 = arith.addf %145, %146 : vector<32x32xf32>
    %cst_50 = arith.constant 5.000000e-01 : f32
    %148 = vector.broadcast %cst_50 : f32 to vector<32x32xf32>
    %149 = arith.mulf %148, %147 : vector<32x32xf32>
    %cst_51 = arith.constant 4.471500e-02 : f32
    %150 = vector.broadcast %cst_51 : f32 to vector<32x32xf32>
    %151 = arith.mulf %150, %147 : vector<32x32xf32>
    %152 = arith.mulf %151, %147 : vector<32x32xf32>
    %153 = arith.mulf %152, %147 : vector<32x32xf32>
    %154 = arith.addf %147, %153 : vector<32x32xf32>
    %cst_52 = arith.constant 0.797884583 : f32
    %155 = vector.broadcast %cst_52 : f32 to vector<32x32xf32>
    %156 = arith.mulf %155, %154 : vector<32x32xf32>
    %157 = math.tanh %156 : vector<32x32xf32>
    %cst_53 = arith.constant 1.000000e+00 : f32
    %158 = vector.broadcast %cst_53 : f32 to vector<32x32xf32>
    %159 = arith.addf %158, %157 : vector<32x32xf32>
    %160 = arith.mulf %149, %159 : vector<32x32xf32>
    %161 = arith.addf %25, %160 : vector<32x32xf32>
    %162 = vector.broadcast %1 : vector<32x1xf32> to vector<32x32xf32>
    %163 = arith.mulf %161, %162 : vector<32x32xf32>
    %c3_i32 = arith.constant 3 : i32
    %164 = tpu.dynamic_rotate %163 by %c3_i32 dim 0 : vector<32x32xf32>, i32 -> vector<32x32xf32>
    %c3_i32_54 = arith.constant 3 : i32
    %165 = vector.broadcast %c3_i32_54 : i32 to vector<32x1xi32>
    %166 = arith.cmpi sge, %18, %165 : vector<32x1xi32>
    %c19_i32 = arith.constant 19 : i32
    %167 = vector.broadcast %c19_i32 : i32 to vector<32x1xi32>
    %168 = arith.cmpi slt, %18, %167 : vector<32x1xi32>
    %169 = arith.andi %166, %168 : vector<32x1xi1>
    %170 = arith.extui %169 : vector<32x1xi1> to vector<32x1xi32>
    %171 = arith.sitofp %170 : vector<32x1xi32> to vector<32x1xf32>
    %172 = vector.broadcast %171 : vector<32x1xf32> to vector<32x32xf32>
    %173 = arith.mulf %164, %172 : vector<32x32xf32>
    %174 = vector.extract_strided_slice %26 {offsets = [1, 0, 0], sizes = [1, 1, 32], strides = [1, 1, 1]} : vector<2x3x32xf32> to vector<1x1x32xf32>
    %175 = vector.shape_cast %174 : vector<1x1x32xf32> to vector<1x32xf32>
    %176 = vector.broadcast %175 : vector<1x32xf32> to vector<32x32xf32>
    %177 = arith.mulf %173, %176 : vector<32x32xf32>
    %178 = vector.extract_strided_slice %26 {offsets = [1, 1, 0], sizes = [1, 1, 32], strides = [1, 1, 1]} : vector<2x3x32xf32> to vector<1x1x32xf32>
    %179 = vector.shape_cast %178 : vector<1x1x32xf32> to vector<1x32xf32>
    %180 = vector.broadcast %179 : vector<1x32xf32> to vector<32x32xf32>
    %181 = arith.mulf %163, %180 : vector<32x32xf32>
    %182 = arith.addf %177, %181 : vector<32x32xf32>
    %c29_i32 = arith.constant 29 : i32
    %183 = tpu.dynamic_rotate %163 by %c29_i32 dim 0 : vector<32x32xf32>, i32 -> vector<32x32xf32>
    %c-3_i32 = arith.constant -3 : i32
    %184 = vector.broadcast %c-3_i32 : i32 to vector<32x1xi32>
    %185 = arith.cmpi sge, %18, %184 : vector<32x1xi32>
    %c13_i32 = arith.constant 13 : i32
    %186 = vector.broadcast %c13_i32 : i32 to vector<32x1xi32>
    %187 = arith.cmpi slt, %18, %186 : vector<32x1xi32>
    %188 = arith.andi %185, %187 : vector<32x1xi1>
    %189 = arith.extui %188 : vector<32x1xi1> to vector<32x1xi32>
    %190 = arith.sitofp %189 : vector<32x1xi32> to vector<32x1xf32>
    %191 = vector.broadcast %190 : vector<32x1xf32> to vector<32x32xf32>
    %192 = arith.mulf %183, %191 : vector<32x32xf32>
    %193 = vector.extract_strided_slice %26 {offsets = [1, 2, 0], sizes = [1, 1, 32], strides = [1, 1, 1]} : vector<2x3x32xf32> to vector<1x1x32xf32>
    %194 = vector.shape_cast %193 : vector<1x1x32xf32> to vector<1x32xf32>
    %195 = vector.broadcast %194 : vector<1x32xf32> to vector<32x32xf32>
    %196 = arith.mulf %192, %195 : vector<32x32xf32>
    %197 = arith.addf %182, %196 : vector<32x32xf32>
    %198 = vector.extract_strided_slice %27 {offsets = [1, 0, 0], sizes = [1, 1, 32], strides = [1, 1, 1]} : vector<2x1x32xf32> to vector<1x1x32xf32>
    %199 = vector.shape_cast %198 : vector<1x1x32xf32> to vector<1x32xf32>
    %200 = vector.broadcast %199 : vector<1x32xf32> to vector<32x32xf32>
    %201 = arith.addf %197, %200 : vector<32x32xf32>
    %202 = vector.extract_strided_slice %28 {offsets = [1, 0, 0], sizes = [1, 1, 32], strides = [1, 1, 1]} : vector<2x1x32xf32> to vector<1x1x32xf32>
    %203 = vector.shape_cast %202 : vector<1x1x32xf32> to vector<1x32xf32>
    %204 = vector.extract_strided_slice %29 {offsets = [1, 0, 0], sizes = [1, 1, 32], strides = [1, 1, 1]} : vector<2x1x32xf32> to vector<1x1x32xf32>
    %205 = vector.shape_cast %204 : vector<1x1x32xf32> to vector<1x32xf32>
    %cst_55 = arith.constant dense<0.000000e+00> : vector<32xf32>
    %206 = vector.multi_reduction <add>, %201, %cst_55 [1] : vector<32x32xf32> to vector<32xf32>
    %207 = vector.shape_cast %206 : vector<32xf32> to vector<32x1xf32>
    %cst_56 = arith.constant 3.200000e+01 : f32
    %208 = vector.broadcast %cst_56 : f32 to vector<32x1xf32>
    %209 = arith.divf %207, %208 : vector<32x1xf32>
    %210 = vector.broadcast %209 : vector<32x1xf32> to vector<32x32xf32>
    %211 = arith.subf %201, %210 : vector<32x32xf32>
    %212 = arith.mulf %211, %211 : vector<32x32xf32>
    %cst_57 = arith.constant dense<0.000000e+00> : vector<32xf32>
    %213 = vector.multi_reduction <add>, %212, %cst_57 [1] : vector<32x32xf32> to vector<32xf32>
    %214 = vector.shape_cast %213 : vector<32xf32> to vector<32x1xf32>
    %cst_58 = arith.constant 3.200000e+01 : f32
    %215 = vector.broadcast %cst_58 : f32 to vector<32x1xf32>
    %216 = arith.divf %214, %215 : vector<32x1xf32>
    %217 = vector.broadcast %209 : vector<32x1xf32> to vector<32x32xf32>
    %218 = arith.subf %201, %217 : vector<32x32xf32>
    %cst_59 = arith.constant 9.99999974E-6 : f32
    %219 = vector.broadcast %cst_59 : f32 to vector<32x1xf32>
    %220 = arith.addf %216, %219 : vector<32x1xf32>
    %221 = math.rsqrt %220 : vector<32x1xf32>
    %222 = vector.broadcast %221 : vector<32x1xf32> to vector<32x32xf32>
    %223 = arith.mulf %218, %222 : vector<32x32xf32>
    %224 = vector.broadcast %203 : vector<1x32xf32> to vector<32x32xf32>
    %225 = arith.mulf %223, %224 : vector<32x32xf32>
    %226 = vector.broadcast %205 : vector<1x32xf32> to vector<32x32xf32>
    %227 = arith.addf %225, %226 : vector<32x32xf32>
    %cst_60 = arith.constant 5.000000e-01 : f32
    %228 = vector.broadcast %cst_60 : f32 to vector<32x32xf32>
    %229 = arith.mulf %228, %227 : vector<32x32xf32>
    %cst_61 = arith.constant 4.471500e-02 : f32
    %230 = vector.broadcast %cst_61 : f32 to vector<32x32xf32>
    %231 = arith.mulf %230, %227 : vector<32x32xf32>
    %232 = arith.mulf %231, %227 : vector<32x32xf32>
    %233 = arith.mulf %232, %227 : vector<32x32xf32>
    %234 = arith.addf %227, %233 : vector<32x32xf32>
    %cst_62 = arith.constant 0.797884583 : f32
    %235 = vector.broadcast %cst_62 : f32 to vector<32x32xf32>
    %236 = arith.mulf %235, %234 : vector<32x32xf32>
    %237 = math.tanh %236 : vector<32x32xf32>
    %cst_63 = arith.constant 1.000000e+00 : f32
    %238 = vector.broadcast %cst_63 : f32 to vector<32x32xf32>
    %239 = arith.addf %238, %237 : vector<32x32xf32>
    %240 = arith.mulf %229, %239 : vector<32x32xf32>
    %241 = vector.extract_strided_slice %30 {offsets = [1, 0, 0], sizes = [1, 32, 32], strides = [1, 1, 1]} : vector<2x32x32xf32> to vector<1x32x32xf32>
    %242 = vector.shape_cast %241 : vector<1x32x32xf32> to vector<32x32xf32>
    %243 = arith.truncf %240 : vector<32x32xf32> to vector<32x32xbf16>
    %244 = arith.truncf %242 : vector<32x32xf32> to vector<32x32xbf16>
    %cst_64 = arith.constant dense<0.000000e+00> : vector<32x32xf32>
    %245 = tpu.matmul %243, %244, %cst_64 {dimension_numbers = #tpu.dot_dimension_numbers<[1], [0], [0], [1], [0, 0, 1, 1], [], []>} : vector<32x32xbf16>, vector<32x32xbf16>, vector<32x32xf32> -> vector<32x32xf32>
    %246 = vector.extract_strided_slice %31 {offsets = [1, 0, 0], sizes = [1, 1, 32], strides = [1, 1, 1]} : vector<2x1x32xf32> to vector<1x1x32xf32>
    %247 = vector.shape_cast %246 : vector<1x1x32xf32> to vector<1x32xf32>
    %248 = vector.broadcast %247 : vector<1x32xf32> to vector<32x32xf32>
    %249 = arith.addf %245, %248 : vector<32x32xf32>
    %250 = vector.extract_strided_slice %32 {offsets = [1, 0, 0], sizes = [1, 1, 32], strides = [1, 1, 1]} : vector<2x1x32xf32> to vector<1x1x32xf32>
    %251 = vector.shape_cast %250 : vector<1x1x32xf32> to vector<1x32xf32>
    %252 = vector.extract_strided_slice %33 {offsets = [1, 0, 0], sizes = [1, 1, 32], strides = [1, 1, 1]} : vector<2x1x32xf32> to vector<1x1x32xf32>
    %253 = vector.shape_cast %252 : vector<1x1x32xf32> to vector<1x32xf32>
    %cst_65 = arith.constant dense<0.000000e+00> : vector<32xf32>
    %254 = vector.multi_reduction <add>, %249, %cst_65 [1] : vector<32x32xf32> to vector<32xf32>
    %255 = vector.shape_cast %254 : vector<32xf32> to vector<32x1xf32>
    %cst_66 = arith.constant 3.200000e+01 : f32
    %256 = vector.broadcast %cst_66 : f32 to vector<32x1xf32>
    %257 = arith.divf %255, %256 : vector<32x1xf32>
    %258 = vector.broadcast %257 : vector<32x1xf32> to vector<32x32xf32>
    %259 = arith.subf %249, %258 : vector<32x32xf32>
    %260 = arith.mulf %259, %259 : vector<32x32xf32>
    %cst_67 = arith.constant dense<0.000000e+00> : vector<32xf32>
    %261 = vector.multi_reduction <add>, %260, %cst_67 [1] : vector<32x32xf32> to vector<32xf32>
    %262 = vector.shape_cast %261 : vector<32xf32> to vector<32x1xf32>
    %cst_68 = arith.constant 3.200000e+01 : f32
    %263 = vector.broadcast %cst_68 : f32 to vector<32x1xf32>
    %264 = arith.divf %262, %263 : vector<32x1xf32>
    %265 = vector.broadcast %257 : vector<32x1xf32> to vector<32x32xf32>
    %266 = arith.subf %249, %265 : vector<32x32xf32>
    %cst_69 = arith.constant 9.99999974E-6 : f32
    %267 = vector.broadcast %cst_69 : f32 to vector<32x1xf32>
    %268 = arith.addf %264, %267 : vector<32x1xf32>
    %269 = math.rsqrt %268 : vector<32x1xf32>
    %270 = vector.broadcast %269 : vector<32x1xf32> to vector<32x32xf32>
    %271 = arith.mulf %266, %270 : vector<32x32xf32>
    %272 = vector.broadcast %251 : vector<1x32xf32> to vector<32x32xf32>
    %273 = arith.mulf %271, %272 : vector<32x32xf32>
    %274 = vector.broadcast %253 : vector<1x32xf32> to vector<32x32xf32>
    %275 = arith.addf %273, %274 : vector<32x32xf32>
    %cst_70 = arith.constant 5.000000e-01 : f32
    %276 = vector.broadcast %cst_70 : f32 to vector<32x32xf32>
    %277 = arith.mulf %276, %275 : vector<32x32xf32>
    %cst_71 = arith.constant 4.471500e-02 : f32
    %278 = vector.broadcast %cst_71 : f32 to vector<32x32xf32>
    %279 = arith.mulf %278, %275 : vector<32x32xf32>
    %280 = arith.mulf %279, %275 : vector<32x32xf32>
    %281 = arith.mulf %280, %275 : vector<32x32xf32>
    %282 = arith.addf %275, %281 : vector<32x32xf32>
    %cst_72 = arith.constant 0.797884583 : f32
    %283 = vector.broadcast %cst_72 : f32 to vector<32x32xf32>
    %284 = arith.mulf %283, %282 : vector<32x32xf32>
    %285 = math.tanh %284 : vector<32x32xf32>
    %cst_73 = arith.constant 1.000000e+00 : f32
    %286 = vector.broadcast %cst_73 : f32 to vector<32x32xf32>
    %287 = arith.addf %286, %285 : vector<32x32xf32>
    %288 = arith.mulf %277, %287 : vector<32x32xf32>
    %289 = arith.addf %161, %288 : vector<32x32xf32>
    %290 = vector.broadcast %1 : vector<32x1xf32> to vector<32x32xf32>
    %291 = arith.mulf %289, %290 : vector<32x32xf32>
    %c0_74 = arith.constant 0 : index
    %c0_75 = arith.constant 0 : index
    %292 = vector.load %arg13[%c0_74, %c0_75] : memref<32x32xf32, #tpu.memory_space<vmem>>, vector<32x32xf32>
    %293 = arith.truncf %291 : vector<32x32xf32> to vector<32x32xbf16>
    %294 = arith.truncf %292 : vector<32x32xf32> to vector<32x32xbf16>
    %cst_76 = arith.constant dense<0.000000e+00> : vector<32x32xf32>
    %295 = tpu.matmul %293, %294, %cst_76 {dimension_numbers = #tpu.dot_dimension_numbers<[1], [0], [0], [1], [0, 0, 1, 1], [], []>} : vector<32x32xbf16>, vector<32x32xbf16>, vector<32x32xf32> -> vector<32x32xf32>
    %c0_77 = arith.constant 0 : index
    %c0_78 = arith.constant 0 : index
    %296 = vector.load %arg14[%c0_77, %c0_78] : memref<1x32xf32, #tpu.memory_space<vmem>>, vector<1x32xf32>
    %297 = vector.broadcast %296 : vector<1x32xf32> to vector<32x32xf32>
    %298 = arith.addf %295, %297 : vector<32x32xf32>
    %299 = vector.broadcast %1 : vector<32x1xf32> to vector<32x32xf32>
    %300 = arith.mulf %298, %299 : vector<32x32xf32>
    %c0_79 = arith.constant 0 : index
    %c0_80 = arith.constant 0 : index
    %301 = vector.load %arg15[%c0_79, %c0_80] : memref<32x32xf32, #tpu.memory_space<vmem>>, vector<32x32xf32>
    tpu.vector_store %arg15[%c0_79, %c0_80], %300 {strides = array<i32>} : memref<32x32xf32, #tpu.memory_space<vmem>>, vector<32x32xf32>,
    return
  }
  func.func @transform_0(%arg0: i32) -> (i32, i32) {
    %c0_i32 = arith.constant 0 : i32
    %c0_i32_0 = arith.constant 0 : i32
    return %arg0, %c0_i32 : i32, i32
  }
  func.func @transform_1(%arg0: i32) -> (i32, i32) {
    %c0_i32 = arith.constant 0 : i32
    %c0_i32_0 = arith.constant 0 : i32
    return %arg0, %c0_i32 : i32, i32
  }
  func.func @transform_2(%arg0: i32) -> (i32, i32) {
    %c0_i32 = arith.constant 0 : i32
    %c0_i32_0 = arith.constant 0 : i32
    %c0_i32_1 = arith.constant 0 : i32
    return %c0_i32, %c0_i32_0 : i32, i32
  }
  func.func @transform_3(%arg0: i32) -> (i32, i32) {
    %c0_i32 = arith.constant 0 : i32
    %c0_i32_0 = arith.constant 0 : i32
    %c0_i32_1 = arith.constant 0 : i32
    return %c0_i32, %c0_i32_0 : i32, i32
  }
  func.func @transform_4(%arg0: i32) -> (i32, i32, i32) {
    %c0_i32 = arith.constant 0 : i32
    %c0_i32_0 = arith.constant 0 : i32
    %c0_i32_1 = arith.constant 0 : i32
    %c0_i32_2 = arith.constant 0 : i32
    return %c0_i32, %c0_i32_0, %c0_i32_1 : i32, i32, i32
  }
  func.func @transform_5(%arg0: i32) -> (i32, i32, i32) {
    %c0_i32 = arith.constant 0 : i32
    %c0_i32_0 = arith.constant 0 : i32
    %c0_i32_1 = arith.constant 0 : i32
    %c0_i32_2 = arith.constant 0 : i32
    return %c0_i32, %c0_i32_0, %c0_i32_1 : i32, i32, i32
  }
  func.func @transform_6(%arg0: i32) -> (i32, i32, i32) {
    %c0_i32 = arith.constant 0 : i32
    %c0_i32_0 = arith.constant 0 : i32
    %c0_i32_1 = arith.constant 0 : i32
    %c0_i32_2 = arith.constant 0 : i32
    return %c0_i32, %c0_i32_0, %c0_i32_1 : i32, i32, i32
  }
  func.func @transform_7(%arg0: i32) -> (i32, i32, i32) {
    %c0_i32 = arith.constant 0 : i32
    %c0_i32_0 = arith.constant 0 : i32
    %c0_i32_1 = arith.constant 0 : i32
    %c0_i32_2 = arith.constant 0 : i32
    return %c0_i32, %c0_i32_0, %c0_i32_1 : i32, i32, i32
  }
  func.func @transform_8(%arg0: i32) -> (i32, i32, i32) {
    %c0_i32 = arith.constant 0 : i32
    %c0_i32_0 = arith.constant 0 : i32
    %c0_i32_1 = arith.constant 0 : i32
    %c0_i32_2 = arith.constant 0 : i32
    return %c0_i32, %c0_i32_0, %c0_i32_1 : i32, i32, i32
  }
  func.func @transform_9(%arg0: i32) -> (i32, i32, i32) {
    %c0_i32 = arith.constant 0 : i32
    %c0_i32_0 = arith.constant 0 : i32
    %c0_i32_1 = arith.constant 0 : i32
    %c0_i32_2 = arith.constant 0 : i32
    return %c0_i32, %c0_i32_0, %c0_i32_1 : i32, i32, i32
  }
  func.func @transform_10(%arg0: i32) -> (i32, i32, i32) {
    %c0_i32 = arith.constant 0 : i32
    %c0_i32_0 = arith.constant 0 : i32
    %c0_i32_1 = arith.constant 0 : i32
    %c0_i32_2 = arith.constant 0 : i32
    return %c0_i32, %c0_i32_0, %c0_i32_1 : i32, i32, i32
  }
  func.func @transform_11(%arg0: i32) -> (i32, i32, i32) {
    %c0_i32 = arith.constant 0 : i32
    %c0_i32_0 = arith.constant 0 : i32
    %c0_i32_1 = arith.constant 0 : i32
    %c0_i32_2 = arith.constant 0 : i32
    return %c0_i32, %c0_i32_0, %c0_i32_1 : i32, i32, i32
  }
  func.func @transform_12(%arg0: i32) -> (i32, i32) {
    %c0_i32 = arith.constant 0 : i32
    %c0_i32_0 = arith.constant 0 : i32
    %c0_i32_1 = arith.constant 0 : i32
    return %c0_i32, %c0_i32_0 : i32, i32
  }
  func.func @transform_13(%arg0: i32) -> (i32, i32) {
    %c0_i32 = arith.constant 0 : i32
    %c0_i32_0 = arith.constant 0 : i32
    %c0_i32_1 = arith.constant 0 : i32
    return %c0_i32, %c0_i32_0 : i32, i32
  }
  func.func @transform_14(%arg0: i32) -> (i32, i32) {
    %c0_i32 = arith.constant 0 : i32
    %c0_i32_0 = arith.constant 0 : i32
    return %arg0, %c0_i32 : i32, i32
  }
}

module attributes {stable_mosaic.version = 11 : i64} {
  func.func @_flow_chain_kernel(%arg0: i32, %arg1: memref<32x2xf32, #tpu.memory_space<vmem>>, %arg2: memref<32x1xf32, #tpu.memory_space<vmem>>, %arg3: memref<32x32xf32, #tpu.memory_space<vmem>>, %arg4: memref<1x2xf32, #tpu.memory_space<vmem>>, %arg5: memref<1x2xf32, #tpu.memory_space<vmem>>, %arg6: memref<2x1x32xf32, #tpu.memory_space<vmem>>, %arg7: memref<2x1x32xf32, #tpu.memory_space<vmem>>, %arg8: memref<2x2x3x32xf32, #tpu.memory_space<vmem>>, %arg9: memref<2x2x1x32xf32, #tpu.memory_space<vmem>>, %arg10: memref<2x2x1x32xf32, #tpu.memory_space<vmem>>, %arg11: memref<2x2x1x32xf32, #tpu.memory_space<vmem>>, %arg12: memref<2x2x32x32xf32, #tpu.memory_space<vmem>>, %arg13: memref<2x2x1x32xf32, #tpu.memory_space<vmem>>, %arg14: memref<2x2x1x32xf32, #tpu.memory_space<vmem>>, %arg15: memref<2x2x1x32xf32, #tpu.memory_space<vmem>>, %arg16: memref<2x32x29xf32, #tpu.memory_space<vmem>>, %arg17: memref<2x1x29xf32, #tpu.memory_space<vmem>>, %arg18: memref<32x2xf32, #tpu.memory_space<vmem>>, %arg19: memref<32x1xf32, #tpu.memory_space<vmem>>) attributes {dimension_semantics = [#tpu.dimension_semantics<parallel>], iteration_bounds = array<i64: 1>, scalar_prefetch = 0 : i64, scratch_operands = 0 : i64, tpu.core_type = #tpu.core_type<tc>, window_params = [{transform_indices = @transform_0, window_bounds = array<i64: 32, 2>}, {transform_indices = @transform_1, window_bounds = array<i64: 32, 1>}, {transform_indices = @transform_2, window_bounds = array<i64: 32, 32>}, {pipeline_mode = #tpu.pipeline_mode<synchronous>, transform_indices = @transform_3, window_bounds = array<i64: 1, 2>}, {pipeline_mode = #tpu.pipeline_mode<synchronous>, transform_indices = @transform_4, window_bounds = array<i64: 1, 2>}, {pipeline_mode = #tpu.pipeline_mode<synchronous>, transform_indices = @transform_5, window_bounds = array<i64: 2, 1, 32>}, {pipeline_mode = #tpu.pipeline_mode<synchronous>, transform_indices = @transform_6, window_bounds = array<i64: 2, 1, 32>}, {pipeline_mode = #tpu.pipeline_mode<synchronous>, transform_indices = @transform_7, window_bounds = array<i64: 2, 2, 3, 32>}, {pipeline_mode = #tpu.pipeline_mode<synchronous>, transform_indices = @transform_8, window_bounds = array<i64: 2, 2, 1, 32>}, {pipeline_mode = #tpu.pipeline_mode<synchronous>, transform_indices = @transform_9, window_bounds = array<i64: 2, 2, 1, 32>}, {pipeline_mode = #tpu.pipeline_mode<synchronous>, transform_indices = @transform_10, window_bounds = array<i64: 2, 2, 1, 32>}, {pipeline_mode = #tpu.pipeline_mode<synchronous>, transform_indices = @transform_11, window_bounds = array<i64: 2, 2, 32, 32>}, {pipeline_mode = #tpu.pipeline_mode<synchronous>, transform_indices = @transform_12, window_bounds = array<i64: 2, 2, 1, 32>}, {pipeline_mode = #tpu.pipeline_mode<synchronous>, transform_indices = @transform_13, window_bounds = array<i64: 2, 2, 1, 32>}, {pipeline_mode = #tpu.pipeline_mode<synchronous>, transform_indices = @transform_14, window_bounds = array<i64: 2, 2, 1, 32>}, {pipeline_mode = #tpu.pipeline_mode<synchronous>, transform_indices = @transform_15, window_bounds = array<i64: 2, 32, 29>}, {pipeline_mode = #tpu.pipeline_mode<synchronous>, transform_indices = @transform_16, window_bounds = array<i64: 2, 1, 29>}, {transform_indices = @transform_17, window_bounds = array<i64: 32, 2>}, {transform_indices = @transform_18, window_bounds = array<i64: 32, 1>}]} {
    %c0 = arith.constant 0 : index
    %c0_0 = arith.constant 0 : index
    %0 = vector.load %arg1[%c0, %c0_0] : memref<32x2xf32, #tpu.memory_space<vmem>>, vector<32x2xf32>
    %c0_1 = arith.constant 0 : index
    %c0_2 = arith.constant 0 : index
    %1 = vector.load %arg2[%c0_1, %c0_2] : memref<32x1xf32, #tpu.memory_space<vmem>>, vector<32x1xf32>
    %c0_3 = arith.constant 0 : index
    %c0_4 = arith.constant 0 : index
    %2 = vector.load %arg3[%c0_3, %c0_4] : memref<32x32xf32, #tpu.memory_space<vmem>>, vector<32x32xf32>
    %3 = tpu.iota {dimensions = array<i32: 0>} : vector<32x1xi32>
    %c16_i32 = arith.constant 16 : i32
    %c0_i32 = arith.constant 0 : i32
    %4 = arith.cmpi eq, %c16_i32, %c0_i32 : i32
    %c1_i32 = arith.constant 1 : i32
    %5 = arith.select %4, %c1_i32, %c16_i32 : i32
    %6 = vector.broadcast %5 : i32 to vector<32x1xi32>
    %7 = arith.remsi %3, %6 : vector<32x1xi32>
    %c0_i32_5 = arith.constant 0 : i32
    %8 = vector.broadcast %c0_i32_5 : i32 to vector<32x1xi32>
    %9 = arith.cmpi ne, %7, %8 : vector<32x1xi32>
    %c0_i32_6 = arith.constant 0 : i32
    %10 = vector.broadcast %c0_i32_6 : i32 to vector<32x1xi32>
    %11 = arith.cmpi slt, %7, %10 : vector<32x1xi32>
    %c0_i32_7 = arith.constant 0 : i32
    %12 = arith.cmpi slt, %5, %c0_i32_7 : i32
    %13 = vector.broadcast %12 : i1 to vector<32x1xi1>
    %14 = vector.broadcast %13 : vector<32x1xi1> to vector<32x1xi1>
    %15 = arith.xori %11, %14 : vector<32x1xi1>
    %16 = arith.andi %15, %9 : vector<32x1xi1>
    %17 = vector.broadcast %5 : i32 to vector<32x1xi32>
    %18 = arith.addi %7, %17 : vector<32x1xi32>
    %19 = arith.select %16, %18, %7 : vector<32x1xi1>, vector<32x1xi32>
    %c0_8 = arith.constant 0 : index
    %c0_9 = arith.constant 0 : index
    %20 = vector.load %arg4[%c0_8, %c0_9] : memref<1x2xf32, #tpu.memory_space<vmem>>, vector<1x2xf32>
    %c0_10 = arith.constant 0 : index
    %c0_11 = arith.constant 0 : index
    %21 = vector.load %arg5[%c0_10, %c0_11] : memref<1x2xf32, #tpu.memory_space<vmem>>, vector<1x2xf32>
    %c0_12 = arith.constant 0 : index
    %c0_13 = arith.constant 0 : index
    %c0_14 = arith.constant 0 : index
    %22 = vector.load %arg6[%c0_12, %c0_13, %c0_14] : memref<2x1x32xf32, #tpu.memory_space<vmem>>, vector<2x1x32xf32>
    %c0_15 = arith.constant 0 : index
    %c0_16 = arith.constant 0 : index
    %c0_17 = arith.constant 0 : index
    %23 = vector.load %arg7[%c0_15, %c0_16, %c0_17] : memref<2x1x32xf32, #tpu.memory_space<vmem>>, vector<2x1x32xf32>
    %c0_18 = arith.constant 0 : index
    %c0_19 = arith.constant 0 : index
    %c0_20 = arith.constant 0 : index
    %c0_21 = arith.constant 0 : index
    %24 = vector.load %arg8[%c0_18, %c0_19, %c0_20, %c0_21] : memref<2x2x3x32xf32, #tpu.memory_space<vmem>>, vector<2x2x3x32xf32>
    %c0_22 = arith.constant 0 : index
    %c0_23 = arith.constant 0 : index
    %c0_24 = arith.constant 0 : index
    %c0_25 = arith.constant 0 : index
    %25 = vector.load %arg9[%c0_22, %c0_23, %c0_24, %c0_25] : memref<2x2x1x32xf32, #tpu.memory_space<vmem>>, vector<2x2x1x32xf32>
    %c0_26 = arith.constant 0 : index
    %c0_27 = arith.constant 0 : index
    %c0_28 = arith.constant 0 : index
    %c0_29 = arith.constant 0 : index
    %26 = vector.load %arg10[%c0_26, %c0_27, %c0_28, %c0_29] : memref<2x2x1x32xf32, #tpu.memory_space<vmem>>, vector<2x2x1x32xf32>
    %c0_30 = arith.constant 0 : index
    %c0_31 = arith.constant 0 : index
    %c0_32 = arith.constant 0 : index
    %c0_33 = arith.constant 0 : index
    %27 = vector.load %arg11[%c0_30, %c0_31, %c0_32, %c0_33] : memref<2x2x1x32xf32, #tpu.memory_space<vmem>>, vector<2x2x1x32xf32>
    %c0_34 = arith.constant 0 : index
    %c0_35 = arith.constant 0 : index
    %c0_36 = arith.constant 0 : index
    %c0_37 = arith.constant 0 : index
    %28 = vector.load %arg12[%c0_34, %c0_35, %c0_36, %c0_37] : memref<2x2x32x32xf32, #tpu.memory_space<vmem>>, vector<2x2x32x32xf32>
    %c0_38 = arith.constant 0 : index
    %c0_39 = arith.constant 0 : index
    %c0_40 = arith.constant 0 : index
    %c0_41 = arith.constant 0 : index
    %29 = vector.load %arg13[%c0_38, %c0_39, %c0_40, %c0_41] : memref<2x2x1x32xf32, #tpu.memory_space<vmem>>, vector<2x2x1x32xf32>
    %c0_42 = arith.constant 0 : index
    %c0_43 = arith.constant 0 : index
    %c0_44 = arith.constant 0 : index
    %c0_45 = arith.constant 0 : index
    %30 = vector.load %arg14[%c0_42, %c0_43, %c0_44, %c0_45] : memref<2x2x1x32xf32, #tpu.memory_space<vmem>>, vector<2x2x1x32xf32>
    %c0_46 = arith.constant 0 : index
    %c0_47 = arith.constant 0 : index
    %c0_48 = arith.constant 0 : index
    %c0_49 = arith.constant 0 : index
    %31 = vector.load %arg15[%c0_46, %c0_47, %c0_48, %c0_49] : memref<2x2x1x32xf32, #tpu.memory_space<vmem>>, vector<2x2x1x32xf32>
    %c0_50 = arith.constant 0 : index
    %c0_51 = arith.constant 0 : index
    %c0_52 = arith.constant 0 : index
    %32 = vector.load %arg16[%c0_50, %c0_51, %c0_52] : memref<2x32x29xf32, #tpu.memory_space<vmem>>, vector<2x32x29xf32>
    %c0_53 = arith.constant 0 : index
    %c0_54 = arith.constant 0 : index
    %c0_55 = arith.constant 0 : index
    %33 = vector.load %arg17[%c0_53, %c0_54, %c0_55] : memref<2x1x29xf32, #tpu.memory_space<vmem>>, vector<2x1x29xf32>
    %34 = tpu.iota {dimensions = array<i32: 0>} : vector<10x11xi32>
    %35 = tpu.iota {dimensions = array<i32: 1>} : vector<10x11xi32>
    %36 = arith.cmpi slt, %34, %35 : vector<10x11xi32>
    %37 = arith.extui %36 : vector<10x11xi1> to vector<10x11xi32>
    %38 = arith.sitofp %37 : vector<10x11xi32> to vector<10x11xf32>
    %39 = tpu.iota {dimensions = array<i32: 1>} : vector<64x11xi32>
    %40 = tpu.iota {dimensions = array<i32: 1>} : vector<32x11xi32>
    %41 = tpu.iota {dimensions = array<i32: 1>} : vector<32x10xi32>
    %42 = vector.extract_strided_slice %0 {offsets = [0, 0], sizes = [32, 1], strides = [1, 1]} : vector<32x2xf32> to vector<32x1xf32>
    %43 = vector.extract_strided_slice %0 {offsets = [0, 1], sizes = [32, 1], strides = [1, 1]} : vector<32x2xf32> to vector<32x1xf32>
    %44 = vector.extract_strided_slice %20 {offsets = [0, 0], sizes = [1, 1], strides = [1, 1]} : vector<1x2xf32> to vector<1x1xf32>
    %45 = vector.extract_strided_slice %21 {offsets = [0, 0], sizes = [1, 1], strides = [1, 1]} : vector<1x2xf32> to vector<1x1xf32>
    %46 = math.exp %45 : vector<1x1xf32>
    %47 = vector.broadcast %46 : vector<1x1xf32> to vector<32x1xf32>
    %48 = arith.mulf %47, %42 : vector<32x1xf32>
    %49 = vector.broadcast %44 : vector<1x1xf32> to vector<32x1xf32>
    %50 = arith.addf %49, %48 : vector<32x1xf32>
    %51 = arith.mulf %50, %1 : vector<32x1xf32>
    %52 = vector.extract_strided_slice %20 {offsets = [0, 1], sizes = [1, 1], strides = [1, 1]} : vector<1x2xf32> to vector<1x1xf32>
    %53 = vector.extract_strided_slice %21 {offsets = [0, 1], sizes = [1, 1], strides = [1, 1]} : vector<1x2xf32> to vector<1x1xf32>
    %54 = math.exp %53 : vector<1x1xf32>
    %55 = vector.broadcast %54 : vector<1x1xf32> to vector<32x1xf32>
    %56 = arith.mulf %55, %43 : vector<32x1xf32>
    %57 = vector.broadcast %52 : vector<1x1xf32> to vector<32x1xf32>
    %58 = arith.addf %57, %56 : vector<32x1xf32>
    %59 = arith.mulf %58, %1 : vector<32x1xf32>
    %60 = vector.extract_strided_slice %21 {offsets = [0, 0], sizes = [1, 1], strides = [1, 1]} : vector<1x2xf32> to vector<1x1xf32>
    %61 = vector.extract_strided_slice %21 {offsets = [0, 1], sizes = [1, 1], strides = [1, 1]} : vector<1x2xf32> to vector<1x1xf32>
    %62 = arith.addf %60, %61 : vector<1x1xf32>
    %63 = vector.broadcast %62 : vector<1x1xf32> to vector<32x1xf32>
    %64 = arith.mulf %63, %1 : vector<32x1xf32>
    %65 = vector.extract_strided_slice %22 {offsets = [0, 0, 0], sizes = [1, 1, 32], strides = [1, 1, 1]} : vector<2x1x32xf32> to vector<1x1x32xf32>
    %66 = vector.shape_cast %65 : vector<1x1x32xf32> to vector<1x32xf32>
    %67 = vector.broadcast %51 : vector<32x1xf32> to vector<32x32xf32>
    %68 = vector.broadcast %66 : vector<1x32xf32> to vector<32x32xf32>
    %69 = arith.mulf %67, %68 : vector<32x32xf32>
    %70 = vector.extract_strided_slice %23 {offsets = [0, 0, 0], sizes = [1, 1, 32], strides = [1, 1, 1]} : vector<2x1x32xf32> to vector<1x1x32xf32>
    %71 = vector.shape_cast %70 : vector<1x1x32xf32> to vector<1x32xf32>
    %72 = vector.broadcast %71 : vector<1x32xf32> to vector<32x32xf32>
    %73 = arith.addf %69, %72 : vector<32x32xf32>
    %74 = arith.addf %73, %2 : vector<32x32xf32>
    %75 = vector.extract_strided_slice %24 {offsets = [0, 0, 0, 0], sizes = [1, 2, 3, 32], strides = [1, 1, 1, 1]} : vector<2x2x3x32xf32> to vector<1x2x3x32xf32>
    %76 = vector.shape_cast %75 : vector<1x2x3x32xf32> to vector<2x3x32xf32>
    %77 = vector.extract_strided_slice %25 {offsets = [0, 0, 0, 0], sizes = [1, 2, 1, 32], strides = [1, 1, 1, 1]} : vector<2x2x1x32xf32> to vector<1x2x1x32xf32>
    %78 = vector.shape_cast %77 : vector<1x2x1x32xf32> to vector<2x1x32xf32>
    %79 = vector.extract_strided_slice %26 {offsets = [0, 0, 0, 0], sizes = [1, 2, 1, 32], strides = [1, 1, 1, 1]} : vector<2x2x1x32xf32> to vector<1x2x1x32xf32>
    %80 = vector.shape_cast %79 : vector<1x2x1x32xf32> to vector<2x1x32xf32>
    %81 = vector.extract_strided_slice %27 {offsets = [0, 0, 0, 0], sizes = [1, 2, 1, 32], strides = [1, 1, 1, 1]} : vector<2x2x1x32xf32> to vector<1x2x1x32xf32>
    %82 = vector.shape_cast %81 : vector<1x2x1x32xf32> to vector<2x1x32xf32>
    %83 = vector.extract_strided_slice %28 {offsets = [0, 0, 0, 0], sizes = [1, 2, 32, 32], strides = [1, 1, 1, 1]} : vector<2x2x32x32xf32> to vector<1x2x32x32xf32>
    %84 = vector.shape_cast %83 : vector<1x2x32x32xf32> to vector<2x32x32xf32>
    %85 = vector.extract_strided_slice %29 {offsets = [0, 0, 0, 0], sizes = [1, 2, 1, 32], strides = [1, 1, 1, 1]} : vector<2x2x1x32xf32> to vector<1x2x1x32xf32>
    %86 = vector.shape_cast %85 : vector<1x2x1x32xf32> to vector<2x1x32xf32>
    %87 = vector.extract_strided_slice %30 {offsets = [0, 0, 0, 0], sizes = [1, 2, 1, 32], strides = [1, 1, 1, 1]} : vector<2x2x1x32xf32> to vector<1x2x1x32xf32>
    %88 = vector.shape_cast %87 : vector<1x2x1x32xf32> to vector<2x1x32xf32>
    %89 = vector.extract_strided_slice %31 {offsets = [0, 0, 0, 0], sizes = [1, 2, 1, 32], strides = [1, 1, 1, 1]} : vector<2x2x1x32xf32> to vector<1x2x1x32xf32>
    %90 = vector.shape_cast %89 : vector<1x2x1x32xf32> to vector<2x1x32xf32>
    %91 = vector.broadcast %1 : vector<32x1xf32> to vector<32x32xf32>
    %92 = arith.mulf %74, %91 : vector<32x32xf32>
    %c1_i32_56 = arith.constant 1 : i32
    %93 = tpu.dynamic_rotate %92 by %c1_i32_56 dim 0 : vector<32x32xf32>, i32 -> vector<32x32xf32>
    %c1_i32_57 = arith.constant 1 : i32
    %94 = vector.broadcast %c1_i32_57 : i32 to vector<32x1xi32>
    %95 = arith.cmpi sge, %19, %94 : vector<32x1xi32>
    %c17_i32 = arith.constant 17 : i32
    %96 = vector.broadcast %c17_i32 : i32 to vector<32x1xi32>
    %97 = arith.cmpi slt, %19, %96 : vector<32x1xi32>
    %98 = arith.andi %95, %97 : vector<32x1xi1>
    %99 = arith.extui %98 : vector<32x1xi1> to vector<32x1xi32>
    %100 = arith.sitofp %99 : vector<32x1xi32> to vector<32x1xf32>
    %101 = vector.broadcast %100 : vector<32x1xf32> to vector<32x32xf32>
    %102 = arith.mulf %93, %101 : vector<32x32xf32>
    %103 = vector.extract_strided_slice %76 {offsets = [0, 0, 0], sizes = [1, 1, 32], strides = [1, 1, 1]} : vector<2x3x32xf32> to vector<1x1x32xf32>
    %104 = vector.shape_cast %103 : vector<1x1x32xf32> to vector<1x32xf32>
    %105 = vector.broadcast %104 : vector<1x32xf32> to vector<32x32xf32>
    %106 = arith.mulf %102, %105 : vector<32x32xf32>
    %107 = vector.extract_strided_slice %76 {offsets = [0, 1, 0], sizes = [1, 1, 32], strides = [1, 1, 1]} : vector<2x3x32xf32> to vector<1x1x32xf32>
    %108 = vector.shape_cast %107 : vector<1x1x32xf32> to vector<1x32xf32>
    %109 = vector.broadcast %108 : vector<1x32xf32> to vector<32x32xf32>
    %110 = arith.mulf %92, %109 : vector<32x32xf32>
    %111 = arith.addf %106, %110 : vector<32x32xf32>
    %c31_i32 = arith.constant 31 : i32
    %112 = tpu.dynamic_rotate %92 by %c31_i32 dim 0 : vector<32x32xf32>, i32 -> vector<32x32xf32>
    %c-1_i32 = arith.constant -1 : i32
    %113 = vector.broadcast %c-1_i32 : i32 to vector<32x1xi32>
    %114 = arith.cmpi sge, %19, %113 : vector<32x1xi32>
    %c15_i32 = arith.constant 15 : i32
    %115 = vector.broadcast %c15_i32 : i32 to vector<32x1xi32>
    %116 = arith.cmpi slt, %19, %115 : vector<32x1xi32>
    %117 = arith.andi %114, %116 : vector<32x1xi1>
    %118 = arith.extui %117 : vector<32x1xi1> to vector<32x1xi32>
    %119 = arith.sitofp %118 : vector<32x1xi32> to vector<32x1xf32>
    %120 = vector.broadcast %119 : vector<32x1xf32> to vector<32x32xf32>
    %121 = arith.mulf %112, %120 : vector<32x32xf32>
    %122 = vector.extract_strided_slice %76 {offsets = [0, 2, 0], sizes = [1, 1, 32], strides = [1, 1, 1]} : vector<2x3x32xf32> to vector<1x1x32xf32>
    %123 = vector.shape_cast %122 : vector<1x1x32xf32> to vector<1x32xf32>
    %124 = vector.broadcast %123 : vector<1x32xf32> to vector<32x32xf32>
    %125 = arith.mulf %121, %124 : vector<32x32xf32>
    %126 = arith.addf %111, %125 : vector<32x32xf32>
    %127 = vector.extract_strided_slice %78 {offsets = [0, 0, 0], sizes = [1, 1, 32], strides = [1, 1, 1]} : vector<2x1x32xf32> to vector<1x1x32xf32>
    %128 = vector.shape_cast %127 : vector<1x1x32xf32> to vector<1x32xf32>
    %129 = vector.broadcast %128 : vector<1x32xf32> to vector<32x32xf32>
    %130 = arith.addf %126, %129 : vector<32x32xf32>
    %131 = vector.extract_strided_slice %80 {offsets = [0, 0, 0], sizes = [1, 1, 32], strides = [1, 1, 1]} : vector<2x1x32xf32> to vector<1x1x32xf32>
    %132 = vector.shape_cast %131 : vector<1x1x32xf32> to vector<1x32xf32>
    %133 = vector.extract_strided_slice %82 {offsets = [0, 0, 0], sizes = [1, 1, 32], strides = [1, 1, 1]} : vector<2x1x32xf32> to vector<1x1x32xf32>
    %134 = vector.shape_cast %133 : vector<1x1x32xf32> to vector<1x32xf32>
    %cst = arith.constant dense<0.000000e+00> : vector<32xf32>
    %135 = vector.multi_reduction <add>, %130, %cst [1] : vector<32x32xf32> to vector<32xf32>
    %136 = vector.shape_cast %135 : vector<32xf32> to vector<32x1xf32>
    %cst_58 = arith.constant 3.200000e+01 : f32
    %137 = vector.broadcast %cst_58 : f32 to vector<32x1xf32>
    %138 = arith.divf %136, %137 : vector<32x1xf32>
    %139 = vector.broadcast %138 : vector<32x1xf32> to vector<32x32xf32>
    %140 = arith.subf %130, %139 : vector<32x32xf32>
    %141 = arith.mulf %140, %140 : vector<32x32xf32>
    %cst_59 = arith.constant dense<0.000000e+00> : vector<32xf32>
    %142 = vector.multi_reduction <add>, %141, %cst_59 [1] : vector<32x32xf32> to vector<32xf32>
    %143 = vector.shape_cast %142 : vector<32xf32> to vector<32x1xf32>
    %cst_60 = arith.constant 3.200000e+01 : f32
    %144 = vector.broadcast %cst_60 : f32 to vector<32x1xf32>
    %145 = arith.divf %143, %144 : vector<32x1xf32>
    %146 = vector.broadcast %138 : vector<32x1xf32> to vector<32x32xf32>
    %147 = arith.subf %130, %146 : vector<32x32xf32>
    %cst_61 = arith.constant 9.99999974E-6 : f32
    %148 = vector.broadcast %cst_61 : f32 to vector<32x1xf32>
    %149 = arith.addf %145, %148 : vector<32x1xf32>
    %150 = math.rsqrt %149 : vector<32x1xf32>
    %151 = vector.broadcast %150 : vector<32x1xf32> to vector<32x32xf32>
    %152 = arith.mulf %147, %151 : vector<32x32xf32>
    %153 = vector.broadcast %132 : vector<1x32xf32> to vector<32x32xf32>
    %154 = arith.mulf %152, %153 : vector<32x32xf32>
    %155 = vector.broadcast %134 : vector<1x32xf32> to vector<32x32xf32>
    %156 = arith.addf %154, %155 : vector<32x32xf32>
    %cst_62 = arith.constant 5.000000e-01 : f32
    %157 = vector.broadcast %cst_62 : f32 to vector<32x32xf32>
    %158 = arith.mulf %157, %156 : vector<32x32xf32>
    %cst_63 = arith.constant 4.471500e-02 : f32
    %159 = vector.broadcast %cst_63 : f32 to vector<32x32xf32>
    %160 = arith.mulf %159, %156 : vector<32x32xf32>
    %161 = arith.mulf %160, %156 : vector<32x32xf32>
    %162 = arith.mulf %161, %156 : vector<32x32xf32>
    %163 = arith.addf %156, %162 : vector<32x32xf32>
    %cst_64 = arith.constant 0.797884583 : f32
    %164 = vector.broadcast %cst_64 : f32 to vector<32x32xf32>
    %165 = arith.mulf %164, %163 : vector<32x32xf32>
    %166 = math.tanh %165 : vector<32x32xf32>
    %cst_65 = arith.constant 1.000000e+00 : f32
    %167 = vector.broadcast %cst_65 : f32 to vector<32x32xf32>
    %168 = arith.addf %167, %166 : vector<32x32xf32>
    %169 = arith.mulf %158, %168 : vector<32x32xf32>
    %170 = vector.extract_strided_slice %84 {offsets = [0, 0, 0], sizes = [1, 32, 32], strides = [1, 1, 1]} : vector<2x32x32xf32> to vector<1x32x32xf32>
    %171 = vector.shape_cast %170 : vector<1x32x32xf32> to vector<32x32xf32>
    %172 = arith.truncf %169 : vector<32x32xf32> to vector<32x32xbf16>
    %173 = arith.truncf %171 : vector<32x32xf32> to vector<32x32xbf16>
    %cst_66 = arith.constant dense<0.000000e+00> : vector<32x32xf32>
    %174 = tpu.matmul %172, %173, %cst_66 {dimension_numbers = #tpu.dot_dimension_numbers<[1], [0], [0], [1], [0, 0, 1, 1], [], []>} : vector<32x32xbf16>, vector<32x32xbf16>, vector<32x32xf32> -> vector<32x32xf32>
    %175 = vector.extract_strided_slice %86 {offsets = [0, 0, 0], sizes = [1, 1, 32], strides = [1, 1, 1]} : vector<2x1x32xf32> to vector<1x1x32xf32>
    %176 = vector.shape_cast %175 : vector<1x1x32xf32> to vector<1x32xf32>
    %177 = vector.broadcast %176 : vector<1x32xf32> to vector<32x32xf32>
    %178 = arith.addf %174, %177 : vector<32x32xf32>
    %179 = vector.extract_strided_slice %88 {offsets = [0, 0, 0], sizes = [1, 1, 32], strides = [1, 1, 1]} : vector<2x1x32xf32> to vector<1x1x32xf32>
    %180 = vector.shape_cast %179 : vector<1x1x32xf32> to vector<1x32xf32>
    %181 = vector.extract_strided_slice %90 {offsets = [0, 0, 0], sizes = [1, 1, 32], strides = [1, 1, 1]} : vector<2x1x32xf32> to vector<1x1x32xf32>
    %182 = vector.shape_cast %181 : vector<1x1x32xf32> to vector<1x32xf32>
    %cst_67 = arith.constant dense<0.000000e+00> : vector<32xf32>
    %183 = vector.multi_reduction <add>, %178, %cst_67 [1] : vector<32x32xf32> to vector<32xf32>
    %184 = vector.shape_cast %183 : vector<32xf32> to vector<32x1xf32>
    %cst_68 = arith.constant 3.200000e+01 : f32
    %185 = vector.broadcast %cst_68 : f32 to vector<32x1xf32>
    %186 = arith.divf %184, %185 : vector<32x1xf32>
    %187 = vector.broadcast %186 : vector<32x1xf32> to vector<32x32xf32>
    %188 = arith.subf %178, %187 : vector<32x32xf32>
    %189 = arith.mulf %188, %188 : vector<32x32xf32>
    %cst_69 = arith.constant dense<0.000000e+00> : vector<32xf32>
    %190 = vector.multi_reduction <add>, %189, %cst_69 [1] : vector<32x32xf32> to vector<32xf32>
    %191 = vector.shape_cast %190 : vector<32xf32> to vector<32x1xf32>
    %cst_70 = arith.constant 3.200000e+01 : f32
    %192 = vector.broadcast %cst_70 : f32 to vector<32x1xf32>
    %193 = arith.divf %191, %192 : vector<32x1xf32>
    %194 = vector.broadcast %186 : vector<32x1xf32> to vector<32x32xf32>
    %195 = arith.subf %178, %194 : vector<32x32xf32>
    %cst_71 = arith.constant 9.99999974E-6 : f32
    %196 = vector.broadcast %cst_71 : f32 to vector<32x1xf32>
    %197 = arith.addf %193, %196 : vector<32x1xf32>
    %198 = math.rsqrt %197 : vector<32x1xf32>
    %199 = vector.broadcast %198 : vector<32x1xf32> to vector<32x32xf32>
    %200 = arith.mulf %195, %199 : vector<32x32xf32>
    %201 = vector.broadcast %180 : vector<1x32xf32> to vector<32x32xf32>
    %202 = arith.mulf %200, %201 : vector<32x32xf32>
    %203 = vector.broadcast %182 : vector<1x32xf32> to vector<32x32xf32>
    %204 = arith.addf %202, %203 : vector<32x32xf32>
    %cst_72 = arith.constant 5.000000e-01 : f32
    %205 = vector.broadcast %cst_72 : f32 to vector<32x32xf32>
    %206 = arith.mulf %205, %204 : vector<32x32xf32>
    %cst_73 = arith.constant 4.471500e-02 : f32
    %207 = vector.broadcast %cst_73 : f32 to vector<32x32xf32>
    %208 = arith.mulf %207, %204 : vector<32x32xf32>
    %209 = arith.mulf %208, %204 : vector<32x32xf32>
    %210 = arith.mulf %209, %204 : vector<32x32xf32>
    %211 = arith.addf %204, %210 : vector<32x32xf32>
    %cst_74 = arith.constant 0.797884583 : f32
    %212 = vector.broadcast %cst_74 : f32 to vector<32x32xf32>
    %213 = arith.mulf %212, %211 : vector<32x32xf32>
    %214 = math.tanh %213 : vector<32x32xf32>
    %cst_75 = arith.constant 1.000000e+00 : f32
    %215 = vector.broadcast %cst_75 : f32 to vector<32x32xf32>
    %216 = arith.addf %215, %214 : vector<32x32xf32>
    %217 = arith.mulf %206, %216 : vector<32x32xf32>
    %218 = arith.addf %74, %217 : vector<32x32xf32>
    %219 = vector.broadcast %1 : vector<32x1xf32> to vector<32x32xf32>
    %220 = arith.mulf %218, %219 : vector<32x32xf32>
    %c3_i32 = arith.constant 3 : i32
    %221 = tpu.dynamic_rotate %220 by %c3_i32 dim 0 : vector<32x32xf32>, i32 -> vector<32x32xf32>
    %c3_i32_76 = arith.constant 3 : i32
    %222 = vector.broadcast %c3_i32_76 : i32 to vector<32x1xi32>
    %223 = arith.cmpi sge, %19, %222 : vector<32x1xi32>
    %c19_i32 = arith.constant 19 : i32
    %224 = vector.broadcast %c19_i32 : i32 to vector<32x1xi32>
    %225 = arith.cmpi slt, %19, %224 : vector<32x1xi32>
    %226 = arith.andi %223, %225 : vector<32x1xi1>
    %227 = arith.extui %226 : vector<32x1xi1> to vector<32x1xi32>
    %228 = arith.sitofp %227 : vector<32x1xi32> to vector<32x1xf32>
    %229 = vector.broadcast %228 : vector<32x1xf32> to vector<32x32xf32>
    %230 = arith.mulf %221, %229 : vector<32x32xf32>
    %231 = vector.extract_strided_slice %76 {offsets = [1, 0, 0], sizes = [1, 1, 32], strides = [1, 1, 1]} : vector<2x3x32xf32> to vector<1x1x32xf32>
    %232 = vector.shape_cast %231 : vector<1x1x32xf32> to vector<1x32xf32>
    %233 = vector.broadcast %232 : vector<1x32xf32> to vector<32x32xf32>
    %234 = arith.mulf %230, %233 : vector<32x32xf32>
    %235 = vector.extract_strided_slice %76 {offsets = [1, 1, 0], sizes = [1, 1, 32], strides = [1, 1, 1]} : vector<2x3x32xf32> to vector<1x1x32xf32>
    %236 = vector.shape_cast %235 : vector<1x1x32xf32> to vector<1x32xf32>
    %237 = vector.broadcast %236 : vector<1x32xf32> to vector<32x32xf32>
    %238 = arith.mulf %220, %237 : vector<32x32xf32>
    %239 = arith.addf %234, %238 : vector<32x32xf32>
    %c29_i32 = arith.constant 29 : i32
    %240 = tpu.dynamic_rotate %220 by %c29_i32 dim 0 : vector<32x32xf32>, i32 -> vector<32x32xf32>
    %c-3_i32 = arith.constant -3 : i32
    %241 = vector.broadcast %c-3_i32 : i32 to vector<32x1xi32>
    %242 = arith.cmpi sge, %19, %241 : vector<32x1xi32>
    %c13_i32 = arith.constant 13 : i32
    %243 = vector.broadcast %c13_i32 : i32 to vector<32x1xi32>
    %244 = arith.cmpi slt, %19, %243 : vector<32x1xi32>
    %245 = arith.andi %242, %244 : vector<32x1xi1>
    %246 = arith.extui %245 : vector<32x1xi1> to vector<32x1xi32>
    %247 = arith.sitofp %246 : vector<32x1xi32> to vector<32x1xf32>
    %248 = vector.broadcast %247 : vector<32x1xf32> to vector<32x32xf32>
    %249 = arith.mulf %240, %248 : vector<32x32xf32>
    %250 = vector.extract_strided_slice %76 {offsets = [1, 2, 0], sizes = [1, 1, 32], strides = [1, 1, 1]} : vector<2x3x32xf32> to vector<1x1x32xf32>
    %251 = vector.shape_cast %250 : vector<1x1x32xf32> to vector<1x32xf32>
    %252 = vector.broadcast %251 : vector<1x32xf32> to vector<32x32xf32>
    %253 = arith.mulf %249, %252 : vector<32x32xf32>
    %254 = arith.addf %239, %253 : vector<32x32xf32>
    %255 = vector.extract_strided_slice %78 {offsets = [1, 0, 0], sizes = [1, 1, 32], strides = [1, 1, 1]} : vector<2x1x32xf32> to vector<1x1x32xf32>
    %256 = vector.shape_cast %255 : vector<1x1x32xf32> to vector<1x32xf32>
    %257 = vector.broadcast %256 : vector<1x32xf32> to vector<32x32xf32>
    %258 = arith.addf %254, %257 : vector<32x32xf32>
    %259 = vector.extract_strided_slice %80 {offsets = [1, 0, 0], sizes = [1, 1, 32], strides = [1, 1, 1]} : vector<2x1x32xf32> to vector<1x1x32xf32>
    %260 = vector.shape_cast %259 : vector<1x1x32xf32> to vector<1x32xf32>
    %261 = vector.extract_strided_slice %82 {offsets = [1, 0, 0], sizes = [1, 1, 32], strides = [1, 1, 1]} : vector<2x1x32xf32> to vector<1x1x32xf32>
    %262 = vector.shape_cast %261 : vector<1x1x32xf32> to vector<1x32xf32>
    %cst_77 = arith.constant dense<0.000000e+00> : vector<32xf32>
    %263 = vector.multi_reduction <add>, %258, %cst_77 [1] : vector<32x32xf32> to vector<32xf32>
    %264 = vector.shape_cast %263 : vector<32xf32> to vector<32x1xf32>
    %cst_78 = arith.constant 3.200000e+01 : f32
    %265 = vector.broadcast %cst_78 : f32 to vector<32x1xf32>
    %266 = arith.divf %264, %265 : vector<32x1xf32>
    %267 = vector.broadcast %266 : vector<32x1xf32> to vector<32x32xf32>
    %268 = arith.subf %258, %267 : vector<32x32xf32>
    %269 = arith.mulf %268, %268 : vector<32x32xf32>
    %cst_79 = arith.constant dense<0.000000e+00> : vector<32xf32>
    %270 = vector.multi_reduction <add>, %269, %cst_79 [1] : vector<32x32xf32> to vector<32xf32>
    %271 = vector.shape_cast %270 : vector<32xf32> to vector<32x1xf32>
    %cst_80 = arith.constant 3.200000e+01 : f32
    %272 = vector.broadcast %cst_80 : f32 to vector<32x1xf32>
    %273 = arith.divf %271, %272 : vector<32x1xf32>
    %274 = vector.broadcast %266 : vector<32x1xf32> to vector<32x32xf32>
    %275 = arith.subf %258, %274 : vector<32x32xf32>
    %cst_81 = arith.constant 9.99999974E-6 : f32
    %276 = vector.broadcast %cst_81 : f32 to vector<32x1xf32>
    %277 = arith.addf %273, %276 : vector<32x1xf32>
    %278 = math.rsqrt %277 : vector<32x1xf32>
    %279 = vector.broadcast %278 : vector<32x1xf32> to vector<32x32xf32>
    %280 = arith.mulf %275, %279 : vector<32x32xf32>
    %281 = vector.broadcast %260 : vector<1x32xf32> to vector<32x32xf32>
    %282 = arith.mulf %280, %281 : vector<32x32xf32>
    %283 = vector.broadcast %262 : vector<1x32xf32> to vector<32x32xf32>
    %284 = arith.addf %282, %283 : vector<32x32xf32>
    %cst_82 = arith.constant 5.000000e-01 : f32
    %285 = vector.broadcast %cst_82 : f32 to vector<32x32xf32>
    %286 = arith.mulf %285, %284 : vector<32x32xf32>
    %cst_83 = arith.constant 4.471500e-02 : f32
    %287 = vector.broadcast %cst_83 : f32 to vector<32x32xf32>
    %288 = arith.mulf %287, %284 : vector<32x32xf32>
    %289 = arith.mulf %288, %284 : vector<32x32xf32>
    %290 = arith.mulf %289, %284 : vector<32x32xf32>
    %291 = arith.addf %284, %290 : vector<32x32xf32>
    %cst_84 = arith.constant 0.797884583 : f32
    %292 = vector.broadcast %cst_84 : f32 to vector<32x32xf32>
    %293 = arith.mulf %292, %291 : vector<32x32xf32>
    %294 = math.tanh %293 : vector<32x32xf32>
    %cst_85 = arith.constant 1.000000e+00 : f32
    %295 = vector.broadcast %cst_85 : f32 to vector<32x32xf32>
    %296 = arith.addf %295, %294 : vector<32x32xf32>
    %297 = arith.mulf %286, %296 : vector<32x32xf32>
    %298 = vector.extract_strided_slice %84 {offsets = [1, 0, 0], sizes = [1, 32, 32], strides = [1, 1, 1]} : vector<2x32x32xf32> to vector<1x32x32xf32>
    %299 = vector.shape_cast %298 : vector<1x32x32xf32> to vector<32x32xf32>
    %300 = arith.truncf %297 : vector<32x32xf32> to vector<32x32xbf16>
    %301 = arith.truncf %299 : vector<32x32xf32> to vector<32x32xbf16>
    %cst_86 = arith.constant dense<0.000000e+00> : vector<32x32xf32>
    %302 = tpu.matmul %300, %301, %cst_86 {dimension_numbers = #tpu.dot_dimension_numbers<[1], [0], [0], [1], [0, 0, 1, 1], [], []>} : vector<32x32xbf16>, vector<32x32xbf16>, vector<32x32xf32> -> vector<32x32xf32>
    %303 = vector.extract_strided_slice %86 {offsets = [1, 0, 0], sizes = [1, 1, 32], strides = [1, 1, 1]} : vector<2x1x32xf32> to vector<1x1x32xf32>
    %304 = vector.shape_cast %303 : vector<1x1x32xf32> to vector<1x32xf32>
    %305 = vector.broadcast %304 : vector<1x32xf32> to vector<32x32xf32>
    %306 = arith.addf %302, %305 : vector<32x32xf32>
    %307 = vector.extract_strided_slice %88 {offsets = [1, 0, 0], sizes = [1, 1, 32], strides = [1, 1, 1]} : vector<2x1x32xf32> to vector<1x1x32xf32>
    %308 = vector.shape_cast %307 : vector<1x1x32xf32> to vector<1x32xf32>
    %309 = vector.extract_strided_slice %90 {offsets = [1, 0, 0], sizes = [1, 1, 32], strides = [1, 1, 1]} : vector<2x1x32xf32> to vector<1x1x32xf32>
    %310 = vector.shape_cast %309 : vector<1x1x32xf32> to vector<1x32xf32>
    %cst_87 = arith.constant dense<0.000000e+00> : vector<32xf32>
    %311 = vector.multi_reduction <add>, %306, %cst_87 [1] : vector<32x32xf32> to vector<32xf32>
    %312 = vector.shape_cast %311 : vector<32xf32> to vector<32x1xf32>
    %cst_88 = arith.constant 3.200000e+01 : f32
    %313 = vector.broadcast %cst_88 : f32 to vector<32x1xf32>
    %314 = arith.divf %312, %313 : vector<32x1xf32>
    %315 = vector.broadcast %314 : vector<32x1xf32> to vector<32x32xf32>
    %316 = arith.subf %306, %315 : vector<32x32xf32>
    %317 = arith.mulf %316, %316 : vector<32x32xf32>
    %cst_89 = arith.constant dense<0.000000e+00> : vector<32xf32>
    %318 = vector.multi_reduction <add>, %317, %cst_89 [1] : vector<32x32xf32> to vector<32xf32>
    %319 = vector.shape_cast %318 : vector<32xf32> to vector<32x1xf32>
    %cst_90 = arith.constant 3.200000e+01 : f32
    %320 = vector.broadcast %cst_90 : f32 to vector<32x1xf32>
    %321 = arith.divf %319, %320 : vector<32x1xf32>
    %322 = vector.broadcast %314 : vector<32x1xf32> to vector<32x32xf32>
    %323 = arith.subf %306, %322 : vector<32x32xf32>
    %cst_91 = arith.constant 9.99999974E-6 : f32
    %324 = vector.broadcast %cst_91 : f32 to vector<32x1xf32>
    %325 = arith.addf %321, %324 : vector<32x1xf32>
    %326 = math.rsqrt %325 : vector<32x1xf32>
    %327 = vector.broadcast %326 : vector<32x1xf32> to vector<32x32xf32>
    %328 = arith.mulf %323, %327 : vector<32x32xf32>
    %329 = vector.broadcast %308 : vector<1x32xf32> to vector<32x32xf32>
    %330 = arith.mulf %328, %329 : vector<32x32xf32>
    %331 = vector.broadcast %310 : vector<1x32xf32> to vector<32x32xf32>
    %332 = arith.addf %330, %331 : vector<32x32xf32>
    %cst_92 = arith.constant 5.000000e-01 : f32
    %333 = vector.broadcast %cst_92 : f32 to vector<32x32xf32>
    %334 = arith.mulf %333, %332 : vector<32x32xf32>
    %cst_93 = arith.constant 4.471500e-02 : f32
    %335 = vector.broadcast %cst_93 : f32 to vector<32x32xf32>
    %336 = arith.mulf %335, %332 : vector<32x32xf32>
    %337 = arith.mulf %336, %332 : vector<32x32xf32>
    %338 = arith.mulf %337, %332 : vector<32x32xf32>
    %339 = arith.addf %332, %338 : vector<32x32xf32>
    %cst_94 = arith.constant 0.797884583 : f32
    %340 = vector.broadcast %cst_94 : f32 to vector<32x32xf32>
    %341 = arith.mulf %340, %339 : vector<32x32xf32>
    %342 = math.tanh %341 : vector<32x32xf32>
    %cst_95 = arith.constant 1.000000e+00 : f32
    %343 = vector.broadcast %cst_95 : f32 to vector<32x32xf32>
    %344 = arith.addf %343, %342 : vector<32x32xf32>
    %345 = arith.mulf %334, %344 : vector<32x32xf32>
    %346 = arith.addf %218, %345 : vector<32x32xf32>
    %347 = vector.broadcast %1 : vector<32x1xf32> to vector<32x32xf32>
    %348 = arith.mulf %346, %347 : vector<32x32xf32>
    %349 = vector.extract_strided_slice %32 {offsets = [0, 0, 0], sizes = [1, 32, 29], strides = [1, 1, 1]} : vector<2x32x29xf32> to vector<1x32x29xf32>
    %350 = vector.shape_cast %349 : vector<1x32x29xf32> to vector<32x29xf32>
    %351 = arith.truncf %348 : vector<32x32xf32> to vector<32x32xbf16>
    %352 = arith.truncf %350 : vector<32x29xf32> to vector<32x29xbf16>
    %cst_96 = arith.constant dense<0.000000e+00> : vector<32x29xf32>
    %353 = tpu.matmul %351, %352, %cst_96 {dimension_numbers = #tpu.dot_dimension_numbers<[1], [0], [0], [1], [0, 0, 1, 1], [], []>} : vector<32x32xbf16>, vector<32x29xbf16>, vector<32x29xf32> -> vector<32x29xf32>
    %354 = vector.extract_strided_slice %33 {offsets = [0, 0, 0], sizes = [1, 1, 29], strides = [1, 1, 1]} : vector<2x1x29xf32> to vector<1x1x29xf32>
    %355 = vector.shape_cast %354 : vector<1x1x29xf32> to vector<1x29xf32>
    %356 = vector.broadcast %355 : vector<1x29xf32> to vector<32x29xf32>
    %357 = arith.addf %353, %356 : vector<32x29xf32>
    %358 = vector.broadcast %1 : vector<32x1xf32> to vector<32x29xf32>
    %359 = arith.mulf %357, %358 : vector<32x29xf32>
    %360 = vector.extract_strided_slice %359 {offsets = [0, 0], sizes = [32, 10], strides = [1, 1]} : vector<32x29xf32> to vector<32x10xf32>
    %cst_97 = arith.constant 0.176776692 : f32
    %361 = vector.broadcast %cst_97 : f32 to vector<32x10xf32>
    %362 = arith.mulf %360, %361 : vector<32x10xf32>
    %363 = vector.extract_strided_slice %359 {offsets = [0, 10], sizes = [32, 10], strides = [1, 1]} : vector<32x29xf32> to vector<32x10xf32>
    %cst_98 = arith.constant 0.176776692 : f32
    %364 = vector.broadcast %cst_98 : f32 to vector<32x10xf32>
    %365 = arith.mulf %363, %364 : vector<32x10xf32>
    %366 = vector.extract_strided_slice %359 {offsets = [0, 20], sizes = [32, 9], strides = [1, 1]} : vector<32x29xf32> to vector<32x9xf32>
    %cst_99 = arith.constant -5.000000e+00 : f32
    %367 = vector.broadcast %cst_99 : f32 to vector<32x1xf32>
    %368 = arith.cmpf oge, %59, %367 : vector<32x1xf32>
    %cst_100 = arith.constant 5.000000e+00 : f32
    %369 = vector.broadcast %cst_100 : f32 to vector<32x1xf32>
    %370 = arith.cmpf ole, %59, %369 : vector<32x1xf32>
    %371 = arith.andi %368, %370 : vector<32x1xi1>
    %cst_101 = arith.constant -5.000000e+00 : f32
    %cst_102 = arith.constant 5.000000e+00 : f32
    %372 = vector.broadcast %cst_101 : f32 to vector<32x1xf32>
    %373 = arith.maximumf %372, %59 : vector<32x1xf32>
    %374 = vector.broadcast %cst_102 : f32 to vector<32x1xf32>
    %375 = arith.minimumf %374, %373 : vector<32x1xf32>
    %376 = tpu.concatenate %362, %365 in 0 : vector<32x10xf32>, vector<32x10xf32> -> vector<64x10xf32>
    %cst_103 = arith.constant dense<0xFF800000> : vector<64xf32>
    %377 = vector.multi_reduction <maximumf>, %376, %cst_103 [1] : vector<64x10xf32> to vector<64xf32>
    %378 = vector.shape_cast %377 : vector<64xf32> to vector<64x1xf32>
    %379 = vector.broadcast %378 : vector<64x1xf32> to vector<64x10xf32>
    %380 = arith.subf %376, %379 : vector<64x10xf32>
    %381 = math.exp %380 : vector<64x10xf32>
    %cst_104 = arith.constant dense<0.000000e+00> : vector<64xf32>
    %382 = vector.multi_reduction <add>, %381, %cst_104 [1] : vector<64x10xf32> to vector<64xf32>
    %383 = vector.shape_cast %382 : vector<64xf32> to vector<64x1xf32>
    %384 = tpu.reciprocal %383 {approx = true} : vector<64x1xf32> -> vector<64x1xf32>
    %385 = vector.broadcast %384 : vector<64x1xf32> to vector<64x10xf32>
    %386 = arith.mulf %381, %385 : vector<64x10xf32>
    %cst_105 = arith.constant 9.900000e-01 : f32
    %387 = vector.broadcast %cst_105 : f32 to vector<64x10xf32>
    %388 = arith.mulf %387, %386 : vector<64x10xf32>
    %cst_106 = arith.constant 1.000000e-03 : f32
    %389 = vector.broadcast %cst_106 : f32 to vector<64x10xf32>
    %390 = arith.addf %389, %388 : vector<64x10xf32>
    %cst_107 = arith.constant dense<0.000000e+00> : vector<64x11xf32>
    %391 = tpu.matmul %390, %38, %cst_107 {dimension_numbers = #tpu.dot_dimension_numbers<[1], [0], [0], [1], [0, 0, 1, 1], [], []>} : vector<64x10xf32>, vector<10x11xf32>, vector<64x11xf32> -> vector<64x11xf32>
    %cst_108 = arith.constant 1.000000e+01 : f32
    %392 = vector.broadcast %cst_108 : f32 to vector<64x11xf32>
    %393 = arith.mulf %392, %391 : vector<64x11xf32>
    %cst_109 = arith.constant -5.000000e+00 : f32
    %394 = vector.broadcast %cst_109 : f32 to vector<64x11xf32>
    %395 = arith.addf %393, %394 : vector<64x11xf32>
    %c0_i32_110 = arith.constant 0 : i32
    %396 = vector.broadcast %c0_i32_110 : i32 to vector<64x11xi32>
    %397 = arith.cmpi eq, %39, %396 : vector<64x11xi32>
    %c10_i32 = arith.constant 10 : i32
    %398 = vector.broadcast %c10_i32 : i32 to vector<64x11xi32>
    %399 = arith.cmpi eq, %39, %398 : vector<64x11xi32>
    %cst_111 = arith.constant 5.000000e+00 : f32
    %400 = vector.broadcast %cst_111 : f32 to vector<64x11xf32>
    %401 = arith.select %399, %400, %395 : vector<64x11xi1>, vector<64x11xf32>
    %cst_112 = arith.constant -5.000000e+00 : f32
    %402 = vector.broadcast %cst_112 : f32 to vector<64x11xf32>
    %403 = arith.select %397, %402, %401 : vector<64x11xi1>, vector<64x11xf32>
    %404 = vector.extract_strided_slice %403 {offsets = [0, 1], sizes = [64, 10], strides = [1, 1]} : vector<64x11xf32> to vector<64x10xf32>
    %405 = vector.extract_strided_slice %403 {offsets = [0, 0], sizes = [64, 10], strides = [1, 1]} : vector<64x11xf32> to vector<64x10xf32>
    %406 = arith.subf %404, %405 : vector<64x10xf32>
    %407 = vector.extract_strided_slice %403 {offsets = [0, 0], sizes = [32, 11], strides = [1, 1]} : vector<64x11xf32> to vector<32x11xf32>
    %408 = vector.extract_strided_slice %403 {offsets = [32, 0], sizes = [32, 11], strides = [1, 1]} : vector<64x11xf32> to vector<32x11xf32>
    %409 = vector.extract_strided_slice %406 {offsets = [0, 0], sizes = [32, 10], strides = [1, 1]} : vector<64x10xf32> to vector<32x10xf32>
    %410 = vector.extract_strided_slice %406 {offsets = [32, 0], sizes = [32, 10], strides = [1, 1]} : vector<64x10xf32> to vector<32x10xf32>
    %cst_113 = arith.constant 0.53974241 : f32
    %411 = vector.broadcast %cst_113 : f32 to vector<32x1xf32>
    %412 = tpu.concatenate %411, %366, %411 in 1 : vector<32x1xf32>, vector<32x9xf32>, vector<32x1xf32> -> vector<32x11xf32>
    %cst_114 = arith.constant 2.000000e+01 : f32
    %413 = vector.broadcast %cst_114 : f32 to vector<32x11xf32>
    %414 = arith.cmpf ogt, %412, %413 : vector<32x11xf32>
    %cst_115 = arith.constant 2.000000e+01 : f32
    %415 = vector.broadcast %cst_115 : f32 to vector<32x11xf32>
    %416 = arith.minimumf %412, %415 : vector<32x11xf32>
    %417 = math.exp %416 : vector<32x11xf32>
    %cst_116 = arith.constant 1.000000e+00 : f32
    %418 = vector.broadcast %cst_116 : f32 to vector<32x11xf32>
    %419 = arith.addf %418, %417 : vector<32x11xf32>
    %420 = math.log %419 : vector<32x11xf32>
    %421 = arith.select %414, %412, %420 : vector<32x11xi1>, vector<32x11xf32>
    %cst_117 = arith.constant 1.000000e-03 : f32
    %422 = vector.broadcast %cst_117 : f32 to vector<32x11xf32>
    %423 = arith.addf %422, %421 : vector<32x11xf32>
    %c10_i32_118 = arith.constant 10 : i32
    %424 = vector.broadcast %c10_i32_118 : i32 to vector<32x11xi32>
    %425 = arith.cmpi eq, %40, %424 : vector<32x11xi32>
    %cst_119 = arith.constant 9.99999997E-7 : f32
    %cst_120 = arith.constant 0.000000e+00 : f32
    %426 = vector.broadcast %cst_119 : f32 to vector<32x11xf32>
    %427 = vector.broadcast %cst_120 : f32 to vector<32x11xf32>
    %428 = arith.select %425, %426, %427 : vector<32x11xi1>, vector<32x11xf32>
    %429 = arith.addf %407, %428 : vector<32x11xf32>
    %430 = vector.broadcast %375 : vector<32x1xf32> to vector<32x11xf32>
    %431 = arith.cmpf oge, %430, %429 : vector<32x11xf32>
    %432 = arith.extui %431 : vector<32x11xi1> to vector<32x11xi32>
    %cst_121 = arith.constant dense<0> : vector<32xi32>
    %433 = vector.multi_reduction <add>, %432, %cst_121 [1] : vector<32x11xi32> to vector<32xi32>
    %434 = vector.shape_cast %433 : vector<32xi32> to vector<32x1xi32>
    %c1_i32_122 = arith.constant 1 : i32
    %435 = vector.broadcast %c1_i32_122 : i32 to vector<32x1xi32>
    %436 = arith.subi %434, %435 : vector<32x1xi32>
    %437 = vector.broadcast %436 : vector<32x1xi32> to vector<32x10xi32>
    %438 = arith.cmpi eq, %41, %437 : vector<32x10xi32>
    %439 = arith.extui %438 : vector<32x10xi1> to vector<32x10xi32>
    %440 = arith.sitofp %439 : vector<32x10xi32> to vector<32x10xf32>
    %441 = vector.extract_strided_slice %407 {offsets = [0, 0], sizes = [32, 10], strides = [1, 1]} : vector<32x11xf32> to vector<32x10xf32>
    %442 = arith.mulf %441, %440 : vector<32x10xf32>
    %cst_123 = arith.constant dense<0.000000e+00> : vector<32xf32>
    %443 = vector.multi_reduction <add>, %442, %cst_123 [1] : vector<32x10xf32> to vector<32xf32>
    %444 = vector.shape_cast %443 : vector<32xf32> to vector<32x1xf32>
    %445 = arith.mulf %409, %440 : vector<32x10xf32>
    %cst_124 = arith.constant dense<0.000000e+00> : vector<32xf32>
    %446 = vector.multi_reduction <add>, %445, %cst_124 [1] : vector<32x10xf32> to vector<32xf32>
    %447 = vector.shape_cast %446 : vector<32xf32> to vector<32x1xf32>
    %448 = vector.extract_strided_slice %408 {offsets = [0, 0], sizes = [32, 10], strides = [1, 1]} : vector<32x11xf32> to vector<32x10xf32>
    %449 = arith.mulf %448, %440 : vector<32x10xf32>
    %cst_125 = arith.constant dense<0.000000e+00> : vector<32xf32>
    %450 = vector.multi_reduction <add>, %449, %cst_125 [1] : vector<32x10xf32> to vector<32xf32>
    %451 = vector.shape_cast %450 : vector<32xf32> to vector<32x1xf32>
    %452 = arith.mulf %410, %440 : vector<32x10xf32>
    %cst_126 = arith.constant dense<0.000000e+00> : vector<32xf32>
    %453 = vector.multi_reduction <add>, %452, %cst_126 [1] : vector<32x10xf32> to vector<32xf32>
    %454 = vector.shape_cast %453 : vector<32xf32> to vector<32x1xf32>
    %455 = vector.extract_strided_slice %423 {offsets = [0, 0], sizes = [32, 10], strides = [1, 1]} : vector<32x11xf32> to vector<32x10xf32>
    %456 = arith.mulf %455, %440 : vector<32x10xf32>
    %cst_127 = arith.constant dense<0.000000e+00> : vector<32xf32>
    %457 = vector.multi_reduction <add>, %456, %cst_127 [1] : vector<32x10xf32> to vector<32xf32>
    %458 = vector.shape_cast %457 : vector<32xf32> to vector<32x1xf32>
    %459 = vector.extract_strided_slice %423 {offsets = [0, 1], sizes = [32, 10], strides = [1, 1]} : vector<32x11xf32> to vector<32x10xf32>
    %460 = arith.mulf %459, %440 : vector<32x10xf32>
    %cst_128 = arith.constant dense<0.000000e+00> : vector<32xf32>
    %461 = vector.multi_reduction <add>, %460, %cst_128 [1] : vector<32x10xf32> to vector<32xf32>
    %462 = vector.shape_cast %461 : vector<32xf32> to vector<32x1xf32>
    %463 = tpu.reciprocal %447 {approx = true} : vector<32x1xf32> -> vector<32x1xf32>
    %464 = arith.mulf %454, %463 : vector<32x1xf32>
    %465 = arith.subf %375, %444 : vector<32x1xf32>
    %466 = arith.mulf %465, %463 : vector<32x1xf32>
    %cst_129 = arith.constant 1.000000e+00 : f32
    %467 = vector.broadcast %cst_129 : f32 to vector<32x1xf32>
    %468 = arith.subf %467, %466 : vector<32x1xf32>
    %469 = arith.mulf %466, %468 : vector<32x1xf32>
    %470 = arith.mulf %464, %466 : vector<32x1xf32>
    %471 = arith.mulf %470, %466 : vector<32x1xf32>
    %472 = arith.mulf %458, %469 : vector<32x1xf32>
    %473 = arith.addf %471, %472 : vector<32x1xf32>
    %474 = arith.mulf %454, %473 : vector<32x1xf32>
    %475 = arith.addf %458, %462 : vector<32x1xf32>
    %cst_130 = arith.constant 2.000000e+00 : f32
    %476 = vector.broadcast %cst_130 : f32 to vector<32x1xf32>
    %477 = arith.mulf %476, %464 : vector<32x1xf32>
    %478 = arith.subf %475, %477 : vector<32x1xf32>
    %479 = arith.mulf %478, %469 : vector<32x1xf32>
    %480 = arith.addf %464, %479 : vector<32x1xf32>
    %481 = tpu.reciprocal %480 {approx = true} : vector<32x1xf32> -> vector<32x1xf32>
    %482 = arith.mulf %474, %481 : vector<32x1xf32>
    %483 = arith.addf %451, %482 : vector<32x1xf32>
    %484 = arith.mulf %464, %464 : vector<32x1xf32>
    %485 = arith.mulf %462, %466 : vector<32x1xf32>
    %486 = arith.mulf %485, %466 : vector<32x1xf32>
    %cst_131 = arith.constant 2.000000e+00 : f32
    %487 = vector.broadcast %cst_131 : f32 to vector<32x1xf32>
    %488 = arith.mulf %487, %464 : vector<32x1xf32>
    %489 = arith.mulf %488, %469 : vector<32x1xf32>
    %490 = arith.addf %486, %489 : vector<32x1xf32>
    %cst_132 = arith.constant 1.000000e+00 : f32
    %491 = vector.broadcast %cst_132 : f32 to vector<32x1xf32>
    %492 = arith.subf %491, %466 : vector<32x1xf32>
    %493 = arith.mulf %458, %492 : vector<32x1xf32>
    %cst_133 = arith.constant 1.000000e+00 : f32
    %494 = vector.broadcast %cst_133 : f32 to vector<32x1xf32>
    %495 = arith.subf %494, %466 : vector<32x1xf32>
    %496 = arith.mulf %493, %495 : vector<32x1xf32>
    %497 = arith.addf %490, %496 : vector<32x1xf32>
    %498 = arith.mulf %484, %497 : vector<32x1xf32>
    %499 = math.log %498 : vector<32x1xf32>
    %500 = math.log %480 : vector<32x1xf32>
    %cst_134 = arith.constant 2.000000e+00 : f32
    %501 = vector.broadcast %cst_134 : f32 to vector<32x1xf32>
    %502 = arith.mulf %501, %500 : vector<32x1xf32>
    %503 = arith.subf %499, %502 : vector<32x1xf32>
    %504 = arith.select %371, %483, %59 : vector<32x1xi1>, vector<32x1xf32>
    %cst_135 = arith.constant 0.000000e+00 : f32
    %505 = vector.broadcast %cst_135 : f32 to vector<32x1xf32>
    %506 = arith.select %371, %503, %505 : vector<32x1xi1>, vector<32x1xf32>
    %507 = arith.mulf %506, %1 : vector<32x1xf32>
    %508 = arith.addf %64, %507 : vector<32x1xf32>
    %509 = arith.mulf %504, %1 : vector<32x1xf32>
    %510 = arith.mulf %51, %1 : vector<32x1xf32>
    %511 = vector.extract_strided_slice %22 {offsets = [1, 0, 0], sizes = [1, 1, 32], strides = [1, 1, 1]} : vector<2x1x32xf32> to vector<1x1x32xf32>
    %512 = vector.shape_cast %511 : vector<1x1x32xf32> to vector<1x32xf32>
    %513 = vector.broadcast %509 : vector<32x1xf32> to vector<32x32xf32>
    %514 = vector.broadcast %512 : vector<1x32xf32> to vector<32x32xf32>
    %515 = arith.mulf %513, %514 : vector<32x32xf32>
    %516 = vector.extract_strided_slice %23 {offsets = [1, 0, 0], sizes = [1, 1, 32], strides = [1, 1, 1]} : vector<2x1x32xf32> to vector<1x1x32xf32>
    %517 = vector.shape_cast %516 : vector<1x1x32xf32> to vector<1x32xf32>
    %518 = vector.broadcast %517 : vector<1x32xf32> to vector<32x32xf32>
    %519 = arith.addf %515, %518 : vector<32x32xf32>
    %520 = arith.addf %519, %2 : vector<32x32xf32>
    %521 = vector.extract_strided_slice %24 {offsets = [1, 0, 0, 0], sizes = [1, 2, 3, 32], strides = [1, 1, 1, 1]} : vector<2x2x3x32xf32> to vector<1x2x3x32xf32>
    %522 = vector.shape_cast %521 : vector<1x2x3x32xf32> to vector<2x3x32xf32>
    %523 = vector.extract_strided_slice %25 {offsets = [1, 0, 0, 0], sizes = [1, 2, 1, 32], strides = [1, 1, 1, 1]} : vector<2x2x1x32xf32> to vector<1x2x1x32xf32>
    %524 = vector.shape_cast %523 : vector<1x2x1x32xf32> to vector<2x1x32xf32>
    %525 = vector.extract_strided_slice %26 {offsets = [1, 0, 0, 0], sizes = [1, 2, 1, 32], strides = [1, 1, 1, 1]} : vector<2x2x1x32xf32> to vector<1x2x1x32xf32>
    %526 = vector.shape_cast %525 : vector<1x2x1x32xf32> to vector<2x1x32xf32>
    %527 = vector.extract_strided_slice %27 {offsets = [1, 0, 0, 0], sizes = [1, 2, 1, 32], strides = [1, 1, 1, 1]} : vector<2x2x1x32xf32> to vector<1x2x1x32xf32>
    %528 = vector.shape_cast %527 : vector<1x2x1x32xf32> to vector<2x1x32xf32>
    %529 = vector.extract_strided_slice %28 {offsets = [1, 0, 0, 0], sizes = [1, 2, 32, 32], strides = [1, 1, 1, 1]} : vector<2x2x32x32xf32> to vector<1x2x32x32xf32>
    %530 = vector.shape_cast %529 : vector<1x2x32x32xf32> to vector<2x32x32xf32>
    %531 = vector.extract_strided_slice %29 {offsets = [1, 0, 0, 0], sizes = [1, 2, 1, 32], strides = [1, 1, 1, 1]} : vector<2x2x1x32xf32> to vector<1x2x1x32xf32>
    %532 = vector.shape_cast %531 : vector<1x2x1x32xf32> to vector<2x1x32xf32>
    %533 = vector.extract_strided_slice %30 {offsets = [1, 0, 0, 0], sizes = [1, 2, 1, 32], strides = [1, 1, 1, 1]} : vector<2x2x1x32xf32> to vector<1x2x1x32xf32>
    %534 = vector.shape_cast %533 : vector<1x2x1x32xf32> to vector<2x1x32xf32>
    %535 = vector.extract_strided_slice %31 {offsets = [1, 0, 0, 0], sizes = [1, 2, 1, 32], strides = [1, 1, 1, 1]} : vector<2x2x1x32xf32> to vector<1x2x1x32xf32>
    %536 = vector.shape_cast %535 : vector<1x2x1x32xf32> to vector<2x1x32xf32>
    %537 = vector.broadcast %1 : vector<32x1xf32> to vector<32x32xf32>
    %538 = arith.mulf %520, %537 : vector<32x32xf32>
    %c1_i32_136 = arith.constant 1 : i32
    %539 = tpu.dynamic_rotate %538 by %c1_i32_136 dim 0 : vector<32x32xf32>, i32 -> vector<32x32xf32>
    %c1_i32_137 = arith.constant 1 : i32
    %540 = vector.broadcast %c1_i32_137 : i32 to vector<32x1xi32>
    %541 = arith.cmpi sge, %19, %540 : vector<32x1xi32>
    %c17_i32_138 = arith.constant 17 : i32
    %542 = vector.broadcast %c17_i32_138 : i32 to vector<32x1xi32>
    %543 = arith.cmpi slt, %19, %542 : vector<32x1xi32>
    %544 = arith.andi %541, %543 : vector<32x1xi1>
    %545 = arith.extui %544 : vector<32x1xi1> to vector<32x1xi32>
    %546 = arith.sitofp %545 : vector<32x1xi32> to vector<32x1xf32>
    %547 = vector.broadcast %546 : vector<32x1xf32> to vector<32x32xf32>
    %548 = arith.mulf %539, %547 : vector<32x32xf32>
    %549 = vector.extract_strided_slice %522 {offsets = [0, 0, 0], sizes = [1, 1, 32], strides = [1, 1, 1]} : vector<2x3x32xf32> to vector<1x1x32xf32>
    %550 = vector.shape_cast %549 : vector<1x1x32xf32> to vector<1x32xf32>
    %551 = vector.broadcast %550 : vector<1x32xf32> to vector<32x32xf32>
    %552 = arith.mulf %548, %551 : vector<32x32xf32>
    %553 = vector.extract_strided_slice %522 {offsets = [0, 1, 0], sizes = [1, 1, 32], strides = [1, 1, 1]} : vector<2x3x32xf32> to vector<1x1x32xf32>
    %554 = vector.shape_cast %553 : vector<1x1x32xf32> to vector<1x32xf32>
    %555 = vector.broadcast %554 : vector<1x32xf32> to vector<32x32xf32>
    %556 = arith.mulf %538, %555 : vector<32x32xf32>
    %557 = arith.addf %552, %556 : vector<32x32xf32>
    %c31_i32_139 = arith.constant 31 : i32
    %558 = tpu.dynamic_rotate %538 by %c31_i32_139 dim 0 : vector<32x32xf32>, i32 -> vector<32x32xf32>
    %c-1_i32_140 = arith.constant -1 : i32
    %559 = vector.broadcast %c-1_i32_140 : i32 to vector<32x1xi32>
    %560 = arith.cmpi sge, %19, %559 : vector<32x1xi32>
    %c15_i32_141 = arith.constant 15 : i32
    %561 = vector.broadcast %c15_i32_141 : i32 to vector<32x1xi32>
    %562 = arith.cmpi slt, %19, %561 : vector<32x1xi32>
    %563 = arith.andi %560, %562 : vector<32x1xi1>
    %564 = arith.extui %563 : vector<32x1xi1> to vector<32x1xi32>
    %565 = arith.sitofp %564 : vector<32x1xi32> to vector<32x1xf32>
    %566 = vector.broadcast %565 : vector<32x1xf32> to vector<32x32xf32>
    %567 = arith.mulf %558, %566 : vector<32x32xf32>
    %568 = vector.extract_strided_slice %522 {offsets = [0, 2, 0], sizes = [1, 1, 32], strides = [1, 1, 1]} : vector<2x3x32xf32> to vector<1x1x32xf32>
    %569 = vector.shape_cast %568 : vector<1x1x32xf32> to vector<1x32xf32>
    %570 = vector.broadcast %569 : vector<1x32xf32> to vector<32x32xf32>
    %571 = arith.mulf %567, %570 : vector<32x32xf32>
    %572 = arith.addf %557, %571 : vector<32x32xf32>
    %573 = vector.extract_strided_slice %524 {offsets = [0, 0, 0], sizes = [1, 1, 32], strides = [1, 1, 1]} : vector<2x1x32xf32> to vector<1x1x32xf32>
    %574 = vector.shape_cast %573 : vector<1x1x32xf32> to vector<1x32xf32>
    %575 = vector.broadcast %574 : vector<1x32xf32> to vector<32x32xf32>
    %576 = arith.addf %572, %575 : vector<32x32xf32>
    %577 = vector.extract_strided_slice %526 {offsets = [0, 0, 0], sizes = [1, 1, 32], strides = [1, 1, 1]} : vector<2x1x32xf32> to vector<1x1x32xf32>
    %578 = vector.shape_cast %577 : vector<1x1x32xf32> to vector<1x32xf32>
    %579 = vector.extract_strided_slice %528 {offsets = [0, 0, 0], sizes = [1, 1, 32], strides = [1, 1, 1]} : vector<2x1x32xf32> to vector<1x1x32xf32>
    %580 = vector.shape_cast %579 : vector<1x1x32xf32> to vector<1x32xf32>
    %cst_142 = arith.constant dense<0.000000e+00> : vector<32xf32>
    %581 = vector.multi_reduction <add>, %576, %cst_142 [1] : vector<32x32xf32> to vector<32xf32>
    %582 = vector.shape_cast %581 : vector<32xf32> to vector<32x1xf32>
    %cst_143 = arith.constant 3.200000e+01 : f32
    %583 = vector.broadcast %cst_143 : f32 to vector<32x1xf32>
    %584 = arith.divf %582, %583 : vector<32x1xf32>
    %585 = vector.broadcast %584 : vector<32x1xf32> to vector<32x32xf32>
    %586 = arith.subf %576, %585 : vector<32x32xf32>
    %587 = arith.mulf %586, %586 : vector<32x32xf32>
    %cst_144 = arith.constant dense<0.000000e+00> : vector<32xf32>
    %588 = vector.multi_reduction <add>, %587, %cst_144 [1] : vector<32x32xf32> to vector<32xf32>
    %589 = vector.shape_cast %588 : vector<32xf32> to vector<32x1xf32>
    %cst_145 = arith.constant 3.200000e+01 : f32
    %590 = vector.broadcast %cst_145 : f32 to vector<32x1xf32>
    %591 = arith.divf %589, %590 : vector<32x1xf32>
    %592 = vector.broadcast %584 : vector<32x1xf32> to vector<32x32xf32>
    %593 = arith.subf %576, %592 : vector<32x32xf32>
    %cst_146 = arith.constant 9.99999974E-6 : f32
    %594 = vector.broadcast %cst_146 : f32 to vector<32x1xf32>
    %595 = arith.addf %591, %594 : vector<32x1xf32>
    %596 = math.rsqrt %595 : vector<32x1xf32>
    %597 = vector.broadcast %596 : vector<32x1xf32> to vector<32x32xf32>
    %598 = arith.mulf %593, %597 : vector<32x32xf32>
    %599 = vector.broadcast %578 : vector<1x32xf32> to vector<32x32xf32>
    %600 = arith.mulf %598, %599 : vector<32x32xf32>
    %601 = vector.broadcast %580 : vector<1x32xf32> to vector<32x32xf32>
    %602 = arith.addf %600, %601 : vector<32x32xf32>
    %cst_147 = arith.constant 5.000000e-01 : f32
    %603 = vector.broadcast %cst_147 : f32 to vector<32x32xf32>
    %604 = arith.mulf %603, %602 : vector<32x32xf32>
    %cst_148 = arith.constant 4.471500e-02 : f32
    %605 = vector.broadcast %cst_148 : f32 to vector<32x32xf32>
    %606 = arith.mulf %605, %602 : vector<32x32xf32>
    %607 = arith.mulf %606, %602 : vector<32x32xf32>
    %608 = arith.mulf %607, %602 : vector<32x32xf32>
    %609 = arith.addf %602, %608 : vector<32x32xf32>
    %cst_149 = arith.constant 0.797884583 : f32
    %610 = vector.broadcast %cst_149 : f32 to vector<32x32xf32>
    %611 = arith.mulf %610, %609 : vector<32x32xf32>
    %612 = math.tanh %611 : vector<32x32xf32>
    %cst_150 = arith.constant 1.000000e+00 : f32
    %613 = vector.broadcast %cst_150 : f32 to vector<32x32xf32>
    %614 = arith.addf %613, %612 : vector<32x32xf32>
    %615 = arith.mulf %604, %614 : vector<32x32xf32>
    %616 = vector.extract_strided_slice %530 {offsets = [0, 0, 0], sizes = [1, 32, 32], strides = [1, 1, 1]} : vector<2x32x32xf32> to vector<1x32x32xf32>
    %617 = vector.shape_cast %616 : vector<1x32x32xf32> to vector<32x32xf32>
    %618 = arith.truncf %615 : vector<32x32xf32> to vector<32x32xbf16>
    %619 = arith.truncf %617 : vector<32x32xf32> to vector<32x32xbf16>
    %cst_151 = arith.constant dense<0.000000e+00> : vector<32x32xf32>
    %620 = tpu.matmul %618, %619, %cst_151 {dimension_numbers = #tpu.dot_dimension_numbers<[1], [0], [0], [1], [0, 0, 1, 1], [], []>} : vector<32x32xbf16>, vector<32x32xbf16>, vector<32x32xf32> -> vector<32x32xf32>
    %621 = vector.extract_strided_slice %532 {offsets = [0, 0, 0], sizes = [1, 1, 32], strides = [1, 1, 1]} : vector<2x1x32xf32> to vector<1x1x32xf32>
    %622 = vector.shape_cast %621 : vector<1x1x32xf32> to vector<1x32xf32>
    %623 = vector.broadcast %622 : vector<1x32xf32> to vector<32x32xf32>
    %624 = arith.addf %620, %623 : vector<32x32xf32>
    %625 = vector.extract_strided_slice %534 {offsets = [0, 0, 0], sizes = [1, 1, 32], strides = [1, 1, 1]} : vector<2x1x32xf32> to vector<1x1x32xf32>
    %626 = vector.shape_cast %625 : vector<1x1x32xf32> to vector<1x32xf32>
    %627 = vector.extract_strided_slice %536 {offsets = [0, 0, 0], sizes = [1, 1, 32], strides = [1, 1, 1]} : vector<2x1x32xf32> to vector<1x1x32xf32>
    %628 = vector.shape_cast %627 : vector<1x1x32xf32> to vector<1x32xf32>
    %cst_152 = arith.constant dense<0.000000e+00> : vector<32xf32>
    %629 = vector.multi_reduction <add>, %624, %cst_152 [1] : vector<32x32xf32> to vector<32xf32>
    %630 = vector.shape_cast %629 : vector<32xf32> to vector<32x1xf32>
    %cst_153 = arith.constant 3.200000e+01 : f32
    %631 = vector.broadcast %cst_153 : f32 to vector<32x1xf32>
    %632 = arith.divf %630, %631 : vector<32x1xf32>
    %633 = vector.broadcast %632 : vector<32x1xf32> to vector<32x32xf32>
    %634 = arith.subf %624, %633 : vector<32x32xf32>
    %635 = arith.mulf %634, %634 : vector<32x32xf32>
    %cst_154 = arith.constant dense<0.000000e+00> : vector<32xf32>
    %636 = vector.multi_reduction <add>, %635, %cst_154 [1] : vector<32x32xf32> to vector<32xf32>
    %637 = vector.shape_cast %636 : vector<32xf32> to vector<32x1xf32>
    %cst_155 = arith.constant 3.200000e+01 : f32
    %638 = vector.broadcast %cst_155 : f32 to vector<32x1xf32>
    %639 = arith.divf %637, %638 : vector<32x1xf32>
    %640 = vector.broadcast %632 : vector<32x1xf32> to vector<32x32xf32>
    %641 = arith.subf %624, %640 : vector<32x32xf32>
    %cst_156 = arith.constant 9.99999974E-6 : f32
    %642 = vector.broadcast %cst_156 : f32 to vector<32x1xf32>
    %643 = arith.addf %639, %642 : vector<32x1xf32>
    %644 = math.rsqrt %643 : vector<32x1xf32>
    %645 = vector.broadcast %644 : vector<32x1xf32> to vector<32x32xf32>
    %646 = arith.mulf %641, %645 : vector<32x32xf32>
    %647 = vector.broadcast %626 : vector<1x32xf32> to vector<32x32xf32>
    %648 = arith.mulf %646, %647 : vector<32x32xf32>
    %649 = vector.broadcast %628 : vector<1x32xf32> to vector<32x32xf32>
    %650 = arith.addf %648, %649 : vector<32x32xf32>
    %cst_157 = arith.constant 5.000000e-01 : f32
    %651 = vector.broadcast %cst_157 : f32 to vector<32x32xf32>
    %652 = arith.mulf %651, %650 : vector<32x32xf32>
    %cst_158 = arith.constant 4.471500e-02 : f32
    %653 = vector.broadcast %cst_158 : f32 to vector<32x32xf32>
    %654 = arith.mulf %653, %650 : vector<32x32xf32>
    %655 = arith.mulf %654, %650 : vector<32x32xf32>
    %656 = arith.mulf %655, %650 : vector<32x32xf32>
    %657 = arith.addf %650, %656 : vector<32x32xf32>
    %cst_159 = arith.constant 0.797884583 : f32
    %658 = vector.broadcast %cst_159 : f32 to vector<32x32xf32>
    %659 = arith.mulf %658, %657 : vector<32x32xf32>
    %660 = math.tanh %659 : vector<32x32xf32>
    %cst_160 = arith.constant 1.000000e+00 : f32
    %661 = vector.broadcast %cst_160 : f32 to vector<32x32xf32>
    %662 = arith.addf %661, %660 : vector<32x32xf32>
    %663 = arith.mulf %652, %662 : vector<32x32xf32>
    %664 = arith.addf %520, %663 : vector<32x32xf32>
    %665 = vector.broadcast %1 : vector<32x1xf32> to vector<32x32xf32>
    %666 = arith.mulf %664, %665 : vector<32x32xf32>
    %c3_i32_161 = arith.constant 3 : i32
    %667 = tpu.dynamic_rotate %666 by %c3_i32_161 dim 0 : vector<32x32xf32>, i32 -> vector<32x32xf32>
    %c3_i32_162 = arith.constant 3 : i32
    %668 = vector.broadcast %c3_i32_162 : i32 to vector<32x1xi32>
    %669 = arith.cmpi sge, %19, %668 : vector<32x1xi32>
    %c19_i32_163 = arith.constant 19 : i32
    %670 = vector.broadcast %c19_i32_163 : i32 to vector<32x1xi32>
    %671 = arith.cmpi slt, %19, %670 : vector<32x1xi32>
    %672 = arith.andi %669, %671 : vector<32x1xi1>
    %673 = arith.extui %672 : vector<32x1xi1> to vector<32x1xi32>
    %674 = arith.sitofp %673 : vector<32x1xi32> to vector<32x1xf32>
    %675 = vector.broadcast %674 : vector<32x1xf32> to vector<32x32xf32>
    %676 = arith.mulf %667, %675 : vector<32x32xf32>
    %677 = vector.extract_strided_slice %522 {offsets = [1, 0, 0], sizes = [1, 1, 32], strides = [1, 1, 1]} : vector<2x3x32xf32> to vector<1x1x32xf32>
    %678 = vector.shape_cast %677 : vector<1x1x32xf32> to vector<1x32xf32>
    %679 = vector.broadcast %678 : vector<1x32xf32> to vector<32x32xf32>
    %680 = arith.mulf %676, %679 : vector<32x32xf32>
    %681 = vector.extract_strided_slice %522 {offsets = [1, 1, 0], sizes = [1, 1, 32], strides = [1, 1, 1]} : vector<2x3x32xf32> to vector<1x1x32xf32>
    %682 = vector.shape_cast %681 : vector<1x1x32xf32> to vector<1x32xf32>
    %683 = vector.broadcast %682 : vector<1x32xf32> to vector<32x32xf32>
    %684 = arith.mulf %666, %683 : vector<32x32xf32>
    %685 = arith.addf %680, %684 : vector<32x32xf32>
    %c29_i32_164 = arith.constant 29 : i32
    %686 = tpu.dynamic_rotate %666 by %c29_i32_164 dim 0 : vector<32x32xf32>, i32 -> vector<32x32xf32>
    %c-3_i32_165 = arith.constant -3 : i32
    %687 = vector.broadcast %c-3_i32_165 : i32 to vector<32x1xi32>
    %688 = arith.cmpi sge, %19, %687 : vector<32x1xi32>
    %c13_i32_166 = arith.constant 13 : i32
    %689 = vector.broadcast %c13_i32_166 : i32 to vector<32x1xi32>
    %690 = arith.cmpi slt, %19, %689 : vector<32x1xi32>
    %691 = arith.andi %688, %690 : vector<32x1xi1>
    %692 = arith.extui %691 : vector<32x1xi1> to vector<32x1xi32>
    %693 = arith.sitofp %692 : vector<32x1xi32> to vector<32x1xf32>
    %694 = vector.broadcast %693 : vector<32x1xf32> to vector<32x32xf32>
    %695 = arith.mulf %686, %694 : vector<32x32xf32>
    %696 = vector.extract_strided_slice %522 {offsets = [1, 2, 0], sizes = [1, 1, 32], strides = [1, 1, 1]} : vector<2x3x32xf32> to vector<1x1x32xf32>
    %697 = vector.shape_cast %696 : vector<1x1x32xf32> to vector<1x32xf32>
    %698 = vector.broadcast %697 : vector<1x32xf32> to vector<32x32xf32>
    %699 = arith.mulf %695, %698 : vector<32x32xf32>
    %700 = arith.addf %685, %699 : vector<32x32xf32>
    %701 = vector.extract_strided_slice %524 {offsets = [1, 0, 0], sizes = [1, 1, 32], strides = [1, 1, 1]} : vector<2x1x32xf32> to vector<1x1x32xf32>
    %702 = vector.shape_cast %701 : vector<1x1x32xf32> to vector<1x32xf32>
    %703 = vector.broadcast %702 : vector<1x32xf32> to vector<32x32xf32>
    %704 = arith.addf %700, %703 : vector<32x32xf32>
    %705 = vector.extract_strided_slice %526 {offsets = [1, 0, 0], sizes = [1, 1, 32], strides = [1, 1, 1]} : vector<2x1x32xf32> to vector<1x1x32xf32>
    %706 = vector.shape_cast %705 : vector<1x1x32xf32> to vector<1x32xf32>
    %707 = vector.extract_strided_slice %528 {offsets = [1, 0, 0], sizes = [1, 1, 32], strides = [1, 1, 1]} : vector<2x1x32xf32> to vector<1x1x32xf32>
    %708 = vector.shape_cast %707 : vector<1x1x32xf32> to vector<1x32xf32>
    %cst_167 = arith.constant dense<0.000000e+00> : vector<32xf32>
    %709 = vector.multi_reduction <add>, %704, %cst_167 [1] : vector<32x32xf32> to vector<32xf32>
    %710 = vector.shape_cast %709 : vector<32xf32> to vector<32x1xf32>
    %cst_168 = arith.constant 3.200000e+01 : f32
    %711 = vector.broadcast %cst_168 : f32 to vector<32x1xf32>
    %712 = arith.divf %710, %711 : vector<32x1xf32>
    %713 = vector.broadcast %712 : vector<32x1xf32> to vector<32x32xf32>
    %714 = arith.subf %704, %713 : vector<32x32xf32>
    %715 = arith.mulf %714, %714 : vector<32x32xf32>
    %cst_169 = arith.constant dense<0.000000e+00> : vector<32xf32>
    %716 = vector.multi_reduction <add>, %715, %cst_169 [1] : vector<32x32xf32> to vector<32xf32>
    %717 = vector.shape_cast %716 : vector<32xf32> to vector<32x1xf32>
    %cst_170 = arith.constant 3.200000e+01 : f32
    %718 = vector.broadcast %cst_170 : f32 to vector<32x1xf32>
    %719 = arith.divf %717, %718 : vector<32x1xf32>
    %720 = vector.broadcast %712 : vector<32x1xf32> to vector<32x32xf32>
    %721 = arith.subf %704, %720 : vector<32x32xf32>
    %cst_171 = arith.constant 9.99999974E-6 : f32
    %722 = vector.broadcast %cst_171 : f32 to vector<32x1xf32>
    %723 = arith.addf %719, %722 : vector<32x1xf32>
    %724 = math.rsqrt %723 : vector<32x1xf32>
    %725 = vector.broadcast %724 : vector<32x1xf32> to vector<32x32xf32>
    %726 = arith.mulf %721, %725 : vector<32x32xf32>
    %727 = vector.broadcast %706 : vector<1x32xf32> to vector<32x32xf32>
    %728 = arith.mulf %726, %727 : vector<32x32xf32>
    %729 = vector.broadcast %708 : vector<1x32xf32> to vector<32x32xf32>
    %730 = arith.addf %728, %729 : vector<32x32xf32>
    %cst_172 = arith.constant 5.000000e-01 : f32
    %731 = vector.broadcast %cst_172 : f32 to vector<32x32xf32>
    %732 = arith.mulf %731, %730 : vector<32x32xf32>
    %cst_173 = arith.constant 4.471500e-02 : f32
    %733 = vector.broadcast %cst_173 : f32 to vector<32x32xf32>
    %734 = arith.mulf %733, %730 : vector<32x32xf32>
    %735 = arith.mulf %734, %730 : vector<32x32xf32>
    %736 = arith.mulf %735, %730 : vector<32x32xf32>
    %737 = arith.addf %730, %736 : vector<32x32xf32>
    %cst_174 = arith.constant 0.797884583 : f32
    %738 = vector.broadcast %cst_174 : f32 to vector<32x32xf32>
    %739 = arith.mulf %738, %737 : vector<32x32xf32>
    %740 = math.tanh %739 : vector<32x32xf32>
    %cst_175 = arith.constant 1.000000e+00 : f32
    %741 = vector.broadcast %cst_175 : f32 to vector<32x32xf32>
    %742 = arith.addf %741, %740 : vector<32x32xf32>
    %743 = arith.mulf %732, %742 : vector<32x32xf32>
    %744 = vector.extract_strided_slice %530 {offsets = [1, 0, 0], sizes = [1, 32, 32], strides = [1, 1, 1]} : vector<2x32x32xf32> to vector<1x32x32xf32>
    %745 = vector.shape_cast %744 : vector<1x32x32xf32> to vector<32x32xf32>
    %746 = arith.truncf %743 : vector<32x32xf32> to vector<32x32xbf16>
    %747 = arith.truncf %745 : vector<32x32xf32> to vector<32x32xbf16>
    %cst_176 = arith.constant dense<0.000000e+00> : vector<32x32xf32>
    %748 = tpu.matmul %746, %747, %cst_176 {dimension_numbers = #tpu.dot_dimension_numbers<[1], [0], [0], [1], [0, 0, 1, 1], [], []>} : vector<32x32xbf16>, vector<32x32xbf16>, vector<32x32xf32> -> vector<32x32xf32>
    %749 = vector.extract_strided_slice %532 {offsets = [1, 0, 0], sizes = [1, 1, 32], strides = [1, 1, 1]} : vector<2x1x32xf32> to vector<1x1x32xf32>
    %750 = vector.shape_cast %749 : vector<1x1x32xf32> to vector<1x32xf32>
    %751 = vector.broadcast %750 : vector<1x32xf32> to vector<32x32xf32>
    %752 = arith.addf %748, %751 : vector<32x32xf32>
    %753 = vector.extract_strided_slice %534 {offsets = [1, 0, 0], sizes = [1, 1, 32], strides = [1, 1, 1]} : vector<2x1x32xf32> to vector<1x1x32xf32>
    %754 = vector.shape_cast %753 : vector<1x1x32xf32> to vector<1x32xf32>
    %755 = vector.extract_strided_slice %536 {offsets = [1, 0, 0], sizes = [1, 1, 32], strides = [1, 1, 1]} : vector<2x1x32xf32> to vector<1x1x32xf32>
    %756 = vector.shape_cast %755 : vector<1x1x32xf32> to vector<1x32xf32>
    %cst_177 = arith.constant dense<0.000000e+00> : vector<32xf32>
    %757 = vector.multi_reduction <add>, %752, %cst_177 [1] : vector<32x32xf32> to vector<32xf32>
    %758 = vector.shape_cast %757 : vector<32xf32> to vector<32x1xf32>
    %cst_178 = arith.constant 3.200000e+01 : f32
    %759 = vector.broadcast %cst_178 : f32 to vector<32x1xf32>
    %760 = arith.divf %758, %759 : vector<32x1xf32>
    %761 = vector.broadcast %760 : vector<32x1xf32> to vector<32x32xf32>
    %762 = arith.subf %752, %761 : vector<32x32xf32>
    %763 = arith.mulf %762, %762 : vector<32x32xf32>
    %cst_179 = arith.constant dense<0.000000e+00> : vector<32xf32>
    %764 = vector.multi_reduction <add>, %763, %cst_179 [1] : vector<32x32xf32> to vector<32xf32>
    %765 = vector.shape_cast %764 : vector<32xf32> to vector<32x1xf32>
    %cst_180 = arith.constant 3.200000e+01 : f32
    %766 = vector.broadcast %cst_180 : f32 to vector<32x1xf32>
    %767 = arith.divf %765, %766 : vector<32x1xf32>
    %768 = vector.broadcast %760 : vector<32x1xf32> to vector<32x32xf32>
    %769 = arith.subf %752, %768 : vector<32x32xf32>
    %cst_181 = arith.constant 9.99999974E-6 : f32
    %770 = vector.broadcast %cst_181 : f32 to vector<32x1xf32>
    %771 = arith.addf %767, %770 : vector<32x1xf32>
    %772 = math.rsqrt %771 : vector<32x1xf32>
    %773 = vector.broadcast %772 : vector<32x1xf32> to vector<32x32xf32>
    %774 = arith.mulf %769, %773 : vector<32x32xf32>
    %775 = vector.broadcast %754 : vector<1x32xf32> to vector<32x32xf32>
    %776 = arith.mulf %774, %775 : vector<32x32xf32>
    %777 = vector.broadcast %756 : vector<1x32xf32> to vector<32x32xf32>
    %778 = arith.addf %776, %777 : vector<32x32xf32>
    %cst_182 = arith.constant 5.000000e-01 : f32
    %779 = vector.broadcast %cst_182 : f32 to vector<32x32xf32>
    %780 = arith.mulf %779, %778 : vector<32x32xf32>
    %cst_183 = arith.constant 4.471500e-02 : f32
    %781 = vector.broadcast %cst_183 : f32 to vector<32x32xf32>
    %782 = arith.mulf %781, %778 : vector<32x32xf32>
    %783 = arith.mulf %782, %778 : vector<32x32xf32>
    %784 = arith.mulf %783, %778 : vector<32x32xf32>
    %785 = arith.addf %778, %784 : vector<32x32xf32>
    %cst_184 = arith.constant 0.797884583 : f32
    %786 = vector.broadcast %cst_184 : f32 to vector<32x32xf32>
    %787 = arith.mulf %786, %785 : vector<32x32xf32>
    %788 = math.tanh %787 : vector<32x32xf32>
    %cst_185 = arith.constant 1.000000e+00 : f32
    %789 = vector.broadcast %cst_185 : f32 to vector<32x32xf32>
    %790 = arith.addf %789, %788 : vector<32x32xf32>
    %791 = arith.mulf %780, %790 : vector<32x32xf32>
    %792 = arith.addf %664, %791 : vector<32x32xf32>
    %793 = vector.broadcast %1 : vector<32x1xf32> to vector<32x32xf32>
    %794 = arith.mulf %792, %793 : vector<32x32xf32>
    %795 = vector.extract_strided_slice %32 {offsets = [1, 0, 0], sizes = [1, 32, 29], strides = [1, 1, 1]} : vector<2x32x29xf32> to vector<1x32x29xf32>
    %796 = vector.shape_cast %795 : vector<1x32x29xf32> to vector<32x29xf32>
    %797 = arith.truncf %794 : vector<32x32xf32> to vector<32x32xbf16>
    %798 = arith.truncf %796 : vector<32x29xf32> to vector<32x29xbf16>
    %cst_186 = arith.constant dense<0.000000e+00> : vector<32x29xf32>
    %799 = tpu.matmul %797, %798, %cst_186 {dimension_numbers = #tpu.dot_dimension_numbers<[1], [0], [0], [1], [0, 0, 1, 1], [], []>} : vector<32x32xbf16>, vector<32x29xbf16>, vector<32x29xf32> -> vector<32x29xf32>
    %800 = vector.extract_strided_slice %33 {offsets = [1, 0, 0], sizes = [1, 1, 29], strides = [1, 1, 1]} : vector<2x1x29xf32> to vector<1x1x29xf32>
    %801 = vector.shape_cast %800 : vector<1x1x29xf32> to vector<1x29xf32>
    %802 = vector.broadcast %801 : vector<1x29xf32> to vector<32x29xf32>
    %803 = arith.addf %799, %802 : vector<32x29xf32>
    %804 = vector.broadcast %1 : vector<32x1xf32> to vector<32x29xf32>
    %805 = arith.mulf %803, %804 : vector<32x29xf32>
    %806 = vector.extract_strided_slice %805 {offsets = [0, 0], sizes = [32, 10], strides = [1, 1]} : vector<32x29xf32> to vector<32x10xf32>
    %cst_187 = arith.constant 0.176776692 : f32
    %807 = vector.broadcast %cst_187 : f32 to vector<32x10xf32>
    %808 = arith.mulf %806, %807 : vector<32x10xf32>
    %809 = vector.extract_strided_slice %805 {offsets = [0, 10], sizes = [32, 10], strides = [1, 1]} : vector<32x29xf32> to vector<32x10xf32>
    %cst_188 = arith.constant 0.176776692 : f32
    %810 = vector.broadcast %cst_188 : f32 to vector<32x10xf32>
    %811 = arith.mulf %809, %810 : vector<32x10xf32>
    %812 = vector.extract_strided_slice %805 {offsets = [0, 20], sizes = [32, 9], strides = [1, 1]} : vector<32x29xf32> to vector<32x9xf32>
    %cst_189 = arith.constant -5.000000e+00 : f32
    %813 = vector.broadcast %cst_189 : f32 to vector<32x1xf32>
    %814 = arith.cmpf oge, %510, %813 : vector<32x1xf32>
    %cst_190 = arith.constant 5.000000e+00 : f32
    %815 = vector.broadcast %cst_190 : f32 to vector<32x1xf32>
    %816 = arith.cmpf ole, %510, %815 : vector<32x1xf32>
    %817 = arith.andi %814, %816 : vector<32x1xi1>
    %cst_191 = arith.constant -5.000000e+00 : f32
    %cst_192 = arith.constant 5.000000e+00 : f32
    %818 = vector.broadcast %cst_191 : f32 to vector<32x1xf32>
    %819 = arith.maximumf %818, %510 : vector<32x1xf32>
    %820 = vector.broadcast %cst_192 : f32 to vector<32x1xf32>
    %821 = arith.minimumf %820, %819 : vector<32x1xf32>
    %822 = tpu.concatenate %808, %811 in 0 : vector<32x10xf32>, vector<32x10xf32> -> vector<64x10xf32>
    %cst_193 = arith.constant dense<0xFF800000> : vector<64xf32>
    %823 = vector.multi_reduction <maximumf>, %822, %cst_193 [1] : vector<64x10xf32> to vector<64xf32>
    %824 = vector.shape_cast %823 : vector<64xf32> to vector<64x1xf32>
    %825 = vector.broadcast %824 : vector<64x1xf32> to vector<64x10xf32>
    %826 = arith.subf %822, %825 : vector<64x10xf32>
    %827 = math.exp %826 : vector<64x10xf32>
    %cst_194 = arith.constant dense<0.000000e+00> : vector<64xf32>
    %828 = vector.multi_reduction <add>, %827, %cst_194 [1] : vector<64x10xf32> to vector<64xf32>
    %829 = vector.shape_cast %828 : vector<64xf32> to vector<64x1xf32>
    %830 = tpu.reciprocal %829 {approx = true} : vector<64x1xf32> -> vector<64x1xf32>
    %831 = vector.broadcast %830 : vector<64x1xf32> to vector<64x10xf32>
    %832 = arith.mulf %827, %831 : vector<64x10xf32>
    %cst_195 = arith.constant 9.900000e-01 : f32
    %833 = vector.broadcast %cst_195 : f32 to vector<64x10xf32>
    %834 = arith.mulf %833, %832 : vector<64x10xf32>
    %cst_196 = arith.constant 1.000000e-03 : f32
    %835 = vector.broadcast %cst_196 : f32 to vector<64x10xf32>
    %836 = arith.addf %835, %834 : vector<64x10xf32>
    %cst_197 = arith.constant dense<0.000000e+00> : vector<64x11xf32>
    %837 = tpu.matmul %836, %38, %cst_197 {dimension_numbers = #tpu.dot_dimension_numbers<[1], [0], [0], [1], [0, 0, 1, 1], [], []>} : vector<64x10xf32>, vector<10x11xf32>, vector<64x11xf32> -> vector<64x11xf32>
    %cst_198 = arith.constant 1.000000e+01 : f32
    %838 = vector.broadcast %cst_198 : f32 to vector<64x11xf32>
    %839 = arith.mulf %838, %837 : vector<64x11xf32>
    %cst_199 = arith.constant -5.000000e+00 : f32
    %840 = vector.broadcast %cst_199 : f32 to vector<64x11xf32>
    %841 = arith.addf %839, %840 : vector<64x11xf32>
    %c0_i32_200 = arith.constant 0 : i32
    %842 = vector.broadcast %c0_i32_200 : i32 to vector<64x11xi32>
    %843 = arith.cmpi eq, %39, %842 : vector<64x11xi32>
    %c10_i32_201 = arith.constant 10 : i32
    %844 = vector.broadcast %c10_i32_201 : i32 to vector<64x11xi32>
    %845 = arith.cmpi eq, %39, %844 : vector<64x11xi32>
    %cst_202 = arith.constant 5.000000e+00 : f32
    %846 = vector.broadcast %cst_202 : f32 to vector<64x11xf32>
    %847 = arith.select %845, %846, %841 : vector<64x11xi1>, vector<64x11xf32>
    %cst_203 = arith.constant -5.000000e+00 : f32
    %848 = vector.broadcast %cst_203 : f32 to vector<64x11xf32>
    %849 = arith.select %843, %848, %847 : vector<64x11xi1>, vector<64x11xf32>
    %850 = vector.extract_strided_slice %849 {offsets = [0, 1], sizes = [64, 10], strides = [1, 1]} : vector<64x11xf32> to vector<64x10xf32>
    %851 = vector.extract_strided_slice %849 {offsets = [0, 0], sizes = [64, 10], strides = [1, 1]} : vector<64x11xf32> to vector<64x10xf32>
    %852 = arith.subf %850, %851 : vector<64x10xf32>
    %853 = vector.extract_strided_slice %849 {offsets = [0, 0], sizes = [32, 11], strides = [1, 1]} : vector<64x11xf32> to vector<32x11xf32>
    %854 = vector.extract_strided_slice %849 {offsets = [32, 0], sizes = [32, 11], strides = [1, 1]} : vector<64x11xf32> to vector<32x11xf32>
    %855 = vector.extract_strided_slice %852 {offsets = [0, 0], sizes = [32, 10], strides = [1, 1]} : vector<64x10xf32> to vector<32x10xf32>
    %856 = vector.extract_strided_slice %852 {offsets = [32, 0], sizes = [32, 10], strides = [1, 1]} : vector<64x10xf32> to vector<32x10xf32>
    %cst_204 = arith.constant 0.53974241 : f32
    %857 = vector.broadcast %cst_204 : f32 to vector<32x1xf32>
    %858 = tpu.concatenate %857, %812, %857 in 1 : vector<32x1xf32>, vector<32x9xf32>, vector<32x1xf32> -> vector<32x11xf32>
    %cst_205 = arith.constant 2.000000e+01 : f32
    %859 = vector.broadcast %cst_205 : f32 to vector<32x11xf32>
    %860 = arith.cmpf ogt, %858, %859 : vector<32x11xf32>
    %cst_206 = arith.constant 2.000000e+01 : f32
    %861 = vector.broadcast %cst_206 : f32 to vector<32x11xf32>
    %862 = arith.minimumf %858, %861 : vector<32x11xf32>
    %863 = math.exp %862 : vector<32x11xf32>
    %cst_207 = arith.constant 1.000000e+00 : f32
    %864 = vector.broadcast %cst_207 : f32 to vector<32x11xf32>
    %865 = arith.addf %864, %863 : vector<32x11xf32>
    %866 = math.log %865 : vector<32x11xf32>
    %867 = arith.select %860, %858, %866 : vector<32x11xi1>, vector<32x11xf32>
    %cst_208 = arith.constant 1.000000e-03 : f32
    %868 = vector.broadcast %cst_208 : f32 to vector<32x11xf32>
    %869 = arith.addf %868, %867 : vector<32x11xf32>
    %c10_i32_209 = arith.constant 10 : i32
    %870 = vector.broadcast %c10_i32_209 : i32 to vector<32x11xi32>
    %871 = arith.cmpi eq, %40, %870 : vector<32x11xi32>
    %cst_210 = arith.constant 9.99999997E-7 : f32
    %cst_211 = arith.constant 0.000000e+00 : f32
    %872 = vector.broadcast %cst_210 : f32 to vector<32x11xf32>
    %873 = vector.broadcast %cst_211 : f32 to vector<32x11xf32>
    %874 = arith.select %871, %872, %873 : vector<32x11xi1>, vector<32x11xf32>
    %875 = arith.addf %853, %874 : vector<32x11xf32>
    %876 = vector.broadcast %821 : vector<32x1xf32> to vector<32x11xf32>
    %877 = arith.cmpf oge, %876, %875 : vector<32x11xf32>
    %878 = arith.extui %877 : vector<32x11xi1> to vector<32x11xi32>
    %cst_212 = arith.constant dense<0> : vector<32xi32>
    %879 = vector.multi_reduction <add>, %878, %cst_212 [1] : vector<32x11xi32> to vector<32xi32>
    %880 = vector.shape_cast %879 : vector<32xi32> to vector<32x1xi32>
    %c1_i32_213 = arith.constant 1 : i32
    %881 = vector.broadcast %c1_i32_213 : i32 to vector<32x1xi32>
    %882 = arith.subi %880, %881 : vector<32x1xi32>
    %883 = vector.broadcast %882 : vector<32x1xi32> to vector<32x10xi32>
    %884 = arith.cmpi eq, %41, %883 : vector<32x10xi32>
    %885 = arith.extui %884 : vector<32x10xi1> to vector<32x10xi32>
    %886 = arith.sitofp %885 : vector<32x10xi32> to vector<32x10xf32>
    %887 = vector.extract_strided_slice %853 {offsets = [0, 0], sizes = [32, 10], strides = [1, 1]} : vector<32x11xf32> to vector<32x10xf32>
    %888 = arith.mulf %887, %886 : vector<32x10xf32>
    %cst_214 = arith.constant dense<0.000000e+00> : vector<32xf32>
    %889 = vector.multi_reduction <add>, %888, %cst_214 [1] : vector<32x10xf32> to vector<32xf32>
    %890 = vector.shape_cast %889 : vector<32xf32> to vector<32x1xf32>
    %891 = arith.mulf %855, %886 : vector<32x10xf32>
    %cst_215 = arith.constant dense<0.000000e+00> : vector<32xf32>
    %892 = vector.multi_reduction <add>, %891, %cst_215 [1] : vector<32x10xf32> to vector<32xf32>
    %893 = vector.shape_cast %892 : vector<32xf32> to vector<32x1xf32>
    %894 = vector.extract_strided_slice %854 {offsets = [0, 0], sizes = [32, 10], strides = [1, 1]} : vector<32x11xf32> to vector<32x10xf32>
    %895 = arith.mulf %894, %886 : vector<32x10xf32>
    %cst_216 = arith.constant dense<0.000000e+00> : vector<32xf32>
    %896 = vector.multi_reduction <add>, %895, %cst_216 [1] : vector<32x10xf32> to vector<32xf32>
    %897 = vector.shape_cast %896 : vector<32xf32> to vector<32x1xf32>
    %898 = arith.mulf %856, %886 : vector<32x10xf32>
    %cst_217 = arith.constant dense<0.000000e+00> : vector<32xf32>
    %899 = vector.multi_reduction <add>, %898, %cst_217 [1] : vector<32x10xf32> to vector<32xf32>
    %900 = vector.shape_cast %899 : vector<32xf32> to vector<32x1xf32>
    %901 = vector.extract_strided_slice %869 {offsets = [0, 0], sizes = [32, 10], strides = [1, 1]} : vector<32x11xf32> to vector<32x10xf32>
    %902 = arith.mulf %901, %886 : vector<32x10xf32>
    %cst_218 = arith.constant dense<0.000000e+00> : vector<32xf32>
    %903 = vector.multi_reduction <add>, %902, %cst_218 [1] : vector<32x10xf32> to vector<32xf32>
    %904 = vector.shape_cast %903 : vector<32xf32> to vector<32x1xf32>
    %905 = vector.extract_strided_slice %869 {offsets = [0, 1], sizes = [32, 10], strides = [1, 1]} : vector<32x11xf32> to vector<32x10xf32>
    %906 = arith.mulf %905, %886 : vector<32x10xf32>
    %cst_219 = arith.constant dense<0.000000e+00> : vector<32xf32>
    %907 = vector.multi_reduction <add>, %906, %cst_219 [1] : vector<32x10xf32> to vector<32xf32>
    %908 = vector.shape_cast %907 : vector<32xf32> to vector<32x1xf32>
    %909 = tpu.reciprocal %893 {approx = true} : vector<32x1xf32> -> vector<32x1xf32>
    %910 = arith.mulf %900, %909 : vector<32x1xf32>
    %911 = arith.subf %821, %890 : vector<32x1xf32>
    %912 = arith.mulf %911, %909 : vector<32x1xf32>
    %cst_220 = arith.constant 1.000000e+00 : f32
    %913 = vector.broadcast %cst_220 : f32 to vector<32x1xf32>
    %914 = arith.subf %913, %912 : vector<32x1xf32>
    %915 = arith.mulf %912, %914 : vector<32x1xf32>
    %916 = arith.mulf %910, %912 : vector<32x1xf32>
    %917 = arith.mulf %916, %912 : vector<32x1xf32>
    %918 = arith.mulf %904, %915 : vector<32x1xf32>
    %919 = arith.addf %917, %918 : vector<32x1xf32>
    %920 = arith.mulf %900, %919 : vector<32x1xf32>
    %921 = arith.addf %904, %908 : vector<32x1xf32>
    %cst_221 = arith.constant 2.000000e+00 : f32
    %922 = vector.broadcast %cst_221 : f32 to vector<32x1xf32>
    %923 = arith.mulf %922, %910 : vector<32x1xf32>
    %924 = arith.subf %921, %923 : vector<32x1xf32>
    %925 = arith.mulf %924, %915 : vector<32x1xf32>
    %926 = arith.addf %910, %925 : vector<32x1xf32>
    %927 = tpu.reciprocal %926 {approx = true} : vector<32x1xf32> -> vector<32x1xf32>
    %928 = arith.mulf %920, %927 : vector<32x1xf32>
    %929 = arith.addf %897, %928 : vector<32x1xf32>
    %930 = arith.mulf %910, %910 : vector<32x1xf32>
    %931 = arith.mulf %908, %912 : vector<32x1xf32>
    %932 = arith.mulf %931, %912 : vector<32x1xf32>
    %cst_222 = arith.constant 2.000000e+00 : f32
    %933 = vector.broadcast %cst_222 : f32 to vector<32x1xf32>
    %934 = arith.mulf %933, %910 : vector<32x1xf32>
    %935 = arith.mulf %934, %915 : vector<32x1xf32>
    %936 = arith.addf %932, %935 : vector<32x1xf32>
    %cst_223 = arith.constant 1.000000e+00 : f32
    %937 = vector.broadcast %cst_223 : f32 to vector<32x1xf32>
    %938 = arith.subf %937, %912 : vector<32x1xf32>
    %939 = arith.mulf %904, %938 : vector<32x1xf32>
    %cst_224 = arith.constant 1.000000e+00 : f32
    %940 = vector.broadcast %cst_224 : f32 to vector<32x1xf32>
    %941 = arith.subf %940, %912 : vector<32x1xf32>
    %942 = arith.mulf %939, %941 : vector<32x1xf32>
    %943 = arith.addf %936, %942 : vector<32x1xf32>
    %944 = arith.mulf %930, %943 : vector<32x1xf32>
    %945 = math.log %944 : vector<32x1xf32>
    %946 = math.log %926 : vector<32x1xf32>
    %cst_225 = arith.constant 2.000000e+00 : f32
    %947 = vector.broadcast %cst_225 : f32 to vector<32x1xf32>
    %948 = arith.mulf %947, %946 : vector<32x1xf32>
    %949 = arith.subf %945, %948 : vector<32x1xf32>
    %950 = arith.select %817, %929, %510 : vector<32x1xi1>, vector<32x1xf32>
    %cst_226 = arith.constant 0.000000e+00 : f32
    %951 = vector.broadcast %cst_226 : f32 to vector<32x1xf32>
    %952 = arith.select %817, %949, %951 : vector<32x1xi1>, vector<32x1xf32>
    %953 = arith.mulf %952, %1 : vector<32x1xf32>
    %954 = arith.addf %508, %953 : vector<32x1xf32>
    %955 = arith.mulf %950, %1 : vector<32x1xf32>
    %956 = arith.mulf %509, %1 : vector<32x1xf32>
    %957 = tpu.concatenate %955, %956 in 1 : vector<32x1xf32>, vector<32x1xf32> -> vector<32x2xf32>
    %c0_227 = arith.constant 0 : index
    %c0_228 = arith.constant 0 : index
    %958 = vector.load %arg18[%c0_227, %c0_228] : memref<32x2xf32, #tpu.memory_space<vmem>>, vector<32x2xf32>
    tpu.vector_store %arg18[%c0_227, %c0_228], %957 {strides = array<i32>} : memref<32x2xf32, #tpu.memory_space<vmem>>, vector<32x2xf32>,
    %c0_229 = arith.constant 0 : index
    %c0_230 = arith.constant 0 : index
    %959 = vector.load %arg19[%c0_229, %c0_230] : memref<32x1xf32, #tpu.memory_space<vmem>>, vector<32x1xf32>
    tpu.vector_store %arg19[%c0_229, %c0_230], %954 {strides = array<i32>} : memref<32x1xf32, #tpu.memory_space<vmem>>, vector<32x1xf32>,
    return
  }
  func.func @transform_0(%arg0: i32) -> (i32, i32) {
    %c0_i32 = arith.constant 0 : i32
    %c0_i32_0 = arith.constant 0 : i32
    return %arg0, %c0_i32 : i32, i32
  }
  func.func @transform_1(%arg0: i32) -> (i32, i32) {
    %c0_i32 = arith.constant 0 : i32
    %c0_i32_0 = arith.constant 0 : i32
    return %arg0, %c0_i32 : i32, i32
  }
  func.func @transform_2(%arg0: i32) -> (i32, i32) {
    %c0_i32 = arith.constant 0 : i32
    %c0_i32_0 = arith.constant 0 : i32
    return %arg0, %c0_i32 : i32, i32
  }
  func.func @transform_3(%arg0: i32) -> (i32, i32) {
    %c0_i32 = arith.constant 0 : i32
    %c0_i32_0 = arith.constant 0 : i32
    %c0_i32_1 = arith.constant 0 : i32
    return %c0_i32, %c0_i32_0 : i32, i32
  }
  func.func @transform_4(%arg0: i32) -> (i32, i32) {
    %c0_i32 = arith.constant 0 : i32
    %c0_i32_0 = arith.constant 0 : i32
    %c0_i32_1 = arith.constant 0 : i32
    return %c0_i32, %c0_i32_0 : i32, i32
  }
  func.func @transform_5(%arg0: i32) -> (i32, i32, i32) {
    %c0_i32 = arith.constant 0 : i32
    %c0_i32_0 = arith.constant 0 : i32
    %c0_i32_1 = arith.constant 0 : i32
    %c0_i32_2 = arith.constant 0 : i32
    return %c0_i32, %c0_i32_0, %c0_i32_1 : i32, i32, i32
  }
  func.func @transform_6(%arg0: i32) -> (i32, i32, i32) {
    %c0_i32 = arith.constant 0 : i32
    %c0_i32_0 = arith.constant 0 : i32
    %c0_i32_1 = arith.constant 0 : i32
    %c0_i32_2 = arith.constant 0 : i32
    return %c0_i32, %c0_i32_0, %c0_i32_1 : i32, i32, i32
  }
  func.func @transform_7(%arg0: i32) -> (i32, i32, i32, i32) {
    %c0_i32 = arith.constant 0 : i32
    %c0_i32_0 = arith.constant 0 : i32
    %c0_i32_1 = arith.constant 0 : i32
    %c0_i32_2 = arith.constant 0 : i32
    %c0_i32_3 = arith.constant 0 : i32
    return %c0_i32, %c0_i32_0, %c0_i32_1, %c0_i32_2 : i32, i32, i32, i32
  }
  func.func @transform_8(%arg0: i32) -> (i32, i32, i32, i32) {
    %c0_i32 = arith.constant 0 : i32
    %c0_i32_0 = arith.constant 0 : i32
    %c0_i32_1 = arith.constant 0 : i32
    %c0_i32_2 = arith.constant 0 : i32
    %c0_i32_3 = arith.constant 0 : i32
    return %c0_i32, %c0_i32_0, %c0_i32_1, %c0_i32_2 : i32, i32, i32, i32
  }
  func.func @transform_9(%arg0: i32) -> (i32, i32, i32, i32) {
    %c0_i32 = arith.constant 0 : i32
    %c0_i32_0 = arith.constant 0 : i32
    %c0_i32_1 = arith.constant 0 : i32
    %c0_i32_2 = arith.constant 0 : i32
    %c0_i32_3 = arith.constant 0 : i32
    return %c0_i32, %c0_i32_0, %c0_i32_1, %c0_i32_2 : i32, i32, i32, i32
  }
  func.func @transform_10(%arg0: i32) -> (i32, i32, i32, i32) {
    %c0_i32 = arith.constant 0 : i32
    %c0_i32_0 = arith.constant 0 : i32
    %c0_i32_1 = arith.constant 0 : i32
    %c0_i32_2 = arith.constant 0 : i32
    %c0_i32_3 = arith.constant 0 : i32
    return %c0_i32, %c0_i32_0, %c0_i32_1, %c0_i32_2 : i32, i32, i32, i32
  }
  func.func @transform_11(%arg0: i32) -> (i32, i32, i32, i32) {
    %c0_i32 = arith.constant 0 : i32
    %c0_i32_0 = arith.constant 0 : i32
    %c0_i32_1 = arith.constant 0 : i32
    %c0_i32_2 = arith.constant 0 : i32
    %c0_i32_3 = arith.constant 0 : i32
    return %c0_i32, %c0_i32_0, %c0_i32_1, %c0_i32_2 : i32, i32, i32, i32
  }
  func.func @transform_12(%arg0: i32) -> (i32, i32, i32, i32) {
    %c0_i32 = arith.constant 0 : i32
    %c0_i32_0 = arith.constant 0 : i32
    %c0_i32_1 = arith.constant 0 : i32
    %c0_i32_2 = arith.constant 0 : i32
    %c0_i32_3 = arith.constant 0 : i32
    return %c0_i32, %c0_i32_0, %c0_i32_1, %c0_i32_2 : i32, i32, i32, i32
  }
  func.func @transform_13(%arg0: i32) -> (i32, i32, i32, i32) {
    %c0_i32 = arith.constant 0 : i32
    %c0_i32_0 = arith.constant 0 : i32
    %c0_i32_1 = arith.constant 0 : i32
    %c0_i32_2 = arith.constant 0 : i32
    %c0_i32_3 = arith.constant 0 : i32
    return %c0_i32, %c0_i32_0, %c0_i32_1, %c0_i32_2 : i32, i32, i32, i32
  }
  func.func @transform_14(%arg0: i32) -> (i32, i32, i32, i32) {
    %c0_i32 = arith.constant 0 : i32
    %c0_i32_0 = arith.constant 0 : i32
    %c0_i32_1 = arith.constant 0 : i32
    %c0_i32_2 = arith.constant 0 : i32
    %c0_i32_3 = arith.constant 0 : i32
    return %c0_i32, %c0_i32_0, %c0_i32_1, %c0_i32_2 : i32, i32, i32, i32
  }
  func.func @transform_15(%arg0: i32) -> (i32, i32, i32) {
    %c0_i32 = arith.constant 0 : i32
    %c0_i32_0 = arith.constant 0 : i32
    %c0_i32_1 = arith.constant 0 : i32
    %c0_i32_2 = arith.constant 0 : i32
    return %c0_i32, %c0_i32_0, %c0_i32_1 : i32, i32, i32
  }
  func.func @transform_16(%arg0: i32) -> (i32, i32, i32) {
    %c0_i32 = arith.constant 0 : i32
    %c0_i32_0 = arith.constant 0 : i32
    %c0_i32_1 = arith.constant 0 : i32
    %c0_i32_2 = arith.constant 0 : i32
    return %c0_i32, %c0_i32_0, %c0_i32_1 : i32, i32, i32
  }
  func.func @transform_17(%arg0: i32) -> (i32, i32) {
    %c0_i32 = arith.constant 0 : i32
    %c0_i32_0 = arith.constant 0 : i32
    return %arg0, %c0_i32 : i32, i32
  }
  func.func @transform_18(%arg0: i32) -> (i32, i32) {
    %c0_i32 = arith.constant 0 : i32
    %c0_i32_0 = arith.constant 0 : i32
    return %arg0, %c0_i32 : i32, i32
  }
}

</mosaic_0001>

<bundles_post_ra>
// kernel: fwd.5
= control target key start
LH: loop header
LB: loop body
LE: loop exit
PB: predicated region body
PF: predicated region fallthrough
CT: control target
= control target key end

     0   :  { %v1208_v0 = vmov 0   ;;  %v56_v9 = vlaneseq  ;;  %v1209_v40 = vmov 0.0   ;;  %vm305_vm6 = vcmask 261120   ;;  %s1620_s0 = inlined_call_operand.vmem [shape: f32[32,1], index: 0, kind: input, shape index: {}]   ;;  %s1621_s1 = inlined_call_operand.vmem [shape: f32[32,1], index: 1, kind: input, shape index: {}]   ;;  %s1622_s2 = inlined_call_operand.vmem [shape: f32[1,32], index: 2, kind: input, shape index: {}]   ;;  %s1623_s3 = inlined_call_operand.vmem [shape: f32[1,32], index: 3, kind: input, shape index: {}]   ;;  %s1624_s4 = inlined_call_operand.vmem [shape: f32[2,3,32], index: 4, kind: input, shape index: {}]   ;;  %s1625_s5 = inlined_call_operand.vmem [shape: f32[2,1,32], index: 5, kind: input, shape index: {}]   ;;  %s1626_s8 = inlined_call_operand.vmem [shape: f32[2,32,32], index: 8, kind: input, shape index: {}]   ;;  %s1627_s6 = inlined_call_operand.vmem [shape: f32[2,1,32], index: 6, kind: input, shape index: {}, may-alias: {6,10}]   ;;  %s1628_s7 = inlined_call_operand.vmem [shape: f32[2,1,32], index: 7, kind: input, shape index: {}, may-alias: {7,11}]   ;;  %s1629_s9 = inlined_call_operand.vmem [shape: f32[2,1,32], index: 9, kind: input, shape index: {}]   ;;  %s1630_s10 = inlined_call_operand.vmem [shape: f32[2,1,32], index: 10, kind: input, shape index: {}, may-alias: {6,10}]   ;;  %s1631_s11 = inlined_call_operand.vmem [shape: f32[2,1,32], index: 11, kind: input, shape index: {}, may-alias: {7,11}]   ;;  %s1632_s12 = inlined_call_operand.vmem [shape: f32[32,32], index: 12, kind: input, shape index: {}]   ;;  %s1633_s13 = inlined_call_operand.vmem [shape: f32[1,32], index: 13, kind: input, shape index: {}]   ;;  %s1634_s14 = inlined_call_operand.vmem [shape: f32[32,32], index: 14, kind: output, shape index: {}]  }
   0x1   :  { %1143 = vset.pattern.permute.xlu1 %v1208_v0  ;;  %1142 = vset.pattern.permute.xlu0 %v1208_v0  ;;  %v49_v1 = vld [vmem:[%s1620_s0 + $0x8] sm:$0xff]  ;;  %v48_v2 = vld [vmem:[%s1620_s0] sm:$0xff]  ;;  %v50_v3 = vld [vmem:[%s1620_s0 + $0x10] sm:$0xff] }
   0x2   :  { %118 = vperm.xlu1 %1143, %v49_v1   ;;  %113 = vperm.xlu0 %1142, %v48_v2   ;;  %v51_v4 = vld [vmem:[%s1620_s0 + $0x18] sm:$0xff]  ;;  %v52_v6 = vld [vmem:[%s1621_s1] sm:$0xff]  ;;  %v54_v7 = vld [vmem:[%s1621_s1 + $0x10] sm:$0xff]  ;;  %v1309_v10 = vshrl.u32 %v56_v9, 7 }
   0x3   :  { %v55_v5 = vld [vmem:[%s1621_s1 + $0x18] sm:$0xff]  ;;  %v53_v8 = vld [vmem:[%s1621_s1 + $0x8] sm:$0xff]  ;;  %v1075_v11 = vld [vmem:[%s1622_s2] ss:$0 sm:$0xff] }
   0x4   :  { %v65_v14 = vand.u32 15, %v1309_v10  ;;  %v1316_v15 = vadd.s32 8, %v1309_v10  ;;  %v1319_v16 = vadd.s32 16, %v1309_v10  ;;  %v1322_v17 = vadd.s32 24, %v1309_v10  ;;  %v1076_v19 = vld [vmem:[%s1623_s3] ss:$0 sm:$0xff] }
   0x5   :  { %v240_v22 = vsub.s32 1, %v1309_v10  ;;  %v151_v24 = vld [vmem:[%s1624_s4] sm:$0x7]  ;;  %v232_v35 = vsub.s32 0, %v1309_v10  ;;  %vm201_vm1 = vcmp.lt.s32.totalorder %v1309_v10, 1  ;;  %v285_v39 = vsub.s32 2, %v1309_v10 }
   0x6   :  { %123 = vperm.xlu1 %1143, %v50_v3   ;;  %128 = vperm.xlu0 %1142, %v51_v4   ;;  %vm1333_vm0 = vcmp.ge.s32.totalorder %v65_v14, 1  ;;  %v72_v26 = vand.u32 15, %v1316_v15  ;;  %v79_v27 = vand.u32 15, %v1319_v16  ;;  %v86_v28 = vand.u32 15, %v1322_v17 }
   0x7   :  { %v241_v36 = vrot.slane %v151_v24, %v240_v22  ;;  %v1077_v41 = vsel %vm1333_vm0, 1.0, %v1209_v40  ;;  %v233_v53 = vrot.slane %v151_v24, %v232_v35  ;;  %vm254_vm5 = vcmp.lt.s32.totalorder %v1309_v10, 7 }
   0x8   :  { %vm1362_vm2 = vcmp.lt.s32.totalorder %v72_v26, 15  ;;  %vm1368_vm3 = vcmp.ge.s32.totalorder %v79_v27, 1  ;;  %vm1374_vm4 = vcmp.lt.s32.totalorder %v86_v28, 15  ;;  %v286_v57 = vrot.slane %v151_v24, %v285_v39 }
   0x9   :  { %v1079_v59 = vsel %vm1362_vm2, 1.0, %v1209_v40  ;;  %v1078_v60 = vsel %vm1368_vm3, 1.0, %v1209_v40  ;;  %v1080_v61 = vsel %vm1374_vm4, 1.0, %v1209_v40  ;;  %vm605_vm7 = vcmp.ge.s32.totalorder %v65_v14, 3 }
   0xa   :  { %190 = vperm.xlu1 %1143, %v55_v5   ;;  %175 = vperm.xlu0 %1142, %v52_v6   ;;  %vm600_vm8 = vcmp.lt.s32.totalorder %v1309_v10, 3  ;;  %v1089_v14 = vsel %vm605_vm7, 1.0, %v1209_v40  ;;  %vm653_vm9 = vcmp.lt.s32.totalorder %v1309_v10, 5  ;;  %vm665_vm10 = vcmp.lt.s32.totalorder %v86_v28, 13 }
   0xb   :  { %vm663_vm11 = vcmp.lt.s32.totalorder %v72_v26, 13  ;;  %vm607_vm12 = vcmp.ge.s32.totalorder %v79_v27, 3  ;;  %v1092_v15 = vsel %vm665_vm10, 1.0, %v1209_v40 }
   0xc   :  { %v1091_v16 = vsel %vm663_vm11, 1.0, %v1209_v40 }
   0xe   :  { %185 = vperm.xlu1 %1143, %v54_v7   ;;  %180 = vperm.xlu0 %1142, %v53_v8  }
  0x81   :  { %v119_v12 = vpop.permute.xlu1 %118  ;;  %v114_v13 = vpop.permute.xlu0 %113 }
  0x82   :  { %v137_v18 = vmul.f32 %v1075_v11, %v114_v13  ;;  %v138_v29 = vmul.f32 %v1075_v11, %v119_v12 }
  0x84   :  { %v1340_v30 = vadd.f32 %v1076_v19, %v137_v18  ;;  %v1378_v45 = vadd.f32 %v1076_v19, %v138_v29 }
  0x85   :  { %v124_v20 = vpop.permute.xlu1 %123  ;;  %v129_v21 = vpop.permute.xlu0 %128 }
  0x86   :  { %v140_v23 = vmul.f32 %v1075_v11, %v129_v21  ;;  %v139_v31 = vmul.f32 %v1075_v11, %v124_v20 }
  0x88   :  { %v1342_v32 = vadd.f32 %v1076_v19, %v140_v23  ;;  %v1380_v46 = vadd.f32 %v1076_v19, %v139_v31  ;;  %v1081_v19 = vld [vmem:[%s1625_s5] ss:$0 sm:$0xff] }
  0x89   :  { %v1344_v33 = vpop.permute.xlu1 %190  ;;  %v1346_v34 = vpop.permute.xlu0 %175 }
  0x8a   :  { %v196_v37 = vmul.f32 %v1344_v33, %v1342_v32  ;;  %v193_v38 = vmul.f32 %v1346_v34, %v1340_v30 }
  0x8c   :  { %v200_v47 = vrot.slane %v196_v37, 7  ;;  %v197_v48 = vrot.slane %v193_v38, 7  ;;  %v253_v49 = vrot.slane %v196_v37, 1  ;;  %v250_v50 = vrot.slane %v193_v38, 1 }
  0x8d   :  { %v1382_v51 = vpop.permute.xlu1 %185  ;;  %v1384_v52 = vpop.permute.xlu0 %180  ;;  %v242_v3 = vmul.f32 %v241_v36, %v193_v38  ;;  %v245_v43 = vmul.f32 %v241_v36, %v196_v37 }
  0x8e   :  { %v195_v54 = vmul.f32 %v1382_v51, %v1380_v46  ;;  %v194_v55 = vmul.f32 %v1384_v52, %v1378_v45  ;;  %v205_v56 = vsel %vm201_vm1, %v200_v47, %v197_v48  ;;  %v258_v5 = vsel %vm254_vm5, %v253_v49, %v250_v50 }
  0x8f   :  { %v226_v58 = vmul.f32 %v1077_v41, %v205_v56  ;;  %v282_v23 = vmul.f32 %v1080_v61, %v258_v5 }
  0x90   :  { %v199_v62 = vrot.slane %v195_v54, 7  ;;  %v252_v63 = vrot.slane %v195_v54, 1  ;;  %v198_v0 = vrot.slane %v194_v55, 7  ;;  %v251_v1 = vrot.slane %v194_v55, 1 }
  0x91   :  { %v234_v2 = vmul.f32 %v233_v53, %v226_v58  ;;  %v243_v4 = vmul.f32 %v241_v36, %v194_v55  ;;  %v244_v41 = vmul.f32 %v241_v36, %v195_v54  ;;  %v290_v58 = vmul.f32 %v286_v57, %v282_v23  ;;  %v159_v23 = vld [vmem:[%s1626_s8] sm:$0xff] }
  0x92   :  { %v257_v6 = vsel %vm254_vm5, %v250_v50, %v251_v1  ;;  %v204_v7 = vsel %vm201_vm1, %v197_v48, %v198_v0  ;;  %v256_v8 = vsel %vm254_vm5, %v251_v1, %v252_v63  ;;  %v203_v9 = vsel %vm201_vm1, %v198_v0, %v199_v62 }
  0x93   :  { %v246_v11 = vadd.f32 %v242_v3, %v234_v2  ;;  %v287_v12 = vmul.f32 %v286_v57, %v257_v6  ;;  %v235_v13 = vmul.f32 %v233_v53, %v204_v7  ;;  %v280_v18 = vmul.f32 %v1079_v59, %v256_v8 }
  0x94   :  { %v228_v20 = vmul.f32 %v1078_v60, %v203_v9  ;;  %v202_v21 = vsel %vm201_vm1, %v199_v62, %v200_v47  ;;  %v255_v31 = vsel %vm254_vm5, %v252_v63, %v253_v49 }
  0x95   :  { %v291_v24 = vadd.f32 %v287_v12, %v246_v11  ;;  %v247_v25 = vadd.f32 %v243_v4, %v235_v13  ;;  %v288_v29 = vmul.f32 %v286_v57, %v280_v18  ;;  %v237_v42 = vmul.f32 %v233_v53, %v202_v21 }
  0x96   :  { %v236_v38 = vmul.f32 %v233_v53, %v228_v20  ;;  %v289_v55 = vmul.f32 %v286_v57, %v255_v31  ;;  %v162_v31 = vld [vmem:[%s1626_s8 + $0x18] sm:$0xff] }
  0x97   :  { %v301_v44 = vadd.f32 %v1081_v19, %v291_v24  ;;  %v292_v48 = vadd.f32 %v288_v29, %v247_v25  ;;  %v249_v56 = vadd.f32 %v245_v43, %v237_v42  ;;  %v160_v24 = vld [vmem:[%s1626_s8 + $0x8] sm:$0xff]  ;;  %v161_v29 = vld [vmem:[%s1626_s8 + $0x10] sm:$0xff] }
  0x98   :  { %v248_v50 = vadd.f32 %v244_v41, %v236_v38  ;;  %v417_v25 = vpack.c.bf16 %v160_v24, %v159_v23  ;;  %v418_v38 = vpack.c.bf16 %v162_v31, %v161_v29 }
  0x99   :  { %v306_v59 = vsel %vm305_vm6, %v301_v44, 0.0  ;;  %v302_v47 = vadd.f32 %v1081_v19, %v292_v48  ;;  %v294_v61 = vadd.f32 %v290_v58, %v249_v56 }
  0x9a   :  { %307 = vadd.xlane.f32.xlu0 %v306_v59  ;;  %v293_v60 = vadd.f32 %v289_v55, %v248_v50  ;;  %1116 = vmatprep.subr.bf16.mxu0 %v417_v25 }
  0x9b   :  { %v309_v62 = vsel %vm305_vm6, %v302_v47, 0.0  ;;  %v304_v53 = vadd.f32 %v1081_v19, %v294_v61  ;;  %1117 = vmatpush3.bf16.msra.mxu0 %v417_v25 }
  0x9c   :  { %310 = vadd.xlane.f32.xlu1 %v309_v62  ;;  %v303_v49 = vadd.f32 %v1081_v19, %v293_v60  ;;  %1118 = vmatprep.subr.bf16.mxu0 %v418_v38  ;;  %v1082_v62 = vld [vmem:[%s1627_s6] ss:$0 sm:$0xff] }
  0x9d   :  { %v315_v36 = vsel %vm305_vm6, %v304_v53, 0.0 }
  0x9e   :  { %v312_v54 = vsel %vm305_vm6, %v303_v49, 0.0 }
  0x9f   :  { %313 = vadd.xlane.f32.xlu0 %v312_v54  ;;  %1119 = vmatpush3.bf16.msra.mxu0 %v418_v38 }
  0xa3   :  { %316 = vadd.xlane.f32.xlu0 %v315_v36 }
 0x127   :  { %v308_v37 = vpop.xlane.xlu0 %307 }
 0x128   :  { %v319_v63 = vmul.f32 0.03125, %v308_v37 }
 0x129   :  { %v311_v57 = vpop.xlane.xlu1 %310 }
 0x12a   :  { %v323_v0 = vsub.f32 %v301_v44, %v319_v63  ;;  %v320_v1 = vmul.f32 0.03125, %v311_v57 }
 0x12c   :  { %v324_v2 = vsub.f32 %v302_v47, %v320_v1  ;;  %v314_v3 = vpop.xlane.xlu0 %313  ;;  %v327_v4 = vmul.f32 %v323_v0, %v323_v0 }
 0x12d   :  { %v321_v5 = vmul.f32 0.03125, %v314_v3 }
 0x12e   :  { %v331_v6 = vsel %vm305_vm6, %v327_v4, 0.0  ;;  %v328_v7 = vmul.f32 %v324_v2, %v324_v2 }
 0x12f   :  { %v325_v8 = vsub.f32 %v303_v49, %v321_v5  ;;  %332 = vadd.xlane.f32.xlu1 %v331_v6 }
 0x130   :  { %v317_v9 = vpop.xlane.xlu0 %316  ;;  %v334_v11 = vsel %vm305_vm6, %v328_v7, 0.0 }
 0x131   :  { %v322_v12 = vmul.f32 0.03125, %v317_v9  ;;  %335 = vadd.xlane.f32.xlu0 %v334_v11  ;;  %v329_v13 = vmul.f32 %v325_v8, %v325_v8 }
 0x133   :  { %v326_v18 = vsub.f32 %v304_v53, %v322_v12  ;;  %v337_v19 = vsel %vm305_vm6, %v329_v13, 0.0  ;;  %v1083_v53 = vld [vmem:[%s1628_s7] ss:$0 sm:$0xff] }
 0x134   :  { %338 = vadd.xlane.f32.xlu1 %v337_v19 }
 0x135   :  { %v330_v20 = vmul.f32 %v326_v18, %v326_v18 }
 0x137   :  { %v340_v21 = vsel %vm305_vm6, %v330_v20, 0.0 }
 0x138   :  { %341 = vadd.xlane.f32.xlu0 %v340_v21 }
 0x1bc   :  { %v333_v41 = vpop.xlane.xlu1 %332 }
 0x1bd   :  { %v343_v42 = vmul.f32 0.03125, %v333_v41 }
 0x1be   :  { %v336_v43 = vpop.xlane.xlu0 %335 }
 0x1bf   :  { %v347_v44 = vadd.f32 1e-05, %v343_v42  ;;  %v344_v48 = vmul.f32 0.03125, %v336_v43 }
 0x1c1   :  { %1144 = vrsqrt.f32 %v347_v44  ;;  %v348_v50 = vadd.f32 1e-05, %v344_v48  ;;  %v339_v55 = vpop.xlane.xlu1 %338 }
 0x1c2   :  { %v345_v56 = vmul.f32 0.03125, %v339_v55 }
 0x1c3   :  { %1146 = vrsqrt.f32 %v348_v50 }
 0x1c4   :  { %v349_v58 = vadd.f32 1e-05, %v345_v56 }
 0x1c5   :  { %v342_v59 = vpop.xlane.xlu0 %341 }
 0x1c6   :  { %1148 = vrsqrt.f32 %v349_v58  ;;  %v346_v47 = vmul.f32 0.03125, %v342_v59 }
 0x1c8   :  { %v350_v60 = vadd.f32 1e-05, %v346_v47 }
 0x1ca   :  { %1150 = vrsqrt.f32 %v350_v60 }
 0x1cb   :  { %v1145_v61 = vpop.eup %1144 }
 0x1cc   :  { %v355_v49 = vmul.f32 %v1145_v61, %v323_v0 }
 0x1cd   :  { %v1147_v54 = vpop.eup %1146 }
 0x1ce   :  { %v365_v36 = vmul.f32 %v1082_v62, %v355_v49  ;;  %v356_v37 = vmul.f32 %v1147_v54, %v324_v2 }
 0x1d0   :  { %v1149_v63 = vpop.eup %1148  ;;  %v375_v57 = vadd.f32 %v1083_v53, %v365_v36  ;;  %v366_v1 = vmul.f32 %v1082_v62, %v356_v37 }
 0x1d1   :  { %v357_v3 = vmul.f32 %v1149_v63, %v325_v8 }
 0x1d2   :  { %v376_v4 = vadd.f32 %v1083_v53, %v366_v1  ;;  %v383_v5 = vmul.f32 0.044715, %v375_v57  ;;  %v379_v59 = vmul.f32 0.5, %v375_v57 }
 0x1d3   :  { %v367_v6 = vmul.f32 %v1082_v62, %v357_v3 }
 0x1d4   :  { %v1151_v7 = vpop.eup %1150  ;;  %v384_v9 = vmul.f32 0.044715, %v376_v4  ;;  %v387_v11 = vmul.f32 %v383_v5, %v375_v57  ;;  %v380_v47 = vmul.f32 0.5, %v376_v4 }
 0x1d5   :  { %v377_v12 = vadd.f32 %v1083_v53, %v367_v6  ;;  %v358_v13 = vmul.f32 %v1151_v7, %v326_v18 }
 0x1d6   :  { %v388_v0 = vmul.f32 %v384_v9, %v376_v4  ;;  %v391_v19 = vmul.f32 %v387_v11, %v375_v57 }
 0x1d7   :  { %v368_v20 = vmul.f32 %v1082_v62, %v358_v13  ;;  %v385_v21 = vmul.f32 0.044715, %v377_v12  ;;  %v381_v37 = vmul.f32 0.5, %v377_v12 }
 0x1d8   :  { %v392_v23 = vmul.f32 %v388_v0, %v376_v4  ;;  %v395_v24 = vadd.f32 %v391_v19, %v375_v57  ;;  %v1084_v57 = vld [vmem:[%s1629_s9] ss:$0 sm:$0xff] }
 0x1d9   :  { %v378_v25 = vadd.f32 %v1083_v53, %v368_v20  ;;  %v389_v2 = vmul.f32 %v385_v21, %v377_v12 }
 0x1da   :  { %v396_v29 = vadd.f32 %v392_v23, %v376_v4  ;;  %v399_v31 = vmul.f32 0.7978846, %v395_v24 }
 0x1db   :  { %v386_v38 = vmul.f32 0.044715, %v378_v25  ;;  %v393_v8 = vmul.f32 %v389_v2, %v377_v12  ;;  %v382_v63 = vmul.f32 0.5, %v378_v25 }
 0x1dc   :  { %v400_v41 = vmul.f32 0.7978846, %v396_v29  ;;  %1152 = vtanh.f32 %v399_v31 }
 0x1dd   :  { %v390_v42 = vmul.f32 %v386_v38, %v378_v25  ;;  %v397_v43 = vadd.f32 %v393_v8, %v377_v12 }
 0x1de   :  { %1154 = vtanh.f32 %v400_v41 }
 0x1df   :  { %v394_v44 = vmul.f32 %v390_v42, %v378_v25  ;;  %v401_v48 = vmul.f32 0.7978846, %v397_v43 }
 0x1e1   :  { %v398_v18 = vadd.f32 %v394_v44, %v378_v25  ;;  %1156 = vtanh.f32 %v401_v48 }
 0x1e3   :  { %v402_v50 = vmul.f32 0.7978846, %v398_v18 }
 0x1e5   :  { %1158 = vtanh.f32 %v402_v50 }
 0x1e6   :  { %v1153_v55 = vpop.eup %1152 }
 0x1e7   :  { %v407_v56 = vadd.f32 1.0, %v1153_v55 }
 0x1e8   :  { %v1155_v58 = vpop.eup %1154 }
 0x1e9   :  { %v408_v60 = vadd.f32 1.0, %v1155_v58  ;;  %v411_v62 = vmul.f32 %v407_v56, %v379_v59 }
 0x1eb   :  { %v1157_v61 = vpop.eup %1156  ;;  %v412_v49 = vmul.f32 %v408_v60, %v380_v47 }
 0x1ec   :  { %v409_v53 = vadd.f32 1.0, %v1157_v61 }
 0x1ed   :  { %v415_v54 = vpack.c.bf16 %v412_v49, %v411_v62 }
 0x1ee   :  { %v413_v3 = vmul.f32 %v409_v53, %v381_v37 }
 0x1ef   :  { %v1159_v36 = vpop.eup %1158  ;;  %1120 = vmatprep.mubr.msk.bf16.mxu0 %vm305_vm6, %v415_v54 }
 0x1f0   :  { %v410_v1 = vadd.f32 1.0, %v1159_v36 }
 0x1f2   :  { %v414_v5 = vmul.f32 %v410_v1, %v382_v63 }
 0x1f4   :  { %v416_v6 = vpack.c.bf16 %v414_v5, %v413_v3 }
 0x1f6   :  { %1121 = vmatmul.mubr.msk.bf16.vlgmr.msra.gmra.mrb[0].mxu0 %vm305_vm6, %v416_v6 }
 0x2c9   :  { %v1122_v4 = vpop.f32.mrb[0].mxu0 }
 0x2ca   :  { %v465_v7 = vpop.f32.mrb[1].mxu0  ;;  %v474_v20 = vadd.f32 %v1122_v4, %v1084_v57 }
 0x2cb   :  { %v466_v9 = vadd.f32 %v1084_v57, %v465_v7  ;;  %v1123_v11 = vpop.f32.mrb[2].mxu0  ;;  %v1087_v7 = vld [vmem:[%s1630_s10] ss:$0 sm:$0xff] }
 0x2cc   :  { %v477_v13 = vadd.f32 %v1123_v11, %v1084_v57  ;;  %v468_v0 = vpop.f32.mrb[3].mxu0  ;;  %v486_v24 = vsel %vm305_vm6, %v474_v20, 0.0 }
 0x2cd   :  { %v469_v19 = vadd.f32 %v1084_v57, %v468_v0  ;;  %v480_v12 = vsel %vm305_vm6, %v466_v9, 0.0 }
 0x2ce   :  { %481 = vadd.xlane.f32.xlu1 %v480_v12  ;;  %v489_v21 = vsel %vm305_vm6, %v477_v13, 0.0 }
 0x2cf   :  { %490 = vadd.xlane.f32.xlu0 %v489_v21  ;;  %v483_v23 = vsel %vm305_vm6, %v469_v19, 0.0 }
 0x2d2   :  { %484 = vadd.xlane.f32.xlu1 %v483_v23 }
 0x2d3   :  { %487 = vadd.xlane.f32.xlu0 %v486_v24 }
 0x35b   :  { %v482_v25 = vpop.xlane.xlu1 %481 }
 0x35c   :  { %v492_v2 = vmul.f32 0.03125, %v482_v25  ;;  %v491_v29 = vpop.xlane.xlu0 %490 }
 0x35d   :  { %v495_v31 = vmul.f32 0.03125, %v491_v29 }
 0x35e   :  { %v496_v38 = vsub.f32 %v466_v9, %v492_v2 }
 0x35f   :  { %v499_v8 = vsub.f32 %v477_v13, %v495_v31  ;;  %v485_v41 = vpop.xlane.xlu1 %484  ;;  %v1088_v13 = vld [vmem:[%s1631_s11] ss:$0 sm:$0xff] }
 0x360   :  { %v493_v42 = vmul.f32 0.03125, %v485_v41  ;;  %v488_v43 = vpop.xlane.xlu0 %487  ;;  %v500_v44 = vmul.f32 %v496_v38, %v496_v38 }
 0x361   :  { %v494_v48 = vmul.f32 0.03125, %v488_v43  ;;  %v503_v18 = vmul.f32 %v499_v8, %v499_v8 }
 0x362   :  { %v497_v50 = vsub.f32 %v469_v19, %v493_v42  ;;  %v504_v55 = vsel %vm305_vm6, %v500_v44, 0.0 }
 0x363   :  { %v498_v56 = vsub.f32 %v474_v20, %v494_v48  ;;  %505 = vadd.xlane.f32.xlu1 %v504_v55  ;;  %v513_v58 = vsel %vm305_vm6, %v503_v18, 0.0 }
 0x364   :  { %514 = vadd.xlane.f32.xlu0 %v513_v58  ;;  %v501_v59 = vmul.f32 %v497_v50, %v497_v50 }
 0x365   :  { %v502_v47 = vmul.f32 %v498_v56, %v498_v56 }
 0x366   :  { %v507_v60 = vsel %vm305_vm6, %v501_v59, 0.0 }
 0x367   :  { %508 = vadd.xlane.f32.xlu1 %v507_v60  ;;  %v510_v61 = vsel %vm305_vm6, %v502_v47, 0.0 }
 0x368   :  { %511 = vadd.xlane.f32.xlu0 %v510_v61 }
 0x3f0   :  { %v506_v62 = vpop.xlane.xlu1 %505 }
 0x3f1   :  { %v516_v49 = vmul.f32 0.03125, %v506_v62  ;;  %v515_v54 = vpop.xlane.xlu0 %514 }
 0x3f2   :  { %v519_v53 = vmul.f32 0.03125, %v515_v54 }
 0x3f3   :  { %v520_v36 = vadd.f32 1e-05, %v516_v49 }
 0x3f4   :  { %v523_v37 = vadd.f32 1e-05, %v519_v53  ;;  %v509_v63 = vpop.xlane.xlu1 %508 }
 0x3f5   :  { %1160 = vrsqrt.f32 %v520_v36  ;;  %v517_v1 = vmul.f32 0.03125, %v509_v63  ;;  %v512_v3 = vpop.xlane.xlu0 %511 }
 0x3f6   :  { %1162 = vrsqrt.f32 %v523_v37  ;;  %v518_v5 = vmul.f32 0.03125, %v512_v3 }
 0x3f7   :  { %v521_v6 = vadd.f32 1e-05, %v517_v1 }
 0x3f8   :  { %v522_v57 = vadd.f32 1e-05, %v518_v5 }
 0x3f9   :  { %1164 = vrsqrt.f32 %v521_v6 }
 0x3fa   :  { %1166 = vrsqrt.f32 %v522_v57 }
 0x3ff   :  { %v1161_v4 = vpop.eup %1160 }
 0x400   :  { %v1163_v9 = vpop.eup %1162  ;;  %v528_v11 = vmul.f32 %v1161_v4, %v496_v38  ;;  %v152_v4 = vld [vmem:[%s1624_s4 + $0x4] sm:$0x7] }
 0x401   :  { %v531_v0 = vmul.f32 %v1163_v9, %v499_v8  ;;  %v632_v28 = vrot.slane %v152_v4, %v232_v35  ;;  %v1090_v35 = vsel %vm607_vm12, 1.0, %v1209_v40 }
 0x402   :  { %v538_v19 = vmul.f32 %v1087_v7, %v528_v11 }
 0x403   :  { %v1165_v12 = vpop.eup %1164  ;;  %v541_v20 = vmul.f32 %v1087_v7, %v531_v0 }
 0x404   :  { %v1167_v21 = vpop.eup %1166  ;;  %v548_v23 = vadd.f32 %v1088_v13, %v538_v19  ;;  %v529_v24 = vmul.f32 %v1165_v12, %v497_v50 }
 0x405   :  { %v551_v25 = vadd.f32 %v1088_v13, %v541_v20  ;;  %v530_v2 = vmul.f32 %v1167_v21, %v498_v56  ;;  %v640_v21 = vrot.slane %v152_v4, %v240_v22 }
 0x406   :  { %v539_v29 = vmul.f32 %v1087_v7, %v529_v24  ;;  %v556_v31 = vmul.f32 0.044715, %v548_v23  ;;  %v552_v3 = vmul.f32 0.5, %v548_v23 }
 0x407   :  { %v559_v41 = vmul.f32 0.044715, %v551_v25  ;;  %v540_v42 = vmul.f32 %v1087_v7, %v530_v2  ;;  %v555_v6 = vmul.f32 0.5, %v551_v25 }
 0x408   :  { %v549_v43 = vadd.f32 %v1088_v13, %v539_v29  ;;  %v560_v44 = vmul.f32 %v556_v31, %v548_v23 }
 0x409   :  { %v563_v38 = vmul.f32 %v559_v41, %v551_v25  ;;  %v550_v48 = vadd.f32 %v1088_v13, %v540_v42 }
 0x40a   :  { %v557_v18 = vmul.f32 0.044715, %v549_v43  ;;  %v564_v55 = vmul.f32 %v560_v44, %v548_v23  ;;  %v553_v0 = vmul.f32 0.5, %v549_v43 }
 0x40b   :  { %v567_v58 = vmul.f32 %v563_v38, %v551_v25  ;;  %v558_v8 = vmul.f32 0.044715, %v550_v48 }
 0x40c   :  { %v561_v59 = vmul.f32 %v557_v18, %v549_v43  ;;  %v568_v47 = vadd.f32 %v564_v55, %v548_v23  ;;  %v554_v23 = vmul.f32 0.5, %v550_v48 }
 0x40d   :  { %v571_v60 = vadd.f32 %v567_v58, %v551_v25  ;;  %v562_v61 = vmul.f32 %v558_v8, %v550_v48 }
 0x40e   :  { %v565_v62 = vmul.f32 %v561_v59, %v549_v43  ;;  %v572_v50 = vmul.f32 0.7978846, %v568_v47 }
 0x40f   :  { %v575_v49 = vmul.f32 0.7978846, %v571_v60  ;;  %v566_v56 = vmul.f32 %v562_v61, %v550_v48 }
 0x410   :  { %v569_v54 = vadd.f32 %v565_v62, %v549_v43  ;;  %1168 = vtanh.f32 %v572_v50 }
 0x411   :  { %1170 = vtanh.f32 %v575_v49  ;;  %v570_v53 = vadd.f32 %v566_v56, %v550_v48 }
 0x412   :  { %v573_v36 = vmul.f32 0.7978846, %v569_v54 }
 0x413   :  { %v574_v37 = vmul.f32 0.7978846, %v570_v53 }
 0x414   :  { %1172 = vtanh.f32 %v573_v36  ;;  %v1093_v36 = vld [vmem:[%s1625_s5 + $0x1] ss:$0 sm:$0xff] }
 0x415   :  { %1174 = vtanh.f32 %v574_v37 }
 0x41a   :  { %v1169_v63 = vpop.eup %1168 }
 0x41b   :  { %v1171_v1 = vpop.eup %1170  ;;  %v580_v5 = vadd.f32 1.0, %v1169_v63 }
 0x41c   :  { %v583_v57 = vadd.f32 1.0, %v1171_v1 }
 0x41d   :  { %v584_v7 = vmul.f32 %v580_v5, %v552_v3 }
 0x41e   :  { %v1173_v9 = vpop.eup %1172  ;;  %v587_v11 = vmul.f32 %v583_v57, %v555_v6 }
 0x41f   :  { %v1175_v13 = vpop.eup %1174  ;;  %v581_v19 = vadd.f32 1.0, %v1173_v9  ;;  %v1474_v12 = vadd.f32 %v584_v7, %v1340_v30 }
 0x420   :  { %v1477_v20 = vadd.f32 %v587_v11, %v1342_v32  ;;  %v582_v24 = vadd.f32 1.0, %v1175_v13 }
 0x421   :  { %v585_v25 = vmul.f32 %v581_v19, %v553_v0  ;;  %v592_v2 = vmul.f32 %v1474_v12, %v1346_v34 }
 0x422   :  { %v595_v30 = vmul.f32 %v1477_v20, %v1344_v33  ;;  %v586_v32 = vmul.f32 %v582_v24, %v554_v23 }
 0x423   :  { %v1491_v22 = vadd.f32 %v585_v25, %v1378_v45  ;;  %v596_v29 = vrot.slane %v592_v2, 5  ;;  %v649_v31 = vrot.slane %v592_v2, 3  ;;  %v685_v45 = vrot.slane %v152_v4, %v285_v39 }
 0x424   :  { %v599_v41 = vrot.slane %v595_v30, 5  ;;  %v1496_v42 = vadd.f32 %v586_v32, %v1380_v46  ;;  %v652_v43 = vrot.slane %v595_v30, 3  ;;  %v641_v18 = vmul.f32 %v640_v21, %v592_v2 }
 0x425   :  { %v593_v17 = vmul.f32 %v1491_v22, %v1384_v52  ;;  %v644_v3 = vmul.f32 %v640_v21, %v595_v30 }
 0x426   :  { %v604_v26 = vsel %vm600_vm8, %v599_v41, %v596_v29  ;;  %v594_v46 = vmul.f32 %v1496_v42, %v1382_v51  ;;  %v657_v27 = vsel %vm653_vm9, %v652_v43, %v649_v31 }
 0x427   :  { %v625_v44 = vmul.f32 %v1089_v14, %v604_v26  ;;  %v650_v38 = vrot.slane %v593_v17, 3  ;;  %v597_v48 = vrot.slane %v593_v17, 5  ;;  %v642_v39 = vmul.f32 %v640_v21, %v593_v17 }
 0x428   :  { %v651_v55 = vrot.slane %v594_v46, 3  ;;  %v598_v58 = vrot.slane %v594_v46, 5  ;;  %v681_v60 = vmul.f32 %v1092_v15, %v657_v27  ;;  %v643_v63 = vmul.f32 %v640_v21, %v594_v46 }
 0x429   :  { %v633_v8 = vmul.f32 %v632_v28, %v625_v44  ;;  %v656_v59 = vsel %vm653_vm9, %v649_v31, %v650_v38  ;;  %v603_v47 = vsel %vm600_vm8, %v596_v29, %v597_v48 }
 0x42a   :  { %v686_v61 = vmul.f32 %v685_v45, %v656_v59  ;;  %v634_v62 = vmul.f32 %v632_v28, %v603_v47  ;;  %v655_v50 = vsel %vm653_vm9, %v650_v38, %v651_v55  ;;  %v602_v40 = vsel %vm600_vm8, %v597_v48, %v598_v58  ;;  %v164_v59 = vld [vmem:[%s1626_s8 + $0x28] sm:$0xff]  ;;  %v165_v47 = vld [vmem:[%s1626_s8 + $0x30] sm:$0xff] }
 0x42b   :  { %v645_v49 = vadd.f32 %v641_v18, %v633_v8  ;;  %v679_v56 = vmul.f32 %v1091_v16, %v655_v50  ;;  %v627_v54 = vmul.f32 %v1090_v35, %v602_v40  ;;  %v654_v53 = vsel %vm653_vm9, %v651_v55, %v652_v43  ;;  %v163_v8 = vld [vmem:[%s1626_s8 + $0x20] sm:$0xff] }
 0x42c   :  { %v646_v37 = vadd.f32 %v642_v39, %v634_v62  ;;  %v601_v1 = vsel %vm600_vm8, %v598_v58, %v599_v41  ;;  %v688_v7 = vmul.f32 %v685_v45, %v654_v53  ;;  %v689_v9 = vmul.f32 %v685_v45, %v681_v60 }
 0x42d   :  { %v690_v5 = vadd.f32 %v686_v61, %v645_v49  ;;  %v687_v6 = vmul.f32 %v685_v45, %v679_v56  ;;  %v635_v57 = vmul.f32 %v632_v28, %v627_v54  ;;  %v636_v4 = vmul.f32 %v632_v28, %v601_v1  ;;  %v166_v61 = vld [vmem:[%s1626_s8 + $0x38] sm:$0xff] }
 0x42e   :  { %v814_v60 = vpack.c.bf16 %v164_v59, %v163_v8  ;;  %v815_v62 = vpack.c.bf16 %v166_v61, %v165_v47 }
 0x42f   :  { %v700_v11 = vadd.f32 %v1093_v36, %v690_v5  ;;  %v691_v13 = vadd.f32 %v687_v6, %v646_v37  ;;  %v647_v0 = vadd.f32 %v643_v63, %v635_v57  ;;  %v648_v19 = vadd.f32 %v644_v3, %v636_v4  ;;  %v1094_v57 = vld [vmem:[%s1627_s6 + $0x1] ss:$0 sm:$0xff] }
 0x430   :  { %1124 = vmatprep.subr.bf16.mxu1 %v814_v60 }
 0x431   :  { %v704_v23 = vsel %vm305_vm6, %v700_v11, 0.0  ;;  %v701_v24 = vadd.f32 %v1093_v36, %v691_v13  ;;  %v692_v25 = vadd.f32 %v688_v7, %v647_v0  ;;  %v693_v2 = vadd.f32 %v689_v9, %v648_v19  ;;  %1125 = vmatpush3.bf16.msra.mxu1 %v814_v60  ;;  %v1095_v9 = vld [vmem:[%s1628_s7 + $0x1] ss:$0 sm:$0xff] }
 0x432   :  { %705 = vadd.xlane.f32.xlu1 %v704_v23  ;;  %1126 = vmatprep.subr.bf16.mxu1 %v815_v62 }
 0x433   :  { %v707_v10 = vsel %vm305_vm6, %v701_v24, 0.0  ;;  %v702_v14 = vadd.f32 %v1093_v36, %v692_v25  ;;  %v703_v21 = vadd.f32 %v1093_v36, %v693_v2 }
 0x434   :  { %708 = vadd.xlane.f32.xlu0 %v707_v10 }
 0x435   :  { %v710_v30 = vsel %vm305_vm6, %v702_v14, 0.0  ;;  %v713_v32 = vsel %vm305_vm6, %v703_v21, 0.0  ;;  %1127 = vmatpush3.bf16.msra.mxu1 %v815_v62 }
 0x436   :  { %711 = vadd.xlane.f32.xlu1 %v710_v30 }
 0x438   :  { %714 = vadd.xlane.f32.xlu0 %v713_v32 }
 0x4bf   :  { %v706_v29 = vpop.xlane.xlu1 %705 }
 0x4c0   :  { %v716_v31 = vmul.f32 0.03125, %v706_v29 }
 0x4c1   :  { %v709_v41 = vpop.xlane.xlu0 %708 }
 0x4c2   :  { %v720_v43 = vsub.f32 %v700_v11, %v716_v31  ;;  %v717_v17 = vmul.f32 0.03125, %v709_v41 }
 0x4c3   :  { %v712_v28 = vpop.xlane.xlu1 %711 }
 0x4c4   :  { %v721_v45 = vsub.f32 %v701_v24, %v717_v17  ;;  %v718_v15 = vmul.f32 0.03125, %v712_v28  ;;  %v724_v26 = vmul.f32 %v720_v43, %v720_v43 }
 0x4c5   :  { %v715_v46 = vpop.xlane.xlu0 %714 }
 0x4c6   :  { %v722_v16 = vsub.f32 %v702_v14, %v718_v15  ;;  %v719_v27 = vmul.f32 0.03125, %v715_v46  ;;  %v728_v44 = vsel %vm305_vm6, %v724_v26, 0.0  ;;  %v725_v38 = vmul.f32 %v721_v45, %v721_v45 }
 0x4c7   :  { %729 = vadd.xlane.f32.xlu1 %v728_v44 }
 0x4c8   :  { %v723_v48 = vsub.f32 %v703_v21, %v719_v27  ;;  %v731_v35 = vsel %vm305_vm6, %v725_v38, 0.0  ;;  %v726_v18 = vmul.f32 %v722_v16, %v722_v16 }
 0x4c9   :  { %732 = vadd.xlane.f32.xlu0 %v731_v35 }
 0x4ca   :  { %v734_v39 = vsel %vm305_vm6, %v726_v18, 0.0  ;;  %v727_v55 = vmul.f32 %v723_v48, %v723_v48 }
 0x4cb   :  { %735 = vadd.xlane.f32.xlu1 %v734_v39 }
 0x4cc   :  { %v737_v58 = vsel %vm305_vm6, %v727_v55, 0.0 }
 0x4cd   :  { %738 = vadd.xlane.f32.xlu0 %v737_v58 }
 0x554   :  { %v730_v50 = vpop.xlane.xlu1 %729 }
 0x555   :  { %v740_v40 = vmul.f32 0.03125, %v730_v50 }
 0x556   :  { %v733_v49 = vpop.xlane.xlu0 %732 }
 0x557   :  { %v744_v56 = vadd.f32 1e-05, %v740_v40  ;;  %v741_v54 = vmul.f32 0.03125, %v733_v49 }
 0x558   :  { %v736_v53 = vpop.xlane.xlu1 %735 }
 0x559   :  { %1176 = vrsqrt.f32 %v744_v56  ;;  %v745_v36 = vadd.f32 1e-05, %v741_v54  ;;  %v742_v37 = vmul.f32 0.03125, %v736_v53 }
 0x55a   :  { %v739_v63 = vpop.xlane.xlu0 %738 }
 0x55b   :  { %1178 = vrsqrt.f32 %v745_v36  ;;  %v746_v1 = vadd.f32 1e-05, %v742_v37  ;;  %v743_v3 = vmul.f32 0.03125, %v739_v63 }
 0x55d   :  { %1180 = vrsqrt.f32 %v746_v1  ;;  %v747_v5 = vadd.f32 1e-05, %v743_v3 }
 0x55f   :  { %1182 = vrsqrt.f32 %v747_v5 }
 0x563   :  { %v1177_v6 = vpop.eup %1176 }
 0x564   :  { %v752_v4 = vmul.f32 %v1177_v6, %v720_v43  ;;  %v1096_v6 = vld [vmem:[%s1629_s9 + $0x1] ss:$0 sm:$0xff] }
 0x565   :  { %v1179_v7 = vpop.eup %1178 }
 0x566   :  { %v762_v11 = vmul.f32 %v1094_v57, %v752_v4  ;;  %v753_v13 = vmul.f32 %v1179_v7, %v721_v45 }
 0x567   :  { %v1181_v0 = vpop.eup %1180 }
 0x568   :  { %v772_v19 = vadd.f32 %v1095_v9, %v762_v11  ;;  %v763_v23 = vmul.f32 %v1094_v57, %v753_v13  ;;  %v754_v24 = vmul.f32 %v1181_v0, %v722_v16 }
 0x569   :  { %v1183_v25 = vpop.eup %1182 }
 0x56a   :  { %v773_v2 = vadd.f32 %v1095_v9, %v763_v23  ;;  %v764_v10 = vmul.f32 %v1094_v57, %v754_v24  ;;  %v755_v14 = vmul.f32 %v1183_v25, %v723_v48  ;;  %v780_v21 = vmul.f32 0.044715, %v772_v19 }
 0x56b   :  { %v776_v60 = vmul.f32 0.5, %v772_v19 }
 0x56c   :  { %v774_v30 = vadd.f32 %v1095_v9, %v764_v10  ;;  %v765_v32 = vmul.f32 %v1094_v57, %v755_v14  ;;  %v781_v29 = vmul.f32 0.044715, %v773_v2  ;;  %v784_v31 = vmul.f32 %v780_v21, %v772_v19 }
 0x56d   :  { %v777_v61 = vmul.f32 0.5, %v773_v2 }
 0x56e   :  { %v775_v41 = vadd.f32 %v1095_v9, %v765_v32  ;;  %v785_v43 = vmul.f32 %v781_v29, %v773_v2  ;;  %v782_v17 = vmul.f32 0.044715, %v774_v30  ;;  %v788_v28 = vmul.f32 %v784_v31, %v772_v19 }
 0x56f   :  { %v778_v36 = vmul.f32 0.5, %v774_v30 }
 0x570   :  { %v789_v15 = vmul.f32 %v785_v43, %v773_v2  ;;  %v783_v26 = vmul.f32 0.044715, %v775_v41  ;;  %v786_v45 = vmul.f32 %v782_v17, %v774_v30  ;;  %v792_v46 = vadd.f32 %v788_v28, %v772_v19 }
 0x571   :  { %v779_v37 = vmul.f32 0.5, %v775_v41 }
 0x572   :  { %v793_v27 = vadd.f32 %v789_v15, %v773_v2  ;;  %v787_v44 = vmul.f32 %v783_v26, %v775_v41  ;;  %v790_v16 = vmul.f32 %v786_v45, %v774_v30  ;;  %v796_v38 = vmul.f32 0.7978846, %v792_v46 }
 0x574   :  { %v797_v35 = vmul.f32 0.7978846, %v793_v27  ;;  %v791_v18 = vmul.f32 %v787_v44, %v775_v41  ;;  %v794_v48 = vadd.f32 %v790_v16, %v774_v30  ;;  %1184 = vtanh.f32 %v796_v38 }
 0x576   :  { %1186 = vtanh.f32 %v797_v35  ;;  %v795_v39 = vadd.f32 %v791_v18, %v775_v41  ;;  %v798_v55 = vmul.f32 0.7978846, %v794_v48  ;;  %v993_v18 = vld [vmem:[%s1632_s12] sm:$0xff]  ;;  %v994_v48 = vld [vmem:[%s1632_s12 + $0x8] sm:$0xff] }
 0x578   :  { %v799_v58 = vmul.f32 0.7978846, %v795_v39  ;;  %1188 = vtanh.f32 %v798_v55  ;;  %v995_v39 = vld [vmem:[%s1632_s12 + $0x10] sm:$0xff]  ;;  %v999_v55 = vpack.c.bf16 %v994_v48, %v993_v18 }
 0x57a   :  { %1190 = vtanh.f32 %v799_v58  ;;  %v996_v58 = vld [vmem:[%s1632_s12 + $0x18] sm:$0xff]  ;;  %1132 = vmatprep.subr.bf16.mxu0 %v999_v55 }
 0x57b   :  { %1133 = vmatpush3.bf16.msra.mxu0 %v999_v55 }
 0x57e   :  { %v1185_v8 = vpop.eup %1184 }
 0x57f   :  { %v804_v47 = vadd.f32 1.0, %v1185_v8  ;;  %v1000_v8 = vpack.c.bf16 %v996_v58, %v995_v39 }
 0x580   :  { %v1187_v59 = vpop.eup %1186 }
 0x581   :  { %v805_v62 = vadd.f32 1.0, %v1187_v59  ;;  %v808_v40 = vmul.f32 %v804_v47, %v776_v60  ;;  %1134 = vmatprep.subr.bf16.mxu0 %v1000_v8 }
 0x582   :  { %v1189_v50 = vpop.eup %1188  ;;  %1135 = vmatpush3.bf16.msra.mxu0 %v1000_v8 }
 0x583   :  { %v809_v49 = vmul.f32 %v805_v62, %v777_v61  ;;  %v806_v56 = vadd.f32 1.0, %v1189_v50 }
 0x584   :  { %v1191_v54 = vpop.eup %1190 }
 0x585   :  { %v812_v53 = vpack.c.bf16 %v809_v49, %v808_v40  ;;  %v807_v63 = vadd.f32 1.0, %v1191_v54  ;;  %v810_v1 = vmul.f32 %v806_v56, %v778_v36 }
 0x587   :  { %1128 = vmatprep.mubr.msk.bf16.mxu1 %vm305_vm6, %v812_v53  ;;  %v811_v3 = vmul.f32 %v807_v63, %v779_v37  ;;  %v1099_v63 = vld [vmem:[%s1630_s10 + $0x1] ss:$0 sm:$0xff] }
 0x589   :  { %v813_v5 = vpack.c.bf16 %v811_v3, %v810_v1 }
 0x58b   :  { %1129 = vmatmul.mubr.msk.bf16.vlgmr.msra.gmra.mrb[0].mxu1 %vm305_vm6, %v813_v5  ;;  %v1100_v5 = vld [vmem:[%s1631_s11 + $0x1] ss:$0 sm:$0xff] }
 0x65e   :  { %v1130_v57 = vpop.f32.mrb[0].mxu1 }
 0x65f   :  { %v862_v4 = vpop.f32.mrb[1].mxu1  ;;  %v871_v13 = vadd.f32 %v1130_v57, %v1096_v6 }
 0x660   :  { %v863_v7 = vadd.f32 %v1096_v6, %v862_v4  ;;  %v1131_v9 = vpop.f32.mrb[2].mxu1 }
 0x661   :  { %v865_v11 = vpop.f32.mrb[3].mxu1  ;;  %v874_v23 = vadd.f32 %v1131_v9, %v1096_v6  ;;  %v883_v25 = vsel %vm305_vm6, %v871_v13, 0.0 }
 0x662   :  { %v866_v0 = vadd.f32 %v1096_v6, %v865_v11  ;;  %v877_v19 = vsel %vm305_vm6, %v863_v7, 0.0 }
 0x663   :  { %878 = vadd.xlane.f32.xlu1 %v877_v19  ;;  %v886_v2 = vsel %vm305_vm6, %v874_v23, 0.0 }
 0x664   :  { %v880_v24 = vsel %vm305_vm6, %v866_v0, 0.0 }
 0x665   :  { %881 = vadd.xlane.f32.xlu0 %v880_v24 }
 0x667   :  { %884 = vadd.xlane.f32.xlu1 %v883_v25 }
 0x669   :  { %887 = vadd.xlane.f32.xlu0 %v886_v2 }
 0x6f0   :  { %v879_v10 = vpop.xlane.xlu1 %878 }
 0x6f1   :  { %v889_v14 = vmul.f32 0.03125, %v879_v10 }
 0x6f2   :  { %v882_v21 = vpop.xlane.xlu0 %881 }
 0x6f3   :  { %v893_v30 = vsub.f32 %v863_v7, %v889_v14  ;;  %v890_v32 = vmul.f32 0.03125, %v882_v21 }
 0x6f4   :  { %v885_v29 = vpop.xlane.xlu1 %884 }
 0x6f5   :  { %v894_v31 = vsub.f32 %v866_v0, %v890_v32  ;;  %v891_v41 = vmul.f32 0.03125, %v885_v29  ;;  %v897_v43 = vmul.f32 %v893_v30, %v893_v30 }
 0x6f6   :  { %v888_v17 = vpop.xlane.xlu0 %887 }
 0x6f7   :  { %v895_v28 = vsub.f32 %v871_v13, %v891_v41  ;;  %v892_v15 = vmul.f32 0.03125, %v888_v17  ;;  %v901_v26 = vsel %vm305_vm6, %v897_v43, 0.0  ;;  %v898_v45 = vmul.f32 %v894_v31, %v894_v31 }
 0x6f8   :  { %902 = vadd.xlane.f32.xlu1 %v901_v26 }
 0x6f9   :  { %v896_v46 = vsub.f32 %v874_v23, %v892_v15  ;;  %v904_v27 = vsel %vm305_vm6, %v898_v45, 0.0  ;;  %v899_v44 = vmul.f32 %v895_v28, %v895_v28 }
 0x6fa   :  { %905 = vadd.xlane.f32.xlu0 %v904_v27 }
 0x6fb   :  { %v907_v16 = vsel %vm305_vm6, %v899_v44, 0.0  ;;  %v900_v38 = vmul.f32 %v896_v46, %v896_v46 }
 0x6fc   :  { %908 = vadd.xlane.f32.xlu1 %v907_v16 }
 0x6fd   :  { %v910_v35 = vsel %vm305_vm6, %v900_v38, 0.0 }
 0x6fe   :  { %911 = vadd.xlane.f32.xlu0 %v910_v35 }
 0x785   :  { %v903_v59 = vpop.xlane.xlu1 %902 }
 0x786   :  { %v913_v47 = vmul.f32 0.03125, %v903_v59 }
 0x787   :  { %v906_v60 = vpop.xlane.xlu0 %905 }
 0x788   :  { %v917_v61 = vadd.f32 1e-05, %v913_v47  ;;  %v914_v62 = vmul.f32 0.03125, %v906_v60 }
 0x789   :  { %v909_v50 = vpop.xlane.xlu1 %908 }
 0x78a   :  { %1192 = vrsqrt.f32 %v917_v61  ;;  %v918_v40 = vadd.f32 1e-05, %v914_v62  ;;  %v915_v49 = vmul.f32 0.03125, %v909_v50 }
 0x78b   :  { %v912_v56 = vpop.xlane.xlu0 %911 }
 0x78c   :  { %1194 = vrsqrt.f32 %v918_v40  ;;  %v919_v54 = vadd.f32 1e-05, %v915_v49  ;;  %v916_v53 = vmul.f32 0.03125, %v912_v56 }
 0x78e   :  { %1196 = vrsqrt.f32 %v919_v54  ;;  %v920_v36 = vadd.f32 1e-05, %v916_v53 }
 0x790   :  { %1198 = vrsqrt.f32 %v920_v36 }
 0x794   :  { %v1193_v37 = vpop.eup %1192 }
 0x795   :  { %v925_v1 = vmul.f32 %v1193_v37, %v893_v30 }
 0x796   :  { %v1195_v3 = vpop.eup %1194 }
 0x797   :  { %v935_v6 = vmul.f32 %v1099_v63, %v925_v1  ;;  %v926_v57 = vmul.f32 %v1195_v3, %v894_v31 }
 0x798   :  { %v1197_v4 = vpop.eup %1196 }
 0x799   :  { %v945_v7 = vadd.f32 %v1100_v5, %v935_v6  ;;  %v936_v9 = vmul.f32 %v1099_v63, %v926_v57  ;;  %v927_v11 = vmul.f32 %v1197_v4, %v895_v28  ;;  %v1101_v57 = vld [vmem:[%s1633_s13] ss:$0 sm:$0xff] }
 0x79a   :  { %v1199_v13 = vpop.eup %1198 }
 0x79b   :  { %v946_v0 = vadd.f32 %v1100_v5, %v936_v9  ;;  %v937_v19 = vmul.f32 %v1099_v63, %v927_v11  ;;  %v928_v23 = vmul.f32 %v1199_v13, %v896_v46  ;;  %v953_v24 = vmul.f32 0.044715, %v945_v7 }
 0x79c   :  { %v949_v39 = vmul.f32 0.5, %v945_v7 }
 0x79d   :  { %v947_v25 = vadd.f32 %v1100_v5, %v937_v19  ;;  %v938_v2 = vmul.f32 %v1099_v63, %v928_v23  ;;  %v954_v10 = vmul.f32 0.044715, %v946_v0  ;;  %v957_v14 = vmul.f32 %v953_v24, %v945_v7 }
 0x79e   :  { %v950_v58 = vmul.f32 0.5, %v946_v0 }
 0x79f   :  { %v955_v21 = vmul.f32 0.044715, %v947_v25  ;;  %v948_v30 = vadd.f32 %v1100_v5, %v938_v2  ;;  %v958_v32 = vmul.f32 %v954_v10, %v946_v0  ;;  %v961_v29 = vmul.f32 %v957_v14, %v945_v7 }
 0x7a0   :  { %v951_v61 = vmul.f32 0.5, %v947_v25 }
 0x7a1   :  { %v956_v41 = vmul.f32 0.044715, %v948_v30  ;;  %v962_v43 = vmul.f32 %v958_v32, %v946_v0  ;;  %v959_v31 = vmul.f32 %v955_v21, %v947_v25  ;;  %v965_v17 = vadd.f32 %v961_v29, %v945_v7 }
 0x7a2   :  { %v952_v56 = vmul.f32 0.5, %v948_v30 }
 0x7a3   :  { %v966_v15 = vadd.f32 %v962_v43, %v946_v0  ;;  %v960_v26 = vmul.f32 %v956_v41, %v948_v30  ;;  %v963_v28 = vmul.f32 %v959_v31, %v947_v25  ;;  %v969_v45 = vmul.f32 0.7978846, %v965_v17 }
 0x7a5   :  { %v970_v27 = vmul.f32 0.7978846, %v966_v15  ;;  %v964_v44 = vmul.f32 %v960_v26, %v948_v30  ;;  %v967_v46 = vadd.f32 %v963_v28, %v947_v25  ;;  %1200 = vtanh.f32 %v969_v45 }
 0x7a7   :  { %1202 = vtanh.f32 %v970_v27  ;;  %v968_v16 = vadd.f32 %v964_v44, %v948_v30  ;;  %v971_v38 = vmul.f32 0.7978846, %v967_v46 }
 0x7a9   :  { %v972_v35 = vmul.f32 0.7978846, %v968_v16  ;;  %1204 = vtanh.f32 %v971_v38 }
 0x7ab   :  { %1206 = vtanh.f32 %v972_v35 }
 0x7af   :  { %v1201_v18 = vpop.eup %1200 }
 0x7b0   :  { %v977_v55 = vadd.f32 1.0, %v1201_v18 }
 0x7b1   :  { %v1203_v48 = vpop.eup %1202 }
 0x7b2   :  { %v978_v8 = vadd.f32 1.0, %v1203_v48  ;;  %v981_v47 = vmul.f32 %v977_v55, %v949_v39 }
 0x7b3   :  { %v1205_v59 = vpop.eup %1204 }
 0x7b4   :  { %v982_v60 = vmul.f32 %v978_v8, %v950_v58  ;;  %v979_v62 = vadd.f32 1.0, %v1205_v59  ;;  %v985_v40 = vadd.f32 %v981_v47, %v1474_v12 }
 0x7b5   :  { %v1207_v50 = vpop.eup %1206 }
 0x7b6   :  { %v986_v49 = vadd.f32 %v982_v60, %v1491_v22  ;;  %v980_v54 = vadd.f32 1.0, %v1207_v50  ;;  %v983_v53 = vmul.f32 %v979_v62, %v951_v61  ;;  %v989_v36 = vmul.f32 %v985_v40, %v1346_v34 }
 0x7b8   :  { %v990_v37 = vmul.f32 %v986_v49, %v1384_v52  ;;  %v984_v63 = vmul.f32 %v980_v54, %v952_v56  ;;  %v987_v1 = vadd.f32 %v983_v53, %v1496_v42 }
 0x7ba   :  { %v997_v3 = vpack.c.bf16 %v990_v37, %v989_v36  ;;  %v988_v5 = vadd.f32 %v984_v63, %v1477_v20  ;;  %v991_v6 = vmul.f32 %v987_v1, %v1382_v51 }
 0x7bc   :  { %1136 = vmatprep.mubr.msk.bf16.mxu0 %vm305_vm6, %v997_v3  ;;  %v992_v12 = vmul.f32 %v988_v5, %v1344_v33 }
 0x7be   :  { %v998_v22 = vpack.c.bf16 %v992_v12, %v991_v6 }
 0x7c0   :  { %1137 = vmatmul.mubr.msk.bf16.vlgmr.msra.gmra.mrb[4].mxu0 %vm305_vm6, %v998_v22 }
 0x893   :  { %v1138_v4 = vpop.f32.mrb[4].mxu0 }
 0x894   :  { %v1057_v7 = vadd.f32 %v1138_v4, %v1101_v57  ;;  %v1048_v9 = vpop.f32.mrb[5].mxu0 }
 0x895   :  { %v1049_v42 = vadd.f32 %v1101_v57, %v1048_v9  ;;  %v1139_v11 = vpop.f32.mrb[6].mxu0 }
 0x896   :  { %v1065_v20 = vmul.f32 %v1057_v7, %v1382_v51  ;;  %v1060_v13 = vadd.f32 %v1139_v11, %v1101_v57  ;;  %v1051_v0 = vpop.f32.mrb[7].mxu0 }
 0x897   :  { %v1063_v19 = vmul.f32 %v1049_v42, %v1346_v34  ;;  %v1052_v23 = vadd.f32 %v1101_v57, %v1051_v0 }
 0x898   :  { %1069 = vst.msk [vmem:[%s1634_s14 + $0x10] sm:$0xff] %vm305_vm6, %v1065_v20  ;;  %v1066_v24 = vmul.f32 %v1060_v13, %v1344_v33 }
 0x899   :  { %1067 = vst.msk [vmem:[%s1634_s14] sm:$0xff] %vm305_vm6, %v1063_v19  ;;  %v1064_v25 = vmul.f32 %v1052_v23, %v1384_v52 }
 0x89a   :  { %1070 = vst.msk [vmem:[%s1634_s14 + $0x18] sm:$0xff] %vm305_vm6, %v1066_v24 }
 0x89b   :  { %1068 = vst.msk [vmem:[%s1634_s14 + $0x8] sm:$0xff] %vm305_vm6, %v1064_v25 }

// kernel: fwd.4
= control target key start
LH: loop header
LB: loop body
LE: loop exit
PB: predicated region body
PF: predicated region fallthrough
CT: control target
= control target key end

     0   :  { %v1249_v3 = vmov 0   ;;  %vm124_vm0 = vcmask 261120   ;;  %v56_v17 = vlaneseq  ;;  %v1250_v48 = vmov 0.0   ;;  %s1648_s2 = inlined_call_operand.vmem [shape: f32[32,32], index: 2, kind: input, shape index: {}]   ;;  %s1649_s0 = inlined_call_operand.vmem [shape: f32[32,32], index: 0, kind: input, shape index: {}]   ;;  %s1650_s1 = inlined_call_operand.vmem [shape: f32[32,1], index: 1, kind: input, shape index: {}]   ;;  %s1651_s3 = inlined_call_operand.vmem [shape: f32[1,32], index: 3, kind: input, shape index: {}]   ;;  %s1652_s4 = inlined_call_operand.vmem [shape: f32[2,3,32], index: 4, kind: input, shape index: {}]   ;;  %s1653_s5 = inlined_call_operand.vmem [shape: f32[2,1,32], index: 5, kind: input, shape index: {}]   ;;  %s1654_s8 = inlined_call_operand.vmem [shape: f32[2,32,32], index: 8, kind: input, shape index: {}]   ;;  %s1655_s6 = inlined_call_operand.vmem [shape: f32[2,1,32], index: 6, kind: input, shape index: {}, may-alias: {6,10}]   ;;  %s1656_s7 = inlined_call_operand.vmem [shape: f32[2,1,32], index: 7, kind: input, shape index: {}, may-alias: {7,11}]   ;;  %s1657_s9 = inlined_call_operand.vmem [shape: f32[2,1,32], index: 9, kind: input, shape index: {}]   ;;  %s1658_s10 = inlined_call_operand.vmem [shape: f32[2,1,32], index: 10, kind: input, shape index: {}, may-alias: {6,10}]   ;;  %s1659_s11 = inlined_call_operand.vmem [shape: f32[2,1,32], index: 11, kind: input, shape index: {}, may-alias: {7,11}]   ;;  %s1660_s12 = inlined_call_operand.vmem [shape: f32[32,32], index: 12, kind: input, shape index: {}]   ;;  %s1661_s13 = inlined_call_operand.vmem [shape: f32[1,32], index: 13, kind: input, shape index: {}]   ;;  %s1662_s14 = inlined_call_operand.vmem [shape: f32[32,32], index: 14, kind: output, shape index: {}]  }
   0x1   :  { %v109_v0 = vld [vmem:[%s1648_s2] sm:$0xff]  ;;  %v110_v1 = vld [vmem:[%s1648_s2 + $0x8] sm:$0xff]  ;;  %v111_v2 = vld [vmem:[%s1648_s2 + $0x10] sm:$0xff]  ;;  %1183 = vset.pattern.permute.xlu0 %v1249_v3  ;;  %1184 = vset.pattern.permute.xlu1 %v1249_v3 }
   0x2   :  { %v116_v4 = vpack.c.bf16 %v110_v1, %v109_v0  ;;  %v112_v5 = vld [vmem:[%s1648_s2 + $0x18] sm:$0xff]  ;;  %v48_v6 = vld [vmem:[%s1649_s0] sm:$0xff]  ;;  %v49_v7 = vld [vmem:[%s1649_s0 + $0x8] sm:$0xff]  ;;  %v1364_v18 = vshrl.u32 %v56_v17, 7 }
   0x3   :  { %v117_v8 = vpack.c.bf16 %v112_v5, %v111_v2  ;;  %v114_v9 = vpack.c.bf16 %v49_v7, %v48_v6  ;;  %v52_v10 = vld [vmem:[%s1650_s1] sm:$0xff]  ;;  %v53_v11 = vld [vmem:[%s1650_s1 + $0x8] sm:$0xff]  ;;  %v50_v12 = vld [vmem:[%s1649_s0 + $0x10] sm:$0xff] }
   0x4   :  { %1149 = vmatprep.subr.bf16.mxu0 %v116_v4  ;;  %204 = vperm.xlu0 %1183, %v52_v10   ;;  %v51_v13 = vld [vmem:[%s1649_s0 + $0x18] sm:$0xff]  ;;  %v54_v15 = vld [vmem:[%s1650_s1 + $0x10] sm:$0xff]  ;;  %v1369_v20 = vadd.s32 8, %v1364_v18  ;;  %v1372_v21 = vadd.s32 16, %v1364_v18  ;;  %v269_v22 = vsub.s32 1, %v1364_v18  ;;  %v1376_v23 = vadd.s32 24, %v1364_v18 }
   0x5   :  { %1150 = vmatpush3.bf16.msra.mxu0 %v116_v4  ;;  %1153 = vmatprep.mubr.msk.bf16.mxu0 %vm124_vm0, %v114_v9  ;;  %v55_v14 = vld [vmem:[%s1650_s1 + $0x18] sm:$0xff]  ;;  %v115_v16 = vpack.c.bf16 %v51_v13, %v50_v12  ;;  %v1103_v25 = vld [vmem:[%s1651_s3] ss:$0 sm:$0xff]  ;;  %v261_v28 = vsub.s32 0, %v1364_v18  ;;  %v65_v29 = vand.u32 15, %v1364_v18  ;;  %v314_v36 = vsub.s32 2, %v1364_v18 }
   0x6   :  { %1151 = vmatprep.subr.bf16.mxu0 %v117_v8  ;;  %209 = vperm.xlu1 %1184, %v53_v11   ;;  %v180_v26 = vld [vmem:[%s1652_s4] sm:$0x7]  ;;  %v72_v27 = vand.u32 15, %v1369_v20  ;;  %v79_v32 = vand.u32 15, %v1372_v21  ;;  %v86_v37 = vand.u32 15, %v1376_v23  ;;  %vm230_vm1 = vcmp.lt.s32.totalorder %v1364_v18, 1 }
   0x7   :  { %v270_v35 = vrot.slane %v180_v26, %v269_v22  ;;  %v262_v43 = vrot.slane %v180_v26, %v261_v28  ;;  %vm235_vm3 = vcmp.ge.s32.totalorder %v65_v29, 1  ;;  %vm283_vm4 = vcmp.lt.s32.totalorder %v1364_v18, 7 }
   0x8   :  { %219 = vperm.xlu0 %1183, %v55_v14   ;;  %vm293_vm2 = vcmp.lt.s32.totalorder %v72_v27, 15  ;;  %vm237_vm5 = vcmp.ge.s32.totalorder %v79_v32, 1  ;;  %v315_v50 = vrot.slane %v180_v26, %v314_v36  ;;  %vm295_vm6 = vcmp.lt.s32.totalorder %v86_v37, 15 }
   0x9   :  { %1152 = vmatpush3.bf16.msra.mxu0 %v117_v8  ;;  %v1108_v49 = vsel %vm293_vm2, 1.0, %v1250_v48  ;;  %v1106_v54 = vsel %vm235_vm3, 1.0, %v1250_v48  ;;  %v1107_v58 = vsel %vm237_vm5, 1.0, %v1250_v48  ;;  %v1109_v62 = vsel %vm295_vm6, 1.0, %v1250_v48 }
   0xa   :  { %214 = vperm.xlu1 %1184, %v54_v15   ;;  %vm633_vm7 = vcmp.ge.s32.totalorder %v65_v29, 3  ;;  %vm628_vm8 = vcmp.lt.s32.totalorder %v1364_v18, 3  ;;  %vm681_vm9 = vcmp.lt.s32.totalorder %v1364_v18, 5  ;;  %vm693_vm10 = vcmp.lt.s32.totalorder %v86_v37, 13 }
   0xb   :  { %v1118_v29 = vsel %vm633_vm7, 1.0, %v1250_v48  ;;  %vm691_vm11 = vcmp.lt.s32.totalorder %v72_v27, 13  ;;  %vm635_vm12 = vcmp.ge.s32.totalorder %v79_v32, 3  ;;  %v1121_v20 = vsel %vm693_vm10, 1.0, %v1250_v48 }
   0xc   :  { %1154 = vmatmul.mubr.msk.bf16.vlgmr.msra.gmra.mrb[0].mxu0 %vm124_vm0, %v115_v16  ;;  %v1120_v21 = vsel %vm691_vm11, 1.0, %v1250_v48 }
  0x83   :  { %v1378_v24 = vpop.permute.xlu0 %204 }
  0x85   :  { %v1366_v19 = vpop.permute.xlu1 %209 }
  0x87   :  { %v1411_v44 = vpop.permute.xlu0 %219 }
  0x89   :  { %v1389_v31 = vpop.permute.xlu1 %214 }
  0xdf   :  { %v1155_v30 = vpop.f32.mrb[0].mxu0 }
  0xe0   :  { %v1392_v33 = vadd.f32 %v1155_v30, %v1103_v25  ;;  %v165_v34 = vpop.f32.mrb[1].mxu0  ;;  %v1110_v30 = vld [vmem:[%s1653_s5] ss:$0 sm:$0xff] }
  0xe1   :  { %v1398_v38 = vadd.f32 %v1103_v25, %v165_v34  ;;  %v1156_v39 = vpop.f32.mrb[2].mxu0 }
  0xe2   :  { %v224_v40 = vmul.f32 %v1389_v31, %v1392_v33  ;;  %v1405_v41 = vadd.f32 %v1156_v39, %v1103_v25  ;;  %v168_v42 = vpop.f32.mrb[3].mxu0 }
  0xe3   :  { %v222_v45 = vmul.f32 %v1378_v24, %v1398_v38  ;;  %v1415_v46 = vadd.f32 %v1103_v25, %v168_v42 }
  0xe4   :  { %v225_v47 = vmul.f32 %v1411_v44, %v1405_v41  ;;  %v228_v55 = vrot.slane %v224_v40, 7  ;;  %v281_v59 = vrot.slane %v224_v40, 1  ;;  %v273_v17 = vmul.f32 %v270_v35, %v224_v40 }
  0xe5   :  { %v226_v51 = vrot.slane %v222_v45, 7  ;;  %v279_v52 = vrot.slane %v222_v45, 1  ;;  %v223_v53 = vmul.f32 %v1366_v19, %v1415_v46  ;;  %v271_v63 = vmul.f32 %v270_v35, %v222_v45 }
  0xe6   :  { %v229_v56 = vrot.slane %v225_v47, 7  ;;  %v282_v57 = vrot.slane %v225_v47, 1  ;;  %v274_v26 = vmul.f32 %v270_v35, %v225_v47 }
  0xe7   :  { %v227_v60 = vrot.slane %v223_v53, 7  ;;  %v280_v61 = vrot.slane %v223_v53, 1  ;;  %v272_v0 = vmul.f32 %v270_v35, %v223_v53 }
  0xe8   :  { %v234_v1 = vsel %vm230_vm1, %v229_v56, %v226_v51  ;;  %v231_v2 = vsel %vm230_vm1, %v228_v55, %v229_v56  ;;  %v287_v6 = vsel %vm283_vm4, %v282_v57, %v279_v52  ;;  %v284_v13 = vsel %vm283_vm4, %v281_v59, %v282_v57 }
  0xe9   :  { %v233_v3 = vsel %vm230_vm1, %v226_v51, %v227_v60  ;;  %v285_v4 = vsel %vm283_vm4, %v280_v61, %v281_v59  ;;  %v255_v5 = vmul.f32 %v1106_v54, %v234_v1  ;;  %v286_v9 = vsel %vm283_vm4, %v279_v52, %v280_v61 }
  0xea   :  { %v264_v7 = vmul.f32 %v262_v43, %v233_v3  ;;  %v309_v8 = vmul.f32 %v1108_v49, %v285_v4  ;;  %v232_v10 = vsel %vm230_vm1, %v227_v60, %v228_v55  ;;  %v266_v14 = vmul.f32 %v262_v43, %v231_v2 }
  0xeb   :  { %v263_v11 = vmul.f32 %v262_v43, %v255_v5  ;;  %v257_v12 = vmul.f32 %v1107_v58, %v232_v10  ;;  %v311_v25 = vmul.f32 %v1109_v62, %v287_v6  ;;  %v316_v39 = vmul.f32 %v315_v50, %v286_v9 }
  0xec   :  { %v276_v15 = vadd.f32 %v272_v0, %v264_v7  ;;  %v317_v16 = vmul.f32 %v315_v50, %v309_v8  ;;  %v318_v49 = vmul.f32 %v315_v50, %v284_v13  ;;  %v278_v53 = vadd.f32 %v274_v26, %v266_v14  ;;  %v190_v26 = vld [vmem:[%s1654_s8 + $0x10] sm:$0xff] }
  0xed   :  { %v275_v34 = vadd.f32 %v271_v63, %v263_v11  ;;  %v265_v42 = vmul.f32 %v262_v43, %v257_v12  ;;  %v319_v54 = vmul.f32 %v315_v50, %v311_v25 }
  0xee   :  { %v321_v45 = vadd.f32 %v317_v16, %v276_v15  ;;  %v188_v16 = vld [vmem:[%s1654_s8] sm:$0xff] }
  0xef   :  { %v320_v51 = vadd.f32 %v316_v39, %v275_v34  ;;  %v277_v52 = vadd.f32 %v273_v17, %v265_v42  ;;  %v323_v58 = vadd.f32 %v319_v54, %v278_v53  ;;  %v189_v17 = vld [vmem:[%s1654_s8 + $0x8] sm:$0xff] }
  0xf0   :  { %v331_v55 = vadd.f32 %v1110_v30, %v321_v45  ;;  %v445_v25 = vpack.c.bf16 %v189_v17, %v188_v16 }
  0xf1   :  { %v330_v56 = vadd.f32 %v1110_v30, %v320_v51  ;;  %v322_v57 = vadd.f32 %v318_v49, %v277_v52  ;;  %v333_v43 = vadd.f32 %v1110_v30, %v323_v58 }
  0xf2   :  { %v337_v40 = vsel %vm124_vm0, %v331_v55, 0.0  ;;  %1157 = vmatprep.subr.bf16.mxu1 %v445_v25 }
  0xf3   :  { %338 = vadd.xlane.f32.xlu1 %v337_v40  ;;  %v334_v35 = vsel %vm124_vm0, %v330_v56, 0.0  ;;  %v332_v47 = vadd.f32 %v1110_v30, %v322_v57  ;;  %v343_v60 = vsel %vm124_vm0, %v333_v43, 0.0  ;;  %1158 = vmatpush3.bf16.msra.mxu1 %v445_v25  ;;  %v191_v30 = vld [vmem:[%s1654_s8 + $0x18] sm:$0xff] }
  0xf4   :  { %335 = vadd.xlane.f32.xlu0 %v334_v35  ;;  %v446_v34 = vpack.c.bf16 %v191_v30, %v190_v26 }
  0xf5   :  { %v340_v59 = vsel %vm124_vm0, %v332_v47, 0.0 }
  0xf6   :  { %1159 = vmatprep.subr.bf16.mxu1 %v446_v34 }
  0xf7   :  { %1160 = vmatpush3.bf16.msra.mxu1 %v446_v34 }
  0xf8   :  { %341 = vadd.xlane.f32.xlu0 %v340_v59 }
  0xfc   :  { %344 = vadd.xlane.f32.xlu0 %v343_v60 }
 0x180   :  { %v339_v61 = vpop.xlane.xlu1 %338 }
 0x181   :  { %v348_v50 = vmul.f32 0.03125, %v339_v61  ;;  %v336_v62 = vpop.xlane.xlu0 %335 }
 0x182   :  { %v347_v63 = vmul.f32 0.03125, %v336_v62 }
 0x183   :  { %v352_v0 = vsub.f32 %v331_v55, %v348_v50 }
 0x184   :  { %v351_v1 = vsub.f32 %v330_v56, %v347_v63 }
 0x185   :  { %v342_v2 = vpop.xlane.xlu0 %341  ;;  %v356_v3 = vmul.f32 %v352_v0, %v352_v0 }
 0x186   :  { %v349_v4 = vmul.f32 0.03125, %v342_v2  ;;  %v355_v5 = vmul.f32 %v351_v1, %v351_v1 }
 0x187   :  { %v362_v6 = vsel %vm124_vm0, %v356_v3, 0.0 }
 0x188   :  { %v353_v7 = vsub.f32 %v332_v47, %v349_v4  ;;  %363 = vadd.xlane.f32.xlu0 %v362_v6  ;;  %v359_v8 = vsel %vm124_vm0, %v355_v5, 0.0  ;;  %v1111_v47 = vld [vmem:[%s1655_s6] ss:$0 sm:$0xff] }
 0x189   :  { %v345_v9 = vpop.xlane.xlu0 %344  ;;  %360 = vadd.xlane.f32.xlu1 %v359_v8 }
 0x18a   :  { %v350_v10 = vmul.f32 0.03125, %v345_v9  ;;  %v357_v11 = vmul.f32 %v353_v7, %v353_v7 }
 0x18c   :  { %v354_v12 = vsub.f32 %v333_v43, %v350_v10  ;;  %v365_v13 = vsel %vm124_vm0, %v357_v11, 0.0  ;;  %v1112_v43 = vld [vmem:[%s1656_s7] ss:$0 sm:$0xff] }
 0x18d   :  { %366 = vadd.xlane.f32.xlu1 %v365_v13 }
 0x18e   :  { %v358_v14 = vmul.f32 %v354_v12, %v354_v12 }
 0x190   :  { %v368_v15 = vsel %vm124_vm0, %v358_v14, 0.0 }
 0x191   :  { %369 = vadd.xlane.f32.xlu0 %v368_v15 }
 0x215   :  { %v364_v39 = vpop.xlane.xlu0 %363 }
 0x216   :  { %v372_v42 = vmul.f32 0.03125, %v364_v39  ;;  %v361_v45 = vpop.xlane.xlu1 %360 }
 0x217   :  { %v371_v49 = vmul.f32 0.03125, %v361_v45 }
 0x218   :  { %v376_v51 = vadd.f32 1e-05, %v372_v42 }
 0x219   :  { %v375_v52 = vadd.f32 1e-05, %v371_v49 }
 0x21a   :  { %1185 = vrsqrt.f32 %v376_v51  ;;  %v367_v53 = vpop.xlane.xlu1 %366 }
 0x21b   :  { %1187 = vrsqrt.f32 %v375_v52  ;;  %v373_v54 = vmul.f32 0.03125, %v367_v53 }
 0x21d   :  { %v377_v55 = vadd.f32 1e-05, %v373_v54 }
 0x21e   :  { %v370_v56 = vpop.xlane.xlu0 %369 }
 0x21f   :  { %1189 = vrsqrt.f32 %v377_v55  ;;  %v374_v57 = vmul.f32 0.03125, %v370_v56 }
 0x221   :  { %v378_v40 = vadd.f32 1e-05, %v374_v57 }
 0x223   :  { %1191 = vrsqrt.f32 %v378_v40 }
 0x224   :  { %v1186_v35 = vpop.eup %1185 }
 0x225   :  { %v1188_v58 = vpop.eup %1187  ;;  %v384_v59 = vmul.f32 %v1186_v35, %v352_v0 }
 0x226   :  { %v383_v60 = vmul.f32 %v1188_v58, %v351_v1 }
 0x227   :  { %v394_v61 = vmul.f32 %v1111_v47, %v384_v59 }
 0x228   :  { %v393_v50 = vmul.f32 %v1111_v47, %v383_v60 }
 0x229   :  { %v1190_v62 = vpop.eup %1189  ;;  %v404_v63 = vadd.f32 %v1112_v43, %v394_v61 }
 0x22a   :  { %v403_v2 = vadd.f32 %v1112_v43, %v393_v50  ;;  %v385_v3 = vmul.f32 %v1190_v62, %v353_v7 }
 0x22b   :  { %v412_v4 = vmul.f32 0.044715, %v404_v63  ;;  %v408_v55 = vmul.f32 0.5, %v404_v63 }
 0x22c   :  { %v395_v5 = vmul.f32 %v1111_v47, %v385_v3  ;;  %v411_v6 = vmul.f32 0.044715, %v403_v2  ;;  %v407_v57 = vmul.f32 0.5, %v403_v2 }
 0x22d   :  { %v1192_v8 = vpop.eup %1191  ;;  %v416_v9 = vmul.f32 %v412_v4, %v404_v63 }
 0x22e   :  { %v405_v10 = vadd.f32 %v1112_v43, %v395_v5  ;;  %v386_v11 = vmul.f32 %v1192_v8, %v354_v12  ;;  %v415_v13 = vmul.f32 %v411_v6, %v403_v2 }
 0x22f   :  { %v420_v0 = vmul.f32 %v416_v9, %v404_v63 }
 0x230   :  { %v396_v14 = vmul.f32 %v1111_v47, %v386_v11  ;;  %v419_v15 = vmul.f32 %v415_v13, %v403_v2  ;;  %v413_v16 = vmul.f32 0.044715, %v405_v10  ;;  %v409_v61 = vmul.f32 0.5, %v405_v10 }
 0x231   :  { %v424_v17 = vadd.f32 %v420_v0, %v404_v63  ;;  %v1113_v63 = vld [vmem:[%s1657_s9] ss:$0 sm:$0xff] }
 0x232   :  { %v406_v1 = vadd.f32 %v1112_v43, %v396_v14  ;;  %v423_v25 = vadd.f32 %v419_v15, %v403_v2  ;;  %v417_v26 = vmul.f32 %v413_v16, %v405_v10 }
 0x233   :  { %v428_v30 = vmul.f32 0.7978846, %v424_v17 }
 0x234   :  { %v427_v34 = vmul.f32 0.7978846, %v423_v25  ;;  %v414_v39 = vmul.f32 0.044715, %v406_v1  ;;  %v421_v7 = vmul.f32 %v417_v26, %v405_v10  ;;  %v410_v50 = vmul.f32 0.5, %v406_v1 }
 0x235   :  { %1193 = vtanh.f32 %v428_v30 }
 0x236   :  { %1195 = vtanh.f32 %v427_v34  ;;  %v418_v42 = vmul.f32 %v414_v39, %v406_v1  ;;  %v425_v45 = vadd.f32 %v421_v7, %v405_v10 }
 0x238   :  { %v422_v49 = vmul.f32 %v418_v42, %v406_v1  ;;  %v429_v51 = vmul.f32 0.7978846, %v425_v45 }
 0x23a   :  { %v426_v12 = vadd.f32 %v422_v49, %v406_v1  ;;  %1197 = vtanh.f32 %v429_v51 }
 0x23c   :  { %v430_v52 = vmul.f32 0.7978846, %v426_v12 }
 0x23e   :  { %1199 = vtanh.f32 %v430_v52 }
 0x23f   :  { %v1194_v53 = vpop.eup %1193 }
 0x240   :  { %v1196_v54 = vpop.eup %1195  ;;  %v436_v56 = vadd.f32 1.0, %v1194_v53 }
 0x241   :  { %v435_v40 = vadd.f32 1.0, %v1196_v54 }
 0x242   :  { %v440_v35 = vmul.f32 %v436_v56, %v408_v55 }
 0x243   :  { %v439_v47 = vmul.f32 %v435_v40, %v407_v57 }
 0x244   :  { %v1198_v58 = vpop.eup %1197 }
 0x245   :  { %v443_v59 = vpack.c.bf16 %v440_v35, %v439_v47  ;;  %v437_v43 = vadd.f32 1.0, %v1198_v58 }
 0x247   :  { %1161 = vmatprep.mubr.msk.bf16.mxu1 %vm124_vm0, %v443_v59  ;;  %v441_v3 = vmul.f32 %v437_v43, %v409_v61 }
 0x248   :  { %v1200_v60 = vpop.eup %1199 }
 0x249   :  { %v438_v62 = vadd.f32 1.0, %v1200_v60 }
 0x24b   :  { %v442_v4 = vmul.f32 %v438_v62, %v410_v50 }
 0x24d   :  { %v444_v5 = vpack.c.bf16 %v442_v4, %v441_v3 }
 0x24f   :  { %1162 = vmatmul.mubr.msk.bf16.vlgmr.msra.gmra.mrb[0].mxu1 %vm124_vm0, %v444_v5 }
 0x322   :  { %v1163_v2 = vpop.f32.mrb[0].mxu1 }
 0x323   :  { %v493_v6 = vpop.f32.mrb[1].mxu1  ;;  %v502_v14 = vadd.f32 %v1163_v2, %v1113_v63 }
 0x324   :  { %v494_v8 = vadd.f32 %v1113_v63, %v493_v6  ;;  %v1164_v9 = vpop.f32.mrb[2].mxu1  ;;  %v1116_v6 = vld [vmem:[%s1658_s10] ss:$0 sm:$0xff] }
 0x325   :  { %v505_v11 = vadd.f32 %v1164_v9, %v1113_v63  ;;  %v496_v13 = vpop.f32.mrb[3].mxu1  ;;  %v514_v17 = vsel %vm124_vm0, %v502_v14, 0.0 }
 0x326   :  { %v497_v0 = vadd.f32 %v1113_v63, %v496_v13  ;;  %v508_v10 = vsel %vm124_vm0, %v494_v8, 0.0 }
 0x327   :  { %509 = vadd.xlane.f32.xlu1 %v508_v10  ;;  %v517_v15 = vsel %vm124_vm0, %v505_v11, 0.0 }
 0x328   :  { %518 = vadd.xlane.f32.xlu0 %v517_v15  ;;  %v511_v16 = vsel %vm124_vm0, %v497_v0, 0.0 }
 0x32b   :  { %512 = vadd.xlane.f32.xlu1 %v511_v16 }
 0x32c   :  { %515 = vadd.xlane.f32.xlu0 %v514_v17 }
 0x3b4   :  { %v510_v1 = vpop.xlane.xlu1 %509 }
 0x3b5   :  { %v520_v25 = vmul.f32 0.03125, %v510_v1  ;;  %v519_v26 = vpop.xlane.xlu0 %518 }
 0x3b6   :  { %v523_v30 = vmul.f32 0.03125, %v519_v26 }
 0x3b7   :  { %v524_v34 = vsub.f32 %v494_v8, %v520_v25 }
 0x3b8   :  { %v527_v39 = vsub.f32 %v505_v11, %v523_v30  ;;  %v513_v7 = vpop.xlane.xlu1 %512  ;;  %v1117_v11 = vld [vmem:[%s1659_s11] ss:$0 sm:$0xff] }
 0x3b9   :  { %v521_v42 = vmul.f32 0.03125, %v513_v7  ;;  %v516_v45 = vpop.xlane.xlu0 %515  ;;  %v528_v49 = vmul.f32 %v524_v34, %v524_v34 }
 0x3ba   :  { %v522_v51 = vmul.f32 0.03125, %v516_v45  ;;  %v531_v12 = vmul.f32 %v527_v39, %v527_v39 }
 0x3bb   :  { %v525_v52 = vsub.f32 %v497_v0, %v521_v42  ;;  %v532_v53 = vsel %vm124_vm0, %v528_v49, 0.0 }
 0x3bc   :  { %v526_v54 = vsub.f32 %v502_v14, %v522_v51  ;;  %533 = vadd.xlane.f32.xlu1 %v532_v53  ;;  %v541_v55 = vsel %vm124_vm0, %v531_v12, 0.0 }
 0x3bd   :  { %542 = vadd.xlane.f32.xlu0 %v541_v55  ;;  %v529_v56 = vmul.f32 %v525_v52, %v525_v52 }
 0x3be   :  { %v530_v57 = vmul.f32 %v526_v54, %v526_v54 }
 0x3bf   :  { %v535_v40 = vsel %vm124_vm0, %v529_v56, 0.0 }
 0x3c0   :  { %536 = vadd.xlane.f32.xlu1 %v535_v40  ;;  %v538_v35 = vsel %vm124_vm0, %v530_v57, 0.0 }
 0x3c1   :  { %539 = vadd.xlane.f32.xlu0 %v538_v35 }
 0x449   :  { %v534_v47 = vpop.xlane.xlu1 %533 }
 0x44a   :  { %v544_v58 = vmul.f32 0.03125, %v534_v47  ;;  %v543_v59 = vpop.xlane.xlu0 %542 }
 0x44b   :  { %v547_v43 = vmul.f32 0.03125, %v543_v59 }
 0x44c   :  { %v548_v60 = vadd.f32 1e-05, %v544_v58 }
 0x44d   :  { %v551_v61 = vadd.f32 1e-05, %v547_v43  ;;  %v537_v50 = vpop.xlane.xlu1 %536 }
 0x44e   :  { %1201 = vrsqrt.f32 %v548_v60  ;;  %v545_v62 = vmul.f32 0.03125, %v537_v50  ;;  %v540_v3 = vpop.xlane.xlu0 %539 }
 0x44f   :  { %1203 = vrsqrt.f32 %v551_v61  ;;  %v546_v4 = vmul.f32 0.03125, %v540_v3 }
 0x450   :  { %v549_v5 = vadd.f32 1e-05, %v545_v62 }
 0x451   :  { %v550_v63 = vadd.f32 1e-05, %v546_v4 }
 0x452   :  { %1205 = vrsqrt.f32 %v549_v5 }
 0x453   :  { %1207 = vrsqrt.f32 %v550_v63 }
 0x458   :  { %v1202_v2 = vpop.eup %1201 }
 0x459   :  { %v1204_v8 = vpop.eup %1203  ;;  %v556_v9 = vmul.f32 %v1202_v2, %v524_v34  ;;  %v181_v2 = vld [vmem:[%s1652_s4 + $0x4] sm:$0x7] }
 0x45a   :  { %v559_v13 = vmul.f32 %v1204_v8, %v527_v39  ;;  %v660_v37 = vrot.slane %v181_v2, %v261_v28  ;;  %v1119_v28 = vsel %vm635_vm12, 1.0, %v1250_v48 }
 0x45b   :  { %v566_v0 = vmul.f32 %v1116_v6, %v556_v9 }
 0x45c   :  { %v1206_v10 = vpop.eup %1205  ;;  %v569_v14 = vmul.f32 %v1116_v6, %v559_v13 }
 0x45d   :  { %v1208_v15 = vpop.eup %1207  ;;  %v576_v16 = vadd.f32 %v1117_v11, %v566_v0  ;;  %v557_v17 = vmul.f32 %v1206_v10, %v525_v52 }
 0x45e   :  { %v579_v1 = vadd.f32 %v1117_v11, %v569_v14  ;;  %v558_v25 = vmul.f32 %v1208_v15, %v526_v54  ;;  %v668_v15 = vrot.slane %v181_v2, %v269_v22 }
 0x45f   :  { %v567_v26 = vmul.f32 %v1116_v6, %v557_v17  ;;  %v584_v30 = vmul.f32 0.044715, %v576_v16  ;;  %v580_v3 = vmul.f32 0.5, %v576_v16 }
 0x460   :  { %v587_v7 = vmul.f32 0.044715, %v579_v1  ;;  %v568_v42 = vmul.f32 %v1116_v6, %v558_v25  ;;  %v583_v5 = vmul.f32 0.5, %v579_v1 }
 0x461   :  { %v577_v45 = vadd.f32 %v1117_v11, %v567_v26  ;;  %v588_v49 = vmul.f32 %v584_v30, %v576_v16 }
 0x462   :  { %v591_v34 = vmul.f32 %v587_v7, %v579_v1  ;;  %v578_v51 = vadd.f32 %v1117_v11, %v568_v42 }
 0x463   :  { %v585_v12 = vmul.f32 0.044715, %v577_v45  ;;  %v592_v53 = vmul.f32 %v588_v49, %v576_v16  ;;  %v581_v13 = vmul.f32 0.5, %v577_v45 }
 0x464   :  { %v595_v55 = vmul.f32 %v591_v34, %v579_v1  ;;  %v586_v39 = vmul.f32 0.044715, %v578_v51 }
 0x465   :  { %v589_v56 = vmul.f32 %v585_v12, %v577_v45  ;;  %v596_v57 = vadd.f32 %v592_v53, %v576_v16  ;;  %v582_v16 = vmul.f32 0.5, %v578_v51 }
 0x466   :  { %v599_v40 = vadd.f32 %v595_v55, %v579_v1  ;;  %v590_v35 = vmul.f32 %v586_v39, %v578_v51 }
 0x467   :  { %v593_v47 = vmul.f32 %v589_v56, %v577_v45  ;;  %v600_v52 = vmul.f32 0.7978846, %v596_v57 }
 0x468   :  { %v603_v58 = vmul.f32 0.7978846, %v599_v40  ;;  %v594_v54 = vmul.f32 %v590_v35, %v578_v51 }
 0x469   :  { %v597_v59 = vadd.f32 %v593_v47, %v577_v45  ;;  %1209 = vtanh.f32 %v600_v52 }
 0x46a   :  { %1211 = vtanh.f32 %v603_v58  ;;  %v598_v43 = vadd.f32 %v594_v54, %v578_v51 }
 0x46b   :  { %v601_v60 = vmul.f32 0.7978846, %v597_v59 }
 0x46c   :  { %v602_v61 = vmul.f32 0.7978846, %v598_v43 }
 0x46d   :  { %1213 = vtanh.f32 %v601_v60  ;;  %v1122_v60 = vld [vmem:[%s1653_s5 + $0x1] ss:$0 sm:$0xff] }
 0x46e   :  { %1215 = vtanh.f32 %v602_v61 }
 0x473   :  { %v1210_v50 = vpop.eup %1209 }
 0x474   :  { %v1212_v62 = vpop.eup %1211  ;;  %v608_v4 = vadd.f32 1.0, %v1210_v50 }
 0x475   :  { %v611_v63 = vadd.f32 1.0, %v1212_v62 }
 0x476   :  { %v612_v6 = vmul.f32 %v608_v4, %v580_v3 }
 0x477   :  { %v1214_v8 = vpop.eup %1213  ;;  %v615_v9 = vmul.f32 %v611_v63, %v583_v5 }
 0x478   :  { %v1216_v11 = vpop.eup %1215  ;;  %v609_v0 = vadd.f32 1.0, %v1214_v8  ;;  %v1502_v10 = vadd.f32 %v612_v6, %v1398_v38 }
 0x479   :  { %v1505_v14 = vadd.f32 %v615_v9, %v1405_v41  ;;  %v610_v17 = vadd.f32 1.0, %v1216_v11 }
 0x47a   :  { %v613_v1 = vmul.f32 %v609_v0, %v581_v13  ;;  %v620_v25 = vmul.f32 %v1502_v10, %v1378_v24 }
 0x47b   :  { %v623_v38 = vmul.f32 %v1505_v14, %v1411_v44  ;;  %v614_v41 = vmul.f32 %v610_v17, %v582_v16 }
 0x47c   :  { %v1519_v22 = vadd.f32 %v613_v1, %v1415_v46  ;;  %v624_v26 = vrot.slane %v620_v25, 5  ;;  %v677_v30 = vrot.slane %v620_v25, 3  ;;  %v713_v46 = vrot.slane %v181_v2, %v314_v36 }
 0x47d   :  { %v627_v7 = vrot.slane %v623_v38, 5  ;;  %v1524_v42 = vadd.f32 %v614_v41, %v1392_v33  ;;  %v680_v45 = vrot.slane %v623_v38, 3  ;;  %v669_v12 = vmul.f32 %v668_v15, %v620_v25 }
 0x47e   :  { %v621_v23 = vmul.f32 %v1519_v22, %v1366_v19  ;;  %v672_v3 = vmul.f32 %v668_v15, %v623_v38 }
 0x47f   :  { %v632_v27 = vsel %vm628_vm8, %v627_v7, %v624_v26  ;;  %v622_v33 = vmul.f32 %v1524_v42, %v1389_v31  ;;  %v685_v32 = vsel %vm681_vm9, %v680_v45, %v677_v30 }
 0x480   :  { %v653_v49 = vmul.f32 %v1118_v29, %v632_v27  ;;  %v678_v34 = vrot.slane %v621_v23, 3  ;;  %v625_v51 = vrot.slane %v621_v23, 5  ;;  %v670_v36 = vmul.f32 %v668_v15, %v621_v23 }
 0x481   :  { %v679_v53 = vrot.slane %v622_v33, 3  ;;  %v626_v55 = vrot.slane %v622_v33, 5  ;;  %v709_v40 = vmul.f32 %v1121_v20, %v685_v32  ;;  %v671_v50 = vmul.f32 %v668_v15, %v622_v33 }
 0x482   :  { %v661_v39 = vmul.f32 %v660_v37, %v653_v49  ;;  %v684_v56 = vsel %vm681_vm9, %v677_v30, %v678_v34  ;;  %v631_v57 = vsel %vm628_vm8, %v624_v26, %v625_v51 }
 0x483   :  { %v714_v35 = vmul.f32 %v713_v46, %v684_v56  ;;  %v662_v47 = vmul.f32 %v660_v37, %v631_v57  ;;  %v683_v52 = vsel %vm681_vm9, %v678_v34, %v679_v53  ;;  %v630_v48 = vsel %vm628_vm8, %v625_v51, %v626_v55  ;;  %v193_v56 = vld [vmem:[%s1654_s8 + $0x28] sm:$0xff]  ;;  %v194_v57 = vld [vmem:[%s1654_s8 + $0x30] sm:$0xff] }
 0x484   :  { %v673_v58 = vadd.f32 %v669_v12, %v661_v39  ;;  %v707_v54 = vmul.f32 %v1120_v21, %v683_v52  ;;  %v655_v59 = vmul.f32 %v1119_v28, %v630_v48  ;;  %v682_v43 = vsel %vm681_vm9, %v679_v53, %v680_v45  ;;  %v192_v39 = vld [vmem:[%s1654_s8 + $0x20] sm:$0xff] }
 0x485   :  { %v674_v61 = vadd.f32 %v670_v36, %v662_v47  ;;  %v629_v62 = vsel %vm628_vm8, %v626_v55, %v627_v7  ;;  %v716_v6 = vmul.f32 %v713_v46, %v682_v43  ;;  %v717_v8 = vmul.f32 %v713_v46, %v709_v40 }
 0x486   :  { %v718_v4 = vadd.f32 %v714_v35, %v673_v58  ;;  %v715_v5 = vmul.f32 %v713_v46, %v707_v54  ;;  %v663_v63 = vmul.f32 %v660_v37, %v655_v59  ;;  %v664_v2 = vmul.f32 %v660_v37, %v629_v62  ;;  %v195_v35 = vld [vmem:[%s1654_s8 + $0x38] sm:$0xff] }
 0x487   :  { %v842_v40 = vpack.c.bf16 %v193_v56, %v192_v39  ;;  %v843_v47 = vpack.c.bf16 %v195_v35, %v194_v57 }
 0x488   :  { %v728_v9 = vadd.f32 %v1122_v60, %v718_v4  ;;  %v719_v11 = vadd.f32 %v715_v5, %v674_v61  ;;  %v675_v13 = vadd.f32 %v671_v50, %v663_v63  ;;  %v676_v0 = vadd.f32 %v672_v3, %v664_v2  ;;  %v1123_v63 = vld [vmem:[%s1655_s6 + $0x1] ss:$0 sm:$0xff] }
 0x489   :  { %1165 = vmatprep.subr.bf16.mxu0 %v842_v40 }
 0x48a   :  { %v732_v16 = vsel %vm124_vm0, %v728_v9, 0.0  ;;  %v729_v17 = vadd.f32 %v1122_v60, %v719_v11  ;;  %v720_v1 = vadd.f32 %v716_v6, %v675_v13  ;;  %v721_v25 = vadd.f32 %v717_v8, %v676_v0  ;;  %1166 = vmatpush3.bf16.msra.mxu0 %v842_v40  ;;  %v1124_v8 = vld [vmem:[%s1656_s7 + $0x1] ss:$0 sm:$0xff] }
 0x48b   :  { %733 = vadd.xlane.f32.xlu1 %v732_v16  ;;  %1167 = vmatprep.subr.bf16.mxu0 %v843_v47 }
 0x48c   :  { %v735_v18 = vsel %vm124_vm0, %v729_v17, 0.0  ;;  %v730_v29 = vadd.f32 %v1122_v60, %v720_v1  ;;  %v731_v15 = vadd.f32 %v1122_v60, %v721_v25 }
 0x48d   :  { %736 = vadd.xlane.f32.xlu0 %v735_v18 }
 0x48e   :  { %v738_v38 = vsel %vm124_vm0, %v730_v29, 0.0  ;;  %v741_v41 = vsel %vm124_vm0, %v731_v15, 0.0  ;;  %1168 = vmatpush3.bf16.msra.mxu0 %v843_v47 }
 0x48f   :  { %739 = vadd.xlane.f32.xlu1 %v738_v38 }
 0x491   :  { %742 = vadd.xlane.f32.xlu0 %v741_v41 }
 0x518   :  { %v734_v26 = vpop.xlane.xlu1 %733 }
 0x519   :  { %v744_v30 = vmul.f32 0.03125, %v734_v26 }
 0x51a   :  { %v737_v7 = vpop.xlane.xlu0 %736 }
 0x51b   :  { %v748_v45 = vsub.f32 %v728_v9, %v744_v30  ;;  %v745_v23 = vmul.f32 0.03125, %v737_v7 }
 0x51c   :  { %v740_v37 = vpop.xlane.xlu1 %739 }
 0x51d   :  { %v749_v46 = vsub.f32 %v729_v17, %v745_v23  ;;  %v746_v20 = vmul.f32 0.03125, %v740_v37  ;;  %v752_v27 = vmul.f32 %v748_v45, %v748_v45 }
 0x51e   :  { %v743_v33 = vpop.xlane.xlu0 %742 }
 0x51f   :  { %v750_v21 = vsub.f32 %v730_v29, %v746_v20  ;;  %v747_v32 = vmul.f32 0.03125, %v743_v33  ;;  %v756_v49 = vsel %vm124_vm0, %v752_v27, 0.0  ;;  %v753_v34 = vmul.f32 %v749_v46, %v749_v46 }
 0x520   :  { %757 = vadd.xlane.f32.xlu1 %v756_v49 }
 0x521   :  { %v751_v51 = vsub.f32 %v731_v15, %v747_v32  ;;  %v759_v28 = vsel %vm124_vm0, %v753_v34, 0.0  ;;  %v754_v12 = vmul.f32 %v750_v21, %v750_v21 }
 0x522   :  { %760 = vadd.xlane.f32.xlu0 %v759_v28 }
 0x523   :  { %v762_v36 = vsel %vm124_vm0, %v754_v12, 0.0  ;;  %v755_v53 = vmul.f32 %v751_v51, %v751_v51 }
 0x524   :  { %763 = vadd.xlane.f32.xlu1 %v762_v36 }
 0x525   :  { %v765_v55 = vsel %vm124_vm0, %v755_v53, 0.0 }
 0x526   :  { %766 = vadd.xlane.f32.xlu0 %v765_v55 }
 0x5ad   :  { %v758_v52 = vpop.xlane.xlu1 %757 }
 0x5ae   :  { %v768_v48 = vmul.f32 0.03125, %v758_v52 }
 0x5af   :  { %v761_v58 = vpop.xlane.xlu0 %760 }
 0x5b0   :  { %v772_v54 = vadd.f32 1e-05, %v768_v48  ;;  %v769_v59 = vmul.f32 0.03125, %v761_v58 }
 0x5b1   :  { %v764_v43 = vpop.xlane.xlu1 %763 }
 0x5b2   :  { %1217 = vrsqrt.f32 %v772_v54  ;;  %v773_v60 = vadd.f32 1e-05, %v769_v59  ;;  %v770_v61 = vmul.f32 0.03125, %v764_v43 }
 0x5b3   :  { %v767_v50 = vpop.xlane.xlu0 %766 }
 0x5b4   :  { %1219 = vrsqrt.f32 %v773_v60  ;;  %v774_v62 = vadd.f32 1e-05, %v770_v61  ;;  %v771_v3 = vmul.f32 0.03125, %v767_v50 }
 0x5b6   :  { %1221 = vrsqrt.f32 %v774_v62  ;;  %v775_v4 = vadd.f32 1e-05, %v771_v3 }
 0x5b8   :  { %1223 = vrsqrt.f32 %v775_v4 }
 0x5bc   :  { %v1218_v5 = vpop.eup %1217 }
 0x5bd   :  { %v780_v2 = vmul.f32 %v1218_v5, %v748_v45  ;;  %v1125_v5 = vld [vmem:[%s1657_s9 + $0x1] ss:$0 sm:$0xff] }
 0x5be   :  { %v1220_v6 = vpop.eup %1219 }
 0x5bf   :  { %v790_v9 = vmul.f32 %v1123_v63, %v780_v2  ;;  %v781_v11 = vmul.f32 %v1220_v6, %v749_v46 }
 0x5c0   :  { %v1222_v13 = vpop.eup %1221 }
 0x5c1   :  { %v800_v0 = vadd.f32 %v1124_v8, %v790_v9  ;;  %v791_v16 = vmul.f32 %v1123_v63, %v781_v11  ;;  %v782_v17 = vmul.f32 %v1222_v13, %v750_v21 }
 0x5c2   :  { %v1224_v1 = vpop.eup %1223 }
 0x5c3   :  { %v801_v25 = vadd.f32 %v1124_v8, %v791_v16  ;;  %v792_v18 = vmul.f32 %v1123_v63, %v782_v17  ;;  %v783_v29 = vmul.f32 %v1224_v1, %v751_v51  ;;  %v808_v15 = vmul.f32 0.044715, %v800_v0 }
 0x5c4   :  { %v804_v40 = vmul.f32 0.5, %v800_v0 }
 0x5c5   :  { %v802_v38 = vadd.f32 %v1124_v8, %v792_v18  ;;  %v793_v41 = vmul.f32 %v1123_v63, %v783_v29  ;;  %v809_v26 = vmul.f32 0.044715, %v801_v25  ;;  %v812_v30 = vmul.f32 %v808_v15, %v800_v0 }
 0x5c6   :  { %v805_v35 = vmul.f32 0.5, %v801_v25 }
 0x5c7   :  { %v803_v7 = vadd.f32 %v1124_v8, %v793_v41  ;;  %v813_v45 = vmul.f32 %v809_v26, %v801_v25  ;;  %v810_v23 = vmul.f32 0.044715, %v802_v38  ;;  %v816_v37 = vmul.f32 %v812_v30, %v800_v0 }
 0x5c8   :  { %v806_v60 = vmul.f32 0.5, %v802_v38 }
 0x5c9   :  { %v817_v20 = vmul.f32 %v813_v45, %v801_v25  ;;  %v811_v27 = vmul.f32 0.044715, %v803_v7  ;;  %v814_v46 = vmul.f32 %v810_v23, %v802_v38  ;;  %v820_v33 = vadd.f32 %v816_v37, %v800_v0 }
 0x5ca   :  { %v807_v61 = vmul.f32 0.5, %v803_v7 }
 0x5cb   :  { %v821_v32 = vadd.f32 %v817_v20, %v801_v25  ;;  %v815_v49 = vmul.f32 %v811_v27, %v803_v7  ;;  %v818_v21 = vmul.f32 %v814_v46, %v802_v38  ;;  %v824_v34 = vmul.f32 0.7978846, %v820_v33 }
 0x5cd   :  { %v825_v28 = vmul.f32 0.7978846, %v821_v32  ;;  %v819_v12 = vmul.f32 %v815_v49, %v803_v7  ;;  %v822_v51 = vadd.f32 %v818_v21, %v802_v38  ;;  %1225 = vtanh.f32 %v824_v34 }
 0x5cf   :  { %1227 = vtanh.f32 %v825_v28  ;;  %v823_v36 = vadd.f32 %v819_v12, %v803_v7  ;;  %v826_v53 = vmul.f32 0.7978846, %v822_v51  ;;  %v1021_v12 = vld [vmem:[%s1660_s12] sm:$0xff]  ;;  %v1022_v51 = vld [vmem:[%s1660_s12 + $0x8] sm:$0xff] }
 0x5d1   :  { %v827_v55 = vmul.f32 0.7978846, %v823_v36  ;;  %1229 = vtanh.f32 %v826_v53  ;;  %v1023_v36 = vld [vmem:[%s1660_s12 + $0x10] sm:$0xff]  ;;  %v1027_v53 = vpack.c.bf16 %v1022_v51, %v1021_v12 }
 0x5d3   :  { %1231 = vtanh.f32 %v827_v55  ;;  %v1024_v55 = vld [vmem:[%s1660_s12 + $0x18] sm:$0xff]  ;;  %1173 = vmatprep.subr.bf16.mxu1 %v1027_v53 }
 0x5d4   :  { %1174 = vmatpush3.bf16.msra.mxu1 %v1027_v53 }
 0x5d7   :  { %v1226_v39 = vpop.eup %1225 }
 0x5d8   :  { %v832_v57 = vadd.f32 1.0, %v1226_v39  ;;  %v1028_v39 = vpack.c.bf16 %v1024_v55, %v1023_v36 }
 0x5d9   :  { %v1228_v56 = vpop.eup %1227 }
 0x5da   :  { %v833_v47 = vadd.f32 1.0, %v1228_v56  ;;  %v836_v48 = vmul.f32 %v832_v57, %v804_v40  ;;  %1175 = vmatprep.subr.bf16.mxu1 %v1028_v39 }
 0x5db   :  { %v1230_v52 = vpop.eup %1229  ;;  %1176 = vmatpush3.bf16.msra.mxu1 %v1028_v39 }
 0x5dc   :  { %v837_v58 = vmul.f32 %v833_v47, %v805_v35  ;;  %v834_v54 = vadd.f32 1.0, %v1230_v52 }
 0x5dd   :  { %v1232_v59 = vpop.eup %1231 }
 0x5de   :  { %v840_v43 = vpack.c.bf16 %v837_v58, %v836_v48  ;;  %v835_v50 = vadd.f32 1.0, %v1232_v59  ;;  %v838_v62 = vmul.f32 %v834_v54, %v806_v60 }
 0x5e0   :  { %1169 = vmatprep.mubr.msk.bf16.mxu0 %vm124_vm0, %v840_v43  ;;  %v839_v3 = vmul.f32 %v835_v50, %v807_v61  ;;  %v1128_v50 = vld [vmem:[%s1658_s10 + $0x1] ss:$0 sm:$0xff] }
 0x5e2   :  { %v841_v4 = vpack.c.bf16 %v839_v3, %v838_v62 }
 0x5e4   :  { %1170 = vmatmul.mubr.msk.bf16.vlgmr.msra.gmra.mrb[4].mxu0 %vm124_vm0, %v841_v4  ;;  %v1129_v4 = vld [vmem:[%s1659_s11 + $0x1] ss:$0 sm:$0xff] }
 0x6b7   :  { %v1171_v63 = vpop.f32.mrb[4].mxu0 }
 0x6b8   :  { %v890_v2 = vpop.f32.mrb[5].mxu0  ;;  %v899_v11 = vadd.f32 %v1171_v63, %v1125_v5 }
 0x6b9   :  { %v891_v6 = vadd.f32 %v1125_v5, %v890_v2  ;;  %v1172_v8 = vpop.f32.mrb[6].mxu0 }
 0x6ba   :  { %v893_v9 = vpop.f32.mrb[7].mxu0  ;;  %v902_v16 = vadd.f32 %v1172_v8, %v1125_v5  ;;  %v911_v1 = vsel %vm124_vm0, %v899_v11, 0.0 }
 0x6bb   :  { %v894_v13 = vadd.f32 %v1125_v5, %v893_v9  ;;  %v905_v0 = vsel %vm124_vm0, %v891_v6, 0.0 }
 0x6bc   :  { %906 = vadd.xlane.f32.xlu1 %v905_v0  ;;  %v914_v25 = vsel %vm124_vm0, %v902_v16, 0.0 }
 0x6bd   :  { %v908_v17 = vsel %vm124_vm0, %v894_v13, 0.0 }
 0x6be   :  { %909 = vadd.xlane.f32.xlu0 %v908_v17 }
 0x6c0   :  { %912 = vadd.xlane.f32.xlu1 %v911_v1 }
 0x6c2   :  { %915 = vadd.xlane.f32.xlu0 %v914_v25 }
 0x749   :  { %v907_v18 = vpop.xlane.xlu1 %906 }
 0x74a   :  { %v917_v29 = vmul.f32 0.03125, %v907_v18 }
 0x74b   :  { %v910_v15 = vpop.xlane.xlu0 %909 }
 0x74c   :  { %v921_v38 = vsub.f32 %v891_v6, %v917_v29  ;;  %v918_v41 = vmul.f32 0.03125, %v910_v15 }
 0x74d   :  { %v913_v26 = vpop.xlane.xlu1 %912 }
 0x74e   :  { %v922_v30 = vsub.f32 %v894_v13, %v918_v41  ;;  %v919_v7 = vmul.f32 0.03125, %v913_v26  ;;  %v925_v45 = vmul.f32 %v921_v38, %v921_v38 }
 0x74f   :  { %v916_v23 = vpop.xlane.xlu0 %915 }
 0x750   :  { %v923_v37 = vsub.f32 %v899_v11, %v919_v7  ;;  %v920_v20 = vmul.f32 0.03125, %v916_v23  ;;  %v929_v27 = vsel %vm124_vm0, %v925_v45, 0.0  ;;  %v926_v46 = vmul.f32 %v922_v30, %v922_v30 }
 0x751   :  { %930 = vadd.xlane.f32.xlu1 %v929_v27 }
 0x752   :  { %v924_v33 = vsub.f32 %v902_v16, %v920_v20  ;;  %v932_v32 = vsel %vm124_vm0, %v926_v46, 0.0  ;;  %v927_v49 = vmul.f32 %v923_v37, %v923_v37 }
 0x753   :  { %933 = vadd.xlane.f32.xlu0 %v932_v32 }
 0x754   :  { %v935_v21 = vsel %vm124_vm0, %v927_v49, 0.0  ;;  %v928_v34 = vmul.f32 %v924_v33, %v924_v33 }
 0x755   :  { %936 = vadd.xlane.f32.xlu1 %v935_v21 }
 0x756   :  { %v938_v28 = vsel %vm124_vm0, %v928_v34, 0.0 }
 0x757   :  { %939 = vadd.xlane.f32.xlu0 %v938_v28 }
 0x7de   :  { %v931_v56 = vpop.xlane.xlu1 %930 }
 0x7df   :  { %v941_v57 = vmul.f32 0.03125, %v931_v56 }
 0x7e0   :  { %v934_v40 = vpop.xlane.xlu0 %933 }
 0x7e1   :  { %v945_v35 = vadd.f32 1e-05, %v941_v57  ;;  %v942_v47 = vmul.f32 0.03125, %v934_v40 }
 0x7e2   :  { %v937_v52 = vpop.xlane.xlu1 %936 }
 0x7e3   :  { %1233 = vrsqrt.f32 %v945_v35  ;;  %v946_v48 = vadd.f32 1e-05, %v942_v47  ;;  %v943_v58 = vmul.f32 0.03125, %v937_v52 }
 0x7e4   :  { %v940_v54 = vpop.xlane.xlu0 %939 }
 0x7e5   :  { %1235 = vrsqrt.f32 %v946_v48  ;;  %v947_v59 = vadd.f32 1e-05, %v943_v58  ;;  %v944_v43 = vmul.f32 0.03125, %v940_v54 }
 0x7e7   :  { %1237 = vrsqrt.f32 %v947_v59  ;;  %v948_v60 = vadd.f32 1e-05, %v944_v43 }
 0x7e9   :  { %1239 = vrsqrt.f32 %v948_v60 }
 0x7ed   :  { %v1234_v61 = vpop.eup %1233 }
 0x7ee   :  { %v953_v62 = vmul.f32 %v1234_v61, %v921_v38 }
 0x7ef   :  { %v1236_v3 = vpop.eup %1235 }
 0x7f0   :  { %v963_v5 = vmul.f32 %v1128_v50, %v953_v62  ;;  %v954_v63 = vmul.f32 %v1236_v3, %v922_v30 }
 0x7f1   :  { %v1238_v2 = vpop.eup %1237 }
 0x7f2   :  { %v973_v6 = vadd.f32 %v1129_v4, %v963_v5  ;;  %v964_v8 = vmul.f32 %v1128_v50, %v954_v63  ;;  %v955_v9 = vmul.f32 %v1238_v2, %v923_v37  ;;  %v1130_v63 = vld [vmem:[%s1661_s13] ss:$0 sm:$0xff] }
 0x7f3   :  { %v1240_v11 = vpop.eup %1239 }
 0x7f4   :  { %v974_v13 = vadd.f32 %v1129_v4, %v964_v8  ;;  %v965_v0 = vmul.f32 %v1128_v50, %v955_v9  ;;  %v956_v16 = vmul.f32 %v1240_v11, %v924_v33  ;;  %v981_v17 = vmul.f32 0.044715, %v973_v6 }
 0x7f5   :  { %v977_v36 = vmul.f32 0.5, %v973_v6 }
 0x7f6   :  { %v975_v1 = vadd.f32 %v1129_v4, %v965_v0  ;;  %v966_v25 = vmul.f32 %v1128_v50, %v956_v16  ;;  %v982_v18 = vmul.f32 0.044715, %v974_v13  ;;  %v985_v29 = vmul.f32 %v981_v17, %v973_v6 }
 0x7f7   :  { %v978_v55 = vmul.f32 0.5, %v974_v13 }
 0x7f8   :  { %v983_v15 = vmul.f32 0.044715, %v975_v1  ;;  %v976_v38 = vadd.f32 %v1129_v4, %v966_v25  ;;  %v986_v41 = vmul.f32 %v982_v18, %v974_v13  ;;  %v989_v26 = vmul.f32 %v985_v29, %v973_v6 }
 0x7f9   :  { %v979_v35 = vmul.f32 0.5, %v975_v1 }
 0x7fa   :  { %v984_v7 = vmul.f32 0.044715, %v976_v38  ;;  %v990_v45 = vmul.f32 %v986_v41, %v974_v13  ;;  %v987_v30 = vmul.f32 %v983_v15, %v975_v1  ;;  %v993_v23 = vadd.f32 %v989_v26, %v973_v6 }
 0x7fb   :  { %v980_v54 = vmul.f32 0.5, %v976_v38 }
 0x7fc   :  { %v994_v20 = vadd.f32 %v990_v45, %v974_v13  ;;  %v988_v27 = vmul.f32 %v984_v7, %v976_v38  ;;  %v991_v37 = vmul.f32 %v987_v30, %v975_v1  ;;  %v997_v46 = vmul.f32 0.7978846, %v993_v23 }
 0x7fe   :  { %v998_v32 = vmul.f32 0.7978846, %v994_v20  ;;  %v992_v49 = vmul.f32 %v988_v27, %v976_v38  ;;  %v995_v33 = vadd.f32 %v991_v37, %v975_v1  ;;  %1241 = vtanh.f32 %v997_v46 }
 0x800   :  { %1243 = vtanh.f32 %v998_v32  ;;  %v996_v21 = vadd.f32 %v992_v49, %v976_v38  ;;  %v999_v34 = vmul.f32 0.7978846, %v995_v33 }
 0x802   :  { %v1000_v28 = vmul.f32 0.7978846, %v996_v21  ;;  %1245 = vtanh.f32 %v999_v34 }
 0x804   :  { %1247 = vtanh.f32 %v1000_v28 }
 0x808   :  { %v1242_v12 = vpop.eup %1241 }
 0x809   :  { %v1005_v53 = vadd.f32 1.0, %v1242_v12 }
 0x80a   :  { %v1244_v51 = vpop.eup %1243 }
 0x80b   :  { %v1006_v39 = vadd.f32 1.0, %v1244_v51  ;;  %v1009_v57 = vmul.f32 %v1005_v53, %v977_v36 }
 0x80c   :  { %v1246_v56 = vpop.eup %1245 }
 0x80d   :  { %v1010_v40 = vmul.f32 %v1006_v39, %v978_v55  ;;  %v1007_v47 = vadd.f32 1.0, %v1246_v56  ;;  %v1013_v48 = vadd.f32 %v1009_v57, %v1502_v10 }
 0x80e   :  { %v1248_v52 = vpop.eup %1247 }
 0x80f   :  { %v1014_v58 = vadd.f32 %v1010_v40, %v1519_v22  ;;  %v1008_v59 = vadd.f32 1.0, %v1248_v52  ;;  %v1011_v43 = vmul.f32 %v1007_v47, %v979_v35  ;;  %v1017_v60 = vmul.f32 %v1013_v48, %v1378_v24 }
 0x811   :  { %v1018_v61 = vmul.f32 %v1014_v58, %v1366_v19  ;;  %v1012_v50 = vmul.f32 %v1008_v59, %v980_v54  ;;  %v1015_v62 = vadd.f32 %v1011_v43, %v1524_v42 }
 0x813   :  { %v1025_v3 = vpack.c.bf16 %v1018_v61, %v1017_v60  ;;  %v1016_v4 = vadd.f32 %v1012_v50, %v1505_v14  ;;  %v1019_v5 = vmul.f32 %v1015_v62, %v1389_v31 }
 0x815   :  { %1177 = vmatprep.mubr.msk.bf16.mxu1 %vm124_vm0, %v1025_v3  ;;  %v1020_v10 = vmul.f32 %v1016_v4, %v1411_v44 }
 0x817   :  { %v1026_v22 = vpack.c.bf16 %v1020_v10, %v1019_v5 }
 0x819   :  { %1178 = vmatmul.mubr.msk.bf16.vlgmr.msra.gmra.mrb[4].mxu1 %vm124_vm0, %v1026_v22 }
 0x8ec   :  { %v1179_v2 = vpop.f32.mrb[4].mxu1 }
 0x8ed   :  { %v1085_v6 = vadd.f32 %v1179_v2, %v1130_v63  ;;  %v1076_v8 = vpop.f32.mrb[5].mxu1 }
 0x8ee   :  { %v1077_v42 = vadd.f32 %v1130_v63, %v1076_v8  ;;  %v1180_v9 = vpop.f32.mrb[6].mxu1 }
 0x8ef   :  { %v1093_v14 = vmul.f32 %v1085_v6, %v1389_v31  ;;  %v1088_v11 = vadd.f32 %v1180_v9, %v1130_v63  ;;  %v1079_v13 = vpop.f32.mrb[7].mxu1 }
 0x8f0   :  { %v1091_v0 = vmul.f32 %v1077_v42, %v1378_v24  ;;  %v1080_v16 = vadd.f32 %v1130_v63, %v1079_v13 }
 0x8f1   :  { %1097 = vst.msk [vmem:[%s1662_s14 + $0x10] sm:$0xff] %vm124_vm0, %v1093_v14  ;;  %v1094_v17 = vmul.f32 %v1088_v11, %v1411_v44 }
 0x8f2   :  { %1095 = vst.msk [vmem:[%s1662_s14] sm:$0xff] %vm124_vm0, %v1091_v0  ;;  %v1092_v1 = vmul.f32 %v1080_v16, %v1366_v19 }
 0x8f3   :  { %1098 = vst.msk [vmem:[%s1662_s14 + $0x18] sm:$0xff] %vm124_vm0, %v1094_v17 }
 0x8f4   :  { %1096 = vst.msk [vmem:[%s1662_s14 + $0x8] sm:$0xff] %vm124_vm0, %v1092_v1 }

// kernel: fwd.6
= control target key start
LH: loop header
LB: loop body
LE: loop exit
PB: predicated region body
PF: predicated region fallthrough
CT: control target
= control target key end

     0   :  { %v5961_v0 = vmov 0   ;;  %v71_v3 = vlaneseq  ;;  %vm425_vm6 = vcmask 261120   ;;  %vm1222_vm13 = vcmask 80896   ;;  %s4283_s21 = smov 1   ;;  %s4285_s27 = smov 109   ;;  %s5940_s4 = inlined_call_operand.vmem [shape: f32[1,2], index: 4, kind: input, shape index: {}, may-alias: {3,4}]   ;;  %s5941_s0 = inlined_call_operand.vmem [shape: f32[32,2], index: 0, kind: input, shape index: {}]   ;;  %s5942_s3 = inlined_call_operand.vmem [shape: f32[1,2], index: 3, kind: input, shape index: {}, may-alias: {3,4}]   ;;  %s5943_s1 = inlined_call_operand.vmem [shape: f32[32,1], index: 1, kind: input, shape index: {}]   ;;  %s5944_s5 = inlined_call_operand.vmem [shape: f32[2,1,32], index: 5, kind: input, shape index: {}]   ;;  %s5945_s6 = inlined_call_operand.vmem [shape: f32[2,1,32], index: 6, kind: input, shape index: {}]   ;;  %s5946_s2 = inlined_call_operand.vmem [shape: f32[32,32], index: 2, kind: input, shape index: {}]   ;;  %s5947_s7 = inlined_call_operand.vmem [shape: f32[2,2,3,32], index: 7, kind: input, shape index: {}]   ;;  %s5948_s8 = inlined_call_operand.vmem [shape: f32[2,2,1,32], index: 8, kind: input, shape index: {}]   ;;  %s5949_s11 = inlined_call_operand.vmem [shape: f32[2,2,32,32], index: 11, kind: input, shape index: {}]   ;;  %s5950_s9 = inlined_call_operand.vmem [shape: f32[2,2,1,32], index: 9, kind: input, shape index: {}, may-alias: {9,13}]   ;;  %s5951_s10 = inlined_call_operand.vmem [shape: f32[2,2,1,32], index: 10, kind: input, shape index: {}, may-alias: {10,14}]   ;;  %s5952_s12 = inlined_call_operand.vmem [shape: f32[2,2,1,32], index: 12, kind: input, shape index: {}]   ;;  %s5953_s13 = inlined_call_operand.vmem [shape: f32[2,2,1,32], index: 13, kind: input, shape index: {}, may-alias: {9,13}]   ;;  %s5954_s14 = inlined_call_operand.vmem [shape: f32[2,2,1,32], index: 14, kind: input, shape index: {}, may-alias: {10,14}]   ;;  %s5955_s15 = inlined_call_operand.vmem [shape: f32[2,32,29], index: 15, kind: input, shape index: {}]   ;;  %s5956_s16 = inlined_call_operand.vmem [shape: f32[2,1,29], index: 16, kind: input, shape index: {}]   ;;  %s5957_s17 = inlined_call_operand.vmem [shape: f32[32,2], index: 17, kind: output, shape index: {0}]   ;;  %s5958_s18 = inlined_call_operand.vmem [shape: f32[32,1], index: 18, kind: output, shape index: {1}]  }
   0x1   :  { %5993 = sst [smem:[#allocation18_spill]] %s5940_s4  ;;  %3948 = vset.pattern.permute.xlu1 %v5961_v0  ;;  %3947 = vset.pattern.permute.xlu0 %v5961_v0  ;;  %v64_v17 = vld [vmem:[%s5943_s1 + $0x8] sm:$0xff]  ;;  %v63_v18 = vld [vmem:[%s5943_s1] sm:$0xff]  ;;  %v65_v23 = vld [vmem:[%s5943_s1 + $0x10] sm:$0xff]  ;;  %s4286_s28 = smov 127  }
   0x2   :  { %5994 = sst [smem:[#allocation19_spill]] %s5941_s0  ;;  %s5996_s29 = sld [smem:[#allocation18_spill]]  ;;  %v4388_v4 = vshrl.u32 %v71_v3, 7  ;;  %v66_v24 = vld [vmem:[%s5943_s1 + $0x18] sm:$0xff]  ;;  %v3709_v29 = vld [vmem:[%s5944_s5] ss:$0 sm:$0xff] }
   0x3   :  { %5995 = sst [smem:[#allocation20_spill]] %s5942_s3  ;;  %s5997_s19 = sld [smem:[#allocation19_spill]]  ;;  %v3710_v30 = vld [vmem:[%s5945_s6] ss:$0 sm:$0xff]  ;;  %v70_v45 = vld [vmem:[%s5946_s2 + $0x18] sm:$0xff]  ;;  %v68_v54 = vld [vmem:[%s5946_s2 + $0x8] sm:$0xff] }
   0x4   :  { %v4391_v5 = vsub.s32 0, %v4388_v4  ;;  %s5998_s26 = sld [smem:[#allocation20_spill]]  ;;  %v4452_v34 = vadd.s32 8, %v4388_v4  ;;  %v4455_v35 = vadd.s32 24, %v4388_v4  ;;  %v67_v38 = vld [vmem:[%s5946_s2] sm:$0xff]  ;;  %v4461_v41 = vadd.s32 16, %v4388_v4 }
   0x5   :  { %v80_v44 = vand.u32 15, %v4388_v4  ;;  %v4468_v46 = vsub.s32 1, %v4388_v4  ;;  %v130_v53 = vld [vmem:[%s5947_s7] sm:$0x7]  ;;  %v69_v55 = vld [vmem:[%s5946_s2 + $0x10] sm:$0xff]  ;;  %vm321_vm1 = vcmp.lt.s32.totalorder %v4388_v4, 1 }
   0x6   :  { %v87_v47 = vand.u32 15, %v4452_v34  ;;  %v101_v48 = vand.u32 15, %v4455_v35  ;;  %v94_v58 = vand.u32 15, %v4461_v41  ;;  %v4497_v62 = vsub.s32 2, %v4388_v4 }
   0x7   :  { %vm326_vm0 = vcmp.ge.s32.totalorder %v80_v44, 1  ;;  %v361_v61 = vrot.slane %v130_v53, %v4468_v46  ;;  %vm374_vm4 = vcmp.lt.s32.totalorder %v4388_v4, 7  ;;  %vm725_vm7 = vcmp.ge.s32.totalorder %v80_v44, 3 }
   0x8   :  { %v125_v1 = vld [vmem:[%s5996_s29] sm:$0x1]  ;;  %6003 = vst [vmem:[#allocation6_spill] sm:$0xff] %v4497_v62  ;;  %vm4501_vm2 = vcmp.lt.s32.totalorder %v87_v47, 15  ;;  %vm386_vm3 = vcmp.lt.s32.totalorder %v101_v48, 15  ;;  %vm4524_vm5 = vcmp.ge.s32.totalorder %v94_v58, 1 }
   0x9   :  { %v192_v2 = vmul.f32 1.442695, %v125_v1  ;;  %v60_v6 = vld [vmem:[%s5997_s19 + $0x8] sm:$0xff]  ;;  %v59_v8 = vld [vmem:[%s5997_s19] sm:$0xff]  ;;  %v61_v9 = vld [vmem:[%s5997_s19 + $0x10] sm:$0xff]  ;;  %vm720_vm8 = vcmp.lt.s32.totalorder %v4388_v4, 3 }
   0xa   :  { %v62_v10 = vld [vmem:[%s5997_s19 + $0x18] sm:$0xff]  ;;  %v3708_v12 = vld [vmem:[%s5998_s26] ss:$0 sm:$0xff]  ;;  %vm773_vm9 = vcmp.lt.s32.totalorder %v4388_v4, 5  ;;  %vm785_vm10 = vcmp.lt.s32.totalorder %v101_v48, 13  ;;  %vm783_vm11 = vcmp.lt.s32.totalorder %v87_v47, 13 }
   0xb   :  { %3973 = vpow2.f32 %v192_v2  ;;  %vm727_vm12 = vcmp.ge.s32.totalorder %v94_v58, 3  ;;  %s4281_s19 = smov 118  }
  0x15   :  { %v3974_v7 = vpop.eup %3973 }
  0x16   :  { %v198_v11 = vrot.slane %v3974_v7, %v4391_v5 }
  0x18   :  { %v201_v13 = vmul.f32 %v198_v11, %v60_v6  ;;  %v200_v14 = vmul.f32 %v198_v11, %v59_v8  ;;  %v202_v15 = vmul.f32 %v198_v11, %v61_v9  ;;  %v203_v16 = vmul.f32 %v198_v11, %v62_v10 }
  0x19   :  { %v5967_v9 = vmov 0.0   ;;  %v353_v11 = vrot.slane %v130_v53, %v4391_v5 }
  0x1a   :  { %v4415_v19 = vadd.f32 %v3708_v12, %v201_v13  ;;  %v4417_v20 = vadd.f32 %v3708_v12, %v200_v14  ;;  %v4419_v21 = vadd.f32 %v3708_v12, %v202_v15  ;;  %v4421_v22 = vadd.f32 %v3708_v12, %v203_v16 }
  0x1b   :  { %v4518_v10 = vsel %vm326_vm0, 1.0, %v5967_v9  ;;  %v4659_v41 = vsel %vm783_vm11, 1.0, %v5967_v9  ;;  %vm1351_vm0 = vcmask 1041408  }
  0x1c   :  { %v4430_v25 = vmul.f32 %v4415_v19, %v64_v17  ;;  %v4433_v26 = vmul.f32 %v4417_v20, %v63_v18  ;;  %v4438_v27 = vmul.f32 %v4419_v21, %v65_v23  ;;  %v4441_v28 = vmul.f32 %v4421_v22, %v66_v24  ;;  %6013 = vst [vmem:[#allocation12_spill] sm:$0xff] %v4659_v41 }
  0x1e   :  { %5999 = vst [vmem:[#allocation2_spill] sm:$0xff] %v4430_v25  ;;  %6000 = vst [vmem:[#allocation3_spill] sm:$0xff] %v4433_v26  ;;  %260 = vperm.xlu1 %3948, %v4430_v25   ;;  %255 = vperm.xlu0 %3947, %v4433_v26  }
  0x1f   :  { %6001 = vst [vmem:[#allocation4_spill] sm:$0xff] %v4438_v27  ;;  %6002 = vst [vmem:[#allocation5_spill] sm:$0xff] %v4441_v28 }
  0x22   :  { %265 = vperm.xlu1 %3948, %v4438_v27   ;;  %270 = vperm.xlu0 %3947, %v4441_v28  }
  0x26   :  { %310 = vperm.xlu1 %3948, %v66_v24   ;;  %298 = vperm.xlu0 %3947, %v63_v18   ;;  %v4536_v18 = vsel %vm4501_vm2, 1.0, %v5967_v9  ;;  %v4539_v24 = vsel %vm386_vm3, 1.0, %v5967_v9 }
  0x27   :  { %6009 = vst [vmem:[#allocation8_spill] sm:$0xff] %v4536_v18 }
  0x2a   :  { %306 = vperm.xlu1 %3948, %v65_v23   ;;  %302 = vperm.xlu0 %3947, %v64_v17   ;;  %v406_v17 = vrot.slane %v130_v53, %v4497_v62 }
  0x9d   :  { %v261_v31 = vpop.permute.xlu1 %260  ;;  %v256_v32 = vpop.permute.xlu0 %255 }
  0x9e   :  { %v279_v33 = vmul.f32 %v3709_v29, %v256_v32  ;;  %v280_v36 = vmul.f32 %v3709_v29, %v261_v31 }
  0xa0   :  { %v289_v37 = vadd.f32 %v3710_v30, %v279_v33  ;;  %v290_v49 = vadd.f32 %v3710_v30, %v280_v36 }
  0xa1   :  { %v266_v39 = vpop.permute.xlu1 %265  ;;  %v271_v40 = vpop.permute.xlu0 %270 }
  0xa2   :  { %v281_v42 = vmul.f32 %v3709_v29, %v266_v39  ;;  %v282_v43 = vmul.f32 %v3709_v29, %v271_v40  ;;  %v4472_v50 = vadd.f32 %v289_v37, %v67_v38  ;;  %v4505_v1 = vadd.f32 %v290_v49, %v68_v54 }
  0xa3   :  { %v4547_v38 = vsel %vm4524_vm5, 1.0, %v5967_v9 }
  0xa4   :  { %v291_v51 = vadd.f32 %v3710_v30, %v281_v42  ;;  %v292_v52 = vadd.f32 %v3710_v30, %v282_v43  ;;  %6010 = vst [vmem:[#allocation9_spill] sm:$0xff] %v4547_v38 }
  0xa5   :  { %v4483_v56 = vpop.permute.xlu1 %310  ;;  %v4485_v57 = vpop.permute.xlu0 %298 }
  0xa6   :  { %v4488_v59 = vadd.f32 %v292_v52, %v70_v45  ;;  %v313_v60 = vmul.f32 %v4485_v57, %v4472_v50  ;;  %v4507_v2 = vadd.f32 %v291_v51, %v69_v55 }
  0xa8   :  { %v316_v6 = vmul.f32 %v4483_v56, %v4488_v59  ;;  %v317_v14 = vrot.slane %v313_v60, 7  ;;  %v370_v30 = vrot.slane %v313_v60, 1  ;;  %v362_v39 = vmul.f32 %v361_v61, %v313_v60 }
  0xa9   :  { %v4513_v7 = vpop.permute.xlu1 %306  ;;  %v4515_v8 = vpop.permute.xlu0 %302 }
  0xaa   :  { %6006 = vst [vmem:[#allocation7_spill] sm:$0xff] %v4515_v8  ;;  %v314_v13 = vmul.f32 %v4515_v8, %v4505_v1  ;;  %v320_v15 = vrot.slane %v316_v6, 7  ;;  %v315_v16 = vmul.f32 %v4513_v7, %v4507_v2  ;;  %v373_v23 = vrot.slane %v316_v6, 1 }
  0xab   :  { %v365_v60 = vmul.f32 %v361_v61, %v316_v6 }
  0xac   :  { %v325_v29 = vsel %vm321_vm1, %v320_v15, %v317_v14  ;;  %v371_v31 = vrot.slane %v314_v13, 1  ;;  %v318_v32 = vrot.slane %v314_v13, 7  ;;  %v372_v36 = vrot.slane %v315_v16, 1 }
  0xad   :  { %v346_v33 = vmul.f32 %v4518_v10, %v325_v29  ;;  %v319_v37 = vrot.slane %v315_v16, 7  ;;  %v363_v43 = vmul.f32 %v361_v61, %v314_v13  ;;  %v378_v52 = vsel %vm374_vm4, %v373_v23, %v370_v30  ;;  %v3715_v29 = vld [vmem:[%s5948_s8] ss:$0 sm:$0xff] }
  0xae   :  { %v377_v40 = vsel %vm374_vm4, %v370_v30, %v371_v31  ;;  %v324_v42 = vsel %vm321_vm1, %v317_v14, %v318_v32  ;;  %v376_v51 = vsel %vm374_vm4, %v371_v31, %v372_v36  ;;  %v375_v30 = vsel %vm374_vm4, %v372_v36, %v373_v23 }
  0xaf   :  { %v354_v45 = vmul.f32 %v353_v11, %v346_v33  ;;  %v355_v49 = vmul.f32 %v353_v11, %v324_v42  ;;  %v400_v53 = vmul.f32 %v4536_v18, %v376_v51  ;;  %v323_v54 = vsel %vm321_vm1, %v318_v32, %v319_v37 }
  0xb0   :  { %v322_v55 = vsel %vm321_vm1, %v319_v37, %v320_v15  ;;  %v407_v12 = vmul.f32 %v406_v17, %v377_v40  ;;  %v348_v14 = vmul.f32 %v4547_v38, %v323_v54  ;;  %v402_v32 = vmul.f32 %v4539_v24, %v378_v52 }
  0xb1   :  { %v366_v63 = vadd.f32 %v362_v39, %v354_v45  ;;  %v367_v13 = vadd.f32 %v363_v43, %v355_v49  ;;  %v408_v31 = vmul.f32 %v406_v17, %v400_v53  ;;  %v357_v33 = vmul.f32 %v353_v11, %v322_v55 }
  0xb2   :  { %v356_v51 = vmul.f32 %v353_v11, %v348_v14  ;;  %v364_v15 = vmul.f32 %v361_v61, %v315_v16  ;;  %v409_v43 = vmul.f32 %v406_v17, %v375_v30  ;;  %v410_v45 = vmul.f32 %v406_v17, %v402_v32 }
  0xb3   :  { %v411_v42 = vadd.f32 %v407_v12, %v366_v63  ;;  %v412_v6 = vadd.f32 %v408_v31, %v367_v13  ;;  %v369_v37 = vadd.f32 %v365_v60, %v357_v33 }
  0xb4   :  { %v368_v40 = vadd.f32 %v364_v15, %v356_v51 }
  0xb5   :  { %v421_v39 = vadd.f32 %v3715_v29, %v411_v42  ;;  %v422_v49 = vadd.f32 %v3715_v29, %v412_v6  ;;  %v414_v0 = vadd.f32 %v410_v45, %v369_v37 }
  0xb6   :  { %v413_v53 = vadd.f32 %v409_v43, %v368_v40  ;;  %v146_v40 = vld [vmem:[%s5949_s11] sm:$0xff]  ;;  %v147_v43 = vld [vmem:[%s5949_s11 + $0x8] sm:$0xff] }
  0xb7   :  { %v426_v54 = vsel %vm425_vm6, %v421_v39, 0.0  ;;  %v429_v23 = vsel %vm425_vm6, %v422_v49, 0.0  ;;  %v424_v61 = vadd.f32 %v3715_v29, %v414_v0  ;;  %v537_v45 = vpack.c.bf16 %v147_v43, %v146_v40 }
  0xb8   :  { %427 = vadd.xlane.f32.xlu0 %v426_v54  ;;  %430 = vadd.xlane.f32.xlu1 %v429_v23  ;;  %v423_v36 = vadd.f32 %v3715_v29, %v413_v53  ;;  %v149_v54 = vld [vmem:[%s5949_s11 + $0x18] sm:$0xff] }
  0xb9   :  { %v435_v16 = vsel %vm425_vm6, %v424_v61, 0.0  ;;  %3847 = vmatprep.subr.bf16.mxu1 %v537_v45 }
  0xba   :  { %v432_v11 = vsel %vm425_vm6, %v423_v36, 0.0  ;;  %3848 = vmatpush3.bf16.msra.mxu1 %v537_v45 }
  0xbc   :  { %433 = vadd.xlane.f32.xlu0 %v432_v11 }
  0xc0   :  { %436 = vadd.xlane.f32.xlu0 %v435_v16 }
 0x145   :  { %v428_v52 = vpop.xlane.xlu0 %427  ;;  %v431_v17 = vpop.xlane.xlu1 %430 }
 0x146   :  { %v439_v55 = vmul.f32 0.03125, %v428_v52  ;;  %v440_v60 = vmul.f32 0.03125, %v431_v17 }
 0x148   :  { %v443_v63 = vsub.f32 %v421_v39, %v439_v55  ;;  %v444_v12 = vsub.f32 %v422_v49, %v440_v60  ;;  %v148_v49 = vld [vmem:[%s5949_s11 + $0x10] sm:$0xff] }
 0x149   :  { %v434_v13 = vpop.xlane.xlu0 %433  ;;  %v538_v53 = vpack.c.bf16 %v149_v54, %v148_v49 }
 0x14a   :  { %v441_v14 = vmul.f32 0.03125, %v434_v13  ;;  %v447_v31 = vmul.f32 %v443_v63, %v443_v63  ;;  %v448_v30 = vmul.f32 %v444_v12, %v444_v12 }
 0x14b   :  { %3849 = vmatprep.subr.bf16.mxu1 %v538_v53 }
 0x14c   :  { %v445_v33 = vsub.f32 %v423_v36, %v441_v14  ;;  %v451_v32 = vsel %vm425_vm6, %v447_v31, 0.0  ;;  %v454_v0 = vsel %vm425_vm6, %v448_v30, 0.0  ;;  %3850 = vmatpush3.bf16.msra.mxu1 %v538_v53 }
 0x14d   :  { %452 = vadd.xlane.f32.xlu1 %v451_v32  ;;  %v437_v29 = vpop.xlane.xlu0 %436  ;;  %455 = vadd.xlane.f32.xlu0 %v454_v0  ;;  %v3716_v32 = vld [vmem:[%s5950_s9] ss:$0 sm:$0xff] }
 0x14e   :  { %v442_v42 = vmul.f32 0.03125, %v437_v29  ;;  %v449_v51 = vmul.f32 %v445_v33, %v445_v33 }
 0x150   :  { %v446_v15 = vsub.f32 %v424_v61, %v442_v42  ;;  %v457_v6 = vsel %vm425_vm6, %v449_v51, 0.0  ;;  %v3717_v42 = vld [vmem:[%s5951_s10] ss:$0 sm:$0xff] }
 0x151   :  { %458 = vadd.xlane.f32.xlu1 %v457_v6 }
 0x152   :  { %v450_v37 = vmul.f32 %v446_v15, %v446_v15 }
 0x154   :  { %v460_v39 = vsel %vm425_vm6, %v450_v37, 0.0 }
 0x155   :  { %461 = vadd.xlane.f32.xlu0 %v460_v39 }
 0x1da   :  { %v453_v23 = vpop.xlane.xlu1 %452  ;;  %v456_v11 = vpop.xlane.xlu0 %455 }
 0x1db   :  { %v463_v36 = vmul.f32 0.03125, %v453_v23  ;;  %v464_v61 = vmul.f32 0.03125, %v456_v11 }
 0x1dd   :  { %v467_v16 = vadd.f32 1e-05, %v463_v36  ;;  %v468_v52 = vadd.f32 1e-05, %v464_v61 }
 0x1de   :  { %v459_v55 = vpop.xlane.xlu1 %458 }
 0x1df   :  { %3975 = vrsqrt.f32 %v467_v16  ;;  %v465_v17 = vmul.f32 0.03125, %v459_v55 }
 0x1e0   :  { %3977 = vrsqrt.f32 %v468_v52 }
 0x1e1   :  { %v469_v60 = vadd.f32 1e-05, %v465_v17 }
 0x1e2   :  { %v462_v13 = vpop.xlane.xlu0 %461 }
 0x1e3   :  { %3979 = vrsqrt.f32 %v469_v60  ;;  %v466_v14 = vmul.f32 0.03125, %v462_v13 }
 0x1e5   :  { %v470_v31 = vadd.f32 1e-05, %v466_v14 }
 0x1e7   :  { %3981 = vrsqrt.f32 %v470_v31 }
 0x1e9   :  { %v3976_v30 = vpop.eup %3975 }
 0x1ea   :  { %v3978_v0 = vpop.eup %3977  ;;  %v475_v29 = vmul.f32 %v3976_v30, %v443_v63 }
 0x1eb   :  { %v476_v51 = vmul.f32 %v3978_v0, %v444_v12 }
 0x1ec   :  { %v485_v6 = vmul.f32 %v3716_v32, %v475_v29 }
 0x1ed   :  { %v3980_v37 = vpop.eup %3979  ;;  %v486_v39 = vmul.f32 %v3716_v32, %v476_v51 }
 0x1ee   :  { %v495_v40 = vadd.f32 %v3717_v42, %v485_v6  ;;  %v477_v43 = vmul.f32 %v3980_v37, %v445_v33 }
 0x1ef   :  { %v496_v45 = vadd.f32 %v3717_v42, %v486_v39 }
 0x1f0   :  { %v487_v49 = vmul.f32 %v3716_v32, %v477_v43  ;;  %v503_v54 = vmul.f32 0.044715, %v495_v40 }
 0x1f1   :  { %v3982_v53 = vpop.eup %3981  ;;  %v504_v23 = vmul.f32 0.044715, %v496_v45 }
 0x1f2   :  { %v497_v36 = vadd.f32 %v3717_v42, %v487_v49  ;;  %v478_v11 = vmul.f32 %v3982_v53, %v446_v15  ;;  %v507_v61 = vmul.f32 %v503_v54, %v495_v40  ;;  %v500_v54 = vmul.f32 0.5, %v496_v45 }
 0x1f3   :  { %v508_v16 = vmul.f32 %v504_v23, %v496_v45 }
 0x1f4   :  { %v488_v63 = vmul.f32 %v3716_v32, %v478_v11  ;;  %v511_v52 = vmul.f32 %v507_v61, %v495_v40  ;;  %v505_v55 = vmul.f32 0.044715, %v497_v36 }
 0x1f5   :  { %v512_v17 = vmul.f32 %v508_v16, %v496_v45 }
 0x1f6   :  { %v498_v60 = vadd.f32 %v3717_v42, %v488_v63  ;;  %v515_v12 = vadd.f32 %v511_v52, %v495_v40  ;;  %v509_v13 = vmul.f32 %v505_v55, %v497_v36  ;;  %v499_v42 = vmul.f32 0.5, %v495_v40  ;;  %v3718_v40 = vld [vmem:[%s5952_s12] ss:$0 sm:$0xff] }
 0x1f7   :  { %v516_v14 = vadd.f32 %v512_v17, %v496_v45  ;;  %v501_v55 = vmul.f32 0.5, %v497_v36 }
 0x1f8   :  { %v519_v31 = vmul.f32 0.7978846, %v515_v12  ;;  %v506_v30 = vmul.f32 0.044715, %v498_v60  ;;  %v513_v33 = vmul.f32 %v509_v13, %v497_v36  ;;  %v502_v17 = vmul.f32 0.5, %v498_v60 }
 0x1f9   :  { %v520_v0 = vmul.f32 0.7978846, %v516_v14 }
 0x1fa   :  { %3983 = vtanh.f32 %v519_v31  ;;  %v510_v29 = vmul.f32 %v506_v30, %v498_v60  ;;  %v517_v51 = vadd.f32 %v513_v33, %v497_v36 }
 0x1fb   :  { %3985 = vtanh.f32 %v520_v0 }
 0x1fc   :  { %v514_v6 = vmul.f32 %v510_v29, %v498_v60  ;;  %v521_v15 = vmul.f32 0.7978846, %v517_v51 }
 0x1fe   :  { %v518_v37 = vadd.f32 %v514_v6, %v498_v60  ;;  %3987 = vtanh.f32 %v521_v15 }
 0x200   :  { %v522_v32 = vmul.f32 0.7978846, %v518_v37 }
 0x202   :  { %3989 = vtanh.f32 %v522_v32 }
 0x204   :  { %v3984_v39 = vpop.eup %3983 }
 0x205   :  { %v3986_v43 = vpop.eup %3985  ;;  %v527_v49 = vadd.f32 1.0, %v3984_v39 }
 0x206   :  { %v528_v53 = vadd.f32 1.0, %v3986_v43 }
 0x207   :  { %v531_v23 = vmul.f32 %v527_v49, %v499_v42 }
 0x208   :  { %v3988_v11 = vpop.eup %3987  ;;  %v532_v61 = vmul.f32 %v528_v53, %v500_v54 }
 0x209   :  { %v529_v63 = vadd.f32 1.0, %v3988_v11 }
 0x20a   :  { %v535_v16 = vpack.c.bf16 %v532_v61, %v531_v23 }
 0x20b   :  { %v533_v13 = vmul.f32 %v529_v63, %v501_v55 }
 0x20c   :  { %v3990_v52 = vpop.eup %3989  ;;  %3851 = vmatprep.mubr.msk.bf16.mxu1 %vm425_vm6, %v535_v16 }
 0x20d   :  { %v530_v12 = vadd.f32 1.0, %v3990_v52 }
 0x20f   :  { %v534_v14 = vmul.f32 %v530_v12, %v502_v17 }
 0x211   :  { %v536_v31 = vpack.c.bf16 %v534_v14, %v533_v13 }
 0x213   :  { %3852 = vmatmul.mubr.msk.bf16.vlgmr.msra.gmra.mrb[0].mxu1 %vm425_vm6, %v536_v31 }
 0x2e6   :  { %v3853_v45 = vpop.f32.mrb[0].mxu1 }
 0x2e7   :  { %v585_v30 = vpop.f32.mrb[1].mxu1  ;;  %v594_v60 = vadd.f32 %v3853_v45, %v3718_v40 }
 0x2e8   :  { %v586_v33 = vadd.f32 %v3718_v40, %v585_v30  ;;  %v3854_v0 = vpop.f32.mrb[2].mxu1 }
 0x2e9   :  { %v597_v29 = vadd.f32 %v3854_v0, %v3718_v40  ;;  %v588_v51 = vpop.f32.mrb[3].mxu1  ;;  %v606_v32 = vsel %vm425_vm6, %v594_v60, 0.0 }
 0x2ea   :  { %v589_v6 = vadd.f32 %v3718_v40, %v588_v51  ;;  %v600_v36 = vsel %vm425_vm6, %v586_v33, 0.0 }
 0x2eb   :  { %601 = vadd.xlane.f32.xlu1 %v600_v36  ;;  %v609_v15 = vsel %vm425_vm6, %v597_v29, 0.0 }
 0x2ec   :  { %610 = vadd.xlane.f32.xlu0 %v609_v15  ;;  %v603_v37 = vsel %vm425_vm6, %v589_v6, 0.0 }
 0x2ef   :  { %604 = vadd.xlane.f32.xlu1 %v603_v37 }
 0x2f0   :  { %607 = vadd.xlane.f32.xlu0 %v606_v32 }
 0x378   :  { %v602_v39 = vpop.xlane.xlu1 %601 }
 0x379   :  { %v612_v43 = vmul.f32 0.03125, %v602_v39  ;;  %v611_v42 = vpop.xlane.xlu0 %610 }
 0x37a   :  { %v615_v49 = vmul.f32 0.03125, %v611_v42  ;;  %v3721_v42 = vld [vmem:[%s5953_s13] ss:$0 sm:$0xff] }
 0x37b   :  { %v616_v54 = vsub.f32 %v586_v33, %v612_v43 }
 0x37c   :  { %v619_v53 = vsub.f32 %v597_v29, %v615_v49  ;;  %v605_v23 = vpop.xlane.xlu1 %604 }
 0x37d   :  { %v613_v11 = vmul.f32 0.03125, %v605_v23  ;;  %v608_v61 = vpop.xlane.xlu0 %607  ;;  %v620_v16 = vmul.f32 %v616_v54, %v616_v54 }
 0x37e   :  { %v614_v63 = vmul.f32 0.03125, %v608_v61  ;;  %v623_v52 = vmul.f32 %v619_v53, %v619_v53 }
 0x37f   :  { %v617_v55 = vsub.f32 %v589_v6, %v613_v11  ;;  %v624_v17 = vsel %vm425_vm6, %v620_v16, 0.0  ;;  %v3722_v11 = vld [vmem:[%s5954_s14] ss:$0 sm:$0xff] }
 0x380   :  { %v618_v12 = vsub.f32 %v594_v60, %v614_v63  ;;  %625 = vadd.xlane.f32.xlu1 %v624_v17  ;;  %v633_v13 = vsel %vm425_vm6, %v623_v52, 0.0 }
 0x381   :  { %634 = vadd.xlane.f32.xlu0 %v633_v13  ;;  %v621_v14 = vmul.f32 %v617_v55, %v617_v55 }
 0x382   :  { %v622_v31 = vmul.f32 %v618_v12, %v618_v12 }
 0x383   :  { %v627_v40 = vsel %vm425_vm6, %v621_v14, 0.0 }
 0x384   :  { %628 = vadd.xlane.f32.xlu1 %v627_v40  ;;  %v630_v45 = vsel %vm425_vm6, %v622_v31, 0.0 }
 0x385   :  { %631 = vadd.xlane.f32.xlu0 %v630_v45 }
 0x40d   :  { %v626_v30 = vpop.xlane.xlu1 %625 }
 0x40e   :  { %v636_v33 = vmul.f32 0.03125, %v626_v30  ;;  %v635_v0 = vpop.xlane.xlu0 %634 }
 0x40f   :  { %v639_v29 = vmul.f32 0.03125, %v635_v0 }
 0x410   :  { %v640_v51 = vadd.f32 1e-05, %v636_v33 }
 0x411   :  { %v643_v6 = vadd.f32 1e-05, %v639_v29  ;;  %v629_v36 = vpop.xlane.xlu1 %628 }
 0x412   :  { %3991 = vrsqrt.f32 %v640_v51  ;;  %v637_v60 = vmul.f32 0.03125, %v629_v36  ;;  %v632_v15 = vpop.xlane.xlu0 %631 }
 0x413   :  { %3993 = vrsqrt.f32 %v643_v6  ;;  %v638_v37 = vmul.f32 0.03125, %v632_v15 }
 0x414   :  { %v641_v32 = vadd.f32 1e-05, %v637_v60 }
 0x415   :  { %v642_v39 = vadd.f32 1e-05, %v638_v37 }
 0x416   :  { %3995 = vrsqrt.f32 %v641_v32 }
 0x417   :  { %3997 = vrsqrt.f32 %v642_v39 }
 0x41c   :  { %v3992_v43 = vpop.eup %3991 }
 0x41d   :  { %v3994_v49 = vpop.eup %3993  ;;  %v648_v23 = vmul.f32 %v3992_v43, %v616_v54 }
 0x41e   :  { %v651_v61 = vmul.f32 %v3994_v49, %v619_v53 }
 0x41f   :  { %v658_v16 = vmul.f32 %v3721_v42, %v648_v23 }
 0x420   :  { %v3996_v63 = vpop.eup %3995  ;;  %v661_v52 = vmul.f32 %v3721_v42, %v651_v61 }
 0x421   :  { %v3998_v17 = vpop.eup %3997  ;;  %v668_v13 = vadd.f32 %v3722_v11, %v658_v16  ;;  %v649_v14 = vmul.f32 %v3996_v63, %v617_v55 }
 0x422   :  { %v671_v31 = vadd.f32 %v3722_v11, %v661_v52  ;;  %v650_v40 = vmul.f32 %v3998_v17, %v618_v12 }
 0x423   :  { %v659_v45 = vmul.f32 %v3721_v42, %v649_v14  ;;  %v676_v30 = vmul.f32 0.044715, %v668_v13  ;;  %v672_v17 = vmul.f32 0.5, %v668_v13 }
 0x424   :  { %v679_v33 = vmul.f32 0.044715, %v671_v31  ;;  %v660_v0 = vmul.f32 %v3721_v42, %v650_v40  ;;  %v675_v40 = vmul.f32 0.5, %v671_v31 }
 0x425   :  { %v669_v29 = vadd.f32 %v3722_v11, %v659_v45  ;;  %v680_v51 = vmul.f32 %v676_v30, %v668_v13 }
 0x426   :  { %v683_v54 = vmul.f32 %v679_v33, %v671_v31  ;;  %v670_v6 = vadd.f32 %v3722_v11, %v660_v0  ;;  %v131_v0 = vld [vmem:[%s5947_s7 + $0x4] sm:$0x7] }
 0x427   :  { %v677_v36 = vmul.f32 0.044715, %v669_v29  ;;  %v684_v60 = vmul.f32 %v680_v51, %v668_v13  ;;  %v760_v44 = vrot.slane %v131_v0, %v4468_v46  ;;  %v752_v48 = vrot.slane %v131_v0, %v4391_v5 }
 0x428   :  { %v687_v15 = vmul.f32 %v683_v54, %v671_v31  ;;  %v678_v53 = vmul.f32 0.044715, %v670_v6 }
 0x429   :  { %v681_v37 = vmul.f32 %v677_v36, %v669_v29  ;;  %v688_v32 = vadd.f32 %v684_v60, %v668_v13  ;;  %v673_v36 = vmul.f32 0.5, %v669_v29 }
 0x42a   :  { %v682_v39 = vmul.f32 %v678_v53, %v670_v6  ;;  %v691_v43 = vadd.f32 %v687_v15, %v671_v31  ;;  %v674_v31 = vmul.f32 0.5, %v670_v6 }
 0x42b   :  { %v685_v49 = vmul.f32 %v681_v37, %v669_v29  ;;  %v692_v55 = vmul.f32 0.7978846, %v688_v32 }
 0x42c   :  { %v695_v23 = vmul.f32 0.7978846, %v691_v43  ;;  %v686_v12 = vmul.f32 %v682_v39, %v670_v6  ;;  %v4629_v39 = vsel %vm725_vm7, 1.0, %v5967_v9  ;;  %vm1628_vm7 = vcmask 89088  }
 0x42d   :  { %v689_v61 = vadd.f32 %v685_v49, %v669_v29  ;;  %3999 = vtanh.f32 %v692_v55  ;;  %6011 = vst [vmem:[#allocation10_spill] sm:$0xff] %v4629_v39 }
 0x42e   :  { %4001 = vtanh.f32 %v695_v23  ;;  %v690_v42 = vadd.f32 %v686_v12, %v670_v6  ;;  %v4652_v12 = vsel %vm785_vm10, 1.0, %v5967_v9 }
 0x42f   :  { %v693_v16 = vmul.f32 0.7978846, %v689_v61  ;;  %6012 = vst [vmem:[#allocation11_spill] sm:$0xff] %v4652_v12 }
 0x430   :  { %v694_v63 = vmul.f32 0.7978846, %v690_v42 }
 0x431   :  { %4003 = vtanh.f32 %v693_v16 }
 0x432   :  { %4005 = vtanh.f32 %v694_v63  ;;  %v4665_v63 = vsel %vm727_vm12, 1.0, %v5967_v9 }
 0x433   :  { %6014 = vst [vmem:[#allocation13_spill] sm:$0xff] %v4665_v63 }
 0x437   :  { %v4000_v11 = vpop.eup %3999 }
 0x438   :  { %v4002_v52 = vpop.eup %4001  ;;  %v700_v14 = vadd.f32 1.0, %v4000_v11 }
 0x439   :  { %v703_v45 = vadd.f32 1.0, %v4002_v52 }
 0x43a   :  { %v704_v30 = vmul.f32 %v700_v14, %v672_v17 }
 0x43b   :  { %v4004_v33 = vpop.eup %4003  ;;  %v707_v51 = vmul.f32 %v703_v45, %v675_v40 }
 0x43c   :  { %v4006_v54 = vpop.eup %4005  ;;  %v701_v60 = vadd.f32 1.0, %v4004_v33  ;;  %v4620_v15 = vadd.f32 %v704_v30, %v4472_v50 }
 0x43d   :  { %v4623_v13 = vadd.f32 %v707_v51, %v4488_v59  ;;  %v702_v53 = vadd.f32 1.0, %v4006_v54 }
 0x43e   :  { %v705_v37 = vmul.f32 %v701_v60, %v673_v36  ;;  %v712_v32 = vmul.f32 %v4620_v15, %v4485_v57 }
 0x43f   :  { %v715_v50 = vmul.f32 %v4623_v13, %v4483_v56  ;;  %v706_v59 = vmul.f32 %v702_v53, %v674_v31 }
 0x440   :  { %v4638_v29 = vadd.f32 %v705_v37, %v4505_v1  ;;  %v716_v6 = vrot.slane %v712_v32, 5  ;;  %v769_v43 = vrot.slane %v712_v32, 3  ;;  %v805_v1 = vrot.slane %v131_v0, %v4497_v62 }
 0x441   :  { %v719_v49 = vrot.slane %v715_v50, 5  ;;  %v4643_v55 = vadd.f32 %v706_v59, %v4507_v2  ;;  %v772_v23 = vrot.slane %v715_v50, 3  ;;  %v761_v11 = vmul.f32 %v760_v44, %v712_v32  ;;  %v3727_v32 = vld [vmem:[%s5948_s8 + $0x1] ss:$0 sm:$0xff] }
 0x442   :  { %v713_v35 = vmul.f32 %v4638_v29, %v4515_v8 }
 0x443   :  { %v724_v47 = vsel %vm720_vm8, %v719_v49, %v716_v6  ;;  %v714_v2 = vmul.f32 %v4643_v55, %v4513_v7  ;;  %v777_v58 = vsel %vm773_vm9, %v772_v23, %v769_v43 }
 0x444   :  { %v745_v61 = vmul.f32 %v4629_v39, %v724_v47  ;;  %v770_v42 = vrot.slane %v713_v35, 3  ;;  %v717_v16 = vrot.slane %v713_v35, 5  ;;  %v762_v52 = vmul.f32 %v760_v44, %v713_v35 }
 0x445   :  { %v771_v17 = vrot.slane %v714_v2, 3  ;;  %v718_v14 = vrot.slane %v714_v2, 5  ;;  %v801_v33 = vmul.f32 %v4652_v12, %v777_v58  ;;  %v764_v35 = vmul.f32 %v760_v44, %v715_v50 }
 0x446   :  { %v753_v40 = vmul.f32 %v752_v48, %v745_v61  ;;  %v776_v45 = vsel %vm773_vm9, %v769_v43, %v770_v42  ;;  %v723_v30 = vsel %vm720_vm8, %v716_v6, %v717_v16  ;;  %v763_v6 = vmul.f32 %v760_v44, %v714_v2 }
 0x447   :  { %v806_v0 = vmul.f32 %v805_v1, %v776_v45  ;;  %v754_v51 = vmul.f32 %v752_v48, %v723_v30  ;;  %v775_v54 = vsel %vm773_vm9, %v770_v42, %v771_v17  ;;  %v722_v36 = vsel %vm720_vm8, %v717_v16, %v718_v14 }
 0x448   :  { %v765_v60 = vadd.f32 %v761_v11, %v753_v40  ;;  %v799_v31 = vmul.f32 %v4659_v41, %v775_v54  ;;  %v747_v53 = vmul.f32 %v4665_v63, %v722_v36  ;;  %v774_v37 = vsel %vm773_vm9, %v771_v17, %v772_v23 }
 0x449   :  { %v766_v59 = vadd.f32 %v762_v52, %v754_v51  ;;  %v721_v43 = vsel %vm720_vm8, %v718_v14, %v719_v49  ;;  %v808_v16 = vmul.f32 %v805_v1, %v774_v37  ;;  %v809_v11 = vmul.f32 %v805_v1, %v801_v33 }
 0x44a   :  { %v810_v47 = vadd.f32 %v806_v0, %v765_v60  ;;  %v807_v58 = vmul.f32 %v805_v1, %v799_v31  ;;  %v755_v61 = vmul.f32 %v752_v48, %v747_v53  ;;  %v756_v42 = vmul.f32 %v752_v48, %v721_v43 }
 0x44c   :  { %v820_v40 = vadd.f32 %v3727_v32, %v810_v47  ;;  %v811_v45 = vadd.f32 %v807_v58, %v766_v59  ;;  %v767_v30 = vadd.f32 %v763_v6, %v755_v61  ;;  %v768_v23 = vadd.f32 %v764_v35, %v756_v42 }
 0x44e   :  { %v824_v17 = vsel %vm425_vm6, %v820_v40, 0.0  ;;  %v821_v54 = vadd.f32 %v3727_v32, %v811_v45  ;;  %v812_v36 = vadd.f32 %v808_v16, %v767_v30  ;;  %v813_v52 = vadd.f32 %v809_v11, %v768_v23  ;;  %v151_v45 = vld [vmem:[%s5949_s11 + $0x28] sm:$0xff]  ;;  %v152_v30 = vld [vmem:[%s5949_s11 + $0x30] sm:$0xff] }
 0x44f   :  { %825 = vadd.xlane.f32.xlu1 %v824_v17  ;;  %v153_v17 = vld [vmem:[%s5949_s11 + $0x38] sm:$0xff] }
 0x450   :  { %v827_v2 = vsel %vm425_vm6, %v821_v54, 0.0  ;;  %v822_v49 = vadd.f32 %v3727_v32, %v812_v36  ;;  %v823_v44 = vadd.f32 %v3727_v32, %v813_v52 }
 0x451   :  { %828 = vadd.xlane.f32.xlu0 %v827_v2 }
 0x452   :  { %v830_v50 = vsel %vm425_vm6, %v822_v49, 0.0  ;;  %v833_v48 = vsel %vm425_vm6, %v823_v44, 0.0 }
 0x453   :  { %831 = vadd.xlane.f32.xlu1 %v830_v50 }
 0x455   :  { %834 = vadd.xlane.f32.xlu0 %v833_v48 }
 0x4dc   :  { %v826_v1 = vpop.xlane.xlu1 %825 }
 0x4dd   :  { %v836_v14 = vmul.f32 0.03125, %v826_v1 }
 0x4de   :  { %v829_v33 = vpop.xlane.xlu0 %828 }
 0x4df   :  { %v840_v0 = vsub.f32 %v820_v40, %v836_v14  ;;  %v837_v51 = vmul.f32 0.03125, %v829_v33  ;;  %v150_v40 = vld [vmem:[%s5949_s11 + $0x20] sm:$0xff] }
 0x4e0   :  { %v832_v60 = vpop.xlane.xlu1 %831  ;;  %v934_v23 = vpack.c.bf16 %v151_v45, %v150_v40 }
 0x4e1   :  { %v841_v31 = vsub.f32 %v821_v54, %v837_v51  ;;  %v838_v53 = vmul.f32 0.03125, %v832_v60  ;;  %v844_v37 = vmul.f32 %v840_v0, %v840_v0  ;;  %v935_v54 = vpack.c.bf16 %v153_v17, %v152_v30 }
 0x4e2   :  { %v835_v59 = vpop.xlane.xlu0 %834  ;;  %3855 = vmatprep.subr.bf16.mxu1 %v934_v23 }
 0x4e3   :  { %v842_v6 = vsub.f32 %v822_v49, %v838_v53  ;;  %v839_v43 = vmul.f32 0.03125, %v835_v59  ;;  %v848_v32 = vsel %vm425_vm6, %v844_v37, 0.0  ;;  %v845_v35 = vmul.f32 %v841_v31, %v841_v31  ;;  %3856 = vmatpush3.bf16.msra.mxu1 %v934_v23  ;;  %v3728_v37 = vld [vmem:[%s5950_s9 + $0x1] ss:$0 sm:$0xff] }
 0x4e4   :  { %849 = vadd.xlane.f32.xlu1 %v848_v32  ;;  %3857 = vmatprep.subr.bf16.mxu1 %v935_v54  ;;  %v3729_v32 = vld [vmem:[%s5951_s10 + $0x1] ss:$0 sm:$0xff] }
 0x4e5   :  { %v843_v47 = vsub.f32 %v823_v44, %v839_v43  ;;  %v851_v58 = vsel %vm425_vm6, %v845_v35, 0.0  ;;  %v846_v61 = vmul.f32 %v842_v6, %v842_v6 }
 0x4e6   :  { %852 = vadd.xlane.f32.xlu0 %v851_v58 }
 0x4e7   :  { %v854_v42 = vsel %vm425_vm6, %v846_v61, 0.0  ;;  %v847_v16 = vmul.f32 %v843_v47, %v843_v47  ;;  %3858 = vmatpush3.bf16.msra.mxu1 %v935_v54 }
 0x4e8   :  { %855 = vadd.xlane.f32.xlu1 %v854_v42 }
 0x4e9   :  { %v857_v11 = vsel %vm425_vm6, %v847_v16, 0.0 }
 0x4ea   :  { %858 = vadd.xlane.f32.xlu0 %v857_v11 }
 0x571   :  { %v850_v36 = vpop.xlane.xlu1 %849 }
 0x572   :  { %v860_v52 = vmul.f32 0.03125, %v850_v36 }
 0x573   :  { %v853_v2 = vpop.xlane.xlu0 %852 }
 0x574   :  { %v864_v49 = vadd.f32 1e-05, %v860_v52  ;;  %v861_v44 = vmul.f32 0.03125, %v853_v2 }
 0x575   :  { %v856_v50 = vpop.xlane.xlu1 %855 }
 0x576   :  { %4007 = vrsqrt.f32 %v864_v49  ;;  %v865_v48 = vadd.f32 1e-05, %v861_v44  ;;  %v862_v1 = vmul.f32 0.03125, %v856_v50 }
 0x577   :  { %v859_v14 = vpop.xlane.xlu0 %858 }
 0x578   :  { %4009 = vrsqrt.f32 %v865_v48  ;;  %v866_v33 = vadd.f32 1e-05, %v862_v1  ;;  %v863_v51 = vmul.f32 0.03125, %v859_v14 }
 0x57a   :  { %4011 = vrsqrt.f32 %v866_v33  ;;  %v867_v60 = vadd.f32 1e-05, %v863_v51 }
 0x57c   :  { %4013 = vrsqrt.f32 %v867_v60 }
 0x580   :  { %v4008_v53 = vpop.eup %4007 }
 0x581   :  { %v872_v59 = vmul.f32 %v4008_v53, %v840_v0 }
 0x582   :  { %v4010_v43 = vpop.eup %4009 }
 0x583   :  { %v882_v35 = vmul.f32 %v3728_v37, %v872_v59  ;;  %v873_v58 = vmul.f32 %v4010_v43, %v841_v31 }
 0x584   :  { %v4012_v61 = vpop.eup %4011 }
 0x585   :  { %v892_v42 = vadd.f32 %v3729_v32, %v882_v35  ;;  %v883_v16 = vmul.f32 %v3728_v37, %v873_v58  ;;  %v874_v11 = vmul.f32 %v4012_v61, %v842_v6 }
 0x586   :  { %v4014_v40 = vpop.eup %4013 }
 0x587   :  { %v893_v45 = vadd.f32 %v3729_v32, %v883_v16  ;;  %v884_v30 = vmul.f32 %v3728_v37, %v874_v11  ;;  %v875_v23 = vmul.f32 %v4014_v40, %v843_v47  ;;  %v900_v17 = vmul.f32 0.044715, %v892_v42 }
 0x588   :  { %v896_v16 = vmul.f32 0.5, %v892_v42 }
 0x589   :  { %v894_v54 = vadd.f32 %v3729_v32, %v884_v30  ;;  %v885_v36 = vmul.f32 %v3728_v37, %v875_v23  ;;  %v901_v52 = vmul.f32 0.044715, %v893_v45  ;;  %v904_v0 = vmul.f32 %v900_v17, %v892_v42 }
 0x58a   :  { %v897_v11 = vmul.f32 0.5, %v893_v45 }
 0x58b   :  { %v895_v2 = vadd.f32 %v3729_v32, %v885_v36  ;;  %v905_v49 = vmul.f32 %v901_v52, %v893_v45  ;;  %v902_v44 = vmul.f32 0.044715, %v894_v54  ;;  %v908_v50 = vmul.f32 %v904_v0, %v892_v42 }
 0x58d   :  { %v909_v48 = vmul.f32 %v905_v49, %v893_v45  ;;  %v903_v1 = vmul.f32 0.044715, %v895_v2  ;;  %v906_v31 = vmul.f32 %v902_v44, %v894_v54  ;;  %v912_v14 = vadd.f32 %v908_v50, %v892_v42  ;;  %v3730_v42 = vld [vmem:[%s5952_s12 + $0x1] ss:$0 sm:$0xff] }
 0x58e   :  { %v898_v49 = vmul.f32 0.5, %v894_v54  ;;  %v899_v44 = vmul.f32 0.5, %v895_v2 }
 0x58f   :  { %v913_v33 = vadd.f32 %v909_v48, %v893_v45  ;;  %v907_v51 = vmul.f32 %v903_v1, %v895_v2  ;;  %v910_v6 = vmul.f32 %v906_v31, %v894_v54  ;;  %v916_v60 = vmul.f32 0.7978846, %v912_v14 }
 0x591   :  { %v917_v53 = vmul.f32 0.7978846, %v913_v33  ;;  %v911_v59 = vmul.f32 %v907_v51, %v895_v2  ;;  %v914_v47 = vadd.f32 %v910_v6, %v894_v54  ;;  %4015 = vtanh.f32 %v916_v60 }
 0x593   :  { %4017 = vtanh.f32 %v917_v53  ;;  %v915_v37 = vadd.f32 %v911_v59, %v895_v2  ;;  %v918_v43 = vmul.f32 0.7978846, %v914_v47 }
 0x595   :  { %v919_v35 = vmul.f32 0.7978846, %v915_v37  ;;  %4019 = vtanh.f32 %v918_v43 }
 0x597   :  { %4021 = vtanh.f32 %v919_v35 }
 0x59b   :  { %v4016_v32 = vpop.eup %4015 }
 0x59c   :  { %v924_v61 = vadd.f32 1.0, %v4016_v32 }
 0x59d   :  { %v4018_v58 = vpop.eup %4017 }
 0x59e   :  { %v925_v40 = vadd.f32 1.0, %v4018_v58  ;;  %v928_v23 = vmul.f32 %v924_v61, %v896_v16 }
 0x59f   :  { %v4020_v30 = vpop.eup %4019 }
 0x5a0   :  { %v929_v17 = vmul.f32 %v925_v40, %v897_v11  ;;  %v926_v36 = vadd.f32 1.0, %v4020_v30 }
 0x5a1   :  { %v4022_v52 = vpop.eup %4021 }
 0x5a2   :  { %v932_v0 = vpack.c.bf16 %v929_v17, %v928_v23  ;;  %v927_v50 = vadd.f32 1.0, %v4022_v52  ;;  %v930_v48 = vmul.f32 %v926_v36, %v898_v49 }
 0x5a4   :  { %3859 = vmatprep.mubr.msk.bf16.mxu1 %vm425_vm6, %v932_v0  ;;  %v931_v1 = vmul.f32 %v927_v50, %v899_v44 }
 0x5a6   :  { %v933_v31 = vpack.c.bf16 %v931_v1, %v930_v48 }
 0x5a8   :  { %3860 = vmatmul.mubr.msk.bf16.vlgmr.msra.gmra.mrb[4].mxu1 %vm425_vm6, %v933_v31 }
 0x67b   :  { %v3861_v45 = vpop.f32.mrb[4].mxu1 }
 0x67c   :  { %v982_v14 = vpop.f32.mrb[5].mxu1  ;;  %v991_v60 = vadd.f32 %v3861_v45, %v3730_v42  ;;  %v175_v45 = vld [vmem:[%s5955_s15 + $0x8] sm:$0xff] }
 0x67d   :  { %v983_v33 = vadd.f32 %v3730_v42, %v982_v14  ;;  %v3862_v51 = vpop.f32.mrb[6].mxu1  ;;  %v176_v14 = vld [vmem:[%s5955_s15 + $0x10] sm:$0xff] }
 0x67e   :  { %v985_v6 = vpop.f32.mrb[7].mxu1  ;;  %v994_v53 = vadd.f32 %v3862_v51, %v3730_v42  ;;  %v1003_v47 = vsel %vm425_vm6, %v991_v60, 0.0  ;;  %v177_v51 = vld [vmem:[%s5955_s15 + $0x18] sm:$0xff] }
 0x67f   :  { %v986_v54 = vadd.f32 %v3730_v42, %v985_v6  ;;  %v997_v2 = vsel %vm425_vm6, %v983_v33, 0.0  ;;  %v174_v42 = vld [vmem:[%s5955_s15] sm:$0xff]  ;;  %v1116_v6 = vpack.c.bf16 %v177_v51, %v176_v14 }
 0x680   :  { %998 = vadd.xlane.f32.xlu1 %v997_v2  ;;  %v1006_v37 = vsel %vm425_vm6, %v994_v53, 0.0 }
 0x681   :  { %v1000_v59 = vsel %vm425_vm6, %v986_v54, 0.0 }
 0x682   :  { %1001 = vadd.xlane.f32.xlu0 %v1000_v59 }
 0x684   :  { %1004 = vadd.xlane.f32.xlu1 %v1003_v47 }
 0x686   :  { %1007 = vadd.xlane.f32.xlu0 %v1006_v37 }
 0x70d   :  { %v999_v43 = vpop.xlane.xlu1 %998 }
 0x70e   :  { %v1009_v35 = vmul.f32 0.03125, %v999_v43 }
 0x70f   :  { %v1002_v32 = vpop.xlane.xlu0 %1001 }
 0x710   :  { %v1013_v58 = vsub.f32 %v983_v33, %v1009_v35  ;;  %v1010_v61 = vmul.f32 0.03125, %v1002_v32  ;;  %v1115_v33 = vpack.c.bf16 %v175_v45, %v174_v42 }
 0x711   :  { %v1005_v16 = vpop.xlane.xlu1 %1004 }
 0x712   :  { %v1014_v11 = vsub.f32 %v986_v54, %v1010_v61  ;;  %v1011_v40 = vmul.f32 0.03125, %v1005_v16  ;;  %v1017_v30 = vmul.f32 %v1013_v58, %v1013_v58  ;;  %3863 = vmatprep.subr.bf16.mxu0 %v1115_v33 }
 0x713   :  { %v1008_v23 = vpop.xlane.xlu0 %1007  ;;  %3864 = vmatpush3.bf16.msra.mxu0 %v1115_v33 }
 0x714   :  { %v1015_v17 = vsub.f32 %v991_v60, %v1011_v40  ;;  %v1012_v36 = vmul.f32 0.03125, %v1008_v23  ;;  %v1021_v52 = vsel %vm425_vm6, %v1017_v30, 0.0  ;;  %v1018_v0 = vmul.f32 %v1014_v11, %v1014_v11  ;;  %3865 = vmatprep.subr.bf16.mxu0 %v1116_v6  ;;  %v3733_v30 = vld [vmem:[%s5953_s13 + $0x1] ss:$0 sm:$0xff] }
 0x715   :  { %1022 = vadd.xlane.f32.xlu1 %v1021_v52  ;;  %v3734_v52 = vld [vmem:[%s5954_s14 + $0x1] ss:$0 sm:$0xff] }
 0x716   :  { %v1016_v49 = vsub.f32 %v994_v53, %v1012_v36  ;;  %v1024_v44 = vsel %vm425_vm6, %v1018_v0, 0.0  ;;  %v1019_v50 = vmul.f32 %v1015_v17, %v1015_v17 }
 0x717   :  { %1025 = vadd.xlane.f32.xlu0 %v1024_v44  ;;  %3866 = vmatpush3.bf16.msra.mxu0 %v1116_v6 }
 0x718   :  { %v1027_v48 = vsel %vm425_vm6, %v1019_v50, 0.0  ;;  %v1020_v1 = vmul.f32 %v1016_v49, %v1016_v49 }
 0x719   :  { %1028 = vadd.xlane.f32.xlu1 %v1027_v48 }
 0x71a   :  { %v1030_v31 = vsel %vm425_vm6, %v1020_v1, 0.0 }
 0x71b   :  { %1031 = vadd.xlane.f32.xlu0 %v1030_v31 }
 0x7a2   :  { %v1023_v60 = vpop.xlane.xlu1 %1022 }
 0x7a3   :  { %v1033_v54 = vmul.f32 0.03125, %v1023_v60 }
 0x7a4   :  { %v1026_v2 = vpop.xlane.xlu0 %1025 }
 0x7a5   :  { %v1037_v53 = vadd.f32 1e-05, %v1033_v54  ;;  %v1034_v59 = vmul.f32 0.03125, %v1026_v2 }
 0x7a6   :  { %v1029_v47 = vpop.xlane.xlu1 %1028 }
 0x7a7   :  { %4023 = vrsqrt.f32 %v1037_v53  ;;  %v1038_v37 = vadd.f32 1e-05, %v1034_v59  ;;  %v1035_v43 = vmul.f32 0.03125, %v1029_v47 }
 0x7a8   :  { %v1032_v35 = vpop.xlane.xlu0 %1031 }
 0x7a9   :  { %4025 = vrsqrt.f32 %v1038_v37  ;;  %v1039_v32 = vadd.f32 1e-05, %v1035_v43  ;;  %v1036_v61 = vmul.f32 0.03125, %v1032_v35 }
 0x7ab   :  { %4027 = vrsqrt.f32 %v1039_v32  ;;  %v1040_v16 = vadd.f32 1e-05, %v1036_v61 }
 0x7ad   :  { %4029 = vrsqrt.f32 %v1040_v16 }
 0x7b1   :  { %v4024_v40 = vpop.eup %4023 }
 0x7b2   :  { %v1045_v23 = vmul.f32 %v4024_v40, %v1013_v58 }
 0x7b3   :  { %v4026_v36 = vpop.eup %4025 }
 0x7b4   :  { %v1055_v0 = vmul.f32 %v3733_v30, %v1045_v23  ;;  %v1046_v44 = vmul.f32 %v4026_v36, %v1014_v11 }
 0x7b5   :  { %v4028_v50 = vpop.eup %4027 }
 0x7b6   :  { %v1065_v48 = vadd.f32 %v3734_v52, %v1055_v0  ;;  %v1056_v1 = vmul.f32 %v3733_v30, %v1046_v44  ;;  %v1047_v31 = vmul.f32 %v4028_v50, %v1015_v17 }
 0x7b7   :  { %v4030_v42 = vpop.eup %4029 }
 0x7b8   :  { %v1066_v45 = vadd.f32 %v3734_v52, %v1056_v1  ;;  %v1057_v14 = vmul.f32 %v3733_v30, %v1047_v31  ;;  %v1048_v33 = vmul.f32 %v4030_v42, %v1016_v49  ;;  %v1073_v51 = vmul.f32 0.044715, %v1065_v48 }
 0x7b9   :  { %v1069_v50 = vmul.f32 0.5, %v1065_v48 }
 0x7ba   :  { %v1067_v6 = vadd.f32 %v3734_v52, %v1057_v14  ;;  %v1058_v60 = vmul.f32 %v3733_v30, %v1048_v33  ;;  %v1074_v54 = vmul.f32 0.044715, %v1066_v45  ;;  %v1077_v58 = vmul.f32 %v1073_v51, %v1065_v48 }
 0x7bb   :  { %v1070_v31 = vmul.f32 0.5, %v1066_v45 }
 0x7bc   :  { %v1068_v2 = vadd.f32 %v3734_v52, %v1058_v60  ;;  %v1078_v53 = vmul.f32 %v1074_v54, %v1066_v45  ;;  %v1075_v59 = vmul.f32 0.044715, %v1067_v6  ;;  %v1081_v47 = vmul.f32 %v1077_v58, %v1065_v48 }
 0x7bd   :  { %v1071_v60 = vmul.f32 0.5, %v1067_v6 }
 0x7be   :  { %v1082_v37 = vmul.f32 %v1078_v53, %v1066_v45  ;;  %v1076_v43 = vmul.f32 0.044715, %v1068_v2  ;;  %v1079_v11 = vmul.f32 %v1075_v59, %v1067_v6  ;;  %v1085_v35 = vadd.f32 %v1081_v47, %v1065_v48 }
 0x7bf   :  { %v1072_v47 = vmul.f32 0.5, %v1068_v2 }
 0x7c0   :  { %v1086_v32 = vadd.f32 %v1082_v37, %v1066_v45  ;;  %v1080_v61 = vmul.f32 %v1076_v43, %v1068_v2  ;;  %v1083_v17 = vmul.f32 %v1079_v11, %v1067_v6  ;;  %v1089_v16 = vmul.f32 0.7978846, %v1085_v35 }
 0x7c2   :  { %v1090_v40 = vmul.f32 0.7978846, %v1086_v32  ;;  %v1084_v23 = vmul.f32 %v1080_v61, %v1068_v2  ;;  %v1087_v49 = vadd.f32 %v1083_v17, %v1067_v6  ;;  %4031 = vtanh.f32 %v1089_v16 }
 0x7c4   :  { %4033 = vtanh.f32 %v1090_v40  ;;  %v1088_v30 = vadd.f32 %v1084_v23, %v1068_v2  ;;  %v1091_v36 = vmul.f32 0.7978846, %v1087_v49  ;;  %v3735_v2 = vld [vmem:[%s5956_s16] ss:$0 sm:$0xff] }
 0x7c6   :  { %v1092_v0 = vmul.f32 0.7978846, %v1088_v30  ;;  %4035 = vtanh.f32 %v1091_v36 }
 0x7c8   :  { %4037 = vtanh.f32 %v1092_v0 }
 0x7cc   :  { %v4032_v52 = vpop.eup %4031 }
 0x7cd   :  { %v1097_v1 = vadd.f32 1.0, %v4032_v52 }
 0x7ce   :  { %v4034_v44 = vpop.eup %4033 }
 0x7cf   :  { %v1098_v42 = vadd.f32 1.0, %v4034_v44  ;;  %v1101_v33 = vmul.f32 %v1097_v1, %v1069_v50 }
 0x7d0   :  { %v4036_v14 = vpop.eup %4035 }
 0x7d1   :  { %v1102_v51 = vmul.f32 %v1098_v42, %v1070_v31  ;;  %v1099_v54 = vadd.f32 1.0, %v4036_v14  ;;  %v1105_v53 = vadd.f32 %v1101_v33, %v4620_v15 }
 0x7d2   :  { %v4038_v58 = vpop.eup %4037 }
 0x7d3   :  { %v1106_v59 = vadd.f32 %v1102_v51, %v4638_v29  ;;  %v1100_v37 = vadd.f32 1.0, %v4038_v58  ;;  %v1103_v43 = vmul.f32 %v1099_v54, %v1071_v60  ;;  %v1109_v11 = vmul.f32 %v1105_v53, %v4485_v57 }
 0x7d5   :  { %v1110_v48 = vmul.f32 %v1106_v59, %v4515_v8  ;;  %v1104_v35 = vmul.f32 %v1100_v37, %v1072_v47  ;;  %v1107_v45 = vadd.f32 %v1103_v43, %v4643_v55 }
 0x7d7   :  { %v1113_v32 = vpack.c.bf16 %v1110_v48, %v1109_v11  ;;  %v1108_v61 = vadd.f32 %v1104_v35, %v4623_v13  ;;  %v1111_v6 = vmul.f32 %v1107_v45, %v4513_v7 }
 0x7d9   :  { %3867 = vmatprep.mubr.msk.bf16.mxu0 %vm425_vm6, %v1113_v32  ;;  %v1112_v15 = vmul.f32 %v1108_v61, %v4483_v56 }
 0x7db   :  { %v1114_v29 = vpack.c.bf16 %v1112_v15, %v1111_v6 }
 0x7dd   :  { %3868 = vmatmul.mubr.msk.bf16.vlgmr.msra.gmra.mrb[0].mxu0 %vm425_vm6, %v1114_v29 }
 0x8b0   :  { %v3869_v17 = vpop.f32.mrb[0].mxu0 }
 0x8b1   :  { %v1172_v16 = vadd.f32 %v3869_v17, %v3735_v2  ;;  %v1163_v40 = vpop.f32.mrb[1].mxu0 }
 0x8b2   :  { %v1164_v55 = vadd.f32 %v3735_v2, %v1163_v40  ;;  %v3870_v23 = vpop.f32.mrb[2].mxu0 }
 0x8b3   :  { %v1175_v49 = vadd.f32 %v3870_v23, %v3735_v2  ;;  %v1166_v13 = vpop.f32.mrb[3].mxu0  ;;  %v4756_v30 = vmul.f32 %v1172_v16, %v4513_v7 }
 0x8b4   :  { %v4759_v36 = vmul.f32 %v1164_v55, %v4485_v57  ;;  %v1167_v0 = vadd.f32 %v3735_v2, %v1166_v13 }
 0x8b5   :  { %v4763_v44 = vmul.f32 %v1175_v49, %v4483_v56  ;;  %v1184_v1 = vmul.f32 0.17677669, %v4756_v30 }
 0x8b6   :  { %v1182_v52 = vmul.f32 0.17677669, %v4759_v36  ;;  %v4766_v50 = vmul.f32 %v1167_v0, %v4515_v8 }
 0x8b7   :  { %v1185_v14 = vmul.f32 0.17677669, %v4763_v44  ;;  %v1229_v51 = vsel %vm1222_vm13, %v1184_v1, -inf }
 0x8b8   :  { %v1183_v31 = vmul.f32 0.17677669, %v4766_v50  ;;  %v1223_v42 = vsel %vm1222_vm13, %v1182_v52, -inf }
 0x8b9   :  { %1224 = vmax.xlane.f32.xlu1 %v1223_v42  ;;  %v1232_v60 = vsel %vm1222_vm13, %v1185_v14, -inf  ;;  %v4791_v42 = vand.u32 127, %v71_v3 }
 0x8ba   :  { %v1226_v33 = vsel %vm1222_vm13, %v1183_v31, -inf }
 0x8bb   :  { %1227 = vmax.xlane.f32.xlu0 %v1226_v33  ;;  %6015 = vst [vmem:[#allocation14_spill] sm:$0xff] %v4791_v42  ;;  %vm186_vm14 = vcmp.lt.s32.totalorder %v4388_v4, %v4791_v42  ;;  %vm187_vm15 = vcmp.lt.s32.totalorder %v4452_v34, %v4791_v42  ;;  %v6016_v33 = vmov 0  ;;  %vm1477_vm3 = vcmp.eq.s32.totalorder %v4791_v42, 10 }
 0x8bc   :  { %vm4798_vm2 = vmpackc.low %vm1351_vm0, %vm186_vm14  ;;  %vm1476_vm5 = vcmp.eq.s32.totalorder %v4791_v42, 0 }
 0x8bd   :  { %1230 = vmax.xlane.f32.xlu1 %v1229_v51  ;;  %v6017_v33 = vsel %vm4798_vm2, 4294967295, %v6016_v33  ;;  %v4282_v51 = vmov 1.0  }
 0x8be   :  { %6018 = vst [vmem:[#allocation15_spill] sm:$0xff] %v6017_v33 }
 0x8bf   :  { %1233 = vmax.xlane.f32.xlu0 %v1232_v60 }
 0x8ce   :  { %1210 = vrot.lane.b32.xlu1 %v1182_v52, %s4281_s19 }
 0x8d2   :  { %1214 = vrot.lane.b32.xlu1 %v1184_v1, %s4281_s19 }
 0x8d5   :  { %1212 = vrot.lane.b32.xlu0 %v1183_v31, %s4281_s19 }
 0x8d6   :  { %1216 = vrot.lane.b32.xlu1 %v1185_v14, %s4281_s19 }
 0x946   :  { %v1225_v54 = vpop.xlane.xlu1 %1224 }
 0x947   :  { %v1247_v58 = vsub.f32 %v1182_v52, %v1225_v54 }
 0x948   :  { %v1228_v53 = vpop.xlane.xlu0 %1227 }
 0x949   :  { %v1255_v59 = vmul.f32 1.442695, %v1247_v58  ;;  %v1248_v47 = vsub.f32 %v1183_v31, %v1228_v53 }
 0x94a   :  { %v1231_v37 = vpop.xlane.xlu1 %1230 }
 0x94b   :  { %4039 = vpow2.f32 %v1255_v59  ;;  %v1257_v43 = vmul.f32 1.442695, %v1248_v47  ;;  %v1249_v11 = vsub.f32 %v1184_v1, %v1231_v37 }
 0x94c   :  { %v1234_v48 = vpop.xlane.xlu0 %1233 }
 0x94d   :  { %4041 = vpow2.f32 %v1257_v43  ;;  %v1259_v35 = vmul.f32 1.442695, %v1249_v11  ;;  %v1250_v45 = vsub.f32 %v1185_v14, %v1234_v48  ;;  %v3707_v14 = vsel %vm187_vm15, 1.0, %v5967_v9 }
 0x94e   :  { %v1211_v29 = vpop.permute.xlu1 %1210  ;;  %v4802_v60 = vpack.c.bf16 %v3707_v14, %v4282_v51 }
 0x94f   :  { %4043 = vpow2.f32 %v1259_v35  ;;  %v1261_v32 = vmul.f32 1.442695, %v1250_v45  ;;  %v1235_v55 = vsel %vm1222_vm13, %v1211_v29, -inf }
 0x950   :  { %v1213_v13 = vpop.permute.xlu0 %1212  ;;  %6019 = vst [vmem:[#allocation16_spill] sm:$0xff] %v4802_v60  ;;  %3929 = vmatprep.subr.msk.bf16.mxu1 %vm4798_vm2, %v4802_v60 }
 0x951   :  { %4045 = vpow2.f32 %v1261_v32  ;;  %v1238_v52 = vsel %vm1222_vm13, %v1213_v13, -inf  ;;  %3932 = vmatpush3.bf16.msk.msra.mxu1 %vm4798_vm2, %v4802_v60 }
 0x952   :  { %v1215_v23 = vpop.permute.xlu1 %1214 }
 0x953   :  { %v1241_v0 = vsel %vm1222_vm13, %v1215_v23, -inf }
 0x955   :  { %v4040_v61 = vpop.eup %4039 }
 0x956   :  { %v1271_v6 = vsel %vm1222_vm13, %v4040_v61, 0.0  ;;  %v1217_v1 = vpop.permute.xlu1 %1216 }
 0x957   :  { %v4042_v15 = vpop.eup %4041  ;;  %1272 = vadd.xlane.f32.xlu0 %v1271_v6  ;;  %v1244_v31 = vsel %vm1222_vm13, %v1217_v1, -inf }
 0x958   :  { %v1274_v2 = vsel %vm1222_vm13, %v4042_v15, 0.0 }
 0x959   :  { %v4044_v17 = vpop.eup %4043  ;;  %1275 = vadd.xlane.f32.xlu1 %v1274_v2 }
 0x95a   :  { %v1277_v16 = vsel %vm1222_vm13, %v4044_v17, 0.0 }
 0x95b   :  { %v4782_v40 = vpop.eup %4045  ;;  %1278 = vadd.xlane.f32.xlu0 %v1277_v16 }
 0x95c   :  { %v1280_v49 = vsel %vm1222_vm13, %v4782_v40, 0.0 }
 0x95d   :  { %1236 = vmax.xlane.f32.xlu1 %v1235_v55 }
 0x95f   :  { %1281 = vadd.xlane.f32.xlu0 %v1280_v49 }
 0x961   :  { %1242 = vmax.xlane.f32.xlu1 %v1241_v0 }
 0x963   :  { %1239 = vmax.xlane.f32.xlu0 %v1238_v52 }
 0x967   :  { %1245 = vmax.xlane.f32.xlu0 %v1244_v31 }
 0x9e4   :  { %v1273_v3 = vpop.xlane.xlu0 %1272 }
 0x9e5   :  { %4047 = vrcp.f32 %v1273_v3 }
 0x9e6   :  { %v1276_v34 = vpop.xlane.xlu1 %1275 }
 0x9e7   :  { %4049 = vrcp.f32 %v1276_v34 }
 0x9e8   :  { %v1279_v54 = vpop.xlane.xlu0 %1278 }
 0x9e9   :  { %4051 = vrcp.f32 %v1279_v54 }
 0x9ea   :  { %v1237_v58 = vpop.xlane.xlu1 %1236 }
 0x9eb   :  { %v1251_v53 = vsub.f32 %v1211_v29, %v1237_v58 }
 0x9ec   :  { %v1282_v59 = vpop.xlane.xlu0 %1281 }
 0x9ed   :  { %v1263_v47 = vmul.f32 1.442695, %v1251_v53  ;;  %4053 = vrcp.f32 %v1282_v59 }
 0x9ee   :  { %v1243_v37 = vpop.xlane.xlu1 %1242 }
 0x9ef   :  { %v4048_v43 = vpop.eup %4047  ;;  %4055 = vpow2.f32 %v1263_v47  ;;  %v1253_v11 = vsub.f32 %v1215_v23, %v1243_v37 }
 0x9f0   :  { %v1240_v48 = vpop.xlane.xlu0 %1239  ;;  %v1303_v35 = vmul.f32 %v4048_v43, %v4040_v61  ;;  %v4263_v43 = vld [vmem:[%s5943_s1] sm:$0xff] }
 0x9f1   :  { %v4050_v45 = vpop.eup %4049  ;;  %v1267_v32 = vmul.f32 1.442695, %v1253_v11  ;;  %v1252_v6 = vsub.f32 %v1213_v13, %v1240_v48  ;;  %v4264_v11 = vld [vmem:[%s5943_s1 + $0x8] sm:$0xff]  ;;  %v4284_v48 = vmov 1  }
 0x9f2   :  { %v1304_v2 = vmul.f32 %v4050_v45, %v4042_v15  ;;  %v1311_v16 = vmul.f32 0.99, %v1303_v35  ;;  %3949 = vset.pattern.permute.xlu0 %v4284_v48  ;;  %3950 = vset.pattern.permute.xlu1 %v4284_v48  ;;  %v4265_v35 = vld [vmem:[%s5943_s1 + $0x10] sm:$0xff]  ;;  %v4266_v45 = vld [vmem:[%s5943_s1 + $0x18] sm:$0xff] }
 0x9f3   :  { %v4052_v55 = vpop.eup %4051  ;;  %4057 = vpow2.f32 %v1267_v32  ;;  %v1265_v49 = vmul.f32 1.442695, %v1252_v6 }
 0x9f4   :  { %v1246_v0 = vpop.xlane.xlu0 %1245  ;;  %v1319_v52 = vadd.f32 0.001, %v1311_v16  ;;  %v1312_v29 = vmul.f32 0.99, %v1304_v2  ;;  %v1305_v31 = vmul.f32 %v4052_v55, %v4044_v17 }
 0x9f5   :  { %4059 = vpow2.f32 %v1265_v49  ;;  %v1254_v14 = vsub.f32 %v1217_v1, %v1246_v0 }
 0x9f6   :  { %3875 = vmatprep.mubr.msk.f32.mxu1 %vm1222_vm13, %v1319_v52  ;;  %v1320_v51 = vadd.f32 0.001, %v1312_v29  ;;  %v1313_v23 = vmul.f32 0.99, %v1305_v31 }
 0x9f7   :  { %v4054_v3 = vpop.eup %4053  ;;  %v1269_v61 = vmul.f32 1.442695, %v1254_v14 }
 0x9f8   :  { %3876 = vmatmul.mubr.msk.f32.vlgmr.msra.gmra.mrb[8].mxu1 %vm1222_vm13, %v1320_v51  ;;  %v1321_v13 = vadd.f32 0.001, %v1313_v23  ;;  %v1306_v15 = vmul.f32 %v4054_v3, %v4782_v40 }
 0x9f9   :  { %v4056_v34 = vpop.eup %4055  ;;  %4061 = vpow2.f32 %v1269_v61 }
 0x9fa   :  { %3878 = vmatprep.mubr.msk.f32.mxu1 %vm1222_vm13, %v1321_v13  ;;  %v1283_v54 = vsel %vm1222_vm13, %v4056_v34, 0.0  ;;  %v1314_v17 = vmul.f32 0.99, %v1306_v15 }
 0x9fb   :  { %1284 = vadd.xlane.f32.xlu1 %v1283_v54 }
 0x9fc   :  { %v1322_v1 = vadd.f32 0.001, %v1314_v17 }
 0x9fd   :  { %v4058_v58 = vpop.eup %4057 }
 0x9fe   :  { %3879 = vmatmul.mubr.msk.f32.gmra.mrb[10].mxu1 %vm1222_vm13, %v1322_v1  ;;  %v1289_v53 = vsel %vm1222_vm13, %v4058_v58, 0.0 }
 0x9ff   :  { %v4060_v59 = vpop.eup %4059  ;;  %1290 = vadd.xlane.f32.xlu1 %v1289_v53 }
 0xa00   :  { %v1286_v47 = vsel %vm1222_vm13, %v4060_v59, 0.0 }
 0xa01   :  { %1287 = vadd.xlane.f32.xlu0 %v1286_v47 }
 0xa03   :  { %v4062_v40 = vpop.eup %4061 }
 0xa04   :  { %v1292_v37 = vsel %vm1222_vm13, %v4062_v40, 0.0 }
 0xa05   :  { %1293 = vadd.xlane.f32.xlu0 %v1292_v37 }
 0xa10   :  { %222 = vrot.lane.b32.xlu1 %v4263_v43, %s4283_s21 }
 0xa14   :  { %224 = vrot.lane.b32.xlu1 %v4264_v11, %s4283_s21 }
 0xa18   :  { %226 = vrot.lane.b32.xlu1 %v4265_v35, %s4283_s21 }
 0xa1b   :  { %228 = vrot.lane.b32.xlu0 %v4266_v45, %s4283_s21 }
 0xa88   :  { %v1285_v32 = vpop.xlane.xlu1 %1284 }
 0xa89   :  { %4063 = vrcp.f32 %v1285_v32 }
 0xa8c   :  { %v1291_v6 = vpop.xlane.xlu1 %1290 }
 0xa8d   :  { %4065 = vrcp.f32 %v1291_v6 }
 0xa8e   :  { %v1288_v2 = vpop.xlane.xlu0 %1287 }
 0xa8f   :  { %4067 = vrcp.f32 %v1288_v2 }
 0xa90   :  { %v4835_v16 = vpop.permute.xlu1 %222 }
 0xa91   :  { %v4839_v55 = vmul.f32 %v4835_v16, %v4417_v20 }
 0xa92   :  { %v1294_v49 = vpop.xlane.xlu0 %1293 }
 0xa93   :  { %v4064_v0 = vpop.eup %4063  ;;  %4069 = vrcp.f32 %v1294_v49  ;;  %v5965_v52 = vclamps-f32 %v4839_v55, 5.0 }
 0xa94   :  { %v4842_v29 = vpop.permute.xlu1 %224  ;;  %v1307_v31 = vmul.f32 %v4064_v0, %v4056_v34 }
 0xa95   :  { %1602 = vperm.xlu0 %3949, %v5965_v52   ;;  %v4850_v3 = vmul.f32 %v4842_v29, %v4415_v19 }
 0xa96   :  { %v4846_v14 = vpop.permute.xlu0 %228  ;;  %v1315_v51 = vmul.f32 0.99, %v1307_v31 }
 0xa97   :  { %v4066_v23 = vpop.eup %4065  ;;  %v4854_v20 = vmul.f32 %v4846_v14, %v4421_v22  ;;  %v5966_v22 = vclamps-f32 %v4850_v3, 5.0 }
 0xa98   :  { %v4856_v61 = vpop.permute.xlu1 %226  ;;  %v1323_v13 = vadd.f32 0.001, %v1315_v51  ;;  %v1309_v15 = vmul.f32 %v4066_v23, %v4058_v58 }
 0xa99   :  { %v4068_v34 = vpop.eup %4067  ;;  %v4860_v54 = vmul.f32 %v4856_v61, %v4419_v21  ;;  %v5963_v17 = vclamps-f32 %v4854_v20, 5.0 }
 0xa9a   :  { %3881 = vmatprep.mubr.msk.f32.mxu1 %vm1222_vm13, %v1323_v13  ;;  %v1308_v1 = vmul.f32 %v4068_v34, %v4060_v59  ;;  %v1317_v53 = vmul.f32 0.99, %v1309_v15  ;;  %v4886_v13 = vsel %vm1477_vm3, 1e-06, %v5967_v9 }
 0xa9b   :  { %1617 = vperm.xlu1 %3950, %v5963_v17   ;;  %v5964_v19 = vclamps-f32 %v4860_v54, 5.0  ;;  %6020 = vst [vmem:[#allocation17_spill] sm:$0xff] %v4886_v13 }
 0xa9c   :  { %v1316_v47 = vmul.f32 0.99, %v1308_v1  ;;  %v1325_v43 = vadd.f32 0.001, %v1317_v53 }
 0xa9d   :  { %v4070_v58 = vpop.eup %4069  ;;  %1612 = vperm.xlu0 %3949, %v5964_v19  }
 0xa9e   :  { %v1324_v21 = vadd.f32 0.001, %v1316_v47  ;;  %v1310_v37 = vmul.f32 %v4070_v58, %v4062_v40 }
 0xa9f   :  { %1607 = vperm.xlu1 %3950, %v5966_v22  }
 0xaa0   :  { %3882 = vmatmul.mubr.msk.f32.gmra.mrb[12].mxu1 %vm1222_vm13, %v1324_v21  ;;  %v1318_v59 = vmul.f32 0.99, %v1310_v37  ;;  %v6021_v37 = vmov 0  }
 0xaa1   :  { %3884 = vmatprep.mubr.msk.f32.mxu1 %vm1222_vm13, %v1325_v43 }
 0xaa2   :  { %v1326_v11 = vadd.f32 0.001, %v1318_v59 }
 0xaa4   :  { %3885 = vmatmul.mubr.msk.f32.gmra.mrb[14].mxu1 %vm1222_vm13, %v1326_v11 }
 0xacb   :  { %v3877_v48 = vpop.f32.mrb[8].mxu1 }
 0xacc   :  { %v1421_v35 = vpop.f32.mrb[9].mxu1  ;;  %v1461_v31 = vmul.f32 10.0, %v3877_v48 }
 0xacd   :  { %v1460_v6 = vmul.f32 10.0, %v1421_v35 }
 0xace   :  { %v1469_v34 = vadd.f32 -5.0, %v1461_v31 }
 0xacf   :  { %v1468_v2 = vadd.f32 -5.0, %v1460_v6 }
 0xad0   :  { %v1479_v59 = vsel %vm1477_vm3, 5.0, %v1469_v34 }
 0xad1   :  { %v3880_v45 = vpop.f32.mrb[10].mxu1  ;;  %v1478_v49 = vsel %vm1477_vm3, 5.0, %v1468_v2 }
 0xad2   :  { %v1431_v32 = vpop.f32.mrb[11].mxu1  ;;  %v1463_v40 = vmul.f32 10.0, %v3880_v45  ;;  %v4881_v23 = vsel %vm1476_vm5, -5.0, %v1478_v49 }
 0xad3   :  { %v1462_v0 = vmul.f32 10.0, %v1431_v32  ;;  %v1596_v53 = vadd.f32 %v4886_v13, %v4881_v23  ;;  %v4910_v32 = vsel %vm1476_vm5, -5.0, %v1479_v59 }
 0xad4   :  { %v1471_v51 = vadd.f32 -5.0, %v1463_v40  ;;  %v1597_v31 = vadd.f32 %v4886_v13, %v4910_v32 }
 0xad5   :  { %v1470_v15 = vadd.f32 -5.0, %v1462_v0 }
 0xad6   :  { %v1481_v1 = vsel %vm1477_vm3, 5.0, %v1471_v51 }
 0xad7   :  { %v1480_v58 = vsel %vm1477_vm3, 5.0, %v1470_v15  ;;  %v4896_v21 = vsel %vm1476_vm5, -5.0, %v1481_v1 }
 0xad8   :  { %v4904_v48 = vsel %vm1476_vm5, -5.0, %v1480_v58  ;;  %v1599_v45 = vadd.f32 %v4886_v13, %v4896_v21 }
 0xad9   :  { %v1598_v40 = vadd.f32 %v4886_v13, %v4904_v48 }
 0xb14   :  { %v1603_v47 = vpop.permute.xlu0 %1602 }
 0xb15   :  { %vm1620_vm10 = vcmp.ge.f32.partialorder %v1603_v47, %v1596_v53 }
 0xb16   :  { %v1624_v43 = vsel %vm1620_vm10, 1, %v6021_v37 }
 0xb17   :  { %v1629_v11 = vsel %vm1628_vm7, %v1624_v43, 0 }
 0xb18   :  { %v1631_v35 = vshrl.u32 %v1629_v11, 16 }
 0xb1a   :  { %v1618_v6 = vpop.permute.xlu1 %1617  ;;  %v1633_v2 = vcvt.s32.f32 %v1631_v35 }
 0xb1b   :  { %vm1623_vm11 = vcmp.ge.f32.partialorder %v1618_v6, %v1599_v45 }
 0xb1c   :  { %v1627_v49 = vsel %vm1623_vm11, 1, %v6021_v37  ;;  %1636 = vadd.xlane.f32.xlu1 %v1633_v2  ;;  %v1613_v0 = vpop.permute.xlu0 %1612 }
 0xb1d   :  { %vm1622_vm12 = vcmp.ge.f32.partialorder %v1613_v0, %v1598_v40  ;;  %v1668_v51 = vsel %vm1628_vm7, %v1627_v49, 0  ;;  %v1630_v40 = vand.u32 65535, %v1629_v11 }
 0xb1e   :  { %v1626_v15 = vsel %vm1622_vm12, 1, %v6021_v37  ;;  %v1608_v34 = vpop.permute.xlu1 %1607  ;;  %v1669_v1 = vand.u32 65535, %v1668_v51  ;;  %v1670_v17 = vshrl.u32 %v1668_v51, 16  ;;  %vm5992_vm12 = vcmask 7168  }
 0xb1f   :  { %vm1621_vm14 = vcmp.ge.f32.partialorder %v1608_v34, %v1597_v31  ;;  %v1655_v53 = vsel %vm1628_vm7, %v1626_v15, 0  ;;  %v1632_v0 = vcvt.s32.f32 %v1630_v40 }
 0xb20   :  { %v1625_v47 = vsel %vm1621_vm14, 1, %v6021_v37  ;;  %v1671_v58 = vcvt.s32.f32 %v1669_v1  ;;  %v1657_v43 = vshrl.u32 %v1655_v53, 16  ;;  %v1656_v2 = vand.u32 65535, %v1655_v53 }
 0xb21   :  { %v1642_v59 = vsel %vm1628_vm7, %v1625_v47, 0  ;;  %v1672_v31 = vcvt.s32.f32 %v1670_v17 }
 0xb22   :  { %1673 = vadd.xlane.f32.xlu1 %v1671_v58  ;;  %v1644_v35 = vshrl.u32 %v1642_v59, 16  ;;  %v1659_v45 = vcvt.s32.f32 %v1657_v43  ;;  %v1658_v49 = vcvt.s32.f32 %v1656_v2  ;;  %v1643_v15 = vand.u32 65535, %v1642_v59 }
 0xb24   :  { %v1646_v6 = vcvt.s32.f32 %v1644_v35  ;;  %v1645_v34 = vcvt.s32.f32 %v1643_v15 }
 0xb26   :  { %1662 = vadd.xlane.f32.xlu1 %v1659_v45  ;;  %1649 = vadd.xlane.f32.xlu0 %v1646_v6 }
 0xb2a   :  { %1660 = vadd.xlane.f32.xlu1 %v1658_v49  ;;  %1634 = vadd.xlane.f32.xlu0 %v1632_v0 }
 0xb2e   :  { %1675 = vadd.xlane.f32.xlu0 %v1672_v31 }
 0xb32   :  { %1647 = vadd.xlane.f32.xlu0 %v1645_v34 }
 0xb3b   :  { %1544 = vrot.lane.b32.xlu1 %v4763_v44, %s4285_s27 }
 0xb3f   :  { %1540 = vrot.lane.b32.xlu1 %v4766_v50, %s4285_s27 }
 0xb43   :  { %1502 = vrot.lane.b32.xlu1 %v4881_v23, %s4283_s21 }
 0xb47   :  { %1504 = vrot.lane.b32.xlu1 %v4910_v32, %s4283_s21 }
 0xb48   :  { %1538 = vrot.lane.b32.xlu0 %v4759_v36, %s4285_s27 }
 0xb4c   :  { %1542 = vrot.lane.b32.xlu0 %v4756_v30, %s4285_s27 }
 0xb50   :  { %1508 = vrot.lane.b32.xlu0 %v4896_v21, %s4283_s21 }
 0xb54   :  { %1506 = vrot.lane.b32.xlu0 %v4904_v48, %s4283_s21 }
 0xb73   :  { %v3883_v44 = vpop.f32.mrb[12].mxu1 }
 0xb74   :  { %v1441_v50 = vpop.f32.mrb[13].mxu1 }
 0xb77   :  { %v3886_v17 = vpop.f32.mrb[14].mxu1 }
 0xb78   :  { %v1451_v11 = vpop.f32.mrb[15].mxu1  ;;  %v1467_v28 = vmul.f32 10.0, %v3886_v17 }
 0xba9   :  { %v1637_v51 = vpop.xlane.xlu1 %1636 }
 0xbaa   :  { %v1639_v58 = vcvt.f32.s32 %v1637_v51 }
 0xbac   :  { %v1640_v45 = vshll.u32 %v1639_v58, 16  ;;  %v1465_v58 = vmul.f32 10.0, %v3883_v44 }
 0xbaf   :  { %v1674_v1 = vpop.xlane.xlu1 %1673 }
 0xbb0   :  { %v1677_v15 = vcvt.f32.s32 %v1674_v1 }
 0xbb3   :  { %v1650_v53 = vpop.xlane.xlu0 %1649  ;;  %v1663_v47 = vpop.xlane.xlu1 %1662 }
 0xbb4   :  { %v1665_v43 = vcvt.f32.s32 %v1663_v47  ;;  %v1652_v49 = vcvt.f32.s32 %v1650_v53  ;;  %v1464_v47 = vmul.f32 10.0, %v1441_v50 }
 0xbb6   :  { %v1666_v6 = vshll.u32 %v1665_v43, 16  ;;  %v1653_v22 = vshll.u32 %v1652_v49, 16  ;;  %v1472_v1 = vadd.f32 -5.0, %v1464_v47  ;;  %v6022_v43 = vmov 0.0  }
 0xbb7   :  { %v1635_v36 = vpop.xlane.xlu0 %1634  ;;  %v1661_v59 = vpop.xlane.xlu1 %1660 }
 0xbb8   :  { %v1638_v35 = vcvt.f32.s32 %v1635_v36  ;;  %v1664_v30 = vcvt.f32.s32 %v1661_v59 }
 0xbba   :  { %v1641_v2 = vadd.s32 %v1640_v45, %v1638_v35  ;;  %v1667_v0 = vadd.s32 %v1666_v6, %v1664_v30  ;;  %v1475_v35 = vadd.f32 -5.0, %v1467_v28  ;;  %v1466_v30 = vmul.f32 10.0, %v1451_v11 }
 0xbbb   :  { %v1676_v40 = vpop.xlane.xlu0 %1675  ;;  %v1482_v28 = vsel %vm1477_vm3, 5.0, %v1472_v1  ;;  %v1545_v49 = vpop.permute.xlu1 %1544 }
 0xbbc   :  { %v1678_v31 = vcvt.f32.s32 %v1676_v40  ;;  %v3752_v19 = vadd.s32 4294967295, %v1641_v2  ;;  %v3754_v9 = vadd.s32 4294967295, %v1667_v0  ;;  %v1474_v44 = vadd.f32 -5.0, %v1466_v30 }
 0xbbd   :  { %v1485_v50 = vsel %vm1477_vm3, 5.0, %v1475_v35  ;;  %v4966_v17 = vsel %vm1476_vm5, -5.0, %v1482_v28 }
 0xbbe   :  { %v1679_v34 = vshll.u32 %v1678_v31, 16  ;;  %vm1685_vm15 = vcmp.eq.s32.totalorder %v4791_v42, %v3752_v19  ;;  %vm1687_vm0 = vcmp.eq.s32.totalorder %v4791_v42, %v3754_v9  ;;  %v4972_v11 = vsel %vm1476_vm5, -5.0, %v1485_v50 }
 0xbbf   :  { %v1648_v52 = vpop.xlane.xlu0 %1647  ;;  %v1484_v6 = vsel %vm1477_vm3, 5.0, %v1474_v44  ;;  %v1554_v31 = vsel %vm5992_vm12, 0.5397424, %v1545_v49 }
 0xbc0   :  { %v1680_v13 = vadd.s32 %v1679_v34, %v1677_v15  ;;  %v1651_v51 = vcvt.f32.s32 %v1648_v52  ;;  %v4945_v52 = vsel %vm1685_vm15, 1.0, %v6022_v43  ;;  %v4988_v40 = vsel %vm1476_vm5, -5.0, %v1484_v6 }
 0xbc1   :  { %v4994_v15 = vsel %vm1222_vm13, %v1554_v31, 0.5397424 }
 0xbc2   :  { %v3755_v26 = vadd.s32 4294967295, %v1680_v13  ;;  %v1654_v36 = vadd.s32 %v1653_v22, %v1651_v51  ;;  %v4949_v22 = vsel %vm1687_vm0, 1.0, %v6022_v43  ;;  %v1473_v13 = vadd.f32 -5.0, %v1465_v58 }
 0xbc3   :  { %v1539_v0 = vpop.permute.xlu0 %1538  ;;  %v1566_v47 = vmin.f32 %v4994_v15, 20.0  ;;  %vm1562_vm14 = vcmp.gt.f32.partialorder %v4994_v15, 20.0 }
 0xbc4   :  { %vm1688_vm10 = vcmp.eq.s32.totalorder %v4791_v42, %v3755_v26  ;;  %v3753_v53 = vadd.s32 4294967295, %v1654_v36  ;;  %v1483_v45 = vsel %vm1477_vm3, 5.0, %v1473_v13  ;;  %v1551_v34 = vsel %vm5992_vm12, 0.5397424, %v1539_v0  ;;  %v1541_v36 = vpop.permute.xlu1 %1540 }
 0xbc5   :  { %v4942_v59 = vsel %vm1688_vm10, 1.0, %v6022_v43  ;;  %v4982_v2 = vsel %vm1476_vm5, -5.0, %v1483_v45  ;;  %v1552_v1 = vsel %vm5992_vm12, 0.5397424, %v1541_v36  ;;  %v1573_v35 = vmul.f32 1.442695, %v1566_v47 }
 0xbc6   :  { %vm1686_vm11 = vcmp.eq.s32.totalorder %v4791_v42, %v3753_v53  ;;  %v3951_v26 = vpack.i.bf16 %v4942_v59, %v4945_v52  ;;  %v4999_v53 = vsel %vm1222_vm13, %v1551_v34, 0.5397424 }
 0xbc7   :  { %v4952_v9 = vsel %vm1686_vm11, 1.0, %v6022_v43  ;;  %v1543_v51 = vpop.permute.xlu0 %1542  ;;  %v1563_v30 = vmin.f32 %v4999_v53, 20.0  ;;  %4071 = vpow2.f32 %v1573_v35  ;;  %vm1559_vm15 = vcmp.gt.f32.partialorder %v4999_v53, 20.0 }
 0xbc8   :  { %v3956_v19 = vpack.i.bf16 %v4949_v22, %v4952_v9  ;;  %3952 = vrot.lane.b32.xlu1 %v3951_v26, %s4283_s21  ;;  %v1553_v58 = vsel %vm5992_vm12, 0.5397424, %v1543_v51  ;;  %v1503_v0 = vpop.permute.xlu1 %1502  ;;  %vm1186_vm11 = vcmp.ge.f32.partialorder %v4839_v55, -5.0  ;;  %vm1191_vm12 = vcmp.le.f32.partialorder %v4850_v3, 5.0 }
 0xbc9   :  { %v5005_v26 = vsel %vm1222_vm13, %v1553_v58, 0.5397424  ;;  %v1567_v44 = vmul.f32 1.442695, %v1563_v30 }
 0xbca   :  { %3957 = vrot.lane.b32.xlu0 %v3956_v19, %s4283_s21  ;;  %v5008_v19 = vsel %vm1222_vm13, %v1552_v1, 0.5397424  ;;  %v1565_v13 = vmin.f32 %v5005_v26, 20.0  ;;  %vm1561_vm0 = vcmp.gt.f32.partialorder %v5005_v26, 20.0 }
 0xbcb   :  { %v1564_v28 = vmin.f32 %v5008_v19, 20.0  ;;  %4073 = vpow2.f32 %v1567_v44  ;;  %v1509_v34 = vpop.permute.xlu0 %1508  ;;  %vm1560_vm10 = vcmp.gt.f32.partialorder %v5008_v19, 20.0 }
 0xbcc   :  { %1510 = vrot.lane.b32.xlu1 %v4966_v17, %s4283_s21  ;;  %v1571_v50 = vmul.f32 1.442695, %v1565_v13  ;;  %v1505_v58 = vpop.permute.xlu1 %1504  ;;  %v1529_v13 = vsub.f32 %v4896_v21, %v1509_v34  ;;  %v1526_v34 = vsub.f32 %v4881_v23, %v1503_v0 }
 0xbcd   :  { %v1569_v45 = vmul.f32 1.442695, %v1564_v28 }
 0xbce   :  { %1516 = vrot.lane.b32.xlu0 %v4972_v11, %s4283_s21  ;;  %4075 = vpow2.f32 %v1571_v50  ;;  %v1527_v50 = vsub.f32 %v4910_v32, %v1505_v58 }
 0xbcf   :  { %4077 = vpow2.f32 %v1569_v45  ;;  %v1507_v35 = vpop.permute.xlu0 %1506 }
 0xbd0   :  { %1512 = vrot.lane.b32.xlu1 %v4982_v2, %s4283_s21 }
 0xbd1   :  { %v4072_v6 = vpop.eup %4071 }
 0xbd2   :  { %1514 = vrot.lane.b32.xlu0 %v4988_v40, %s4283_s21  ;;  %v1578_v49 = vadd.f32 1.0, %v4072_v6 }
 0xbd4   :  { %4079 = vlog2.f32 %v1578_v49 }
 0xbd5   :  { %v4074_v31 = vpop.eup %4073 }
 0xbd6   :  { %v1575_v47 = vadd.f32 1.0, %v4074_v31 }
 0xbd8   :  { %v4076_v51 = vpop.eup %4075  ;;  %4081 = vlog2.f32 %v1575_v47 }
 0xbd9   :  { %v4078_v36 = vpop.eup %4077  ;;  %v1577_v1 = vadd.f32 1.0, %v4076_v51  ;;  %v1528_v51 = vsub.f32 %v4904_v48, %v1507_v35 }
 0xbda   :  { %v1576_v43 = vadd.f32 1.0, %v4078_v36 }
 0xbdb   :  { %4083 = vlog2.f32 %v1577_v1 }
 0xbdc   :  { %4085 = vlog2.f32 %v1576_v43 }
 0xbde   :  { %v4080_v6 = vpop.eup %4079 }
 0xbdf   :  { %v1586_v36 = vmul.f32 0.6931472, %v4080_v6 }
 0xbe2   :  { %v4082_v1 = vpop.eup %4081 }
 0xbe3   :  { %v1580_v0 = vmul.f32 0.6931472, %v4082_v1 }
 0xbe5   :  { %v4084_v35 = vpop.eup %4083 }
 0xc3a   :  { %v3953_v30 = vpop.permute.xlu1 %3952 }
 0xc3b   :  { %v3955_v28 = vunpack.i.h.bf16 %v3953_v30  ;;  %v3954_v31 = vunpack.i.l.bf16 %v3953_v30 }
 0xc3c   :  { %v3958_v44 = vpop.permute.xlu0 %3957 }
 0xc3d   :  { %v3959_v45 = vunpack.i.l.bf16 %v3958_v44  ;;  %v3960_v49 = vunpack.i.h.bf16 %v3958_v44  ;;  %v1732_v42 = vmul.f32 %v3955_v28, %v1529_v13  ;;  %v1729_v30 = vmul.f32 %v3954_v31, %v1526_v34 }
 0xc3e   :  { %v1511_v27 = vpop.permute.xlu1 %1510 }
 0xc3f   :  { %v1730_v25 = vmul.f32 %v3959_v45, %v1527_v50  ;;  %1743 = vrot.lane.b32.xlu0 %v1732_v42, %s4286_s28  ;;  %v1731_v58 = vmul.f32 %v3960_v49, %v1528_v51  ;;  %v1530_v13 = vsub.f32 %v4966_v17, %v1511_v27  ;;  %v1590_v42 = vsel %vm1562_vm14, %v4994_v15, %v1586_v36 }
 0xc40   :  { %v1517_v47 = vpop.permute.xlu0 %1516  ;;  %v1594_v33 = vadd.f32 0.001, %v1590_v42  ;;  %v1584_v27 = vmul.f32 0.6931472, %v4084_v35  ;;  %v1587_v15 = vsel %vm1559_vm15, %v4999_v53, %v1580_v0  ;;  %vm1190_vm14 = vcmp.le.f32.partialorder %v4839_v55, 5.0 }
 0xc41   :  { %1739 = vrot.lane.b32.xlu1 %v1730_v25, %s4286_s28  ;;  %v1533_v43 = vsub.f32 %v4972_v11, %v1517_v47  ;;  %v4086_v25 = vpop.eup %4085  ;;  %v1777_v6 = vmul.f32 %v3954_v31, %v1530_v13  ;;  %v1591_v1 = vadd.f32 0.001, %v1587_v15  ;;  %vm1189_vm15 = vcmp.ge.f32.partialorder %v4854_v20, -5.0 }
 0xc42   :  { %v1513_v44 = vpop.permute.xlu1 %1512  ;;  %v1582_v34 = vmul.f32 0.6931472, %v4086_v25  ;;  %v1589_v13 = vsel %vm1561_vm0, %v5005_v26, %v1584_v27  ;;  %v1697_v26 = vmul.f32 %v4945_v52, %v4881_v23  ;;  %vm1193_vm0 = vcmp.le.f32.partialorder %v4854_v20, 5.0 }
 0xc43   :  { %1741 = vrot.lane.b32.xlu0 %v1731_v58, %s4286_s28  ;;  %v1780_v50 = vmul.f32 %v3955_v28, %v1533_v43  ;;  %v1531_v51 = vsub.f32 %v4982_v2, %v1513_v44  ;;  %v1828_v58 = vmul.f32 %v3955_v28, %v1594_v33  ;;  %v1825_v42 = vmul.f32 %v3954_v31, %v1591_v1 }
 0xc44   :  { %v1515_v47 = vpop.permute.xlu0 %1514  ;;  %v1593_v53 = vadd.f32 0.001, %v1589_v13  ;;  %v1700_v31 = vmul.f32 %v4942_v59, %v4896_v21 }
 0xc45   :  { %1737 = vrot.lane.b32.xlu1 %v1729_v30, %s4286_s28  ;;  %v1532_v36 = vsub.f32 %v4988_v40, %v1515_v47  ;;  %v1778_v43 = vmul.f32 %v3959_v45, %v1531_v51  ;;  %v1588_v30 = vsel %vm1560_vm10, %v5008_v19, %v1582_v34  ;;  %v1698_v19 = vmul.f32 %v4952_v9, %v4910_v32  ;;  %vm5172_vm10 = vmand %vm1186_vm11, %vm1190_vm14 }
 0xc46   :  { %v1592_v28 = vadd.f32 0.001, %v1588_v30  ;;  %v1827_v35 = vmul.f32 %v3960_v49, %v1593_v53  ;;  %v1812_v34 = vmul.f32 %v4942_v59, %v1594_v33  ;;  %vm5194_vm11 = vmand %vm1189_vm15, %vm1193_vm0  ;;  %vm1188_vm14 = vcmp.ge.f32.partialorder %v4860_v54, -5.0 }
 0xc47   :  { %1791 = vrot.lane.b32.xlu0 %v1780_v50, %s4286_s28  ;;  %v1779_v44 = vmul.f32 %v3960_v49, %v1532_v36  ;;  %v1701_v50 = vsel %vm1222_vm13, %v1697_v26, 0.0  ;;  %v1704_v25 = vsel %vm1222_vm13, %v1698_v19, 0.0  ;;  %v1699_v49 = vmul.f32 %v4949_v22, %v4904_v48 }
 0xc48   :  { %v1826_v0 = vmul.f32 %v3959_v45, %v1592_v28  ;;  %v1710_v45 = vsel %vm1222_vm13, %v1700_v31, 0.0  ;;  %v1822_v36 = vsel %vm1222_vm13, %v1812_v34, 0.0  ;;  %v1809_v26 = vmul.f32 %v4945_v52, %v1591_v1 }
 0xc49   :  { %1785 = vrot.lane.b32.xlu1 %v1777_v6, %s4286_s28  ;;  %v1707_v23 = vsel %vm1222_vm13, %v1699_v49, 0.0  ;;  %vm1192_vm15 = vcmp.le.f32.partialorder %v4860_v54, 5.0 }
 0xc4a   :  { %v1813_v31 = vsel %vm1222_vm13, %v1809_v26, 0.0  ;;  %vm5213_vm0 = vmand %vm1188_vm14, %vm1192_vm15 }
 0xc4b   :  { %1839 = vrot.lane.b32.xlu0 %v1828_v58, %s4286_s28 }
 0xc4d   :  { %1787 = vrot.lane.b32.xlu1 %v1778_v43, %s4286_s28 }
 0xc4f   :  { %1789 = vrot.lane.b32.xlu0 %v1779_v44, %s4286_s28 }
 0xc51   :  { %1833 = vrot.lane.b32.xlu1 %v1825_v42, %s4286_s28 }
 0xc53   :  { %1837 = vrot.lane.b32.xlu0 %v1827_v35, %s4286_s28 }
 0xc55   :  { %1835 = vrot.lane.b32.xlu1 %v1826_v0, %s4286_s28  ;;  %v1811_v0 = vmul.f32 %v4949_v22, %v1593_v53 }
 0xc57   :  { %v1819_v19 = vsel %vm1222_vm13, %v1811_v0, 0.0 }
 0xc72   :  { %1702 = vadd.xlane.f32.xlu0 %v1701_v50 }
 0xc76   :  { %1705 = vadd.xlane.f32.xlu0 %v1704_v25 }
 0xc79   :  { %1711 = vadd.xlane.f32.xlu1 %v1710_v45 }
 0xc7d   :  { %1708 = vadd.xlane.f32.xlu1 %v1707_v23  ;;  %v1810_v23 = vmul.f32 %v4952_v9, %v1592_v28  ;;  %v1763_v28 = vmul.f32 %v4949_v22, %v4988_v40 }
 0xc7f   :  { %v1816_v53 = vsel %vm1222_vm13, %v1810_v23, 0.0  ;;  %v1771_v34 = vsel %vm1222_vm13, %v1763_v28, 0.0 }
 0xcb1   :  { %v1744_v6 = vpop.permute.xlu0 %1743 }
 0xcb2   :  { %v1758_v35 = vsel %vm1222_vm13, %v1744_v6, 0.0 }
 0xcb3   :  { %v1740_v51 = vpop.permute.xlu1 %1739 }
 0xcb4   :  { %v1752_v32 = vsel %vm1222_vm13, %v1740_v51, 0.0  ;;  %v1764_v51 = vmul.f32 %v4942_v59, %v4972_v11  ;;  %v1762_v59 = vmul.f32 %v4952_v9, %v4982_v2 }
 0xcb5   :  { %1753 = vadd.xlane.f32.xlu0 %v1752_v32  ;;  %v1742_v47 = vpop.permute.xlu0 %1741 }
 0xcb6   :  { %v1755_v30 = vsel %vm1222_vm13, %v1742_v47, 0.0  ;;  %v1774_v47 = vsel %vm1222_vm13, %v1764_v51, 0.0  ;;  %v1768_v11 = vsel %vm1222_vm13, %v1762_v59, 0.0 }
 0xcb7   :  { %v1738_v27 = vpop.permute.xlu1 %1737 }
 0xcb8   :  { %v1749_v21 = vsel %vm1222_vm13, %v1738_v27, 0.0 }
 0xcb9   :  { %1750 = vadd.xlane.f32.xlu1 %v1749_v21  ;;  %v1792_v48 = vpop.permute.xlu0 %1791  ;;  %v1761_v21 = vmul.f32 %v4945_v52, %v4966_v17 }
 0xcba   :  { %v1806_v43 = vsel %vm1222_vm13, %v1792_v48, 0.0 }
 0xcbb   :  { %v1786_v15 = vpop.permute.xlu1 %1785 }
 0xcbc   :  { %v1797_v44 = vsel %vm1222_vm13, %v1786_v15, 0.0  ;;  %v1765_v15 = vsel %vm1222_vm13, %v1761_v21, 0.0 }
 0xcbd   :  { %1823 = vadd.xlane.f32.xlu1 %v1822_v36  ;;  %v1840_v42 = vpop.permute.xlu0 %1839 }
 0xcbe   :  { %v1854_v33 = vsel %vm1222_vm13, %v1840_v42, 0.0 }
 0xcbf   :  { %v1788_v58 = vpop.permute.xlu1 %1787 }
 0xcc0   :  { %v1800_v13 = vsel %vm1222_vm13, %v1788_v58, 0.0 }
 0xcc1   :  { %1807 = vadd.xlane.f32.xlu1 %v1806_v43  ;;  %1801 = vadd.xlane.f32.xlu0 %v1800_v13  ;;  %v1790_v50 = vpop.permute.xlu0 %1789  ;;  %v6023_v43 = vclamps-f32 %v4850_v3, 5.0 }
 0xcc2   :  { %v1803_v45 = vsel %vm1222_vm13, %v1790_v50, 0.0 }
 0xcc3   :  { %v1834_v25 = vpop.permute.xlu1 %1833 }
 0xcc4   :  { %v1845_v49 = vsel %vm1222_vm13, %v1834_v25, 0.0 }
 0xcc5   :  { %1756 = vadd.xlane.f32.xlu1 %v1755_v30  ;;  %1798 = vadd.xlane.f32.xlu0 %v1797_v44  ;;  %v1838_v6 = vpop.permute.xlu0 %1837 }
 0xcc6   :  { %v1851_v1 = vsel %vm1222_vm13, %v1838_v6, 0.0 }
 0xcc7   :  { %v1836_v32 = vpop.permute.xlu1 %1835 }
 0xcc8   :  { %v1848_v27 = vsel %vm1222_vm13, %v1836_v32, 0.0 }
 0xcc9   :  { %1855 = vadd.xlane.f32.xlu1 %v1854_v33  ;;  %1759 = vadd.xlane.f32.xlu0 %v1758_v35  ;;  %v6024_v33 = vclamps-f32 %v4839_v55, 5.0 }
 0xccd   :  { %1820 = vadd.xlane.f32.xlu1 %v1819_v19  ;;  %1814 = vadd.xlane.f32.xlu0 %v1813_v31 }
 0xcd1   :  { %1804 = vadd.xlane.f32.xlu1 %v1803_v45  ;;  %1846 = vadd.xlane.f32.xlu0 %v1845_v49 }
 0xcd5   :  { %1852 = vadd.xlane.f32.xlu1 %v1851_v1  ;;  %1817 = vadd.xlane.f32.xlu0 %v1816_v53 }
 0xcd9   :  { %1775 = vadd.xlane.f32.xlu1 %v1774_v47  ;;  %1849 = vadd.xlane.f32.xlu0 %v1848_v27 }
 0xcdd   :  { %1772 = vadd.xlane.f32.xlu1 %v1771_v34  ;;  %1766 = vadd.xlane.f32.xlu0 %v1765_v15  ;;  %v6025_v34 = vclamps-f32 %v4860_v54, 5.0 }
 0xce1   :  { %1769 = vadd.xlane.f32.xlu0 %v1768_v11 }
 0xcff   :  { %v1703_v36 = vpop.xlane.xlu0 %1702 }
 0xd00   :  { %v1865_v35 = vsub.f32 %v6024_v33, %v1703_v36  ;;  %v6026_v33 = vclamps-f32 %v4854_v20, 5.0 }
 0xd03   :  { %v1706_v22 = vpop.xlane.xlu0 %1705 }
 0xd04   :  { %v1866_v13 = vsub.f32 %v6023_v43, %v1706_v22 }
 0xd06   :  { %v1712_v48 = vpop.xlane.xlu1 %1711 }
 0xd0a   :  { %v1709_v40 = vpop.xlane.xlu1 %1708 }
 0xd0b   :  { %v1867_v15 = vsub.f32 %v6025_v34, %v1709_v40 }
 0xd42   :  { %v1754_v58 = vpop.xlane.xlu0 %1753 }
 0xd43   :  { %4087 = vrcp.f32 %v1754_v58 }
 0xd46   :  { %v1751_v52 = vpop.xlane.xlu1 %1750 }
 0xd47   :  { %4089 = vrcp.f32 %v1751_v52 }
 0xd4a   :  { %v5084_v17 = vpop.xlane.xlu1 %1823 }
 0xd4d   :  { %v4088_v30 = vpop.eup %4087 }
 0xd4e   :  { %v5088_v9 = vmul.f32 %v4088_v30, %v1866_v13  ;;  %v5090_v2 = vpop.xlane.xlu0 %1801  ;;  %v5092_v44 = vpop.xlane.xlu1 %1807 }
 0xd4f   :  { %v5095_v42 = vmul.f32 %v4088_v30, %v5090_v2 }
 0xd50   :  { %v5100_v0 = vsub.f32 1.0, %v5088_v9 }
 0xd51   :  { %v4090_v26 = vpop.eup %4089  ;;  %v5103_v50 = vmul.f32 2.0, %v5095_v42  ;;  %v5128_v34 = vmul.f32 %v5095_v42, %v5095_v42 }
 0xd52   :  { %v1869_v19 = vmul.f32 %v4090_v26, %v1865_v35  ;;  %v1799_v31 = vpop.xlane.xlu0 %1798  ;;  %v1757_v25 = vpop.xlane.xlu1 %1756  ;;  %v5107_v45 = vmul.f32 %v5100_v0, %v5088_v9  ;;  %v1868_v35 = vsub.f32 %v6026_v33, %v1712_v48 }
 0xd53   :  { %v1861_v49 = vmul.f32 %v4090_v26, %v1799_v31  ;;  %4091 = vrcp.f32 %v1757_v25 }
 0xd54   :  { %v1873_v23 = vsub.f32 1.0, %v1869_v19  ;;  %v5111_v6 = vmul.f32 %v5103_v50, %v5107_v45 }
 0xd55   :  { %v1905_v1 = vmul.f32 2.0, %v1861_v49  ;;  %v1881_v21 = vmul.f32 %v1869_v19, %v1861_v49 }
 0xd56   :  { %v1760_v53 = vpop.xlane.xlu0 %1759  ;;  %v1856_v51 = vpop.xlane.xlu1 %1855  ;;  %v1877_v32 = vmul.f32 %v1873_v23, %v1869_v19 }
 0xd57   :  { %4093 = vrcp.f32 %v1760_v53  ;;  %v1885_v30 = vmul.f32 %v1881_v21, %v1869_v19 }
 0xd58   :  { %v1945_v47 = vmul.f32 %v1905_v1, %v1877_v32 }
 0xd5a   :  { %v1815_v27 = vpop.xlane.xlu0 %1814  ;;  %v5113_v28 = vpop.xlane.xlu1 %1820 }
 0xd5b   :  { %v1889_v11 = vmul.f32 %v1877_v32, %v1815_v27  ;;  %v1953_v52 = vmul.f32 %v1873_v23, %v1815_v27 }
 0xd5d   :  { %v4092_v59 = vpop.eup %4091  ;;  %v1893_v40 = vadd.f32 %v1889_v11, %v1885_v30  ;;  %v1957_v48 = vmul.f32 %v1953_v52, %v1873_v23 }
 0xd5e   :  { %v5117_v36 = vmul.f32 %v4092_v59, %v1867_v15  ;;  %v1847_v22 = vpop.xlane.xlu0 %1846  ;;  %v5119_v58 = vpop.xlane.xlu1 %1804 }
 0xd5f   :  { %v1901_v43 = vadd.f32 %v1847_v22, %v1815_v27  ;;  %v1937_v13 = vmul.f32 %v1869_v19, %v1847_v22  ;;  %v5124_v60 = vmul.f32 %v4092_v59, %v5119_v58  ;;  %v1933_v22 = vmul.f32 %v1861_v49, %v1861_v49 }
 0xd60   :  { %v1875_v27 = vsub.f32 1.0, %v5117_v36  ;;  %v1904_v59 = vadd.f32 %v1856_v51, %v5084_v17  ;;  %v1897_v12 = vmul.f32 %v1893_v40, %v1799_v31 }
 0xd61   :  { %v4094_v26 = vpop.eup %4093  ;;  %v1909_v25 = vsub.f32 %v1901_v43, %v1905_v1  ;;  %v1941_v53 = vmul.f32 %v1937_v13, %v1869_v19  ;;  %v1883_v41 = vmul.f32 %v5117_v36, %v5124_v60  ;;  %v1907_v40 = vmul.f32 2.0, %v5124_v60 }
 0xd62   :  { %v1864_v15 = vmul.f32 %v4094_v26, %v5092_v44  ;;  %v1872_v63 = vmul.f32 %v4094_v26, %v1868_v35  ;;  %v5132_v21 = vpop.xlane.xlu0 %1817  ;;  %v1879_v38 = vmul.f32 %v1875_v27, %v5117_v36  ;;  %v1853_v52 = vpop.xlane.xlu1 %1852 }
 0xd63   :  { %v1913_v33 = vmul.f32 %v1909_v25, %v1877_v32  ;;  %v1949_v1 = vadd.f32 %v1945_v47, %v1941_v53  ;;  %v1955_v32 = vmul.f32 %v1875_v27, %v5113_v28  ;;  %v1954_v31 = vmul.f32 %v5100_v0, %v5132_v21 }
 0xd64   :  { %v1876_v19 = vsub.f32 1.0, %v1872_v63  ;;  %v1908_v43 = vmul.f32 2.0, %v1864_v15  ;;  %v1940_v11 = vmul.f32 %v1872_v63, %v1856_v51  ;;  %v1936_v23 = vmul.f32 %v1864_v15, %v1864_v15 }
 0xd65   :  { %v1917_v13 = vadd.f32 %v1913_v33, %v1861_v49  ;;  %v1961_v30 = vadd.f32 %v1957_v48, %v1949_v1  ;;  %v1939_v18 = vmul.f32 %v5117_v36, %v1853_v52  ;;  %v1958_v8 = vmul.f32 %v1954_v31, %v5100_v0 }
 0xd66   :  { %v1880_v35 = vmul.f32 %v1876_v19, %v1872_v63  ;;  %v1956_v26 = vmul.f32 %v1876_v19, %v5084_v17  ;;  %v1912_v39 = vsub.f32 %v1904_v59, %v1908_v43  ;;  %v1944_v49 = vmul.f32 %v1940_v11, %v1872_v63  ;;  %v1850_v53 = vpop.xlane.xlu0 %1849 }
 0xd67   :  { %4095 = vrcp.f32 %v1917_v13  ;;  %v1965_v47 = vmul.f32 %v1961_v30, %v1933_v22  ;;  %v1903_v59 = vadd.f32 %v1853_v52, %v5113_v28  ;;  %v1902_v22 = vadd.f32 %v1850_v53, %v5132_v21 }
 0xd68   :  { %v1948_v25 = vmul.f32 %v1908_v43, %v1880_v35  ;;  %v1916_v51 = vmul.f32 %v1912_v39, %v1880_v35  ;;  %4097 = vlog2.f32 %v1917_v13  ;;  %v1960_v48 = vmul.f32 %v1956_v26, %v1876_v19 }
 0xd69   :  { %4099 = vlog2.f32 %v1965_v47  ;;  %v1947_v39 = vmul.f32 %v1907_v40, %v1879_v38  ;;  %v1938_v19 = vmul.f32 %v5088_v9, %v1850_v53  ;;  %v1884_v43 = vmul.f32 %v1872_v63, %v1864_v15 }
 0xd6a   :  { %v1920_v33 = vadd.f32 %v1916_v51, %v1864_v15  ;;  %v1952_v1 = vadd.f32 %v1948_v25, %v1944_v49  ;;  %v1911_v13 = vsub.f32 %v1903_v59, %v1907_v40  ;;  %v1943_v30 = vmul.f32 %v1939_v18, %v5117_v36 }
 0xd6b   :  { %v1959_v26 = vmul.f32 %v1955_v32, %v1875_v27  ;;  %v1910_v47 = vsub.f32 %v1902_v22, %v5103_v50  ;;  %v1942_v52 = vmul.f32 %v1938_v19, %v5088_v9  ;;  %v1892_v62 = vmul.f32 %v1880_v35, %v5084_v17 }
 0xd6c   :  { %4101 = vrcp.f32 %v1920_v33  ;;  %v1964_v11 = vadd.f32 %v1960_v48, %v1952_v1  ;;  %v1915_v51 = vmul.f32 %v1911_v13, %v1879_v38  ;;  %v1951_v49 = vadd.f32 %v1947_v39, %v1943_v30 }
 0xd6d   :  { %4103 = vlog2.f32 %v1920_v33  ;;  %v1914_v15 = vmul.f32 %v1910_v47, %v5107_v45  ;;  %v1950_v53 = vadd.f32 %v5111_v6, %v1942_v52  ;;  %v1888_v48 = vmul.f32 %v1884_v43, %v1872_v63 }
 0xd6e   :  { %v1968_v25 = vmul.f32 %v1964_v11, %v1936_v23  ;;  %v1935_v18 = vmul.f32 %v5124_v60, %v5124_v60  ;;  %v1919_v50 = vadd.f32 %v1915_v51, %v5124_v60  ;;  %v1963_v27 = vadd.f32 %v1959_v26, %v1951_v49  ;;  %v1767_v60 = vpop.xlane.xlu0 %1766  ;;  %v1776_v11 = vpop.xlane.xlu1 %1775 }
 0xd6f   :  { %v1887_v23 = vmul.f32 %v1883_v41, %v5117_v36  ;;  %v1918_v40 = vadd.f32 %v1914_v15, %v5095_v42  ;;  %v1962_v17 = vadd.f32 %v1958_v8, %v1950_v53  ;;  %v1896_v35 = vadd.f32 %v1892_v62, %v1888_v48 }
 0xd70   :  { %4105 = vlog2.f32 %v1968_v25  ;;  %v1891_v31 = vmul.f32 %v1879_v38, %v5113_v28  ;;  %v1967_v6 = vmul.f32 %v1963_v27, %v1935_v18  ;;  %v1882_v41 = vmul.f32 %v5088_v9, %v5095_v42 }
 0xd71   :  { %v4096_v32 = vpop.eup %4095  ;;  %4107 = vrcp.f32 %v1919_v50  ;;  %v1966_v1 = vmul.f32 %v1962_v17, %v5128_v34  ;;  %v1900_v38 = vmul.f32 %v1896_v35, %v5092_v44  ;;  %v1890_v42 = vmul.f32 %v5107_v45, %v5132_v21 }
 0xd72   :  { %v4098_v0 = vpop.eup %4097  ;;  %v1925_v63 = vmul.f32 %v4096_v32, %v1897_v12  ;;  %4109 = vlog2.f32 %v1919_v50  ;;  %v1895_v34 = vadd.f32 %v1891_v31, %v1887_v23  ;;  %v1886_v13 = vmul.f32 %v1882_v41, %v5088_v9  ;;  %v1773_v27 = vpop.xlane.xlu1 %1772 }
 0xd73   :  { %v4100_v33 = vpop.eup %4099  ;;  %v1978_v59 = vmul.f32 0.6931472, %v4098_v0  ;;  %4111 = vlog2.f32 %v1967_v6 }
 0xd74   :  { %v1929_v8 = vadd.f32 %v1925_v63, %v1767_v60  ;;  %v1970_v62 = vmul.f32 0.6931472, %v4100_v33  ;;  %4113 = vrcp.f32 %v1918_v40  ;;  %v1894_v47 = vadd.f32 %v1890_v42, %v1886_v13  ;;  %v1770_v33 = vpop.xlane.xlu0 %1769 }
 0xd75   :  { %v1985_v28 = vmul.f32 2.0, %v1978_v59  ;;  %4115 = vlog2.f32 %v1966_v1  ;;  %v1899_v9 = vmul.f32 %v1895_v34, %v5119_v58  ;;  %v3761_v34 = vld [vmem:[%s5945_s6 + $0x1] ss:$0 sm:$0xff] }
 0xd76   :  { %v4102_v36 = vpop.eup %4101  ;;  %v1993_v39 = vsel %vm5172_vm10, %v1929_v8, %v4839_v55  ;;  %4117 = vlog2.f32 %v1918_v40  ;;  %v1898_v58 = vmul.f32 %v1894_v47, %v5090_v2 }
 0xd77   :  { %v4104_v44 = vpop.eup %4103  ;;  %v1928_v22 = vmul.f32 %v4102_v36, %v1900_v38  ;;  %v5182_v19 = vmul.f32 %v1993_v39, %v4835_v16  ;;  %v1989_v43 = vsub.f32 %v1970_v62, %v1985_v28 }
 0xd78   :  { %v1984_v30 = vmul.f32 0.6931472, %v4104_v44 }
 0xd79   :  { %v1932_v26 = vadd.f32 %v1928_v22, %v1776_v11  ;;  %2035 = vperm.xlu0 %3949, %v5182_v19   ;;  %v5188_v45 = vsel %vm5172_vm10, %v1989_v43, 0.0  ;;  %vm1187_vm10 = vcmp.ge.f32.partialorder %v4850_v3, -5.0  ;;  %v4267_v43 = vld [vmem:[%s5946_s2] sm:$0xff] }
 0xd7a   :  { %v4106_v21 = vpop.eup %4105  ;;  %v1988_v51 = vmul.f32 2.0, %v1984_v30 }
 0xd7b   :  { %v1996_v52 = vsel %vm5194_vm11, %v1932_v26, %v4854_v20  ;;  %v1976_v25 = vmul.f32 0.6931472, %v4106_v21  ;;  %v4108_v49 = vpop.eup %4107  ;;  %v4268_v21 = vld [vmem:[%s5946_s2 + $0x18] sm:$0xff] }
 0xd7c   :  { %v5203_v15 = vmul.f32 %v1996_v52, %v4846_v14  ;;  %v4110_v53 = vpop.eup %4109  ;;  %v1927_v48 = vmul.f32 %v4108_v49, %v1899_v9 }
 0xd7d   :  { %v1992_v18 = vsub.f32 %v1976_v25, %v1988_v51  ;;  %v4112_v50 = vpop.eup %4111  ;;  %v1982_v20 = vmul.f32 0.6931472, %v4110_v53 }
 0xd7e   :  { %2050 = vperm.xlu1 %3950, %v5203_v15   ;;  %v4114_v32 = vpop.eup %4113  ;;  %v1931_v23 = vadd.f32 %v1927_v48, %v1773_v27  ;;  %v1974_v40 = vmul.f32 0.6931472, %v4112_v50  ;;  %v132_v27 = vld [vmem:[%s5947_s7 + $0x8] sm:$0x7] }
 0xd7f   :  { %v5211_v17 = vsel %vm5194_vm11, %v1992_v18, 0.0  ;;  %v4116_v35 = vpop.eup %4115  ;;  %v1926_v2 = vmul.f32 %v4114_v32, %v1898_v58  ;;  %v1987_v31 = vmul.f32 2.0, %v1982_v20  ;;  %vm1195_vm11 = vmand %vm1187_vm10, %vm1191_vm12  ;;  %v4269_v58 = vld [vmem:[%s5946_s2 + $0x10] sm:$0xff] }
 0xd80   :  { %v4118_v6 = vpop.eup %4117  ;;  %v1995_v63 = vsel %vm5213_vm0, %v1931_v23, %v4860_v54  ;;  %v1972_v1 = vmul.f32 0.6931472, %v4116_v35 }
 0xd81   :  { %v5223_v60 = vmul.f32 %v1995_v63, %v4856_v61  ;;  %v1930_v59 = vadd.f32 %v1926_v2, %v1770_v33  ;;  %v1991_v41 = vsub.f32 %v1974_v40, %v1987_v31  ;;  %v1980_v8 = vmul.f32 0.6931472, %v4118_v6  ;;  %v4270_v6 = vld [vmem:[%s5946_s2 + $0x8] sm:$0xff] }
 0xd82   :  { %v2096_v2 = vrot.slane %v132_v27, %v4391_v5  ;;  %v2104_v31 = vrot.slane %v132_v27, %v4468_v46 }
 0xd83   :  { %v1994_v62 = vsel %vm1195_vm11, %v1930_v59, %v4850_v3  ;;  %2045 = vperm.xlu0 %3949, %v5223_v60   ;;  %v5229_v38 = vsel %vm5213_vm0, %v1991_v41, 0.0  ;;  %v1986_v12 = vmul.f32 2.0, %v1980_v8  ;;  %v3760_v3 = vld [vmem:[%s5944_s5 + $0x1] ss:$0 sm:$0xff]  ;;  %v6033_v59 = vld [vmem:[#allocation7_spill] sm:$0xff] }
 0xd84   :  { %v5232_v54 = vmul.f32 %v1994_v62, %v4842_v29  ;;  %v6034_v62 = vld [vmem:[#allocation6_spill] sm:$0xff] }
 0xd85   :  { %v1990_v28 = vsub.f32 %v1972_v1, %v1986_v12  ;;  %v2128_v12 = vrot.slane %v132_v27, %v6034_v62 }
 0xd86   :  { %2040 = vperm.xlu1 %3950, %v5232_v54  }
 0xd87   :  { %3961 = vset.pattern.permute.xlu0 %v6021_v37  ;;  %v5236_v36 = vsel %vm1195_vm11, %v1990_v28, 0.0 }
 0xd8a   :  { %3962 = vset.pattern.permute.xlu1 %v6021_v37 }
 0xdf8   :  { %v2036_v42 = vpop.permute.xlu0 %2035 }
 0xdf9   :  { %v2059_v39 = vmul.f32 %v3760_v3, %v2036_v42 }
 0xdfb   :  { %v2069_v44 = vadd.f32 %v3761_v34, %v2059_v39 }
 0xdfd   :  { %v2051_v22 = vpop.permute.xlu1 %2050  ;;  %v5248_v11 = vadd.f32 %v4267_v43, %v2069_v44 }
 0xdfe   :  { %v2062_v13 = vmul.f32 %v3760_v3, %v2051_v22 }
 0xdff   :  { %v2077_v26 = vmul.f32 %v5248_v11, %v4485_v57 }
 0xe00   :  { %v2072_v30 = vadd.f32 %v3761_v34, %v2062_v13 }
 0xe01   :  { %v2081_v25 = vrot.slane %v2077_v26, 7  ;;  %v2113_v18 = vrot.slane %v2077_v26, 1  ;;  %v2105_v8 = vmul.f32 %v2104_v31, %v2077_v26 }
 0xe02   :  { %v5255_v55 = vadd.f32 %v4268_v21, %v2072_v30  ;;  %v2046_v47 = vpop.permute.xlu0 %2045 }
 0xe03   :  { %v2061_v9 = vmul.f32 %v3760_v3, %v2046_v47 }
 0xe04   :  { %v2080_v52 = vmul.f32 %v5255_v55, %v4483_v56 }
 0xe05   :  { %v2071_v51 = vadd.f32 %v3761_v34, %v2061_v9  ;;  %v2041_v48 = vpop.permute.xlu1 %2040 }
 0xe06   :  { %v2084_v49 = vrot.slane %v2080_v52, 7  ;;  %v2116_v53 = vrot.slane %v2080_v52, 1  ;;  %v2060_v50 = vmul.f32 %v3760_v3, %v2041_v48  ;;  %v2108_v3 = vmul.f32 %v2104_v31, %v2080_v52  ;;  %v6035_v52 = vld [vmem:[#allocation8_spill] sm:$0xff]  ;;  %v6036_v48 = vld [vmem:[#allocation9_spill] sm:$0xff] }
 0xe07   :  { %v5265_v20 = vadd.f32 %v4269_v58, %v2071_v51 }
 0xe08   :  { %v2088_v32 = vsel %vm321_vm1, %v2084_v49, %v2081_v25  ;;  %v2070_v23 = vadd.f32 %v3761_v34, %v2060_v50  ;;  %v2120_v35 = vsel %vm374_vm4, %v2116_v53, %v2113_v18 }
 0xe09   :  { %v2089_v40 = vmul.f32 %v4518_v10, %v2088_v32  ;;  %v2079_v0 = vmul.f32 %v5265_v20, %v4513_v7  ;;  %v2124_v10 = vmul.f32 %v4539_v24, %v2120_v35 }
 0xe0a   :  { %v5279_v63 = vadd.f32 %v4270_v6, %v2070_v23  ;;  %v3762_v23 = vld [vmem:[%s5948_s8 + $0x2] ss:$0 sm:$0xff] }
 0xe0b   :  { %v2083_v33 = vrot.slane %v2079_v0, 7  ;;  %v2097_v1 = vmul.f32 %v2096_v2, %v2089_v40  ;;  %v2115_v34 = vrot.slane %v2079_v0, 1  ;;  %v2132_v13 = vmul.f32 %v2128_v12, %v2124_v10 }
 0xe0c   :  { %v2078_v41 = vmul.f32 %v5279_v63, %v6033_v59  ;;  %v2107_v35 = vmul.f32 %v2104_v31, %v2079_v0 }
 0xe0d   :  { %v2085_v28 = vsel %vm321_vm1, %v2083_v33, %v2084_v49  ;;  %v2109_v22 = vadd.f32 %v2105_v8, %v2097_v1  ;;  %v2117_v27 = vsel %vm374_vm4, %v2115_v34, %v2116_v53 }
 0xe0e   :  { %v2082_v42 = vrot.slane %v2078_v41, 7  ;;  %v2114_v39 = vrot.slane %v2078_v41, 1  ;;  %v2100_v44 = vmul.f32 %v2096_v2, %v2085_v28  ;;  %v2106_v43 = vmul.f32 %v2104_v31, %v2078_v41 }
 0xe0f   :  { %v2131_v41 = vmul.f32 %v2128_v12, %v2117_v27 }
 0xe10   :  { %v2119_v24 = vsel %vm374_vm4, %v2113_v18, %v2114_v39  ;;  %v2087_v30 = vsel %vm321_vm1, %v2081_v25, %v2082_v42  ;;  %v2118_v26 = vsel %vm374_vm4, %v2114_v39, %v2115_v34  ;;  %v2112_v21 = vadd.f32 %v2108_v3, %v2100_v44 }
 0xe11   :  { %v2129_v47 = vmul.f32 %v2128_v12, %v2119_v24  ;;  %v2098_v9 = vmul.f32 %v2096_v2, %v2087_v30  ;;  %v2122_v51 = vmul.f32 %v6035_v52, %v2118_v26  ;;  %v2086_v49 = vsel %vm321_vm1, %v2082_v42, %v2083_v33 }
 0xe12   :  { %v2091_v50 = vmul.f32 %v6036_v48, %v2086_v49  ;;  %v2136_v25 = vadd.f32 %v2132_v13, %v2112_v21 }
 0xe13   :  { %v2133_v18 = vadd.f32 %v2129_v47, %v2109_v22  ;;  %v2110_v58 = vadd.f32 %v2106_v43, %v2098_v9  ;;  %v2130_v32 = vmul.f32 %v2128_v12, %v2122_v51 }
 0xe14   :  { %v2099_v40 = vmul.f32 %v2096_v2, %v2091_v50  ;;  %v2146_v28 = vadd.f32 %v3762_v23, %v2136_v25 }
 0xe15   :  { %v2143_v6 = vadd.f32 %v3762_v23, %v2133_v18  ;;  %v2134_v1 = vadd.f32 %v2130_v32, %v2110_v58  ;;  %v154_v18 = vld [vmem:[%s5949_s11 + $0x40] sm:$0xff]  ;;  %v155_v58 = vld [vmem:[%s5949_s11 + $0x48] sm:$0xff]  ;;  %v156_v32 = vld [vmem:[%s5949_s11 + $0x50] sm:$0xff] }
 0xe16   :  { %v2111_v10 = vadd.f32 %v2107_v35, %v2099_v40  ;;  %v2156_v42 = vsel %vm425_vm6, %v2146_v28, 0.0  ;;  %v2257_v25 = vpack.c.bf16 %v155_v58, %v154_v18 }
 0xe17   :  { %v2147_v33 = vsel %vm425_vm6, %v2143_v6, 0.0  ;;  %v2144_v8 = vadd.f32 %v3762_v23, %v2134_v1 }
 0xe18   :  { %2148 = vadd.xlane.f32.xlu1 %v2147_v33  ;;  %v2135_v53 = vadd.f32 %v2131_v41, %v2111_v10  ;;  %3887 = vmatprep.subr.bf16.mxu0 %v2257_v25 }
 0xe19   :  { %v2150_v3 = vsel %vm425_vm6, %v2144_v8, 0.0  ;;  %3888 = vmatpush3.bf16.msra.mxu0 %v2257_v25 }
 0xe1a   :  { %2151 = vadd.xlane.f32.xlu0 %v2150_v3  ;;  %v2145_v34 = vadd.f32 %v3762_v23, %v2135_v53  ;;  %v157_v23 = vld [vmem:[%s5949_s11 + $0x58] sm:$0xff] }
 0xe1b   :  { %v2258_v40 = vpack.c.bf16 %v157_v23, %v156_v32 }
 0xe1c   :  { %2157 = vadd.xlane.f32.xlu1 %v2156_v42  ;;  %v2153_v2 = vsel %vm425_vm6, %v2145_v34, 0.0 }
 0xe1d   :  { %3889 = vmatprep.subr.bf16.mxu0 %v2258_v40 }
 0xe1e   :  { %2154 = vadd.xlane.f32.xlu0 %v2153_v2  ;;  %3890 = vmatpush3.bf16.msra.mxu0 %v2258_v40 }
 0xea5   :  { %v2149_v0 = vpop.xlane.xlu1 %2148 }
 0xea6   :  { %v2159_v31 = vmul.f32 0.03125, %v2149_v0  ;;  %v3763_v0 = vld [vmem:[%s5950_s9 + $0x2] ss:$0 sm:$0xff] }
 0xea7   :  { %v2152_v39 = vpop.xlane.xlu0 %2151 }
 0xea8   :  { %v2163_v12 = vsub.f32 %v2143_v6, %v2159_v31  ;;  %v2160_v44 = vmul.f32 0.03125, %v2152_v39 }
 0xea9   :  { %v2158_v22 = vpop.xlane.xlu1 %2157 }
 0xeaa   :  { %v2164_v43 = vsub.f32 %v2144_v8, %v2160_v44  ;;  %v2162_v13 = vmul.f32 0.03125, %v2158_v22  ;;  %v2167_v24 = vmul.f32 %v2163_v12, %v2163_v12  ;;  %v3764_v44 = vld [vmem:[%s5951_s10 + $0x2] ss:$0 sm:$0xff] }
 0xeab   :  { %v2155_v30 = vpop.xlane.xlu0 %2154 }
 0xeac   :  { %v2166_v26 = vsub.f32 %v2146_v28, %v2162_v13  ;;  %v2161_v21 = vmul.f32 0.03125, %v2155_v30  ;;  %v2171_v47 = vsel %vm425_vm6, %v2167_v24, 0.0  ;;  %v2168_v9 = vmul.f32 %v2164_v43, %v2164_v43 }
 0xead   :  { %2172 = vadd.xlane.f32.xlu0 %v2171_v47 }
 0xeae   :  { %v2165_v52 = vsub.f32 %v2145_v34, %v2161_v21  ;;  %v2174_v51 = vsel %vm425_vm6, %v2168_v9, 0.0  ;;  %v2170_v49 = vmul.f32 %v2166_v26, %v2166_v26 }
 0xeaf   :  { %2175 = vadd.xlane.f32.xlu1 %v2174_v51 }
 0xeb0   :  { %v2169_v48 = vmul.f32 %v2165_v52, %v2165_v52  ;;  %v2180_v50 = vsel %vm425_vm6, %v2170_v49, 0.0 }
 0xeb2   :  { %v2177_v27 = vsel %vm425_vm6, %v2169_v48, 0.0 }
 0xeb3   :  { %2181 = vadd.xlane.f32.xlu1 %v2180_v50  ;;  %2178 = vadd.xlane.f32.xlu0 %v2177_v27 }
 0xf3a   :  { %v2173_v35 = vpop.xlane.xlu0 %2172 }
 0xf3b   :  { %v2183_v6 = vmul.f32 0.03125, %v2173_v35 }
 0xf3c   :  { %v2176_v1 = vpop.xlane.xlu1 %2175 }
 0xf3d   :  { %v2187_v10 = vadd.f32 1e-05, %v2183_v6  ;;  %v2184_v41 = vmul.f32 0.03125, %v2176_v1 }
 0xf3f   :  { %4119 = vrsqrt.f32 %v2187_v10  ;;  %v2188_v33 = vadd.f32 1e-05, %v2184_v41 }
 0xf40   :  { %v2182_v8 = vpop.xlane.xlu1 %2181  ;;  %v2179_v28 = vpop.xlane.xlu0 %2178 }
 0xf41   :  { %4121 = vrsqrt.f32 %v2188_v33  ;;  %v2186_v53 = vmul.f32 0.03125, %v2182_v8  ;;  %v2185_v3 = vmul.f32 0.03125, %v2179_v28 }
 0xf43   :  { %v2190_v34 = vadd.f32 1e-05, %v2186_v53  ;;  %v2189_v42 = vadd.f32 1e-05, %v2185_v3 }
 0xf45   :  { %4123 = vrsqrt.f32 %v2190_v34 }
 0xf46   :  { %4125 = vrsqrt.f32 %v2189_v42 }
 0xf49   :  { %v4120_v2 = vpop.eup %4119 }
 0xf4a   :  { %v2195_v31 = vmul.f32 %v4120_v2, %v2163_v12 }
 0xf4b   :  { %v4122_v39 = vpop.eup %4121 }
 0xf4c   :  { %v2205_v22 = vmul.f32 %v3763_v0, %v2195_v31  ;;  %v2196_v13 = vmul.f32 %v4122_v39, %v2164_v43 }
 0xf4e   :  { %v2215_v24 = vadd.f32 %v3764_v44, %v2205_v22  ;;  %v2206_v30 = vmul.f32 %v3763_v0, %v2196_v13 }
 0xf4f   :  { %v4124_v21 = vpop.eup %4123 }
 0xf50   :  { %v4126_v47 = vpop.eup %4125  ;;  %v2216_v9 = vadd.f32 %v3764_v44, %v2206_v30  ;;  %v2198_v51 = vmul.f32 %v4124_v21, %v2166_v26  ;;  %v2223_v49 = vmul.f32 0.044715, %v2215_v24  ;;  %v2219_v31 = vmul.f32 0.5, %v2215_v24 }
 0xf51   :  { %v2197_v48 = vmul.f32 %v4126_v47, %v2165_v52 }
 0xf52   :  { %v2208_v50 = vmul.f32 %v3763_v0, %v2198_v51  ;;  %v2224_v27 = vmul.f32 0.044715, %v2216_v9  ;;  %v2227_v18 = vmul.f32 %v2223_v49, %v2215_v24  ;;  %v2220_v39 = vmul.f32 0.5, %v2216_v9 }
 0xf53   :  { %v2207_v58 = vmul.f32 %v3763_v0, %v2197_v48 }
 0xf54   :  { %v2218_v12 = vadd.f32 %v3764_v44, %v2208_v50  ;;  %v2228_v32 = vmul.f32 %v2224_v27, %v2216_v9  ;;  %v2231_v25 = vmul.f32 %v2227_v18, %v2215_v24 }
 0xf55   :  { %v2217_v23 = vadd.f32 %v3764_v44, %v2207_v58 }
 0xf56   :  { %v2232_v40 = vmul.f32 %v2228_v32, %v2216_v9  ;;  %v2235_v35 = vadd.f32 %v2231_v25, %v2215_v24  ;;  %v2226_v6 = vmul.f32 0.044715, %v2218_v12  ;;  %v2222_v51 = vmul.f32 0.5, %v2218_v12  ;;  %v3765_v24 = vld [vmem:[%s5952_s12 + $0x2] ss:$0 sm:$0xff] }
 0xf57   :  { %v2225_v43 = vmul.f32 0.044715, %v2217_v23  ;;  %v2221_v48 = vmul.f32 0.5, %v2217_v23 }
 0xf58   :  { %v2236_v1 = vadd.f32 %v2232_v40, %v2216_v9  ;;  %v2239_v10 = vmul.f32 0.7978846, %v2235_v35  ;;  %v2230_v41 = vmul.f32 %v2226_v6, %v2218_v12 }
 0xf59   :  { %v2229_v33 = vmul.f32 %v2225_v43, %v2217_v23 }
 0xf5a   :  { %v2240_v8 = vmul.f32 0.7978846, %v2236_v1  ;;  %4127 = vtanh.f32 %v2239_v10  ;;  %v2234_v26 = vmul.f32 %v2230_v41, %v2218_v12 }
 0xf5b   :  { %v2233_v52 = vmul.f32 %v2229_v33, %v2217_v23 }
 0xf5c   :  { %4129 = vtanh.f32 %v2240_v8  ;;  %v2238_v28 = vadd.f32 %v2234_v26, %v2218_v12 }
 0xf5d   :  { %v2237_v53 = vadd.f32 %v2233_v52, %v2217_v23 }
 0xf5e   :  { %v2242_v3 = vmul.f32 0.7978846, %v2238_v28 }
 0xf5f   :  { %v2241_v34 = vmul.f32 0.7978846, %v2237_v53 }
 0xf60   :  { %4131 = vtanh.f32 %v2242_v3 }
 0xf61   :  { %4133 = vtanh.f32 %v2241_v34 }
 0xf64   :  { %v4128_v42 = vpop.eup %4127 }
 0xf65   :  { %v2247_v2 = vadd.f32 1.0, %v4128_v42 }
 0xf66   :  { %v4130_v0 = vpop.eup %4129 }
 0xf67   :  { %v2248_v44 = vadd.f32 1.0, %v4130_v0  ;;  %v2251_v22 = vmul.f32 %v2247_v2, %v2219_v31 }
 0xf69   :  { %v2252_v13 = vmul.f32 %v2248_v44, %v2220_v39 }
 0xf6a   :  { %v4132_v30 = vpop.eup %4131 }
 0xf6b   :  { %v4134_v21 = vpop.eup %4133  ;;  %v2255_v47 = vpack.c.bf16 %v2252_v13, %v2251_v22  ;;  %v2250_v49 = vadd.f32 1.0, %v4132_v30 }
 0xf6c   :  { %v2249_v50 = vadd.f32 1.0, %v4134_v21 }
 0xf6d   :  { %3891 = vmatprep.mubr.msk.bf16.mxu0 %vm425_vm6, %v2255_v47  ;;  %v2254_v27 = vmul.f32 %v2250_v49, %v2222_v51 }
 0xf6e   :  { %v2253_v18 = vmul.f32 %v2249_v50, %v2221_v48 }
 0xf70   :  { %v2256_v58 = vpack.c.bf16 %v2254_v27, %v2253_v18 }
 0xf72   :  { %3892 = vmatmul.mubr.msk.bf16.vlgmr.msra.gmra.mrb[4].mxu0 %vm425_vm6, %v2256_v58 }
0x1045   :  { %v3893_v9 = vpop.f32.mrb[4].mxu0 }
0x1046   :  { %v2305_v32 = vpop.f32.mrb[5].mxu0  ;;  %v2314_v43 = vadd.f32 %v3893_v9, %v3765_v24 }
0x1047   :  { %v2306_v25 = vadd.f32 %v3765_v24, %v2305_v32  ;;  %v3894_v40 = vpop.f32.mrb[6].mxu0 }
0x1048   :  { %v2317_v35 = vadd.f32 %v3894_v40, %v3765_v24  ;;  %v2308_v12 = vpop.f32.mrb[7].mxu0  ;;  %v2326_v41 = vsel %vm425_vm6, %v2314_v43, 0.0 }
0x1049   :  { %v2309_v6 = vadd.f32 %v3765_v24, %v2308_v12  ;;  %v2320_v23 = vsel %vm425_vm6, %v2306_v25, 0.0 }
0x104a   :  { %2321 = vadd.xlane.f32.xlu0 %v2320_v23  ;;  %v2329_v1 = vsel %vm425_vm6, %v2317_v35, 0.0 }
0x104b   :  { %2330 = vadd.xlane.f32.xlu1 %v2329_v1  ;;  %v2323_v10 = vsel %vm425_vm6, %v2309_v6, 0.0  ;;  %v3769_v1 = vld [vmem:[%s5954_s14 + $0x2] ss:$0 sm:$0xff] }
0x104e   :  { %2324 = vadd.xlane.f32.xlu0 %v2323_v10 }
0x104f   :  { %2327 = vadd.xlane.f32.xlu1 %v2326_v41 }
0x10d7   :  { %v2322_v33 = vpop.xlane.xlu0 %2321 }
0x10d8   :  { %v2332_v8 = vmul.f32 0.03125, %v2322_v33  ;;  %v2331_v26 = vpop.xlane.xlu1 %2330 }
0x10d9   :  { %v2335_v52 = vmul.f32 0.03125, %v2331_v26 }
0x10da   :  { %v2336_v28 = vsub.f32 %v2306_v25, %v2332_v8 }
0x10db   :  { %v2339_v53 = vsub.f32 %v2317_v35, %v2335_v52  ;;  %v2325_v3 = vpop.xlane.xlu0 %2324 }
0x10dc   :  { %v2333_v34 = vmul.f32 0.03125, %v2325_v3  ;;  %v2328_v42 = vpop.xlane.xlu1 %2327  ;;  %v2340_v2 = vmul.f32 %v2336_v28, %v2336_v28 }
0x10dd   :  { %v2334_v0 = vmul.f32 0.03125, %v2328_v42  ;;  %v2343_v31 = vmul.f32 %v2339_v53, %v2339_v53 }
0x10de   :  { %v2337_v39 = vsub.f32 %v2309_v6, %v2333_v34  ;;  %v2344_v44 = vsel %vm425_vm6, %v2340_v2, 0.0  ;;  %v3768_v6 = vld [vmem:[%s5953_s13 + $0x2] ss:$0 sm:$0xff] }
0x10df   :  { %v2338_v22 = vsub.f32 %v2314_v43, %v2334_v0  ;;  %2345 = vadd.xlane.f32.xlu0 %v2344_v44  ;;  %v2353_v13 = vsel %vm425_vm6, %v2343_v31, 0.0 }
0x10e0   :  { %2354 = vadd.xlane.f32.xlu1 %v2353_v13  ;;  %v2341_v30 = vmul.f32 %v2337_v39, %v2337_v39 }
0x10e1   :  { %v2342_v21 = vmul.f32 %v2338_v22, %v2338_v22 }
0x10e2   :  { %v2347_v47 = vsel %vm425_vm6, %v2341_v30, 0.0 }
0x10e3   :  { %2348 = vadd.xlane.f32.xlu0 %v2347_v47  ;;  %v2350_v51 = vsel %vm425_vm6, %v2342_v21, 0.0 }
0x10e4   :  { %2351 = vadd.xlane.f32.xlu1 %v2350_v51 }
0x116c   :  { %v2346_v49 = vpop.xlane.xlu0 %2345 }
0x116d   :  { %v2356_v48 = vmul.f32 0.03125, %v2346_v49  ;;  %v2355_v50 = vpop.xlane.xlu1 %2354 }
0x116e   :  { %v2359_v27 = vmul.f32 0.03125, %v2355_v50 }
0x116f   :  { %v2360_v18 = vadd.f32 1e-05, %v2356_v48 }
0x1170   :  { %v2363_v58 = vadd.f32 1e-05, %v2359_v27  ;;  %v2349_v24 = vpop.xlane.xlu0 %2348 }
0x1171   :  { %4135 = vrsqrt.f32 %v2360_v18  ;;  %v2357_v9 = vmul.f32 0.03125, %v2349_v24  ;;  %v2352_v32 = vpop.xlane.xlu1 %2351 }
0x1172   :  { %4137 = vrsqrt.f32 %v2363_v58  ;;  %v2358_v25 = vmul.f32 0.03125, %v2352_v32 }
0x1173   :  { %v2361_v40 = vadd.f32 1e-05, %v2357_v9 }
0x1174   :  { %v2362_v35 = vadd.f32 1e-05, %v2358_v25 }
0x1175   :  { %4139 = vrsqrt.f32 %v2361_v40 }
0x1176   :  { %4141 = vrsqrt.f32 %v2362_v35 }
0x117b   :  { %v4136_v12 = vpop.eup %4135 }
0x117c   :  { %v4138_v23 = vpop.eup %4137  ;;  %v2368_v43 = vmul.f32 %v4136_v12, %v2336_v28 }
0x117d   :  { %v2371_v10 = vmul.f32 %v4138_v23, %v2339_v53 }
0x117e   :  { %v2378_v41 = vmul.f32 %v3768_v6, %v2368_v43 }
0x117f   :  { %v4140_v33 = vpop.eup %4139  ;;  %v2381_v8 = vmul.f32 %v3768_v6, %v2371_v10 }
0x1180   :  { %v4142_v26 = vpop.eup %4141  ;;  %v2388_v52 = vadd.f32 %v3769_v1, %v2378_v41  ;;  %v2369_v3 = vmul.f32 %v4140_v33, %v2337_v39 }
0x1181   :  { %v2391_v34 = vadd.f32 %v3769_v1, %v2381_v8  ;;  %v2370_v42 = vmul.f32 %v4142_v26, %v2338_v22 }
0x1182   :  { %v2379_v2 = vmul.f32 %v3768_v6, %v2369_v3  ;;  %v2396_v0 = vmul.f32 0.044715, %v2388_v52 }
0x1183   :  { %v2399_v31 = vmul.f32 0.044715, %v2391_v34  ;;  %v2380_v44 = vmul.f32 %v3768_v6, %v2370_v42  ;;  %v2392_v6 = vmul.f32 0.5, %v2388_v52  ;;  %v2395_v43 = vmul.f32 0.5, %v2391_v34 }
0x1184   :  { %v2389_v13 = vadd.f32 %v3769_v1, %v2379_v2  ;;  %v2400_v30 = vmul.f32 %v2396_v0, %v2388_v52 }
0x1185   :  { %v2403_v28 = vmul.f32 %v2399_v31, %v2391_v34  ;;  %v2390_v21 = vadd.f32 %v3769_v1, %v2380_v44 }
0x1186   :  { %v2397_v47 = vmul.f32 0.044715, %v2389_v13  ;;  %v2404_v51 = vmul.f32 %v2400_v30, %v2388_v52  ;;  %v2393_v26 = vmul.f32 0.5, %v2389_v13 }
0x1187   :  { %v2407_v49 = vmul.f32 %v2403_v28, %v2391_v34  ;;  %v2398_v53 = vmul.f32 0.044715, %v2390_v21  ;;  %v2394_v0 = vmul.f32 0.5, %v2390_v21 }
0x1188   :  { %v2401_v48 = vmul.f32 %v2397_v47, %v2389_v13  ;;  %v2408_v50 = vadd.f32 %v2404_v51, %v2388_v52  ;;  %v133_v52 = vld [vmem:[%s5947_s7 + $0xc] sm:$0x7] }
0x1189   :  { %v2411_v27 = vadd.f32 %v2407_v49, %v2391_v34  ;;  %v2402_v18 = vmul.f32 %v2398_v53, %v2390_v21 }
0x118a   :  { %v2405_v58 = vmul.f32 %v2401_v48, %v2389_v13  ;;  %v2412_v39 = vmul.f32 0.7978846, %v2408_v50  ;;  %v2451_v48 = vrot.slane %v133_v52, %v4391_v5 }
0x118b   :  { %v2415_v24 = vmul.f32 0.7978846, %v2411_v27  ;;  %v2406_v22 = vmul.f32 %v2402_v18, %v2390_v21  ;;  %v6037_v18 = vld [vmem:[#allocation10_spill] sm:$0xff] }
0x118c   :  { %v2409_v9 = vadd.f32 %v2405_v58, %v2389_v13  ;;  %4143 = vtanh.f32 %v2412_v39 }
0x118d   :  { %4145 = vtanh.f32 %v2415_v24  ;;  %v2410_v32 = vadd.f32 %v2406_v22, %v2390_v21  ;;  %v2459_v21 = vrot.slane %v133_v52, %v4468_v46 }
0x118e   :  { %v2413_v25 = vmul.f32 0.7978846, %v2409_v9 }
0x118f   :  { %v2414_v40 = vmul.f32 0.7978846, %v2410_v32 }
0x1190   :  { %4147 = vtanh.f32 %v2413_v25 }
0x1191   :  { %4149 = vtanh.f32 %v2414_v40 }
0x1196   :  { %v4144_v35 = vpop.eup %4143 }
0x1197   :  { %v4146_v12 = vpop.eup %4145  ;;  %v2420_v23 = vadd.f32 1.0, %v4144_v35  ;;  %v6038_v35 = vld [vmem:[#allocation11_spill] sm:$0xff] }
0x1198   :  { %v2423_v1 = vadd.f32 1.0, %v4146_v12 }
0x1199   :  { %v2424_v10 = vmul.f32 %v2420_v23, %v2392_v6 }
0x119a   :  { %v4148_v41 = vpop.eup %4147  ;;  %v2427_v33 = vmul.f32 %v2423_v1, %v2395_v43 }
0x119b   :  { %v4150_v8 = vpop.eup %4149  ;;  %v2421_v3 = vadd.f32 1.0, %v4148_v41  ;;  %v5348_v42 = vadd.f32 %v2424_v10, %v5248_v11  ;;  %v6039_v41 = vld [vmem:[#allocation12_spill] sm:$0xff] }
0x119c   :  { %v5351_v2 = vadd.f32 %v2427_v33, %v5255_v55  ;;  %v2422_v31 = vadd.f32 1.0, %v4150_v8  ;;  %v6040_v8 = vld [vmem:[#allocation13_spill] sm:$0xff] }
0x119d   :  { %v2425_v34 = vmul.f32 %v2421_v3, %v2393_v26  ;;  %v2432_v44 = vmul.f32 %v5348_v42, %v4485_v57 }
0x119e   :  { %v2435_v13 = vmul.f32 %v5351_v2, %v4483_v56  ;;  %v2426_v30 = vmul.f32 %v2422_v31, %v2394_v0  ;;  %v3770_v0 = vld [vmem:[%s5948_s8 + $0x3] ss:$0 sm:$0xff] }
0x119f   :  { %v5361_v11 = vadd.f32 %v2425_v34, %v5279_v63  ;;  %v2436_v28 = vrot.slane %v2432_v44, 5  ;;  %v2468_v55 = vrot.slane %v2432_v44, 3  ;;  %v2483_v63 = vrot.slane %v133_v52, %v6034_v62 }
0x11a0   :  { %v2439_v47 = vrot.slane %v2435_v13, 5  ;;  %v5365_v51 = vadd.f32 %v2426_v30, %v5265_v20  ;;  %v2471_v49 = vrot.slane %v2435_v13, 3  ;;  %v2460_v24 = vmul.f32 %v2459_v21, %v2432_v44 }
0x11a1   :  { %v2433_v53 = vmul.f32 %v5361_v11, %v6033_v59  ;;  %v2463_v44 = vmul.f32 %v2459_v21, %v2435_v13 }
0x11a2   :  { %v2443_v50 = vsel %vm720_vm8, %v2439_v47, %v2436_v28  ;;  %v2434_v27 = vmul.f32 %v5365_v51, %v4513_v7  ;;  %v2475_v46 = vsel %vm773_vm9, %v2471_v49, %v2468_v55 }
0x11a3   :  { %v2444_v20 = vmul.f32 %v6037_v18, %v2443_v50  ;;  %v2469_v58 = vrot.slane %v2433_v53, 3  ;;  %v2437_v39 = vrot.slane %v2433_v53, 5  ;;  %v2461_v22 = vmul.f32 %v2459_v21, %v2433_v53 }
0x11a4   :  { %v2470_v9 = vrot.slane %v2434_v27, 3  ;;  %v2438_v32 = vrot.slane %v2434_v27, 5  ;;  %v2479_v12 = vmul.f32 %v6038_v35, %v2475_v46  ;;  %v2462_v52 = vmul.f32 %v2459_v21, %v2434_v27 }
0x11a5   :  { %v2452_v25 = vmul.f32 %v2451_v48, %v2444_v20  ;;  %v2474_v40 = vsel %vm773_vm9, %v2468_v55, %v2469_v58  ;;  %v2442_v62 = vsel %vm720_vm8, %v2436_v28, %v2437_v39 }
0x11a6   :  { %v2484_v6 = vmul.f32 %v2483_v63, %v2474_v40  ;;  %v2453_v23 = vmul.f32 %v2451_v48, %v2442_v62  ;;  %v2473_v43 = vsel %vm773_vm9, %v2469_v58, %v2470_v9  ;;  %v2441_v1 = vsel %vm720_vm8, %v2437_v39, %v2438_v32 }
0x11a7   :  { %v2464_v10 = vadd.f32 %v2460_v24, %v2452_v25  ;;  %v2477_v33 = vmul.f32 %v6039_v41, %v2473_v43  ;;  %v2446_v26 = vmul.f32 %v6040_v8, %v2441_v1  ;;  %v2472_v3 = vsel %vm773_vm9, %v2470_v9, %v2471_v49 }
0x11a8   :  { %v2465_v31 = vadd.f32 %v2461_v22, %v2453_v23  ;;  %v2440_v34 = vsel %vm720_vm8, %v2438_v32, %v2439_v47  ;;  %v2486_v50 = vmul.f32 %v2483_v63, %v2472_v3  ;;  %v2487_v46 = vmul.f32 %v2483_v63, %v2479_v12 }
0x11a9   :  { %v2488_v30 = vadd.f32 %v2484_v6, %v2464_v10  ;;  %v2485_v28 = vmul.f32 %v2483_v63, %v2477_v33  ;;  %v2454_v55 = vmul.f32 %v2451_v48, %v2446_v26  ;;  %v2455_v53 = vmul.f32 %v2451_v48, %v2440_v34  ;;  %v159_v34 = vld [vmem:[%s5949_s11 + $0x68] sm:$0xff] }
0x11aa   :  { %vm6049_vm9 = vcmask 7168  }
0x11ab   :  { %v2498_v18 = vadd.f32 %v3770_v0, %v2488_v30  ;;  %v2489_v20 = vadd.f32 %v2485_v28, %v2465_v31  ;;  %v2466_v58 = vadd.f32 %v2462_v52, %v2454_v55  ;;  %v2467_v49 = vadd.f32 %v2463_v44, %v2455_v53  ;;  %v158_v52 = vld [vmem:[%s5949_s11 + $0x60] sm:$0xff]  ;;  %v160_v44 = vld [vmem:[%s5949_s11 + $0x70] sm:$0xff]  ;;  %v161_v28 = vld [vmem:[%s5949_s11 + $0x78] sm:$0xff] }
0x11ac   :  { %v2612_v30 = vpack.c.bf16 %v159_v34, %v158_v52  ;;  %v2613_v55 = vpack.c.bf16 %v161_v28, %v160_v44  ;;  %v6041_v53 = vld [vmem:[#allocation16_spill] sm:$0xff] }
0x11ad   :  { %v2502_v39 = vsel %vm425_vm6, %v2498_v18, 0.0  ;;  %v2499_v24 = vadd.f32 %v3770_v0, %v2489_v20  ;;  %v2490_v9 = vadd.f32 %v2486_v50, %v2466_v58  ;;  %v2491_v22 = vadd.f32 %v2487_v46, %v2467_v49 }
0x11ae   :  { %2503 = vadd.xlane.f32.xlu0 %v2502_v39  ;;  %3895 = vmatprep.subr.bf16.mxu0 %v2612_v30 }
0x11af   :  { %v2505_v4 = vsel %vm425_vm6, %v2499_v24, 0.0  ;;  %v2500_v47 = vadd.f32 %v3770_v0, %v2490_v9  ;;  %v2501_v13 = vadd.f32 %v3770_v0, %v2491_v22  ;;  %3896 = vmatpush3.bf16.msra.mxu0 %v2612_v30 }
0x11b0   :  { %2506 = vadd.xlane.f32.xlu1 %v2505_v4  ;;  %3897 = vmatprep.subr.bf16.mxu0 %v2613_v55 }
0x11b1   :  { %v2508_v21 = vsel %vm425_vm6, %v2500_v47, 0.0  ;;  %v2511_v48 = vsel %vm425_vm6, %v2501_v13, 0.0 }
0x11b2   :  { %2509 = vadd.xlane.f32.xlu0 %v2508_v21 }
0x11b3   :  { %3898 = vmatpush3.bf16.msra.mxu0 %v2613_v55 }
0x11b4   :  { %2512 = vadd.xlane.f32.xlu1 %v2511_v48  ;;  %3935 = vmatprep.subr.msk.bf16.mxu0 %vm4798_vm2, %v6041_v53  ;;  %v3771_v48 = vld [vmem:[%s5950_s9 + $0x3] ss:$0 sm:$0xff] }
0x123b   :  { %v2504_v63 = vpop.xlane.xlu0 %2503 }
0x123c   :  { %v2514_v27 = vmul.f32 0.03125, %v2504_v63 }
0x123d   :  { %v2507_v32 = vpop.xlane.xlu1 %2506 }
0x123e   :  { %v2518_v25 = vsub.f32 %v2498_v18, %v2514_v27  ;;  %v2515_v40 = vmul.f32 0.03125, %v2507_v32  ;;  %v3772_v32 = vld [vmem:[%s5951_s10 + $0x3] ss:$0 sm:$0xff] }
0x123f   :  { %v2510_v62 = vpop.xlane.xlu0 %2509 }
0x1240   :  { %v2519_v35 = vsub.f32 %v2499_v24, %v2515_v40  ;;  %v2516_v12 = vmul.f32 0.03125, %v2510_v62  ;;  %v2522_v6 = vmul.f32 %v2518_v25, %v2518_v25 }
0x1241   :  { %v2513_v23 = vpop.xlane.xlu1 %2512 }
0x1242   :  { %v2520_v43 = vsub.f32 %v2500_v47, %v2516_v12  ;;  %v2517_v1 = vmul.f32 0.03125, %v2513_v23  ;;  %v2526_v10 = vsel %vm425_vm6, %v2522_v6, 0.0  ;;  %v2523_v41 = vmul.f32 %v2519_v35, %v2519_v35 }
0x1243   :  { %2527 = vadd.xlane.f32.xlu0 %v2526_v10 }
0x1244   :  { %v2521_v33 = vsub.f32 %v2501_v13, %v2517_v1  ;;  %v2529_v8 = vsel %vm425_vm6, %v2523_v41, 0.0  ;;  %v2524_v26 = vmul.f32 %v2520_v43, %v2520_v43 }
0x1245   :  { %2530 = vadd.xlane.f32.xlu1 %v2529_v8 }
0x1246   :  { %v2532_v3 = vsel %vm425_vm6, %v2524_v26, 0.0  ;;  %v2525_v0 = vmul.f32 %v2521_v33, %v2521_v33 }
0x1247   :  { %2533 = vadd.xlane.f32.xlu0 %v2532_v3 }
0x1248   :  { %v2535_v31 = vsel %vm425_vm6, %v2525_v0, 0.0 }
0x1249   :  { %2536 = vadd.xlane.f32.xlu1 %v2535_v31 }
0x12d0   :  { %v2528_v46 = vpop.xlane.xlu0 %2527 }
0x12d1   :  { %v2538_v18 = vmul.f32 0.03125, %v2528_v46 }
0x12d2   :  { %v2531_v20 = vpop.xlane.xlu1 %2530 }
0x12d3   :  { %v2542_v58 = vadd.f32 1e-05, %v2538_v18  ;;  %v2539_v49 = vmul.f32 0.03125, %v2531_v20 }
0x12d4   :  { %v2534_v39 = vpop.xlane.xlu0 %2533 }
0x12d5   :  { %4151 = vrsqrt.f32 %v2542_v58  ;;  %v2543_v24 = vadd.f32 1e-05, %v2539_v49  ;;  %v2540_v9 = vmul.f32 0.03125, %v2534_v39 }
0x12d6   :  { %v2537_v22 = vpop.xlane.xlu1 %2536 }
0x12d7   :  { %4153 = vrsqrt.f32 %v2543_v24  ;;  %v2544_v4 = vadd.f32 1e-05, %v2540_v9  ;;  %v2541_v47 = vmul.f32 0.03125, %v2537_v22 }
0x12d9   :  { %4155 = vrsqrt.f32 %v2544_v4  ;;  %v2545_v13 = vadd.f32 1e-05, %v2541_v47 }
0x12db   :  { %4157 = vrsqrt.f32 %v2545_v13 }
0x12df   :  { %v4152_v21 = vpop.eup %4151 }
0x12e0   :  { %v2550_v63 = vmul.f32 %v4152_v21, %v2518_v25 }
0x12e1   :  { %v4154_v27 = vpop.eup %4153 }
0x12e2   :  { %v2560_v40 = vmul.f32 %v3771_v48, %v2550_v63  ;;  %v2551_v62 = vmul.f32 %v4154_v27, %v2519_v35 }
0x12e3   :  { %v4156_v12 = vpop.eup %4155 }
0x12e4   :  { %v2570_v6 = vadd.f32 %v3772_v32, %v2560_v40  ;;  %v2561_v23 = vmul.f32 %v3771_v48, %v2551_v62  ;;  %v2552_v1 = vmul.f32 %v4156_v12, %v2520_v43 }
0x12e5   :  { %v4158_v10 = vpop.eup %4157 }
0x12e6   :  { %v2571_v41 = vadd.f32 %v3772_v32, %v2561_v23  ;;  %v2562_v8 = vmul.f32 %v3771_v48, %v2552_v1  ;;  %v2553_v26 = vmul.f32 %v4158_v10, %v2521_v33  ;;  %v2578_v3 = vmul.f32 0.044715, %v2570_v6 }
0x12e8   :  { %v2572_v0 = vadd.f32 %v3772_v32, %v2562_v8  ;;  %v2563_v31 = vmul.f32 %v3771_v48, %v2553_v26  ;;  %v2579_v52 = vmul.f32 0.044715, %v2571_v41  ;;  %v2582_v25 = vmul.f32 %v2578_v3, %v2570_v6 }
0x12e9   :  { %v2574_v48 = vmul.f32 0.5, %v2570_v6  ;;  %v2575_v63 = vmul.f32 0.5, %v2571_v41 }
0x12ea   :  { %v2573_v34 = vadd.f32 %v3772_v32, %v2563_v31  ;;  %v2583_v44 = vmul.f32 %v2579_v52, %v2571_v41  ;;  %v2580_v30 = vmul.f32 0.044715, %v2572_v0  ;;  %v2586_v28 = vmul.f32 %v2582_v25, %v2570_v6 }
0x12eb   :  { %v2576_v10 = vmul.f32 0.5, %v2572_v0 }
0x12ec   :  { %v2587_v55 = vmul.f32 %v2583_v44, %v2571_v41  ;;  %v2581_v46 = vmul.f32 0.044715, %v2573_v34  ;;  %v2584_v35 = vmul.f32 %v2580_v30, %v2572_v0  ;;  %v2590_v18 = vadd.f32 %v2586_v28, %v2570_v6  ;;  %v3773_v6 = vld [vmem:[%s5952_s12 + $0x3] ss:$0 sm:$0xff] }
0x12ed   :  { %v2577_v8 = vmul.f32 0.5, %v2573_v34 }
0x12ee   :  { %v2591_v20 = vadd.f32 %v2587_v55, %v2571_v41  ;;  %v2585_v58 = vmul.f32 %v2581_v46, %v2573_v34  ;;  %v2588_v43 = vmul.f32 %v2584_v35, %v2572_v0  ;;  %v2594_v49 = vmul.f32 0.7978846, %v2590_v18 }
0x12f0   :  { %v2595_v39 = vmul.f32 0.7978846, %v2591_v20  ;;  %v2589_v24 = vmul.f32 %v2585_v58, %v2573_v34  ;;  %v2592_v33 = vadd.f32 %v2588_v43, %v2572_v0  ;;  %4159 = vtanh.f32 %v2594_v49 }
0x12f2   :  { %4161 = vtanh.f32 %v2595_v39  ;;  %v2593_v9 = vadd.f32 %v2589_v24, %v2573_v34  ;;  %v2596_v22 = vmul.f32 0.7978846, %v2592_v33 }
0x12f4   :  { %v2597_v4 = vmul.f32 0.7978846, %v2593_v9  ;;  %4163 = vtanh.f32 %v2596_v22 }
0x12f6   :  { %4165 = vtanh.f32 %v2597_v4 }
0x12fa   :  { %v4160_v47 = vpop.eup %4159 }
0x12fb   :  { %v2602_v21 = vadd.f32 1.0, %v4160_v47 }
0x12fc   :  { %v4162_v13 = vpop.eup %4161 }
0x12fd   :  { %v2603_v27 = vadd.f32 1.0, %v4162_v13  ;;  %v2606_v40 = vmul.f32 %v2602_v21, %v2574_v48 }
0x12fe   :  { %v4164_v32 = vpop.eup %4163 }
0x12ff   :  { %v2607_v62 = vmul.f32 %v2603_v27, %v2575_v63  ;;  %v2604_v12 = vadd.f32 1.0, %v4164_v32 }
0x1300   :  { %v4166_v23 = vpop.eup %4165 }
0x1301   :  { %v2610_v1 = vpack.c.bf16 %v2607_v62, %v2606_v40  ;;  %v2605_v26 = vadd.f32 1.0, %v4166_v23  ;;  %v2608_v3 = vmul.f32 %v2604_v12, %v2576_v10  ;;  %v178_v12 = vld [vmem:[%s5955_s15 + $0x20] sm:$0xff]  ;;  %v179_v23 = vld [vmem:[%s5955_s15 + $0x28] sm:$0xff] }
0x1302   :  { %v2793_v10 = vpack.c.bf16 %v179_v23, %v178_v12 }
0x1303   :  { %3899 = vmatprep.mubr.msk.bf16.mxu0 %vm425_vm6, %v2610_v1  ;;  %v2609_v31 = vmul.f32 %v2605_v26, %v2577_v8  ;;  %v180_v1 = vld [vmem:[%s5955_s15 + $0x30] sm:$0xff]  ;;  %v181_v8 = vld [vmem:[%s5955_s15 + $0x38] sm:$0xff] }
0x1304   :  { %v2794_v26 = vpack.c.bf16 %v181_v8, %v180_v1  ;;  %3903 = vmatprep.subr.bf16.mxu1 %v2793_v10 }
0x1305   :  { %v2611_v52 = vpack.c.bf16 %v2609_v31, %v2608_v3  ;;  %3904 = vmatpush3.bf16.msra.mxu1 %v2793_v10 }
0x1306   :  { %3905 = vmatprep.subr.bf16.mxu1 %v2794_v26 }
0x1307   :  { %3900 = vmatmul.mubr.msk.bf16.vlgmr.msra.gmra.mrb[8].mxu0 %vm425_vm6, %v2611_v52 }
0x1308   :  { %3938 = vmatpush3.bf16.msk.msra.mxu0 %vm4798_vm2, %v6041_v53 }
0x1309   :  { %3906 = vmatpush3.bf16.msra.mxu1 %v2794_v26 }
0x13da   :  { %v3901_v41 = vpop.f32.mrb[8].mxu0 }
0x13db   :  { %v2660_v25 = vpop.f32.mrb[9].mxu0  ;;  %v2669_v30 = vadd.f32 %v3901_v41, %v3773_v6 }
0x13dc   :  { %v2661_v0 = vadd.f32 %v3773_v6, %v2660_v25  ;;  %v3902_v34 = vpop.f32.mrb[10].mxu0 }
0x13dd   :  { %v2663_v44 = vpop.f32.mrb[11].mxu0  ;;  %v2672_v46 = vadd.f32 %v3902_v34, %v3773_v6  ;;  %v2681_v53 = vsel %vm425_vm6, %v2669_v30, 0.0 }
0x13de   :  { %v2664_v28 = vadd.f32 %v3773_v6, %v2663_v44  ;;  %v2675_v55 = vsel %vm425_vm6, %v2661_v0, 0.0 }
0x13df   :  { %2676 = vadd.xlane.f32.xlu0 %v2675_v55  ;;  %v2684_v50 = vsel %vm425_vm6, %v2672_v46, 0.0 }
0x13e0   :  { %v2678_v35 = vsel %vm425_vm6, %v2664_v28, 0.0 }
0x13e1   :  { %2679 = vadd.xlane.f32.xlu1 %v2678_v35  ;;  %v3776_v35 = vld [vmem:[%s5953_s13 + $0x3] ss:$0 sm:$0xff] }
0x13e3   :  { %2682 = vadd.xlane.f32.xlu0 %v2681_v53 }
0x13e5   :  { %2685 = vadd.xlane.f32.xlu1 %v2684_v50 }
0x146c   :  { %v2677_v18 = vpop.xlane.xlu0 %2676 }
0x146d   :  { %v2687_v20 = vmul.f32 0.03125, %v2677_v18  ;;  %v3777_v18 = vld [vmem:[%s5954_s14 + $0x3] ss:$0 sm:$0xff] }
0x146e   :  { %v2680_v58 = vpop.xlane.xlu1 %2679 }
0x146f   :  { %v2691_v43 = vsub.f32 %v2661_v0, %v2687_v20  ;;  %v2688_v49 = vmul.f32 0.03125, %v2680_v58 }
0x1470   :  { %v2683_v39 = vpop.xlane.xlu0 %2682 }
0x1471   :  { %v2692_v24 = vsub.f32 %v2664_v28, %v2688_v49  ;;  %v2689_v33 = vmul.f32 0.03125, %v2683_v39  ;;  %v2695_v9 = vmul.f32 %v2691_v43, %v2691_v43 }
0x1472   :  { %v2686_v22 = vpop.xlane.xlu1 %2685 }
0x1473   :  { %v2693_v4 = vsub.f32 %v2669_v30, %v2689_v33  ;;  %v2690_v47 = vmul.f32 0.03125, %v2686_v22  ;;  %v2699_v13 = vsel %vm425_vm6, %v2695_v9, 0.0  ;;  %v2696_v21 = vmul.f32 %v2692_v24, %v2692_v24 }
0x1474   :  { %2700 = vadd.xlane.f32.xlu0 %v2699_v13 }
0x1475   :  { %v2694_v48 = vsub.f32 %v2672_v46, %v2690_v47  ;;  %v2702_v63 = vsel %vm425_vm6, %v2696_v21, 0.0  ;;  %v2697_v27 = vmul.f32 %v2693_v4, %v2693_v4 }
0x1476   :  { %2703 = vadd.xlane.f32.xlu1 %v2702_v63 }
0x1477   :  { %v2705_v32 = vsel %vm425_vm6, %v2697_v27, 0.0  ;;  %v2698_v40 = vmul.f32 %v2694_v48, %v2694_v48 }
0x1478   :  { %2706 = vadd.xlane.f32.xlu0 %v2705_v32 }
0x1479   :  { %v2708_v62 = vsel %vm425_vm6, %v2698_v40, 0.0 }
0x147a   :  { %2709 = vadd.xlane.f32.xlu1 %v2708_v62 }
0x1501   :  { %v2701_v3 = vpop.xlane.xlu0 %2700 }
0x1502   :  { %v2711_v31 = vmul.f32 0.03125, %v2701_v3 }
0x1503   :  { %v2704_v52 = vpop.xlane.xlu1 %2703 }
0x1504   :  { %v2715_v6 = vadd.f32 1e-05, %v2711_v31  ;;  %v2712_v41 = vmul.f32 0.03125, %v2704_v52 }
0x1505   :  { %v2707_v25 = vpop.xlane.xlu0 %2706 }
0x1506   :  { %4167 = vrsqrt.f32 %v2715_v6  ;;  %v2716_v0 = vadd.f32 1e-05, %v2712_v41  ;;  %v2713_v34 = vmul.f32 0.03125, %v2707_v25 }
0x1507   :  { %v2710_v44 = vpop.xlane.xlu1 %2709 }
0x1508   :  { %4169 = vrsqrt.f32 %v2716_v0  ;;  %v2717_v30 = vadd.f32 1e-05, %v2713_v34  ;;  %v2714_v28 = vmul.f32 0.03125, %v2710_v44 }
0x150a   :  { %4171 = vrsqrt.f32 %v2717_v30  ;;  %v2718_v55 = vadd.f32 1e-05, %v2714_v28 }
0x150c   :  { %4173 = vrsqrt.f32 %v2718_v55 }
0x1510   :  { %v4168_v46 = vpop.eup %4167 }
0x1511   :  { %v2723_v53 = vmul.f32 %v4168_v46, %v2691_v43 }
0x1512   :  { %v4170_v50 = vpop.eup %4169 }
0x1513   :  { %v2733_v20 = vmul.f32 %v3776_v35, %v2723_v53  ;;  %v2724_v58 = vmul.f32 %v4170_v50, %v2692_v24 }
0x1514   :  { %v4172_v49 = vpop.eup %4171 }
0x1515   :  { %v2743_v39 = vadd.f32 %v3777_v18, %v2733_v20  ;;  %v2734_v33 = vmul.f32 %v3776_v35, %v2724_v58  ;;  %v2725_v9 = vmul.f32 %v4172_v49, %v2693_v4 }
0x1516   :  { %v4174_v22 = vpop.eup %4173 }
0x1517   :  { %v2744_v47 = vadd.f32 %v3777_v18, %v2734_v33  ;;  %v2735_v13 = vmul.f32 %v3776_v35, %v2725_v9  ;;  %v2726_v21 = vmul.f32 %v4174_v22, %v2694_v48  ;;  %v2751_v63 = vmul.f32 0.044715, %v2743_v39 }
0x1518   :  { %v2747_v28 = vmul.f32 0.5, %v2743_v39 }
0x1519   :  { %v2745_v27 = vadd.f32 %v3777_v18, %v2735_v13  ;;  %v2736_v32 = vmul.f32 %v3776_v35, %v2726_v21  ;;  %v2752_v40 = vmul.f32 0.044715, %v2744_v47  ;;  %v2755_v43 = vmul.f32 %v2751_v63, %v2743_v39 }
0x151a   :  { %v2748_v46 = vmul.f32 0.5, %v2744_v47 }
0x151b   :  { %v2753_v62 = vmul.f32 0.044715, %v2745_v27  ;;  %v2746_v12 = vadd.f32 %v3777_v18, %v2736_v32  ;;  %v2756_v23 = vmul.f32 %v2752_v40, %v2744_v47  ;;  %v2759_v1 = vmul.f32 %v2755_v43, %v2743_v39 }
0x151c   :  { %v2749_v20 = vmul.f32 0.5, %v2745_v27 }
0x151d   :  { %v2757_v10 = vmul.f32 %v2753_v62, %v2745_v27  ;;  %v2754_v8 = vmul.f32 0.044715, %v2746_v12  ;;  %v2760_v24 = vmul.f32 %v2756_v23, %v2744_v47  ;;  %v2763_v26 = vadd.f32 %v2759_v1, %v2743_v39  ;;  %v3778_v62 = vld [vmem:[%s5956_s16 + $0x1] ss:$0 sm:$0xff] }
0x151e   :  { %v2750_v22 = vmul.f32 0.5, %v2746_v12 }
0x151f   :  { %v2761_v3 = vmul.f32 %v2757_v10, %v2745_v27  ;;  %v2758_v31 = vmul.f32 %v2754_v8, %v2746_v12  ;;  %v2764_v4 = vadd.f32 %v2760_v24, %v2744_v47  ;;  %v2767_v52 = vmul.f32 0.7978846, %v2763_v26 }
0x1521   :  { %v2765_v6 = vadd.f32 %v2761_v3, %v2745_v27  ;;  %v2762_v41 = vmul.f32 %v2758_v31, %v2746_v12  ;;  %v2768_v48 = vmul.f32 0.7978846, %v2764_v4  ;;  %4175 = vtanh.f32 %v2767_v52 }
0x1523   :  { %v2766_v25 = vadd.f32 %v2762_v41, %v2746_v12  ;;  %4177 = vtanh.f32 %v2768_v48  ;;  %v2769_v0 = vmul.f32 0.7978846, %v2765_v6 }
0x1525   :  { %v2770_v34 = vmul.f32 0.7978846, %v2766_v25  ;;  %4179 = vtanh.f32 %v2769_v0 }
0x1527   :  { %4181 = vtanh.f32 %v2770_v34 }
0x152b   :  { %v4176_v44 = vpop.eup %4175 }
0x152c   :  { %v2775_v55 = vadd.f32 1.0, %v4176_v44 }
0x152d   :  { %v4178_v30 = vpop.eup %4177 }
0x152e   :  { %v2776_v35 = vadd.f32 1.0, %v4178_v30  ;;  %v2779_v50 = vmul.f32 %v2775_v55, %v2747_v28 }
0x152f   :  { %v4180_v53 = vpop.eup %4179 }
0x1530   :  { %v2780_v18 = vmul.f32 %v2776_v35, %v2748_v46  ;;  %v2777_v58 = vadd.f32 1.0, %v4180_v53  ;;  %v2783_v33 = vadd.f32 %v2779_v50, %v5348_v42 }
0x1531   :  { %v4182_v49 = vpop.eup %4181 }
0x1532   :  { %v2784_v9 = vadd.f32 %v2780_v18, %v5361_v11  ;;  %v2778_v13 = vadd.f32 1.0, %v4182_v49  ;;  %v2781_v21 = vmul.f32 %v2777_v58, %v2749_v20  ;;  %v2787_v63 = vmul.f32 %v2783_v33, %v4485_v57 }
0x1534   :  { %v2788_v39 = vmul.f32 %v2784_v9, %v6033_v59  ;;  %v2782_v32 = vmul.f32 %v2778_v13, %v2750_v22  ;;  %v2785_v47 = vadd.f32 %v2781_v21, %v5365_v51 }
0x1536   :  { %v2791_v40 = vpack.c.bf16 %v2788_v39, %v2787_v63  ;;  %v2786_v43 = vadd.f32 %v2782_v32, %v5351_v2  ;;  %v2789_v27 = vmul.f32 %v2785_v47, %v4513_v7 }
0x1538   :  { %3907 = vmatprep.mubr.msk.bf16.mxu1 %vm425_vm6, %v2791_v40  ;;  %v2790_v42 = vmul.f32 %v2786_v43, %v4483_v56 }
0x153a   :  { %v2792_v11 = vpack.c.bf16 %v2790_v42, %v2789_v27 }
0x153c   :  { %3908 = vmatmul.mubr.msk.bf16.vlgmr.msra.gmra.mrb[16].mxu1 %vm425_vm6, %v2792_v11 }
0x160f   :  { %v3909_v12 = vpop.f32.mrb[16].mxu1 }
0x1610   :  { %v2850_v23 = vadd.f32 %v3909_v12, %v3778_v62  ;;  %v2841_v1 = vpop.f32.mrb[17].mxu1 }
0x1611   :  { %v2842_v51 = vadd.f32 %v3778_v62, %v2841_v1  ;;  %v3910_v10 = vpop.f32.mrb[18].mxu1 }
0x1612   :  { %v2853_v8 = vadd.f32 %v3910_v10, %v3778_v62  ;;  %v2844_v2 = vpop.f32.mrb[19].mxu1  ;;  %v5473_v24 = vmul.f32 %v2850_v23, %v4513_v7 }
0x1613   :  { %v5476_v26 = vmul.f32 %v2842_v51, %v4485_v57  ;;  %v2845_v3 = vadd.f32 %v3778_v62, %v2844_v2 }
0x1614   :  { %v5480_v4 = vmul.f32 %v2853_v8, %v4483_v56  ;;  %v2862_v6 = vmul.f32 0.17677669, %v5473_v24 }
0x1615   :  { %v2860_v31 = vmul.f32 0.17677669, %v5476_v26  ;;  %v5483_v52 = vmul.f32 %v2845_v3, %v6033_v59 }
0x1616   :  { %v2863_v7 = vmul.f32 0.17677669, %v5480_v4  ;;  %v2906_v25 = vsel %vm1222_vm13, %v2862_v6, -inf }
0x1617   :  { %v2861_v41 = vmul.f32 0.17677669, %v5483_v52  ;;  %v2900_v48 = vsel %vm1222_vm13, %v2860_v31, -inf }
0x1618   :  { %2901 = vmax.xlane.f32.xlu0 %v2900_v48  ;;  %v2909_v56 = vsel %vm1222_vm13, %v2863_v7, -inf }
0x1619   :  { %v2903_v57 = vsel %vm1222_vm13, %v2861_v41, -inf }
0x161a   :  { %2904 = vmax.xlane.f32.xlu1 %v2903_v57 }
0x161c   :  { %2907 = vmax.xlane.f32.xlu0 %v2906_v25 }
0x161e   :  { %2910 = vmax.xlane.f32.xlu1 %v2909_v56 }
0x162f   :  { %2890 = vrot.lane.b32.xlu1 %v2861_v41, %s4281_s19 }
0x1632   :  { %2888 = vrot.lane.b32.xlu0 %v2860_v31, %s4281_s19 }
0x1633   :  { %2892 = vrot.lane.b32.xlu1 %v2862_v6, %s4281_s19 }
0x1636   :  { %2894 = vrot.lane.b32.xlu0 %v2863_v7, %s4281_s19 }
0x16a5   :  { %v2902_v59 = vpop.xlane.xlu0 %2901 }
0x16a6   :  { %v2924_v0 = vsub.f32 %v2860_v31, %v2902_v59 }
0x16a7   :  { %v2905_v34 = vpop.xlane.xlu1 %2904 }
0x16a8   :  { %v2932_v44 = vmul.f32 1.442695, %v2924_v0  ;;  %v2925_v30 = vsub.f32 %v2861_v41, %v2905_v34 }
0x16a9   :  { %v2908_v28 = vpop.xlane.xlu0 %2907 }
0x16aa   :  { %4183 = vpow2.f32 %v2932_v44  ;;  %v2934_v55 = vmul.f32 1.442695, %v2925_v30  ;;  %v2926_v46 = vsub.f32 %v2862_v6, %v2908_v28 }
0x16ab   :  { %v2911_v35 = vpop.xlane.xlu1 %2910 }
0x16ac   :  { %4185 = vpow2.f32 %v2934_v55  ;;  %v2936_v53 = vmul.f32 1.442695, %v2926_v46  ;;  %v2927_v50 = vsub.f32 %v2863_v7, %v2911_v35 }
0x16ad   :  { %v2889_v13 = vpop.permute.xlu0 %2888 }
0x16ae   :  { %4187 = vpow2.f32 %v2936_v53  ;;  %v2938_v18 = vmul.f32 1.442695, %v2927_v50  ;;  %v2912_v47 = vsel %vm1222_vm13, %v2889_v13, -inf }
0x16af   :  { %v2891_v21 = vpop.permute.xlu1 %2890 }
0x16b0   :  { %4189 = vpow2.f32 %v2938_v18  ;;  %v2915_v32 = vsel %vm1222_vm13, %v2891_v21, -inf }
0x16b1   :  { %v2895_v40 = vpop.permute.xlu0 %2894 }
0x16b2   :  { %v2921_v42 = vsel %vm1222_vm13, %v2895_v40, -inf }
0x16b3   :  { %v2893_v43 = vpop.permute.xlu1 %2892 }
0x16b4   :  { %v4184_v20 = vpop.eup %4183  ;;  %v2918_v27 = vsel %vm1222_vm13, %v2893_v43, -inf }
0x16b5   :  { %v2948_v58 = vsel %vm1222_vm13, %v4184_v20, 0.0 }
0x16b6   :  { %v4186_v49 = vpop.eup %4185  ;;  %2949 = vadd.xlane.f32.xlu1 %v2948_v58 }
0x16b7   :  { %v2951_v33 = vsel %vm1222_vm13, %v4186_v49, 0.0 }
0x16b8   :  { %v4188_v9 = vpop.eup %4187  ;;  %2952 = vadd.xlane.f32.xlu0 %v2951_v33 }
0x16b9   :  { %v2954_v39 = vsel %vm1222_vm13, %v4188_v9, 0.0 }
0x16ba   :  { %v4190_v22 = vpop.eup %4189 }
0x16bb   :  { %v2957_v63 = vsel %vm1222_vm13, %v4190_v22, 0.0 }
0x16bc   :  { %2958 = vadd.xlane.f32.xlu1 %v2957_v63  ;;  %2955 = vadd.xlane.f32.xlu0 %v2954_v39 }
0x16c0   :  { %2916 = vmax.xlane.f32.xlu1 %v2915_v32  ;;  %2913 = vmax.xlane.f32.xlu0 %v2912_v47  ;;  %v4271_v32 = vld [vmem:[%s5943_s1 + $0x8] sm:$0xff]  ;;  %v6043_v47 = vld [vmem:[#allocation2_spill] sm:$0xff] }
0x16c4   :  { %2919 = vmax.xlane.f32.xlu0 %v2918_v27  ;;  %2922 = vmax.xlane.f32.xlu1 %v2921_v42  ;;  %v6044_v27 = vld [vmem:[#allocation4_spill] sm:$0xff] }
0x1743   :  { %v2950_v11 = vpop.xlane.xlu1 %2949 }
0x1744   :  { %4191 = vrcp.f32 %v2950_v11 }
0x1745   :  { %v2953_v62 = vpop.xlane.xlu0 %2952 }
0x1746   :  { %4193 = vrcp.f32 %v2953_v62  ;;  %v5531_v62 = vld [vmem:[%s5943_s1] sm:$0xff] }
0x1749   :  { %v2959_v12 = vpop.xlane.xlu1 %2958  ;;  %v2956_v23 = vpop.xlane.xlu0 %2955 }
0x174a   :  { %4195 = vrcp.f32 %v2959_v12  ;;  %v6045_v12 = vld [vmem:[#allocation3_spill] sm:$0xff] }
0x174b   :  { %4197 = vrcp.f32 %v2956_v23  ;;  %v5535_v23 = vmul.f32 %v5531_v62, %v6045_v12 }
0x174d   :  { %v2917_v1 = vpop.xlane.xlu1 %2916  ;;  %v2914_v51 = vpop.xlane.xlu0 %2913 }
0x174e   :  { %v4192_v10 = vpop.eup %4191  ;;  %v2929_v8 = vsub.f32 %v2891_v21, %v2917_v1  ;;  %v2928_v2 = vsub.f32 %v2889_v13, %v2914_v51  ;;  %v4274_v1 = vld [vmem:[%s5943_s1 + $0x18] sm:$0xff] }
0x174f   :  { %v2980_v3 = vmul.f32 %v4192_v10, %v4184_v20  ;;  %v6046_v51 = vld [vmem:[#allocation5_spill] sm:$0xff] }
0x1750   :  { %v4194_v31 = vpop.eup %4193  ;;  %v2942_v6 = vmul.f32 1.442695, %v2929_v8  ;;  %v2940_v41 = vmul.f32 1.442695, %v2928_v2  ;;  %v5541_v10 = vmul.f32 %v4274_v1, %v6046_v51  ;;  %v3781_v2 = vclamps-f32 %v5535_v23, 5.0 }
0x1751   :  { %v2981_v48 = vmul.f32 %v4194_v31, %v4186_v49  ;;  %v2923_v7 = vpop.xlane.xlu1 %2922  ;;  %v2920_v57 = vpop.xlane.xlu0 %2919  ;;  %v2988_v25 = vmul.f32 0.99, %v2980_v3 }
0x1752   :  { %4199 = vpow2.f32 %v2942_v6  ;;  %v2931_v56 = vsub.f32 %v2895_v40, %v2923_v7  ;;  %v2930_v59 = vsub.f32 %v2893_v43, %v2920_v57  ;;  %v5516_v40 = vmul.f32 %v4271_v32, %v6043_v47  ;;  %v5521_v43 = vld [vmem:[%s5943_s1 + $0x10] sm:$0xff] }
0x1753   :  { %v2989_v0 = vmul.f32 0.99, %v2981_v48  ;;  %4201 = vpow2.f32 %v2940_v41  ;;  %v2996_v34 = vadd.f32 0.001, %v2988_v25  ;;  %v5525_v42 = vmul.f32 %v5521_v43, %v6044_v27  ;;  %v6048_v27 = vld [vmem:[#allocation17_spill] sm:$0xff] }
0x1754   :  { %v4196_v44 = vpop.eup %4195  ;;  %v2946_v30 = vmul.f32 1.442695, %v2931_v56  ;;  %v2944_v28 = vmul.f32 1.442695, %v2930_v59  ;;  %v3782_v11 = vclamps-f32 %v5516_v40, 5.0  ;;  %v3784_v3 = vclamps-f32 %v5541_v10, 5.0 }
0x1755   :  { %v4198_v55 = vpop.eup %4197  ;;  %3915 = vmatprep.mubr.msk.f32.mxu0 %vm1222_vm13, %v2996_v34  ;;  %v2997_v46 = vadd.f32 0.001, %v2989_v0  ;;  %v2983_v35 = vmul.f32 %v4196_v44, %v4190_v22  ;;  %v3783_v8 = vclamps-f32 %v5525_v42, 5.0 }
0x1756   :  { %4203 = vpow2.f32 %v2946_v30  ;;  %v2982_v53 = vmul.f32 %v4198_v55, %v4188_v9 }
0x1757   :  { %4205 = vpow2.f32 %v2944_v28  ;;  %3916 = vmatmul.mubr.msk.f32.vlgmr.msra.gmra.mrb[12].mxu0 %vm1222_vm13, %v2997_v46  ;;  %v2991_v50 = vmul.f32 0.99, %v2983_v35 }
0x1758   :  { %v2990_v18 = vmul.f32 0.99, %v2982_v53 }
0x1759   :  { %v2999_v20 = vadd.f32 0.001, %v2991_v50 }
0x175a   :  { %v2998_v58 = vadd.f32 0.001, %v2990_v18 }
0x175c   :  { %v4200_v49 = vpop.eup %4199  ;;  %3918 = vmatprep.mubr.msk.f32.mxu0 %vm1222_vm13, %v2998_v58 }
0x175d   :  { %v4202_v33 = vpop.eup %4201  ;;  %3919 = vmatmul.mubr.msk.f32.gmra.mrb[14].mxu0 %vm1222_vm13, %v2999_v20  ;;  %v2963_v13 = vsel %vm1222_vm13, %v4200_v49, 0.0 }
0x175e   :  { %2964 = vadd.xlane.f32.xlu1 %v2963_v13  ;;  %v2960_v22 = vsel %vm1222_vm13, %v4202_v33, 0.0 }
0x175f   :  { %2961 = vadd.xlane.f32.xlu0 %v2960_v22 }
0x1760   :  { %v4204_v9 = vpop.eup %4203 }
0x1761   :  { %v4206_v21 = vpop.eup %4205  ;;  %v2969_v63 = vsel %vm1222_vm13, %v4204_v9, 0.0 }
0x1762   :  { %2970 = vadd.xlane.f32.xlu1 %v2969_v63  ;;  %v2966_v39 = vsel %vm1222_vm13, %v4206_v21, 0.0 }
0x1763   :  { %2967 = vadd.xlane.f32.xlu0 %v2966_v39 }
0x1773   :  { %3276 = vperm.xlu1 %3962, %v3782_v11  }
0x1777   :  { %3281 = vperm.xlu1 %3962, %v3783_v8  }
0x1779   :  { %3271 = vperm.xlu0 %3961, %v3781_v2  }
0x177b   :  { %3286 = vperm.xlu1 %3962, %v3784_v3  }
0x17eb   :  { %v2965_v31 = vpop.xlane.xlu1 %2964 }
0x17ec   :  { %4207 = vrcp.f32 %v2965_v31  ;;  %v2962_v6 = vpop.xlane.xlu0 %2961 }
0x17ed   :  { %4209 = vrcp.f32 %v2962_v6 }
0x17ef   :  { %v2971_v41 = vpop.xlane.xlu1 %2970 }
0x17f0   :  { %4211 = vrcp.f32 %v2971_v41  ;;  %v2968_v48 = vpop.xlane.xlu0 %2967 }
0x17f1   :  { %4213 = vrcp.f32 %v2968_v48 }
0x17f6   :  { %v4208_v7 = vpop.eup %4207 }
0x17f7   :  { %v4210_v57 = vpop.eup %4209  ;;  %v2985_v25 = vmul.f32 %v4208_v7, %v4200_v49 }
0x17f8   :  { %v2984_v56 = vmul.f32 %v4210_v57, %v4202_v33  ;;  %v3277_v33 = vpop.permute.xlu1 %3276  ;;  %v3272_v6 = vpop.permute.xlu0 %3271 }
0x17f9   :  { %v2993_v59 = vmul.f32 0.99, %v2985_v25 }
0x17fa   :  { %v4212_v0 = vpop.eup %4211  ;;  %v2992_v34 = vmul.f32 0.99, %v2984_v56 }
0x17fb   :  { %v4214_v44 = vpop.eup %4213  ;;  %v3001_v30 = vadd.f32 0.001, %v2993_v59  ;;  %v2987_v28 = vmul.f32 %v4212_v0, %v4204_v9 }
0x17fc   :  { %v3000_v55 = vadd.f32 0.001, %v2992_v34  ;;  %v2986_v46 = vmul.f32 %v4214_v44, %v4206_v21  ;;  %v6047_v21 = vld [vmem:[#allocation14_spill] sm:$0xff]  ;;  %v3282_v41 = vpop.permute.xlu1 %3281 }
0x17fd   :  { %v2995_v35 = vmul.f32 0.99, %v2987_v28 }
0x17fe   :  { %3921 = vmatprep.mubr.msk.f32.mxu0 %vm1222_vm13, %v3000_v55  ;;  %v2994_v53 = vmul.f32 0.99, %v2986_v46 }
0x17ff   :  { %3922 = vmatmul.mubr.msk.f32.gmra.mrb[16].mxu0 %vm1222_vm13, %v3001_v30  ;;  %v3003_v50 = vadd.f32 0.001, %v2995_v35 }
0x1800   :  { %v3002_v18 = vadd.f32 0.001, %v2994_v53 }
0x1802   :  { %3924 = vmatprep.mubr.msk.f32.mxu0 %vm1222_vm13, %v3002_v18 }
0x1803   :  { %3925 = vmatmul.mubr.msk.f32.gmra.mrb[18].mxu0 %vm1222_vm13, %v3003_v50  ;;  %v3287_v50 = vpop.permute.xlu1 %3286 }
0x182a   :  { %v3917_v20 = vpop.f32.mrb[12].mxu0 }
0x182b   :  { %v3134_v58 = vmul.f32 10.0, %v3917_v20  ;;  %v3094_v49 = vpop.f32.mrb[13].mxu0 }
0x182c   :  { %v3133_v13 = vmul.f32 10.0, %v3094_v49 }
0x182d   :  { %v3142_v22 = vadd.f32 -5.0, %v3134_v58 }
0x182e   :  { %v3141_v9 = vadd.f32 -5.0, %v3133_v13 }
0x182f   :  { %v3150_v63 = vsel %vm1477_vm3, 5.0, %v3142_v22 }
0x1830   :  { %v5562_v39 = vsel %vm1476_vm5, -5.0, %v3150_v63  ;;  %v3149_v32 = vsel %vm1477_vm3, 5.0, %v3141_v9  ;;  %v3920_v47 = vpop.f32.mrb[14].mxu0 }
0x1831   :  { %v3266_v12 = vadd.f32 %v5562_v39, %v6048_v27  ;;  %v5570_v1 = vsel %vm1476_vm5, -5.0, %v3149_v32  ;;  %v3136_v51 = vmul.f32 10.0, %v3920_v47  ;;  %v3104_v31 = vpop.f32.mrb[15].mxu0 }
0x1832   :  { %v3135_v48 = vmul.f32 10.0, %v3104_v31  ;;  %v3265_v7 = vadd.f32 %v5570_v1, %v6048_v27 }
0x1833   :  { %v3144_v57 = vadd.f32 -5.0, %v3136_v51  ;;  %vm3290_vm1 = vcmp.ge.f32.partialorder %v3277_v33, %v3266_v12 }
0x1834   :  { %v3143_v25 = vadd.f32 -5.0, %v3135_v48  ;;  %vm3289_vm4 = vcmp.ge.f32.partialorder %v3272_v6, %v3265_v7  ;;  %v3294_v56 = vsel %vm3290_vm1, 1, %v6021_v37 }
0x1835   :  { %v3152_v59 = vsel %vm1477_vm3, 5.0, %v3144_v57  ;;  %v3293_v0 = vsel %vm3289_vm4, 1, %v6021_v37  ;;  %v3310_v34 = vsel %vm1628_vm7, %v3294_v56, 0  ;;  %vm2868_vm4 = vcmp.le.f32.partialorder %v5535_v23, 5.0 }
0x1836   :  { %v5581_v44 = vsel %vm1476_vm5, -5.0, %v3152_v59  ;;  %v3151_v30 = vsel %vm1477_vm3, 5.0, %v3143_v25  ;;  %v3297_v28 = vsel %vm1628_vm7, %v3293_v0, 0  ;;  %v3311_v55 = vand.u32 65535, %v3310_v34 }
0x1837   :  { %v5588_v46 = vsel %vm1476_vm5, -5.0, %v3151_v30  ;;  %v3268_v35 = vadd.f32 %v5581_v44, %v6048_v27  ;;  %v3299_v18 = vshrl.u32 %v3297_v28, 16  ;;  %v3312_v58 = vshrl.u32 %v3310_v34, 16 }
0x1838   :  { %v3267_v53 = vadd.f32 %v5588_v46, %v6048_v27  ;;  %v3313_v20 = vcvt.s32.f32 %v3311_v55  ;;  %v3298_v22 = vand.u32 65535, %v3297_v28 }
0x1839   :  { %vm3292_vm6 = vcmp.ge.f32.partialorder %v3287_v50, %v3268_v35  ;;  %v3314_v33 = vcvt.s32.f32 %v3312_v58  ;;  %v3301_v9 = vcvt.s32.f32 %v3299_v18 }
0x183a   :  { %v3296_v49 = vsel %vm3292_vm6, 1, %v6021_v37  ;;  %3315 = vadd.xlane.f32.xlu1 %v3313_v20  ;;  %vm3291_vm8 = vcmp.ge.f32.partialorder %v3282_v41, %v3267_v53  ;;  %v3300_v51 = vcvt.s32.f32 %v3298_v22  ;;  %vm3689_vm6 = vcmask 15360  }
0x183b   :  { %v3295_v13 = vsel %vm3291_vm8, 1, %v6021_v37  ;;  %3317 = vadd.xlane.f32.xlu0 %v3314_v33  ;;  %v3336_v32 = vsel %vm1628_vm7, %v3296_v49, 0 }
0x183c   :  { %v3323_v63 = vsel %vm1628_vm7, %v3295_v13, 0  ;;  %v3338_v12 = vshrl.u32 %v3336_v32, 16  ;;  %v3337_v41 = vand.u32 65535, %v3336_v32 }
0x183d   :  { %v3324_v47 = vand.u32 65535, %v3323_v63  ;;  %v3325_v6 = vshrl.u32 %v3323_v63, 16 }
0x183e   :  { %3304 = vadd.xlane.f32.xlu1 %v3301_v9  ;;  %v3340_v31 = vcvt.s32.f32 %v3338_v12  ;;  %v3339_v37 = vcvt.s32.f32 %v3337_v41 }
0x183f   :  { %v3326_v27 = vcvt.s32.f32 %v3324_v47  ;;  %v3327_v48 = vcvt.s32.f32 %v3325_v6 }
0x1841   :  { %3328 = vadd.xlane.f32.xlu0 %v3326_v27 }
0x1842   :  { %3302 = vadd.xlane.f32.xlu1 %v3300_v51 }
0x1846   :  { %3343 = vadd.xlane.f32.xlu1 %v3340_v31  ;;  %v6050_v31 = vmov 0.0  }
0x184a   :  { %3330 = vadd.xlane.f32.xlu1 %v3327_v48 }
0x184e   :  { %3341 = vadd.xlane.f32.xlu1 %v3339_v37 }
0x1857   :  { %3209 = vrot.lane.b32.xlu0 %v5476_v26, %s4285_s27 }
0x185b   :  { %3215 = vrot.lane.b32.xlu0 %v5480_v4, %s4285_s27 }
0x185f   :  { %3175 = vrot.lane.b32.xlu0 %v5562_v39, %s4283_s21  ;;  %3211 = vrot.lane.b32.xlu1 %v5483_v52, %s4285_s27 }
0x1863   :  { %3179 = vrot.lane.b32.xlu0 %v5581_v44, %s4283_s21  ;;  %3213 = vrot.lane.b32.xlu1 %v5473_v24, %s4285_s27 }
0x1867   :  { %3173 = vrot.lane.b32.xlu1 %v5570_v1, %s4283_s21 }
0x186b   :  { %3177 = vrot.lane.b32.xlu1 %v5588_v46, %s4283_s21 }
0x18c7   :  { %v3316_v26 = vpop.xlane.xlu1 %3315 }
0x18c8   :  { %v3318_v4 = vpop.xlane.xlu0 %3317  ;;  %v3319_v59 = vcvt.f32.s32 %v3316_v26 }
0x18c9   :  { %v3320_v7 = vcvt.f32.s32 %v3318_v4 }
0x18cb   :  { %v3305_v57 = vpop.xlane.xlu1 %3304  ;;  %v3321_v25 = vshll.u32 %v3320_v7, 16 }
0x18cc   :  { %v3307_v56 = vcvt.f32.s32 %v3305_v57 }
0x18cd   :  { %v3322_v0 = vadd.s32 %v3321_v25, %v3319_v59 }
0x18ce   :  { %v3329_v52 = vpop.xlane.xlu0 %3328  ;;  %v3308_v30 = vshll.u32 %v3307_v56, 16 }
0x18cf   :  { %v3303_v34 = vpop.xlane.xlu1 %3302  ;;  %v3796_v53 = vadd.s32 4294967295, %v3322_v0  ;;  %v3332_v25 = vcvt.f32.s32 %v3329_v52 }
0x18d0   :  { %v3306_v28 = vcvt.f32.s32 %v3303_v34 }
0x18d1   :  { %vm3354_vm7 = vcmp.eq.s32.totalorder %v6047_v21, %v3796_v53 }
0x18d2   :  { %v3309_v55 = vadd.s32 %v3308_v30, %v3306_v28  ;;  %v3923_v24 = vpop.f32.mrb[16].mxu0  ;;  %v3210_v35 = vpop.permute.xlu0 %3209  ;;  %v5628_v57 = vsel %vm3354_vm7, 1.0, %v6050_v31  ;;  %vm2869_vm7 = vcmp.le.f32.partialorder %v5516_v40, 5.0 }
0x18d3   :  { %v3138_v50 = vmul.f32 10.0, %v3923_v24  ;;  %v3221_v18 = vsel %vm6049_vm9, 0.5397424, %v3210_v35  ;;  %v3114_v20 = vpop.f32.mrb[17].mxu0  ;;  %v3344_v58 = vpop.xlane.xlu1 %3343 }
0x18d4   :  { %v3795_v49 = vadd.s32 4294967295, %v3309_v55  ;;  %v3225_v33 = vsel %vm1222_vm13, %v3221_v18, 0.5397424  ;;  %v3137_v13 = vmul.f32 10.0, %v3114_v20  ;;  %v3346_v48 = vcvt.f32.s32 %v3344_v58 }
0x18d5   :  { %v3146_v22 = vadd.f32 -5.0, %v3138_v50  ;;  %v3233_v9 = vmin.f32 %v3225_v33, 20.0 }
0x18d6   :  { %vm3353_vm2 = vcmp.eq.s32.totalorder %v6047_v21, %v3795_v49  ;;  %v3926_v63 = vpop.f32.mrb[18].mxu0  ;;  %v3145_v41 = vadd.f32 -5.0, %v3137_v13  ;;  %v3347_v30 = vshll.u32 %v3346_v48, 16 }
0x18d7   :  { %v3154_v32 = vsel %vm1477_vm3, 5.0, %v3146_v22  ;;  %v3237_v47 = vmul.f32 1.442695, %v3233_v9  ;;  %v3140_v27 = vmul.f32 10.0, %v3926_v63  ;;  %v3124_v12 = vpop.f32.mrb[19].mxu0  ;;  %v3331_v51 = vpop.xlane.xlu1 %3330  ;;  %v5621_v6 = vsel %vm3353_vm2, 1.0, %v6050_v31 }
0x18d8   :  { %v3333_v37 = vcvt.f32.s32 %v3331_v51  ;;  %v3139_v4 = vmul.f32 10.0, %v3124_v12  ;;  %v5625_v7 = vsel %vm1476_vm5, -5.0, %v3154_v32  ;;  %v3963_v0 = vpack.i.bf16 %v5628_v57, %v5621_v6 }
0x18d9   :  { %4215 = vpow2.f32 %v3237_v47  ;;  %v3148_v26 = vadd.f32 -5.0, %v3140_v27  ;;  %3183 = vrot.lane.b32.xlu0 %v5625_v7, %s4283_s21  ;;  %v3153_v24 = vsel %vm1477_vm3, 5.0, %v3145_v41  ;;  %v5673_v47 = vld [vmem:[%s5996_s29] sm:$0x1]  ;;  %vm2865_vm2 = vcmp.ge.f32.partialorder %v5516_v40, -5.0 }
0x18da   :  { %v3334_v56 = vshll.u32 %v3333_v37, 16  ;;  %v3147_v35 = vadd.f32 -5.0, %v3139_v4  ;;  %3964 = vrot.lane.b32.xlu1 %v3963_v0, %s4283_s21  ;;  %v5648_v20 = vsel %vm1476_vm5, -5.0, %v3153_v24  ;;  %v3216_v37 = vpop.permute.xlu0 %3215 }
0x18db   :  { %v3156_v59 = vsel %vm1477_vm3, 5.0, %v3148_v26  ;;  %v3342_v34 = vpop.xlane.xlu1 %3341 }
0x18dc   :  { %v3335_v28 = vadd.s32 %v3334_v56, %v3332_v25  ;;  %v3345_v55 = vcvt.f32.s32 %v3342_v34  ;;  %v5641_v52 = vsel %vm1476_vm5, -5.0, %v3156_v59  ;;  %v3155_v58 = vsel %vm1477_vm3, 5.0, %v3147_v35 }
0x18dd   :  { %3187 = vrot.lane.b32.xlu0 %v5641_v52, %s4283_s21  ;;  %v5663_v63 = vsel %vm1476_vm5, -5.0, %v3155_v58  ;;  %vm3229_vm3 = vcmp.gt.f32.partialorder %v3225_v33, 20.0  ;;  %vm6051_vm5 = vmmov %vm6049_vm9 }
0x18de   :  { %v3797_v53 = vadd.s32 4294967295, %v3335_v28  ;;  %v3348_v50 = vadd.s32 %v3347_v30, %v3345_v55  ;;  %3181 = vrot.lane.b32.xlu1 %v5648_v20, %s4283_s21  ;;  %vm6052_vm15 = vmmov %vm6051_vm5 }
0x18df   :  { %v3212_v41 = vpop.permute.xlu1 %3211  ;;  %v3224_v4 = vsel %vm6052_vm15, 0.5397424, %v3216_v37  ;;  %vm6053_vm11 = vmmov %vm6051_vm5 }
0x18e0   :  { %vm3355_vm12 = vcmp.eq.s32.totalorder %v6047_v21, %v3797_v53  ;;  %v3798_v18 = vadd.s32 4294967295, %v3348_v50  ;;  %v3222_v48 = vsel %vm6051_vm5, 0.5397424, %v3212_v41  ;;  %v3228_v56 = vsel %vm1222_vm13, %v3224_v4, 0.5397424  ;;  %vm6056_vm9 = vmmov %vm6051_vm5 }
0x18e1   :  { %v5656_v13 = vsel %vm3355_vm12, 1.0, %v6050_v31  ;;  %v3226_v26 = vsel %vm1222_vm13, %v3222_v48, 0.5397424  ;;  %v3236_v59 = vmin.f32 %v3228_v56, 20.0  ;;  %vm3232_vm10 = vcmp.gt.f32.partialorder %v3228_v56, 20.0  ;;  %vm5855_vm12 = vmand %vm2865_vm2, %vm2869_vm7 }
0x18e2   :  { %vm3356_vm14 = vcmp.eq.s32.totalorder %v6047_v21, %v3798_v18  ;;  %3185 = vrot.lane.b32.xlu1 %v5663_v63, %s4283_s21  ;;  %v3234_v25 = vmin.f32 %v3226_v26, 20.0  ;;  %vm3230_vm0 = vcmp.gt.f32.partialorder %v3226_v26, 20.0 }
0x18e3   :  { %v4216_v49 = vpop.eup %4215  ;;  %v5659_v22 = vsel %vm3356_vm14, 1.0, %v6050_v31  ;;  %v3214_v34 = vpop.permute.xlu1 %3213  ;;  %v3243_v30 = vmul.f32 1.442695, %v3236_v59  ;;  %vm2867_vm14 = vcmp.ge.f32.partialorder %v5541_v10, -5.0 }
0x18e4   :  { %v3245_v9 = vadd.f32 1.0, %v4216_v49  ;;  %v3968_v32 = vpack.i.bf16 %v5659_v22, %v5656_v13  ;;  %v3239_v0 = vmul.f32 1.442695, %v3234_v25 }
0x18e6   :  { %4217 = vlog2.f32 %v3245_v9  ;;  %3969 = vrot.lane.b32.xlu0 %v3968_v32, %s4283_s21  ;;  %239 = vrot.lane.b32.xlu1 %v5673_v47, %s4286_s28 }
0x18e7   :  { %4219 = vpow2.f32 %v3239_v0  ;;  %v3174_v28 = vpop.permute.xlu1 %3173 }
0x18e8   :  { %4221 = vpow2.f32 %v3243_v30  ;;  %v3197_v9 = vsub.f32 %v5570_v1, %v3174_v28 }
0x18eb   :  { %v3178_v35 = vpop.permute.xlu1 %3177 }
0x18ec   :  { %v3199_v30 = vsub.f32 %v5588_v46, %v3178_v35 }
0x18f0   :  { %v4218_v21 = vpop.eup %4217 }
0x18f1   :  { %v3250_v27 = vmul.f32 0.6931472, %v4218_v21  ;;  %v4220_v55 = vpop.eup %4219 }
0x18f2   :  { %v3246_v53 = vadd.f32 1.0, %v4220_v55  ;;  %v4222_v50 = vpop.eup %4221 }
0x18f3   :  { %v3257_v12 = vsel %vm3229_vm3, %v3225_v33, %v3250_v27  ;;  %v3176_v33 = vpop.permute.xlu0 %3175  ;;  %v3248_v27 = vadd.f32 1.0, %v4222_v50  ;;  %vm6059_vm3 = vmmov %vm6051_vm5  ;;  %vm2871_vm5 = vcmp.le.f32.partialorder %v5541_v10, 5.0 }
0x18f4   :  { %v3261_v51 = vadd.f32 0.001, %v3257_v12  ;;  %v3198_v49 = vsub.f32 %v5562_v39, %v3176_v33  ;;  %4223 = vlog2.f32 %v3246_v53  ;;  %vm5878_vm15 = vmand %vm2867_vm14, %vm2871_vm5 }
0x18f5   :  { %4225 = vlog2.f32 %v3248_v27 }
0x18f6   :  { %v5678_v31 = vmul.f32 %v5621_v6, %v3261_v51 }
0x18f7   :  { %v3180_v24 = vpop.permute.xlu0 %3179 }
0x18f8   :  { %v3200_v0 = vsub.f32 %v5581_v44, %v3180_v24 }
0x18fe   :  { %v4224_v55 = vpop.eup %4223 }
0x194b   :  { %v3184_v18 = vpop.permute.xlu0 %3183 }
0x194c   :  { %v3965_v58 = vpop.permute.xlu1 %3964 }
0x194d   :  { %v3967_v32 = vunpack.i.h.bf16 %v3965_v58  ;;  %v3966_v21 = vunpack.i.l.bf16 %v3965_v58  ;;  %v3202_v58 = vsub.f32 %v5625_v7, %v3184_v18  ;;  %v2001_v18 = vmul.f32 %v5188_v45, %v4835_v16 }
0x194f   :  { %v3397_v12 = vmul.f32 %v3966_v21, %v3197_v9  ;;  %v3398_v41 = vmul.f32 %v3967_v32, %v3198_v49  ;;  %v3188_v37 = vpop.permute.xlu0 %3187  ;;  %v3252_v49 = vmul.f32 0.6931472, %v4224_v55  ;;  %v4226_v9 = vpop.eup %4225  ;;  %v3446_v27 = vmul.f32 %v3967_v32, %v3202_v58 }
0x1950   :  { %v3182_v48 = vpop.permute.xlu1 %3181  ;;  %v3204_v24 = vsub.f32 %v5641_v52, %v3188_v37  ;;  %v3256_v35 = vmul.f32 0.6931472, %v4226_v9  ;;  %v2003_v37 = vmul.f32 %v5229_v38, %v4856_v61  ;;  %v2004_v38 = vmul.f32 %v5211_v17, %v4846_v14 }
0x1951   :  { %v3201_v4 = vsub.f32 %v5648_v20, %v3182_v48  ;;  %3405 = vrot.lane.b32.xlu1 %v3397_v12, %s4286_s28  ;;  %3407 = vrot.lane.b32.xlu0 %v3398_v41, %s4286_s28  ;;  %v3493_v12 = vmul.f32 %v3966_v21, %v3261_v51  ;;  %v3258_v41 = vsel %vm3230_vm0, %v3226_v26, %v3252_v49  ;;  %v3223_v26 = vsel %vm6053_vm11, 0.5397424, %v3214_v34  ;;  %vm6062_vm0 = vmmov %vm6059_vm3 }
0x1952   :  { %v3260_v51 = vsel %vm3232_vm10, %v3228_v56, %v3256_v35  ;;  %v2002_v56 = vmul.f32 %v5236_v36, %v4842_v29  ;;  %v3429_v49 = vmul.f32 %v5621_v6, %v5648_v20  ;;  %v3481_v35 = vsel %vm1222_vm13, %v5678_v31, 0.0  ;;  %vm6063_vm10 = vmmov %vm6062_vm0 }
0x1953   :  { %v3445_v25 = vmul.f32 %v3966_v21, %v3201_v4  ;;  %v3262_v4 = vadd.f32 0.001, %v3258_v41  ;;  %vm6064_vm11 = vmmov %vm6062_vm0 }
0x1954   :  { %v3186_v58 = vpop.permute.xlu1 %3185  ;;  %vm6067_vm2 = vmmov %vm6062_vm0 }
0x1955   :  { %3453 = vrot.lane.b32.xlu0 %v3445_v25, %s4286_s28  ;;  %v3494_v21 = vmul.f32 %v3967_v32, %v3262_v4  ;;  %v5704_v25 = vadd.f32 0.001, %v3260_v51 }
0x1958   :  { %v3970_v59 = vpop.permute.xlu0 %3969  ;;  %v240_v20 = vpop.permute.xlu1 %239 }
0x1959   :  { %v3972_v33 = vunpack.i.h.bf16 %v3970_v59  ;;  %v3971_v28 = vunpack.i.l.bf16 %v3970_v59  ;;  %v3227_v59 = vsel %vm1222_vm13, %v3223_v26, 0.5397424 }
0x195a   :  { %v3235_v32 = vmin.f32 %v3227_v59, 20.0  ;;  %vm3231_vm1 = vcmp.gt.f32.partialorder %v3227_v59, 20.0 }
0x195b   :  { %v3400_v53 = vmul.f32 %v3972_v33, %v3200_v0  ;;  %v3399_v50 = vmul.f32 %v3971_v28, %v3199_v30  ;;  %v3448_v48 = vmul.f32 %v3972_v33, %v3204_v24  ;;  %v3496_v45 = vmul.f32 %v3972_v33, %v5704_v25 }
0x195c   :  { %v3241_v0 = vmul.f32 1.442695, %v3235_v32  ;;  %v3365_v30 = vmul.f32 %v5621_v6, %v5570_v1  ;;  %v3203_v1 = vsub.f32 %v5663_v63, %v3186_v58  ;;  %v3367_v6 = vmul.f32 %v5656_v13, %v5588_v46 }
0x195d   :  { %3411 = vrot.lane.b32.xlu0 %v3400_v53, %s4286_s28  ;;  %3409 = vrot.lane.b32.xlu1 %v3399_v50, %s4286_s28  ;;  %v3366_v53 = vmul.f32 %v5628_v57, %v5562_v39 }
0x195e   :  { %4227 = vpow2.f32 %v3241_v0  ;;  %v3369_v55 = vsel %vm1222_vm13, %v3365_v30, 0.0  ;;  %v3375_v41 = vsel %vm1222_vm13, %v3367_v6, 0.0 }
0x195f   :  { %v3372_v17 = vsel %vm1222_vm13, %v3366_v53, 0.0 }
0x1961   :  { %3501 = vrot.lane.b32.xlu0 %v3493_v12, %s4286_s28  ;;  %3455 = vrot.lane.b32.xlu1 %v3446_v27, %s4286_s28  ;;  %v3447_v27 = vmul.f32 %v3971_v28, %v3203_v1  ;;  %v3433_v12 = vsel %vm1222_vm13, %v3429_v49, 0.0 }
0x1965   :  { %2009 = vrot.lane.b32.xlu0 %v2001_v18, %s4286_s28  ;;  %3459 = vrot.lane.b32.xlu1 %v3448_v48, %s4286_s28  ;;  %v3368_v48 = vmul.f32 %v5659_v22, %v5581_v44 }
0x1967   :  { %v3378_v18 = vsel %vm1222_vm13, %v3368_v48, 0.0  ;;  %v3431_v48 = vmul.f32 %v5656_v13, %v5663_v63 }
0x1968   :  { %v4228_v34 = vpop.eup %4227 }
0x1969   :  { %2013 = vrot.lane.b32.xlu0 %v2003_v37, %s4286_s28  ;;  %3503 = vrot.lane.b32.xlu1 %v3494_v21, %s4286_s28  ;;  %v3247_v33 = vadd.f32 1.0, %v4228_v34  ;;  %v3478_v37 = vmul.f32 %v5628_v57, %v3262_v4 }
0x196b   :  { %4229 = vlog2.f32 %v3247_v33 }
0x196d   :  { %3507 = vrot.lane.b32.xlu1 %v3496_v45, %s4286_s28  ;;  %v3484_v45 = vsel %vm1222_vm13, %v3478_v37, 0.0 }
0x1971   :  { %2011 = vrot.lane.b32.xlu1 %v2002_v56, %s4286_s28 }
0x1975   :  { %2015 = vrot.lane.b32.xlu1 %v2004_v38, %s4286_s28  ;;  %v4230_v36 = vpop.eup %4229 }
0x1976   :  { %v3254_v50 = vmul.f32 0.6931472, %v4230_v36 }
0x1978   :  { %v3259_v9 = vsel %vm3231_vm1, %v3227_v59, %v3254_v50  ;;  %vm6065_vm1 = vmmov %vm6062_vm0 }
0x1979   :  { %v3263_v24 = vadd.f32 0.001, %v3259_v9 }
0x197b   :  { %v3495_v39 = vmul.f32 %v3971_v28, %v3263_v24  ;;  %v3430_v28 = vmul.f32 %v5628_v57, %v5625_v7  ;;  %v3479_v38 = vmul.f32 %v5656_v13, %v3263_v24  ;;  %v242_v57 = vadd.f32 %v5673_v47, %v240_v20 }
0x197c   :  { %v3432_v24 = vmul.f32 %v5659_v22, %v5641_v52 }
0x197d   :  { %v3436_v46 = vsel %vm1222_vm13, %v3430_v28, 0.0  ;;  %v3487_v30 = vsel %vm1222_vm13, %v3479_v38, 0.0  ;;  %v5752_v33 = vrot.slane %v242_v57, %v4391_v5  ;;  %v3480_v5 = vmul.f32 %v5659_v22, %v5704_v25 }
0x197f   :  { %v251_v47 = vmul.f32 %v5521_v43, %v5752_v33  ;;  %v3490_v9 = vsel %vm1222_vm13, %v3480_v5, 0.0 }
0x1988   :  { %3370 = vadd.xlane.f32.xlu0 %v3369_v55 }
0x1999   :  { %3373 = vadd.xlane.f32.xlu1 %v3372_v17 }
0x199d   :  { %3434 = vadd.xlane.f32.xlu1 %v3433_v12 }
0x199e   :  { %3457 = vrot.lane.b32.xlu0 %v3447_v27, %s4286_s28 }
0x19a1   :  { %3482 = vadd.xlane.f32.xlu1 %v3481_v35 }
0x19a2   :  { %3505 = vrot.lane.b32.xlu0 %v3495_v39, %s4286_s28  ;;  %v3442_v39 = vsel %vm1222_vm13, %v3432_v24, 0.0 }
0x19c1   :  { %3376 = vadd.xlane.f32.xlu0 %v3375_v41 }
0x19c3   :  { %v3406_v31 = vpop.permute.xlu1 %3405  ;;  %v3408_v51 = vpop.permute.xlu0 %3407 }
0x19c4   :  { %v3417_v21 = vsel %vm1222_vm13, %v3406_v31, 0.0  ;;  %v3420_v56 = vsel %vm1222_vm13, %v3408_v51, 0.0 }
0x19c5   :  { %3379 = vadd.xlane.f32.xlu0 %v3378_v18  ;;  %3418 = vadd.xlane.f32.xlu1 %v3417_v21  ;;  %v3439_v18 = vsel %vm1222_vm13, %v3431_v48, 0.0 }
0x19c7   :  { %v3454_v26 = vpop.permute.xlu0 %3453 }
0x19c8   :  { %v3465_v44 = vsel %vm1222_vm13, %v3454_v26, 0.0 }
0x19c9   :  { %3437 = vadd.xlane.f32.xlu0 %v3436_v46  ;;  %3466 = vadd.xlane.f32.xlu1 %v3465_v44 }
0x19cd   :  { %3485 = vadd.xlane.f32.xlu0 %v3484_v45 }
0x19cf   :  { %v3412_v59 = vpop.permute.xlu0 %3411  ;;  %v3410_v7 = vpop.permute.xlu1 %3409 }
0x19d0   :  { %v3423_v32 = vsel %vm1222_vm13, %v3410_v7, 0.0  ;;  %v3426_v36 = vsel %vm1222_vm13, %v3412_v59, 0.0 }
0x19d1   :  { %3421 = vadd.xlane.f32.xlu0 %v3420_v56  ;;  %3424 = vadd.xlane.f32.xlu1 %v3423_v32 }
0x19d3   :  { %v3502_v4 = vpop.permute.xlu0 %3501  ;;  %v3456_v0 = vpop.permute.xlu1 %3455 }
0x19d4   :  { %v3468_v34 = vsel %vm1222_vm13, %v3456_v0, 0.0  ;;  %v3513_v53 = vsel %vm1222_vm13, %v3502_v4, 0.0 }
0x19d5   :  { %3488 = vadd.xlane.f32.xlu1 %v3487_v30  ;;  %3469 = vadd.xlane.f32.xlu0 %v3468_v34 }
0x19d7   :  { %v5754_v55 = vpop.permute.xlu0 %2009  ;;  %v3460_v50 = vpop.permute.xlu1 %3459 }
0x19d8   :  { %v3474_v17 = vsel %vm1222_vm13, %v3460_v50, 0.0 }
0x19d9   :  { %3514 = vadd.xlane.f32.xlu1 %v3513_v53  ;;  %3427 = vadd.xlane.f32.xlu0 %v3426_v36 }
0x19db   :  { %v2014_v58 = vpop.permute.xlu0 %2013  ;;  %v3504_v1 = vpop.permute.xlu1 %3503 }
0x19dc   :  { %v5761_v49 = vadd.f32 %v2014_v58, %v251_v47  ;;  %v3516_v27 = vsel %vm1222_vm13, %v3504_v1, 0.0 }
0x19dd   :  { %3475 = vadd.xlane.f32.xlu0 %v3474_v17 }
0x19df   :  { %v3508_v12 = vpop.permute.xlu1 %3507 }
0x19e0   :  { %v3522_v43 = vsel %vm1222_vm13, %v3508_v12, 0.0 }
0x19e1   :  { %3491 = vadd.xlane.f32.xlu0 %v3490_v9 }
0x19e3   :  { %v5776_v52 = vpop.permute.xlu1 %2011 }
0x19e5   :  { %3517 = vadd.xlane.f32.xlu0 %v3516_v27 }
0x19e7   :  { %v5778_v22 = vpop.permute.xlu1 %2015 }
0x19e9   :  { %3523 = vadd.xlane.f32.xlu0 %v3522_v43 }
0x19ed   :  { %3443 = vadd.xlane.f32.xlu0 %v3442_v39 }
0x1a15   :  { %v3371_v35 = vpop.xlane.xlu0 %3370 }
0x1a16   :  { %v3533_v59 = vsub.f32 %v3781_v2, %v3371_v35 }
0x1a19   :  { %v3458_v25 = vpop.permute.xlu0 %3457 }
0x1a1a   :  { %v3471_v6 = vsel %vm1222_vm13, %v3458_v25, 0.0 }
0x1a1b   :  { %3472 = vadd.xlane.f32.xlu1 %v3471_v6 }
0x1a1d   :  { %v3506_v20 = vpop.permute.xlu0 %3505 }
0x1a1e   :  { %v3519_v41 = vsel %vm1222_vm13, %v3506_v20, 0.0  ;;  %vm2864_vm13 = vcmp.ge.f32.partialorder %v5535_v23, -5.0 }
0x1a1f   :  { %3520 = vadd.xlane.f32.xlu1 %v3519_v41  ;;  %vm5831_vm8 = vmand %vm2864_vm13, %vm2868_vm4  ;;  %vm2866_vm13 = vcmp.ge.f32.partialorder %v5525_v42, -5.0  ;;  %vm2870_vm4 = vcmp.le.f32.partialorder %v5525_v42, 5.0 }
0x1a23   :  { %3440 = vadd.xlane.f32.xlu1 %v3439_v18 }
0x1a26   :  { %v3374_v28 = vpop.xlane.xlu1 %3373 }
0x1a27   :  { %v3534_v36 = vsub.f32 %v3782_v11, %v3374_v28 }
0x1a2a   :  { %v5780_v31 = vpop.xlane.xlu1 %3434 }
0x1a2e   :  { %v3483_v21 = vpop.xlane.xlu1 %3482 }
0x1a4e   :  { %v5782_v51 = vpop.xlane.xlu0 %3376 }
0x1a52   :  { %v3380_v46 = vpop.xlane.xlu0 %3379  ;;  %v3419_v37 = vpop.xlane.xlu1 %3418 }
0x1a53   :  { %4231 = vrcp.f32 %v3419_v37  ;;  %v3536_v48 = vsub.f32 %v3784_v3, %v3380_v46  ;;  %v3681_v46 = vmul.f32 %v5182_v19, %v4835_v16 }
0x1a56   :  { %v5784_v26 = vpop.xlane.xlu0 %3437  ;;  %v5786_v13 = vpop.xlane.xlu1 %3466 }
0x1a5a   :  { %v5788_v63 = vpop.xlane.xlu0 %3485 }
0x1a5d   :  { %v4232_v7 = vpop.eup %4231 }
0x1a5e   :  { %v3422_v44 = vpop.xlane.xlu0 %3421  ;;  %v5790_v45 = vpop.xlane.xlu1 %3424  ;;  %v3537_v56 = vmul.f32 %v4232_v7, %v3533_v59  ;;  %v3529_v4 = vmul.f32 %v4232_v7, %v5786_v13 }
0x1a5f   :  { %4233 = vrcp.f32 %v3422_v44 }
0x1a60   :  { %v3541_v57 = vsub.f32 1.0, %v3537_v56  ;;  %v3573_v53 = vmul.f32 2.0, %v3529_v4  ;;  %v3549_v35 = vmul.f32 %v3537_v56, %v3529_v4  ;;  %v3601_v11 = vmul.f32 %v3529_v4, %v3529_v4 }
0x1a62   :  { %v5794_v32 = vpop.xlane.xlu0 %3469  ;;  %v5796_v38 = vpop.xlane.xlu1 %3488  ;;  %v3545_v30 = vmul.f32 %v3541_v57, %v3537_v56  ;;  %v3621_v58 = vmul.f32 %v3541_v57, %v3483_v21  ;;  %v3553_v59 = vmul.f32 %v3549_v35, %v3537_v56 }
0x1a64   :  { %v3613_v27 = vmul.f32 %v3573_v53, %v3545_v30  ;;  %v3625_v24 = vmul.f32 %v3621_v58, %v3541_v57  ;;  %v3557_v18 = vmul.f32 %v3545_v30, %v3483_v21 }
0x1a66   :  { %v3428_v0 = vpop.xlane.xlu0 %3427  ;;  %v3515_v34 = vpop.xlane.xlu1 %3514  ;;  %v3561_v3 = vadd.f32 %v3557_v18, %v3553_v59 }
0x1a67   :  { %4235 = vrcp.f32 %v3428_v0  ;;  %v3569_v47 = vadd.f32 %v3515_v34, %v3483_v21  ;;  %v3605_v2 = vmul.f32 %v3537_v56, %v3515_v34 }
0x1a68   :  { %v3565_v35 = vmul.f32 %v3561_v3, %v5786_v13 }
0x1a69   :  { %v4234_v50 = vpop.eup %4233  ;;  %v3577_v5 = vsub.f32 %v3569_v47, %v3573_v53  ;;  %v3609_v1 = vmul.f32 %v3605_v2, %v3537_v56 }
0x1a6a   :  { %v3538_v17 = vmul.f32 %v4234_v50, %v3534_v36  ;;  %v5801_v9 = vpop.xlane.xlu0 %3475  ;;  %v3530_v20 = vmul.f32 %v4234_v50, %v5794_v32 }
0x1a6b   :  { %v3581_v12 = vmul.f32 %v3577_v5, %v3545_v30  ;;  %v3617_v39 = vadd.f32 %v3613_v27, %v3609_v1 }
0x1a6c   :  { %v3542_v43 = vsub.f32 1.0, %v3538_v17  ;;  %v3574_v34 = vmul.f32 2.0, %v3530_v20  ;;  %v3550_v2 = vmul.f32 %v3538_v17, %v3530_v20 }
0x1a6d   :  { %v3585_v25 = vadd.f32 %v3581_v12, %v3529_v4  ;;  %v3629_v41 = vadd.f32 %v3625_v24, %v3617_v39 }
0x1a6e   :  { %v5803_v6 = vpop.xlane.xlu0 %3491  ;;  %v3546_v37 = vmul.f32 %v3542_v43, %v3538_v17  ;;  %v3622_v4 = vmul.f32 %v3542_v43, %v5788_v63 }
0x1a6f   :  { %4237 = vrcp.f32 %v3585_v25  ;;  %v3633_v44 = vmul.f32 %v3629_v41, %v3601_v11 }
0x1a70   :  { %4239 = vlog2.f32 %v3585_v25  ;;  %v3614_v47 = vmul.f32 %v3574_v34, %v3546_v37  ;;  %v3626_v58 = vmul.f32 %v3622_v4, %v3542_v43  ;;  %v3602_v25 = vmul.f32 %v3530_v20, %v3530_v20 }
0x1a71   :  { %v4236_v28 = vpop.eup %4235  ;;  %4241 = vlog2.f32 %v3633_v44  ;;  %v3554_v44 = vmul.f32 %v3550_v2, %v3538_v17  ;;  %v3558_v59 = vmul.f32 %v3546_v37, %v5788_v63 }
0x1a72   :  { %v5808_v7 = vmul.f32 %v4236_v28, %v3536_v48  ;;  %v3532_v57 = vmul.f32 %v4236_v28, %v5801_v9  ;;  %v3518_v0 = vpop.xlane.xlu0 %3517  ;;  %v249_v28 = vmul.f32 %v5531_v62, %v5752_v33 }
0x1a73   :  { %v3570_v36 = vadd.f32 %v3518_v0, %v5788_v63  ;;  %v3606_v53 = vmul.f32 %v3538_v17, %v3518_v0 }
0x1a74   :  { %v3544_v21 = vsub.f32 1.0, %v5808_v7  ;;  %v3576_v5 = vmul.f32 2.0, %v3532_v57  ;;  %v3552_v2 = vmul.f32 %v5808_v7, %v3532_v57 }
0x1a75   :  { %v3578_v56 = vsub.f32 %v3570_v36, %v3574_v34  ;;  %v3610_v30 = vmul.f32 %v3606_v53, %v3538_v17 }
0x1a76   :  { %v3548_v50 = vmul.f32 %v3544_v21, %v5808_v7  ;;  %v3524_v1 = vpop.xlane.xlu0 %3523  ;;  %v3624_v16 = vmul.f32 %v3544_v21, %v5803_v6 }
0x1a77   :  { %v3582_v27 = vmul.f32 %v3578_v56, %v3546_v37  ;;  %v3618_v12 = vadd.f32 %v3614_v47, %v3610_v30  ;;  %v3572_v24 = vadd.f32 %v3524_v1, %v5803_v6  ;;  %v3608_v39 = vmul.f32 %v5808_v7, %v3524_v1 }
0x1a78   :  { %v3616_v19 = vmul.f32 %v3576_v5, %v3548_v50  ;;  %v3628_v53 = vmul.f32 %v3624_v16, %v3544_v21  ;;  %v3604_v37 = vmul.f32 %v3532_v57, %v3532_v57  ;;  %v3560_v21 = vmul.f32 %v3548_v50, %v5803_v6 }
0x1a79   :  { %v3586_v11 = vadd.f32 %v3582_v27, %v3530_v20  ;;  %v3630_v41 = vadd.f32 %v3626_v58, %v3618_v12  ;;  %v3580_v48 = vsub.f32 %v3572_v24, %v3576_v5  ;;  %v3612_v18 = vmul.f32 %v3608_v39, %v5808_v7  ;;  %v4238_v43 = vpop.eup %4237 }
0x1a7a   :  { %v4240_v0 = vpop.eup %4239  ;;  %v3593_v4 = vmul.f32 %v4238_v43, %v3565_v35  ;;  %v3562_v5 = vadd.f32 %v3558_v59, %v3554_v44  ;;  %v3556_v39 = vmul.f32 %v3552_v2, %v5808_v7  ;;  %v2021_v35 = vadd.f32 %v5754_v55, %v249_v28  ;;  %v4276_v28 = vld [vmem:[%s5943_s1 + $0x8] sm:$0xff] }
0x1a7b   :  { %4243 = vrcp.f32 %v3586_v11  ;;  %v3634_v13 = vmul.f32 %v3630_v41, %v3602_v25  ;;  %v3584_v34 = vmul.f32 %v3580_v48, %v3548_v50  ;;  %v3646_v36 = vmul.f32 0.6931472, %v4240_v0  ;;  %v4242_v3 = vpop.eup %4241 }
0x1a7c   :  { %4245 = vlog2.f32 %v3586_v11  ;;  %v3620_v17 = vadd.f32 %v3616_v19, %v3612_v18  ;;  %v3597_v63 = vadd.f32 %v3593_v4, %v5780_v31  ;;  %v3638_v30 = vmul.f32 0.6931472, %v4242_v3 }
0x1a7d   :  { %4247 = vlog2.f32 %v3634_v13  ;;  %v3588_v56 = vadd.f32 %v3584_v34, %v3532_v57  ;;  %v3653_v47 = vmul.f32 2.0, %v3646_v36  ;;  %v3566_v6 = vmul.f32 %v3562_v5, %v5794_v32  ;;  %v3444_v34 = vpop.xlane.xlu0 %3443 }
0x1a7e   :  { %v3632_v58 = vadd.f32 %v3628_v53, %v3620_v17  ;;  %v3661_v1 = vsel %vm5831_vm8, %v3597_v63, %v5535_v23  ;;  %v3564_v50 = vadd.f32 %v3560_v21, %v3556_v39  ;;  %v250_v44 = vmul.f32 %v4276_v28, %v5752_v33 }
0x1a7f   :  { %4249 = vrcp.f32 %v3588_v56  ;;  %v3657_v27 = vsub.f32 %v3638_v30, %v3653_v47  ;;  %v3677_v31 = vmul.f32 %v5531_v62, %v3661_v1  ;;  %v3684_v47 = vmul.f32 %v5203_v15, %v4846_v14 }
0x1a80   :  { %v3636_v12 = vmul.f32 %v3632_v58, %v3604_v37  ;;  %4251 = vlog2.f32 %v3588_v56  ;;  %v3568_v41 = vmul.f32 %v3564_v50, %v5801_v9 }
0x1a81   :  { %v3665_v24 = vsel %vm5831_vm8, %v3657_v27, 0.0  ;;  %v3685_v57 = vsel %vm6056_vm9, %v3677_v31, %v3681_v46  ;;  %vm2874_vm8 = vmand %vm2866_vm13, %vm2870_vm4 }
0x1a82   :  { %4253 = vlog2.f32 %v3636_v12  ;;  %v3669_v23 = vmul.f32 %v5531_v62, %v3665_v24  ;;  %3690 = vst.msk [vmem:[%s5957_s17] sm:$0xff] %vm3689_vm6, %v3685_v57  ;;  %vm6066_vm9 = vmmov %vm6062_vm0 }
0x1a83   :  { %4255 = vrcp.f32 %v5790_v45 }
0x1a84   :  { %v3673_v25 = vadd.f32 %v3669_v23, %v2021_v35 }
0x1a85   :  { %v4244_v7 = vpop.eup %4243 }
0x1a86   :  { %v4246_v16 = vpop.eup %4245  ;;  %v3594_v46 = vmul.f32 %v4244_v7, %v3566_v6  ;;  %3694 = vst.msk [vmem:[%s5958_s18] sm:$0xff] %vm6059_vm3, %v3673_v25 }
0x1a87   :  { %v4248_v19 = vpop.eup %4247  ;;  %v3648_v62 = vmul.f32 0.6931472, %v4246_v16 }
0x1a88   :  { %v3598_v32 = vadd.f32 %v3594_v46, %v5784_v26  ;;  %v3640_v11 = vmul.f32 0.6931472, %v4248_v19  ;;  %v3682_v26 = vmul.f32 %v5232_v54, %v4842_v29  ;;  %v2022_v29 = vadd.f32 %v5776_v52, %v250_v44  ;;  %v4277_v54 = vld [vmem:[%s5943_s1 + $0x18] sm:$0xff] }
0x1a89   :  { %v4250_v48 = vpop.eup %4249  ;;  %v3654_v18 = vmul.f32 2.0, %v3648_v62  ;;  %v252_v37 = vmul.f32 %v4277_v54, %v5752_v33 }
0x1a8a   :  { %v4252_v43 = vpop.eup %4251  ;;  %v3662_v59 = vsel %vm5855_vm12, %v3598_v32, %v5516_v40  ;;  %v3596_v0 = vmul.f32 %v4250_v48, %v3568_v41 }
0x1a8b   :  { %v3658_v4 = vsub.f32 %v3640_v11, %v3654_v18  ;;  %v3652_v13 = vmul.f32 0.6931472, %v4252_v43  ;;  %v3678_v20 = vmul.f32 %v4276_v28, %v3662_v59  ;;  %v2024_v1 = vadd.f32 %v5778_v22, %v252_v37 }
0x1a8c   :  { %v4254_v36 = vpop.eup %4253  ;;  %v3600_v53 = vadd.f32 %v3596_v0, %v3444_v34 }
0x1a8d   :  { %v3666_v17 = vsel %vm5855_vm12, %v3658_v4, 0.0  ;;  %v3644_v40 = vmul.f32 0.6931472, %v4254_v36  ;;  %v3656_v3 = vmul.f32 2.0, %v3652_v13  ;;  %v3686_v63 = vsel %vm6062_vm0, %v3678_v20, %v3682_v26  ;;  %v4256_v15 = vpop.eup %4255  ;;  %v4278_v20 = vld [vmem:[%s5943_s1 + $0x10] sm:$0xff] }
0x1a8e   :  { %v3670_v56 = vmul.f32 %v4276_v28, %v3666_v17  ;;  %v3664_v30 = vsel %vm5878_vm15, %v3600_v53, %v5541_v10  ;;  %3691 = vst.msk [vmem:[%s5957_s17 + $0x8] sm:$0xff] %vm3689_vm6, %v3686_v63  ;;  %v3535_v10 = vsub.f32 %v3783_v8, %v5782_v51 }
0x1a8f   :  { %v3660_v52 = vsub.f32 %v3644_v40, %v3656_v3  ;;  %v3680_v2 = vmul.f32 %v4277_v54, %v3664_v30 }
0x1a90   :  { %v3674_v58 = vadd.f32 %v3670_v56, %v2022_v29  ;;  %v3539_v22 = vmul.f32 %v4256_v15, %v3535_v10 }
0x1a91   :  { %v3668_v5 = vsel %vm5878_vm15, %v3660_v52, 0.0  ;;  %v3688_v33 = vsel %vm6063_vm10, %v3680_v2, %v3684_v47 }
0x1a92   :  { %v3672_v21 = vmul.f32 %v4277_v54, %v3668_v5  ;;  %3693 = vst.msk [vmem:[%s5957_s17 + $0x18] sm:$0xff] %vm3689_vm6, %v3688_v33  ;;  %v3543_v12 = vsub.f32 1.0, %v3539_v22 }
0x1a93   :  { %3695 = vst.msk [vmem:[%s5958_s18 + $0x8] sm:$0xff] %vm6064_vm11, %v3674_v58 }
0x1a94   :  { %v3676_v14 = vadd.f32 %v3672_v21, %v2024_v1  ;;  %v3547_v57 = vmul.f32 %v3543_v12, %v3539_v22  ;;  %v3623_v35 = vmul.f32 %v3543_v12, %v5796_v38 }
0x1a96   :  { %3697 = vst.msk [vmem:[%s5958_s18 + $0x18] sm:$0xff] %vm6065_vm1, %v3676_v14  ;;  %v3627_v25 = vmul.f32 %v3623_v35, %v3543_v12  ;;  %v3559_v11 = vmul.f32 %v3547_v57, %v5796_v38 }
0x1aa8   :  { %v3473_v27 = vpop.xlane.xlu1 %3472 }
0x1aa9   :  { %v3531_v31 = vmul.f32 %v4256_v15, %v3473_v27 }
0x1aab   :  { %v3575_v24 = vmul.f32 2.0, %v3531_v31  ;;  %v3551_v19 = vmul.f32 %v3539_v22, %v3531_v31  ;;  %v3603_v8 = vmul.f32 %v3531_v31, %v3531_v31 }
0x1aac   :  { %v3521_v39 = vpop.xlane.xlu1 %3520 }
0x1aad   :  { %v3571_v23 = vadd.f32 %v3521_v39, %v5796_v38  ;;  %v3607_v6 = vmul.f32 %v3539_v22, %v3521_v39  ;;  %v3615_v50 = vmul.f32 %v3575_v24, %v3547_v57  ;;  %v3555_v32 = vmul.f32 %v3551_v19, %v3539_v22 }
0x1aae   :  { %v3683_v38 = vmul.f32 %v5223_v60, %v4856_v61 }
0x1aaf   :  { %v3579_v7 = vsub.f32 %v3571_v23, %v3575_v24  ;;  %v3611_v45 = vmul.f32 %v3607_v6, %v3539_v22  ;;  %v3563_v41 = vadd.f32 %v3559_v11, %v3555_v32 }
0x1ab0   :  { %v3441_v0 = vpop.xlane.xlu1 %3440 }
0x1ab1   :  { %v3583_v16 = vmul.f32 %v3579_v7, %v3547_v57  ;;  %v3619_v46 = vadd.f32 %v3615_v50, %v3611_v45  ;;  %v3567_v48 = vmul.f32 %v3563_v41, %v3473_v27 }
0x1ab3   :  { %v3587_v51 = vadd.f32 %v3583_v16, %v3531_v31  ;;  %v3631_v55 = vadd.f32 %v3627_v25, %v3619_v46 }
0x1ab5   :  { %4257 = vrcp.f32 %v3587_v51  ;;  %v3635_v62 = vmul.f32 %v3631_v55, %v3603_v8 }
0x1ab6   :  { %4259 = vlog2.f32 %v3587_v51 }
0x1ab7   :  { %4261 = vlog2.f32 %v3635_v62 }
0x1abf   :  { %v4258_v18 = vpop.eup %4257 }
0x1ac0   :  { %v4260_v43 = vpop.eup %4259  ;;  %v3595_v28 = vmul.f32 %v4258_v18, %v3567_v48 }
0x1ac1   :  { %v4262_v44 = vpop.eup %4261  ;;  %v3650_v59 = vmul.f32 0.6931472, %v4260_v43 }
0x1ac2   :  { %v3642_v26 = vmul.f32 0.6931472, %v4262_v44  ;;  %v3599_v4 = vadd.f32 %v3595_v28, %v3441_v0 }
0x1ac3   :  { %v3655_v13 = vmul.f32 2.0, %v3650_v59 }
0x1ac4   :  { %v3663_v9 = vsel %vm2874_vm8, %v3599_v4, %v5525_v42 }
0x1ac5   :  { %v3659_v34 = vsub.f32 %v3642_v26, %v3655_v13  ;;  %v3679_v36 = vmul.f32 %v4278_v20, %v3663_v9 }
0x1ac7   :  { %v3667_v53 = vsel %vm2874_vm8, %v3659_v34, 0.0  ;;  %v3687_v17 = vsel %vm6066_vm9, %v3679_v36, %v3683_v38 }
0x1ac8   :  { %v3671_v40 = vmul.f32 %v4278_v20, %v3667_v53  ;;  %3692 = vst.msk [vmem:[%s5957_s17 + $0x10] sm:$0xff] %vm3689_vm6, %v3687_v17 }
0x1aca   :  { %v3675_v42 = vadd.f32 %v3671_v40, %v5761_v49 }
0x1acc   :  { %3696 = vst.msk [vmem:[%s5958_s18 + $0x10] sm:$0xff] %vm6067_vm2, %v3675_v42 }

</bundles_post_ra>
